<compile_context>
chip_gen: v5e
topology: v5e:2x2
jax: 0.10.0
libtpu: 0.0.40
codegen_flags: <defaults>
</compile_context>

<pallas_src>
import functools

import jax
import jax.numpy as jnp
import numpy as np
from jax.experimental import pallas as pl
from jax.experimental.pallas import tpu as pltpu

HIDDEN1 = 640
HIDDEN2 = 320
BN_EPS = 1e-5
LANE = 128


def _round_up(n, m):
    return -(-n // m) * m


def autoencoder2_kernel(
    x_ref,
    enc_w_ref, enc_b_ref,            # encoder Linear (BN1 folded in), bf16 W / f32 b
    dec_w_ref, dec_b_ref,            # decoder Linear(640, in_pad)
    l1a_w_ref, l1b_w_ref, l1_b_ref,  # layer[0] Linear(2*in, 640) split, BN2 folded in
    l2_w_ref, l2_b_ref,              # Linear(640, 320)
    l3_w_ref, l3_b_ref,              # Linear(320, 640)
    l4_w_ref, l4_b_ref,              # Linear(640, out_pad)
    out_ref,
    *, num_subtiles,
):
    tb = x_ref.shape[0]
    sub = tb // num_subtiles

    def dot(a, w_ref):
        # bf16 x bf16 MXU matmul with f32 accumulation (default precision, single pass).
        return jnp.dot(a.astype(jnp.bfloat16), w_ref[...],
                       preferred_element_type=jnp.float32)

    def chain(x_in):
        # encoder: BN1 (folded) -> Linear(in, 640) -> ReLU        (f32 bias add / ReLU)
        h = jnp.maximum(dot(x_in, enc_w_ref) + enc_b_ref[...], 0.0)
        # decoder: Dropout (identity at inference) -> Linear(640, in)
        x_dec = dot(h, dec_w_ref) + dec_b_ref[...]
        # cat((x_dec, x_in), 1) @ W1 + b1, with BN2 already folded into W1/b1
        z = dot(x_dec, l1a_w_ref) + dot(x_in, l1b_w_ref) + l1_b_ref[...]
        # remaining Linears (Dropouts are identity at inference)
        z = dot(z, l2_w_ref) + l2_b_ref[...]
        z = dot(z, l3_w_ref) + l3_b_ref[...]
        z = dot(z, l4_w_ref) + l4_b_ref[...]
        return z

    # Two independent sub-tile chains per step -> scheduler can interleave MXU work.
    # Static, sublane-aligned (multiple-of-8) slices: no relayout, no copies.
    for s in range(num_subtiles):
        x_in = x_ref[s * sub:(s + 1) * sub, :]
        out_ref[s * sub:(s + 1) * sub, :] = chain(x_in).astype(out_ref.dtype)


def prepare_kernel_params(params):
    """Fold BatchNorms into adjacent Linears, pad in/out dims lane-dense, cast W to bf16."""
    in_size = params["enc_w"].shape[0]
    out_size = params["l4_w"].shape[1]
    in_pad = _round_up(in_size, LANE)
    out_pad = _round_up(out_size, LANE)
    dp_in = in_pad - in_size
    dp_out = out_pad - out_size

    # Fold BN1 (pre-encoder) into the encoder Linear:
    #   (x*s1 + b1) @ We + be == x @ (s1[:,None] * We) + (b1 @ We + be)
    enc_w = params["enc_w"] * params["bn1_s"].T
    enc_b = params["enc_b"] + params["bn1_b"] @ params["enc_w"]

    # Fold BN2 (after layer[0] Linear) into that Linear:
    #   (cat @ W1 + b1) * s2 + b2 == cat @ (W1 * s2) + (b1 * s2 + b2)
    l1a_w = params["l1a_w"] * params["bn2_s"]
    l1b_w = params["l1b_w"] * params["bn2_s"]
    l1_b = params["l1_b"] * params["bn2_s"] + params["bn2_b"]

    # Lane-dense padding of the input dimension (zeros everywhere -> semantics unchanged:
    # padded x columns are 0, padded dec_w/dec_b columns produce 0, padded l1* rows are 0).
    enc_w = jnp.pad(enc_w, ((0, dp_in), (0, 0)))
    dec_w = jnp.pad(params["dec_w"], ((0, 0), (0, dp_in)))
    dec_b = jnp.pad(params["dec_b"], ((0, 0), (0, dp_in)))
    l1a_w = jnp.pad(l1a_w, ((0, dp_in), (0, 0)))
    l1b_w = jnp.pad(l1b_w, ((0, dp_in), (0, 0)))

    # Lane-dense padding of the output dimension (sliced off in the wrapper).
    l4_w = jnp.pad(params["l4_w"], ((0, 0), (0, dp_out)))
    l4_b = jnp.pad(params["l4_b"], ((0, 0), (0, dp_out)))

    bf16 = jnp.bfloat16
    return dict(
        in_size=in_size, out_size=out_size,
        enc_w=enc_w.astype(bf16), enc_b=enc_b,
        dec_w=dec_w.astype(bf16), dec_b=dec_b,
        l1a_w=l1a_w.astype(bf16), l1b_w=l1b_w.astype(bf16), l1_b=l1_b,
        l2_w=params["l2_w"].astype(bf16), l2_b=params["l2_b"],
        l3_w=params["l3_w"].astype(bf16), l3_b=params["l3_b"],
        l4_w=l4_w.astype(bf16), l4_b=l4_b,
    )


def autoencoder2_forward(x, kparams, *, batch_tile=512, out_dtype=jnp.bfloat16):
    B, in_size = x.shape
    assert in_size == kparams["in_size"]
    out_size = kparams["out_size"]
    in_pad = kparams["enc_w"].shape[0]
    out_pad = kparams["l4_w"].shape[1]

    # Batch tiling: big tiles (overhead amortization); when B is small, split into at
    # least two tiles so v7x can shard the "parallel" grid across its two TensorCores.
    batch_tile = _round_up(batch_tile, 8)
    if B >= 2 * batch_tile:
        tb = batch_tile
    else:
        tb = max(8, _round_up(-(-B // 2), 8))
    n_tiles = -(-B // tb)
    b_pad = n_tiles * tb

    # Two interleaved sub-tile chains per grid step when the tile splits cleanly.
    num_subtiles = 2 if (tb % 16 == 0 and tb >= 16) else 1

    # bf16 input: half the streamed DMA bytes, no in-kernel cast of x.
    x = x.astype(jnp.bfloat16)
    if b_pad != B or in_pad != in_size:
        x = jnp.pad(x, ((0, b_pad - B), (0, in_pad - in_size)))

    operands = (
        x,
        kparams["enc_w"], kparams["enc_b"],
        kparams["dec_w"], kparams["dec_b"],
        kparams["l1a_w"], kparams["l1b_w"], kparams["l1_b"],
        kparams["l2_w"], kparams["l2_b"],
        kparams["l3_w"], kparams["l3_b"],
        kparams["l4_w"], kparams["l4_b"],
    )

    # x/out stream per batch tile; weights/biases use a constant index_map (DMA'd once,
    # VMEM-resident) and Buffered(1) so they are not double-buffered.
    in_specs = [pl.BlockSpec((tb, in_pad), lambda i: (i, 0))]
    in_specs += [
        pl.BlockSpec(op.shape, lambda i: (0, 0), pipeline_mode=pl.Buffered(1))
        for op in operands[1:]
    ]

    out = pl.pallas_call(
        functools.partial(autoencoder2_kernel, num_subtiles=num_subtiles),
        grid=(n_tiles,),
        in_specs=in_specs,
        out_specs=pl.BlockSpec((tb, out_pad), lambda i: (i, 0)),
        out_shape=jax.ShapeDtypeStruct((b_pad, out_pad), out_dtype),
        compiler_params=pltpu.CompilerParams(
            dimension_semantics=("parallel",),
            vmem_limit_bytes=64 * 1024 * 1024,
        ),
    )(*operands)

    return out[:B, :out_size]


def init_params(key, input_size, output_size):
    """Deterministic synthetic parameters matching the PyTorch module's shapes (f32)."""

    def linear(k, fan_in, fan_out):
        k1, k2 = jax.random.split(k)
        bound = 1.0 / np.sqrt(fan_in)
        w = jax.random.uniform(k1, (fan_in, fan_out), jnp.float32, -bound, bound)
        b = jax.random.uniform(k2, (1, fan_out), jnp.float32, -bound, bound)
        return w, b

    def batchnorm_affine(k, n):
        k1, k2, k3, k4 = jax.random.split(k, 4)
        gamma = jax.random.uniform(k1, (1, n), jnp.float32, 0.8, 1.2)
        beta = 0.1 * jax.random.normal(k2, (1, n), jnp.float32)
        running_mean = 0.1 * jax.random.normal(k3, (1, n), jnp.float32)
        running_var = jax.random.uniform(k4, (1, n), jnp.float32, 0.8, 1.2)
        scale = gamma / jnp.sqrt(running_var + BN_EPS)
        bias = beta - running_mean * scale
        return scale, bias

    keys = jax.random.split(key, 8)
    bn1_s, bn1_b = batchnorm_affine(keys[0], input_size)
    enc_w, enc_b = linear(keys[1], input_size, HIDDEN1)
    dec_w, dec_b = linear(keys[2], HIDDEN1, input_size)
    l1_w, l1_b = linear(keys[3], 2 * input_size, HIDDEN1)
    bn2_s, bn2_b = batchnorm_affine(keys[4], HIDDEN1)
    l2_w, l2_b = linear(keys[5], HIDDEN1, HIDDEN2)
    l3_w, l3_b = linear(keys[6], HIDDEN2, HIDDEN1)
    l4_w, l4_b = linear(keys[7], HIDDEN1, output_size)

    return dict(
        bn1_s=bn1_s, bn1_b=bn1_b,
        enc_w=enc_w, enc_b=enc_b,
        dec_w=dec_w, dec_b=dec_b,
        l1a_w=l1_w[:input_size], l1b_w=l1_w[input_size:], l1_b=l1_b,
        bn2_s=bn2_s, bn2_b=bn2_b,
        l2_w=l2_w, l2_b=l2_b,
        l3_w=l3_w, l3_b=l3_b,
        l4_w=l4_w, l4_b=l4_b,
    )


def reference_forward(x, params):
    """Pure-JAX reference mirroring the PyTorch forward (eval mode), full f32."""
    dot = functools.partial(jnp.dot, precision=jax.lax.Precision.HIGHEST)
    x_in = x
    h = x * params["bn1_s"] + params["bn1_b"]
    h = jnp.maximum(dot(h, params["enc_w"]) + params["enc_b"], 0.0)
    x_dec = dot(h, params["dec_w"]) + params["dec_b"]
    cat = jnp.concatenate([x_dec, x_in], axis=1)
    l1_w = jnp.concatenate([params["l1a_w"], params["l1b_w"]], axis=0)
    z = dot(cat, l1_w) + params["l1_b"]
    z = z * params["bn2_s"] + params["bn2_b"]
    z = dot(z, params["l2_w"]) + params["l2_b"]
    z = dot(z, params["l3_w"]) + params["l3_b"]
    z = dot(z, params["l4_w"]) + params["l4_b"]
    return z


if __name__ == "__main__":
    # Small demo shapes; B=32 exercises both the multi-tile grid (2 tiles) and the
    # two-sub-tile interleaved kernel path.
    B, INPUT_SIZE, OUTPUT_SIZE = 32, 32, 16

    key = jax.random.PRNGKey(0)
    kx, kp = jax.random.split(key)
    x = jax.random.normal(kx, (B, INPUT_SIZE), jnp.float32)
    params = init_params(kp, INPUT_SIZE, OUTPUT_SIZE)
    kparams = prepare_kernel_params(params)

    out = autoencoder2_forward(x, kparams)
    out = jax.block_until_ready(out)
    assert out.shape == (B, OUTPUT_SIZE), out.shape

    ref = reference_forward(x, params)
    np.testing.assert_allclose(
        np.asarray(out.astype(jnp.float32)), np.asarray(ref), rtol=2e-2, atol=2e-2
    )

    print("KERNEL_OK")
</pallas_src>

<mosaic_0001>
module attributes {stable_mosaic.version = 11 : i64} {
  func.func @autoencoder2_kernel(%arg0: i32, %arg1: memref<16x128xbf16, #tpu.memory_space<vmem>>, %arg2: memref<128x640xbf16, #tpu.memory_space<vmem>>, %arg3: memref<1x640xf32, #tpu.memory_space<vmem>>, %arg4: memref<640x128xbf16, #tpu.memory_space<vmem>>, %arg5: memref<1x128xf32, #tpu.memory_space<vmem>>, %arg6: memref<128x640xbf16, #tpu.memory_space<vmem>>, %arg7: memref<128x640xbf16, #tpu.memory_space<vmem>>, %arg8: memref<1x640xf32, #tpu.memory_space<vmem>>, %arg9: memref<640x320xbf16, #tpu.memory_space<vmem>>, %arg10: memref<1x320xf32, #tpu.memory_space<vmem>>, %arg11: memref<320x640xbf16, #tpu.memory_space<vmem>>, %arg12: memref<1x640xf32, #tpu.memory_space<vmem>>, %arg13: memref<640x128xbf16, #tpu.memory_space<vmem>>, %arg14: memref<1x128xf32, #tpu.memory_space<vmem>>, %arg15: memref<16x128xbf16, #tpu.memory_space<vmem>>) attributes {dimension_semantics = [#tpu.dimension_semantics<parallel>], iteration_bounds = array<i64: 2>, scalar_prefetch = 0 : i64, scratch_operands = 0 : i64, tpu.core_type = #tpu.core_type<tc>, window_params = [{transform_indices = @transform_0, window_bounds = array<i64: 16, 128>}, {pipeline_mode = #tpu.pipeline_mode<synchronous>, transform_indices = @transform_1, window_bounds = array<i64: 128, 640>}, {pipeline_mode = #tpu.pipeline_mode<synchronous>, transform_indices = @transform_2, window_bounds = array<i64: 1, 640>}, {pipeline_mode = #tpu.pipeline_mode<synchronous>, transform_indices = @transform_3, window_bounds = array<i64: 640, 128>}, {pipeline_mode = #tpu.pipeline_mode<synchronous>, transform_indices = @transform_4, window_bounds = array<i64: 1, 128>}, {pipeline_mode = #tpu.pipeline_mode<synchronous>, transform_indices = @transform_5, window_bounds = array<i64: 128, 640>}, {pipeline_mode = #tpu.pipeline_mode<synchronous>, transform_indices = @transform_6, window_bounds = array<i64: 128, 640>}, {pipeline_mode = #tpu.pipeline_mode<synchronous>, transform_indices = @transform_7, window_bounds = array<i64: 1, 640>}, {pipeline_mode = #tpu.pipeline_mode<synchronous>, transform_indices = @transform_8, window_bounds = array<i64: 640, 320>}, {pipeline_mode = #tpu.pipeline_mode<synchronous>, transform_indices = @transform_9, window_bounds = array<i64: 1, 320>}, {pipeline_mode = #tpu.pipeline_mode<synchronous>, transform_indices = @transform_10, window_bounds = array<i64: 320, 640>}, {pipeline_mode = #tpu.pipeline_mode<synchronous>, transform_indices = @transform_11, window_bounds = array<i64: 1, 640>}, {pipeline_mode = #tpu.pipeline_mode<synchronous>, transform_indices = @transform_12, window_bounds = array<i64: 640, 128>}, {pipeline_mode = #tpu.pipeline_mode<synchronous>, transform_indices = @transform_13, window_bounds = array<i64: 1, 128>}, {transform_indices = @transform_14, window_bounds = array<i64: 16, 128>}]} {
    %c0 = arith.constant 0 : index
    %c0_0 = arith.constant 0 : index
    %0 = vector.load %arg1[%c0, %c0_0] : memref<16x128xbf16, #tpu.memory_space<vmem>>, vector<8x128xbf16>
    %c0_1 = arith.constant 0 : index
    %c0_2 = arith.constant 0 : index
    %1 = vector.load %arg2[%c0_1, %c0_2] : memref<128x640xbf16, #tpu.memory_space<vmem>>, vector<128x640xbf16>
    %cst = arith.constant dense<0.000000e+00> : vector<8x640xf32>
    %2 = tpu.matmul %0, %1, %cst {dimension_numbers = #tpu.dot_dimension_numbers<[1], [0], [0], [1], [0, 0, 1, 1], [], []>} : vector<8x128xbf16>, vector<128x640xbf16>, vector<8x640xf32> -> vector<8x640xf32>
    %c0_3 = arith.constant 0 : index
    %c0_4 = arith.constant 0 : index
    %3 = vector.load %arg3[%c0_3, %c0_4] : memref<1x640xf32, #tpu.memory_space<vmem>>, vector<1x640xf32>
    %4 = vector.broadcast %3 : vector<1x640xf32> to vector<8x640xf32>
    %5 = arith.addf %2, %4 : vector<8x640xf32>
    %cst_5 = arith.constant 0.000000e+00 : f32
    %6 = vector.broadcast %cst_5 : f32 to vector<8x640xf32>
    %7 = arith.maximumf %5, %6 : vector<8x640xf32>
    %8 = arith.truncf %7 : vector<8x640xf32> to vector<8x640xbf16>
    %c0_6 = arith.constant 0 : index
    %c0_7 = arith.constant 0 : index
    %9 = vector.load %arg4[%c0_6, %c0_7] : memref<640x128xbf16, #tpu.memory_space<vmem>>, vector<640x128xbf16>
    %cst_8 = arith.constant dense<0.000000e+00> : vector<8x128xf32>
    %10 = tpu.matmul %8, %9, %cst_8 {dimension_numbers = #tpu.dot_dimension_numbers<[1], [0], [0], [1], [0, 0, 1, 1], [], []>} : vector<8x640xbf16>, vector<640x128xbf16>, vector<8x128xf32> -> vector<8x128xf32>
    %c0_9 = arith.constant 0 : index
    %c0_10 = arith.constant 0 : index
    %11 = vector.load %arg5[%c0_9, %c0_10] : memref<1x128xf32, #tpu.memory_space<vmem>>, vector<1x128xf32>
    %12 = vector.broadcast %11 : vector<1x128xf32> to vector<8x128xf32>
    %13 = arith.addf %10, %12 : vector<8x128xf32>
    %14 = arith.truncf %13 : vector<8x128xf32> to vector<8x128xbf16>
    %c0_11 = arith.constant 0 : index
    %c0_12 = arith.constant 0 : index
    %15 = vector.load %arg6[%c0_11, %c0_12] : memref<128x640xbf16, #tpu.memory_space<vmem>>, vector<128x640xbf16>
    %cst_13 = arith.constant dense<0.000000e+00> : vector<8x640xf32>
    %16 = tpu.matmul %14, %15, %cst_13 {dimension_numbers = #tpu.dot_dimension_numbers<[1], [0], [0], [1], [0, 0, 1, 1], [], []>} : vector<8x128xbf16>, vector<128x640xbf16>, vector<8x640xf32> -> vector<8x640xf32>
    %c0_14 = arith.constant 0 : index
    %c0_15 = arith.constant 0 : index
    %17 = vector.load %arg7[%c0_14, %c0_15] : memref<128x640xbf16, #tpu.memory_space<vmem>>, vector<128x640xbf16>
    %cst_16 = arith.constant dense<0.000000e+00> : vector<8x640xf32>
    %18 = tpu.matmul %0, %17, %cst_16 {dimension_numbers = #tpu.dot_dimension_numbers<[1], [0], [0], [1], [0, 0, 1, 1], [], []>} : vector<8x128xbf16>, vector<128x640xbf16>, vector<8x640xf32> -> vector<8x640xf32>
    %19 = arith.addf %16, %18 : vector<8x640xf32>
    %c0_17 = arith.constant 0 : index
    %c0_18 = arith.constant 0 : index
    %20 = vector.load %arg8[%c0_17, %c0_18] : memref<1x640xf32, #tpu.memory_space<vmem>>, vector<1x640xf32>
    %21 = vector.broadcast %20 : vector<1x640xf32> to vector<8x640xf32>
    %22 = arith.addf %19, %21 : vector<8x640xf32>
    %23 = arith.truncf %22 : vector<8x640xf32> to vector<8x640xbf16>
    %c0_19 = arith.constant 0 : index
    %c0_20 = arith.constant 0 : index
    %24 = vector.load %arg9[%c0_19, %c0_20] : memref<640x320xbf16, #tpu.memory_space<vmem>>, vector<640x320xbf16>
    %cst_21 = arith.constant dense<0.000000e+00> : vector<8x320xf32>
    %25 = tpu.matmul %23, %24, %cst_21 {dimension_numbers = #tpu.dot_dimension_numbers<[1], [0], [0], [1], [0, 0, 1, 1], [], []>} : vector<8x640xbf16>, vector<640x320xbf16>, vector<8x320xf32> -> vector<8x320xf32>
    %c0_22 = arith.constant 0 : index
    %c0_23 = arith.constant 0 : index
    %26 = vector.load %arg10[%c0_22, %c0_23] : memref<1x320xf32, #tpu.memory_space<vmem>>, vector<1x320xf32>
    %27 = vector.broadcast %26 : vector<1x320xf32> to vector<8x320xf32>
    %28 = arith.addf %25, %27 : vector<8x320xf32>
    %29 = arith.truncf %28 : vector<8x320xf32> to vector<8x320xbf16>
    %c0_24 = arith.constant 0 : index
    %c0_25 = arith.constant 0 : index
    %30 = vector.load %arg11[%c0_24, %c0_25] : memref<320x640xbf16, #tpu.memory_space<vmem>>, vector<320x640xbf16>
    %cst_26 = arith.constant dense<0.000000e+00> : vector<8x640xf32>
    %31 = tpu.matmul %29, %30, %cst_26 {dimension_numbers = #tpu.dot_dimension_numbers<[1], [0], [0], [1], [0, 0, 1, 1], [], []>} : vector<8x320xbf16>, vector<320x640xbf16>, vector<8x640xf32> -> vector<8x640xf32>
    %c0_27 = arith.constant 0 : index
    %c0_28 = arith.constant 0 : index
    %32 = vector.load %arg12[%c0_27, %c0_28] : memref<1x640xf32, #tpu.memory_space<vmem>>, vector<1x640xf32>
    %33 = vector.broadcast %32 : vector<1x640xf32> to vector<8x640xf32>
    %34 = arith.addf %31, %33 : vector<8x640xf32>
    %35 = arith.truncf %34 : vector<8x640xf32> to vector<8x640xbf16>
    %c0_29 = arith.constant 0 : index
    %c0_30 = arith.constant 0 : index
    %36 = vector.load %arg13[%c0_29, %c0_30] : memref<640x128xbf16, #tpu.memory_space<vmem>>, vector<640x128xbf16>
    %cst_31 = arith.constant dense<0.000000e+00> : vector<8x128xf32>
    %37 = tpu.matmul %35, %36, %cst_31 {dimension_numbers = #tpu.dot_dimension_numbers<[1], [0], [0], [1], [0, 0, 1, 1], [], []>} : vector<8x640xbf16>, vector<640x128xbf16>, vector<8x128xf32> -> vector<8x128xf32>
    %c0_32 = arith.constant 0 : index
    %c0_33 = arith.constant 0 : index
    %38 = vector.load %arg14[%c0_32, %c0_33] : memref<1x128xf32, #tpu.memory_space<vmem>>, vector<1x128xf32>
    %39 = vector.broadcast %38 : vector<1x128xf32> to vector<8x128xf32>
    %40 = arith.addf %37, %39 : vector<8x128xf32>
    %41 = arith.truncf %40 : vector<8x128xf32> to vector<8x128xbf16>
    %c0_34 = arith.constant 0 : index
    %c0_35 = arith.constant 0 : index
    %42 = vector.load %arg15[%c0_34, %c0_35] : memref<16x128xbf16, #tpu.memory_space<vmem>>, vector<8x128xbf16>
    tpu.vector_store %arg15[%c0_34, %c0_35], %41 {strides = array<i32>} : memref<16x128xbf16, #tpu.memory_space<vmem>>, vector<8x128xbf16>,
    %c8 = arith.constant 8 : index
    %c0_36 = arith.constant 0 : index
    %43 = vector.load %arg1[%c8, %c0_36] : memref<16x128xbf16, #tpu.memory_space<vmem>>, vector<8x128xbf16>
    %c0_37 = arith.constant 0 : index
    %c0_38 = arith.constant 0 : index
    %44 = vector.load %arg2[%c0_37, %c0_38] : memref<128x640xbf16, #tpu.memory_space<vmem>>, vector<128x640xbf16>
    %cst_39 = arith.constant dense<0.000000e+00> : vector<8x640xf32>
    %45 = tpu.matmul %43, %44, %cst_39 {dimension_numbers = #tpu.dot_dimension_numbers<[1], [0], [0], [1], [0, 0, 1, 1], [], []>} : vector<8x128xbf16>, vector<128x640xbf16>, vector<8x640xf32> -> vector<8x640xf32>
    %c0_40 = arith.constant 0 : index
    %c0_41 = arith.constant 0 : index
    %46 = vector.load %arg3[%c0_40, %c0_41] : memref<1x640xf32, #tpu.memory_space<vmem>>, vector<1x640xf32>
    %47 = vector.broadcast %46 : vector<1x640xf32> to vector<8x640xf32>
    %48 = arith.addf %45, %47 : vector<8x640xf32>
    %cst_42 = arith.constant 0.000000e+00 : f32
    %49 = vector.broadcast %cst_42 : f32 to vector<8x640xf32>
    %50 = arith.maximumf %48, %49 : vector<8x640xf32>
    %51 = arith.truncf %50 : vector<8x640xf32> to vector<8x640xbf16>
    %c0_43 = arith.constant 0 : index
    %c0_44 = arith.constant 0 : index
    %52 = vector.load %arg4[%c0_43, %c0_44] : memref<640x128xbf16, #tpu.memory_space<vmem>>, vector<640x128xbf16>
    %cst_45 = arith.constant dense<0.000000e+00> : vector<8x128xf32>
    %53 = tpu.matmul %51, %52, %cst_45 {dimension_numbers = #tpu.dot_dimension_numbers<[1], [0], [0], [1], [0, 0, 1, 1], [], []>} : vector<8x640xbf16>, vector<640x128xbf16>, vector<8x128xf32> -> vector<8x128xf32>
    %c0_46 = arith.constant 0 : index
    %c0_47 = arith.constant 0 : index
    %54 = vector.load %arg5[%c0_46, %c0_47] : memref<1x128xf32, #tpu.memory_space<vmem>>, vector<1x128xf32>
    %55 = vector.broadcast %54 : vector<1x128xf32> to vector<8x128xf32>
    %56 = arith.addf %53, %55 : vector<8x128xf32>
    %57 = arith.truncf %56 : vector<8x128xf32> to vector<8x128xbf16>
    %c0_48 = arith.constant 0 : index
    %c0_49 = arith.constant 0 : index
    %58 = vector.load %arg6[%c0_48, %c0_49] : memref<128x640xbf16, #tpu.memory_space<vmem>>, vector<128x640xbf16>
    %cst_50 = arith.constant dense<0.000000e+00> : vector<8x640xf32>
    %59 = tpu.matmul %57, %58, %cst_50 {dimension_numbers = #tpu.dot_dimension_numbers<[1], [0], [0], [1], [0, 0, 1, 1], [], []>} : vector<8x128xbf16>, vector<128x640xbf16>, vector<8x640xf32> -> vector<8x640xf32>
    %c0_51 = arith.constant 0 : index
    %c0_52 = arith.constant 0 : index
    %60 = vector.load %arg7[%c0_51, %c0_52] : memref<128x640xbf16, #tpu.memory_space<vmem>>, vector<128x640xbf16>
    %cst_53 = arith.constant dense<0.000000e+00> : vector<8x640xf32>
    %61 = tpu.matmul %43, %60, %cst_53 {dimension_numbers = #tpu.dot_dimension_numbers<[1], [0], [0], [1], [0, 0, 1, 1], [], []>} : vector<8x128xbf16>, vector<128x640xbf16>, vector<8x640xf32> -> vector<8x640xf32>
    %62 = arith.addf %59, %61 : vector<8x640xf32>
    %c0_54 = arith.constant 0 : index
    %c0_55 = arith.constant 0 : index
    %63 = vector.load %arg8[%c0_54, %c0_55] : memref<1x640xf32, #tpu.memory_space<vmem>>, vector<1x640xf32>
    %64 = vector.broadcast %63 : vector<1x640xf32> to vector<8x640xf32>
    %65 = arith.addf %62, %64 : vector<8x640xf32>
    %66 = arith.truncf %65 : vector<8x640xf32> to vector<8x640xbf16>
    %c0_56 = arith.constant 0 : index
    %c0_57 = arith.constant 0 : index
    %67 = vector.load %arg9[%c0_56, %c0_57] : memref<640x320xbf16, #tpu.memory_space<vmem>>, vector<640x320xbf16>
    %cst_58 = arith.constant dense<0.000000e+00> : vector<8x320xf32>
    %68 = tpu.matmul %66, %67, %cst_58 {dimension_numbers = #tpu.dot_dimension_numbers<[1], [0], [0], [1], [0, 0, 1, 1], [], []>} : vector<8x640xbf16>, vector<640x320xbf16>, vector<8x320xf32> -> vector<8x320xf32>
    %c0_59 = arith.constant 0 : index
    %c0_60 = arith.constant 0 : index
    %69 = vector.load %arg10[%c0_59, %c0_60] : memref<1x320xf32, #tpu.memory_space<vmem>>, vector<1x320xf32>
    %70 = vector.broadcast %69 : vector<1x320xf32> to vector<8x320xf32>
    %71 = arith.addf %68, %70 : vector<8x320xf32>
    %72 = arith.truncf %71 : vector<8x320xf32> to vector<8x320xbf16>
    %c0_61 = arith.constant 0 : index
    %c0_62 = arith.constant 0 : index
    %73 = vector.load %arg11[%c0_61, %c0_62] : memref<320x640xbf16, #tpu.memory_space<vmem>>, vector<320x640xbf16>
    %cst_63 = arith.constant dense<0.000000e+00> : vector<8x640xf32>
    %74 = tpu.matmul %72, %73, %cst_63 {dimension_numbers = #tpu.dot_dimension_numbers<[1], [0], [0], [1], [0, 0, 1, 1], [], []>} : vector<8x320xbf16>, vector<320x640xbf16>, vector<8x640xf32> -> vector<8x640xf32>
    %c0_64 = arith.constant 0 : index
    %c0_65 = arith.constant 0 : index
    %75 = vector.load %arg12[%c0_64, %c0_65] : memref<1x640xf32, #tpu.memory_space<vmem>>, vector<1x640xf32>
    %76 = vector.broadcast %75 : vector<1x640xf32> to vector<8x640xf32>
    %77 = arith.addf %74, %76 : vector<8x640xf32>
    %78 = arith.truncf %77 : vector<8x640xf32> to vector<8x640xbf16>
    %c0_66 = arith.constant 0 : index
    %c0_67 = arith.constant 0 : index
    %79 = vector.load %arg13[%c0_66, %c0_67] : memref<640x128xbf16, #tpu.memory_space<vmem>>, vector<640x128xbf16>
    %cst_68 = arith.constant dense<0.000000e+00> : vector<8x128xf32>
    %80 = tpu.matmul %78, %79, %cst_68 {dimension_numbers = #tpu.dot_dimension_numbers<[1], [0], [0], [1], [0, 0, 1, 1], [], []>} : vector<8x640xbf16>, vector<640x128xbf16>, vector<8x128xf32> -> vector<8x128xf32>
    %c0_69 = arith.constant 0 : index
    %c0_70 = arith.constant 0 : index
    %81 = vector.load %arg14[%c0_69, %c0_70] : memref<1x128xf32, #tpu.memory_space<vmem>>, vector<1x128xf32>
    %82 = vector.broadcast %81 : vector<1x128xf32> to vector<8x128xf32>
    %83 = arith.addf %80, %82 : vector<8x128xf32>
    %84 = arith.truncf %83 : vector<8x128xf32> to vector<8x128xbf16>
    %c8_71 = arith.constant 8 : index
    %c0_72 = arith.constant 0 : index
    %85 = vector.load %arg15[%c8_71, %c0_72] : memref<16x128xbf16, #tpu.memory_space<vmem>>, vector<8x128xbf16>
    tpu.vector_store %arg15[%c8_71, %c0_72], %84 {strides = array<i32>} : memref<16x128xbf16, #tpu.memory_space<vmem>>, vector<8x128xbf16>,
    return
  }
  func.func @transform_0(%arg0: i32) -> (i32, i32) {
    %c0_i32 = arith.constant 0 : i32
    %c0_i32_0 = arith.constant 0 : i32
    return %arg0, %c0_i32 : i32, i32
  }
  func.func @transform_1(%arg0: i32) -> (i32, i32) {
    %c0_i32 = arith.constant 0 : i32
    %c0_i32_0 = arith.constant 0 : i32
    %c0_i32_1 = arith.constant 0 : i32
    return %c0_i32, %c0_i32_0 : i32, i32
  }
  func.func @transform_2(%arg0: i32) -> (i32, i32) {
    %c0_i32 = arith.constant 0 : i32
    %c0_i32_0 = arith.constant 0 : i32
    %c0_i32_1 = arith.constant 0 : i32
    return %c0_i32, %c0_i32_0 : i32, i32
  }
  func.func @transform_3(%arg0: i32) -> (i32, i32) {
    %c0_i32 = arith.constant 0 : i32
    %c0_i32_0 = arith.constant 0 : i32
    %c0_i32_1 = arith.constant 0 : i32
    return %c0_i32, %c0_i32_0 : i32, i32
  }
  func.func @transform_4(%arg0: i32) -> (i32, i32) {
    %c0_i32 = arith.constant 0 : i32
    %c0_i32_0 = arith.constant 0 : i32
    %c0_i32_1 = arith.constant 0 : i32
    return %c0_i32, %c0_i32_0 : i32, i32
  }
  func.func @transform_5(%arg0: i32) -> (i32, i32) {
    %c0_i32 = arith.constant 0 : i32
    %c0_i32_0 = arith.constant 0 : i32
    %c0_i32_1 = arith.constant 0 : i32
    return %c0_i32, %c0_i32_0 : i32, i32
  }
  func.func @transform_6(%arg0: i32) -> (i32, i32) {
    %c0_i32 = arith.constant 0 : i32
    %c0_i32_0 = arith.constant 0 : i32
    %c0_i32_1 = arith.constant 0 : i32
    return %c0_i32, %c0_i32_0 : i32, i32
  }
  func.func @transform_7(%arg0: i32) -> (i32, i32) {
    %c0_i32 = arith.constant 0 : i32
    %c0_i32_0 = arith.constant 0 : i32
    %c0_i32_1 = arith.constant 0 : i32
    return %c0_i32, %c0_i32_0 : i32, i32
  }
  func.func @transform_8(%arg0: i32) -> (i32, i32) {
    %c0_i32 = arith.constant 0 : i32
    %c0_i32_0 = arith.constant 0 : i32
    %c0_i32_1 = arith.constant 0 : i32
    return %c0_i32, %c0_i32_0 : i32, i32
  }
  func.func @transform_9(%arg0: i32) -> (i32, i32) {
    %c0_i32 = arith.constant 0 : i32
    %c0_i32_0 = arith.constant 0 : i32
    %c0_i32_1 = arith.constant 0 : i32
    return %c0_i32, %c0_i32_0 : i32, i32
  }
  func.func @transform_10(%arg0: i32) -> (i32, i32) {
    %c0_i32 = arith.constant 0 : i32
    %c0_i32_0 = arith.constant 0 : i32
    %c0_i32_1 = arith.constant 0 : i32
    return %c0_i32, %c0_i32_0 : i32, i32
  }
  func.func @transform_11(%arg0: i32) -> (i32, i32) {
    %c0_i32 = arith.constant 0 : i32
    %c0_i32_0 = arith.constant 0 : i32
    %c0_i32_1 = arith.constant 0 : i32
    return %c0_i32, %c0_i32_0 : i32, i32
  }
  func.func @transform_12(%arg0: i32) -> (i32, i32) {
    %c0_i32 = arith.constant 0 : i32
    %c0_i32_0 = arith.constant 0 : i32
    %c0_i32_1 = arith.constant 0 : i32
    return %c0_i32, %c0_i32_0 : i32, i32
  }
  func.func @transform_13(%arg0: i32) -> (i32, i32) {
    %c0_i32 = arith.constant 0 : i32
    %c0_i32_0 = arith.constant 0 : i32
    %c0_i32_1 = arith.constant 0 : i32
    return %c0_i32, %c0_i32_0 : i32, i32
  }
  func.func @transform_14(%arg0: i32) -> (i32, i32) {
    %c0_i32 = arith.constant 0 : i32
    %c0_i32_0 = arith.constant 0 : i32
    return %arg0, %c0_i32 : i32, i32
  }
}

</mosaic_0001>

<bundles_post_ra>
// kernel: tpu_custom_call.1
= control target key start
LH: loop header
LB: loop body
LE: loop exit
PB: predicated region body
PF: predicated region fallthrough
CT: control target
= control target key end

     0   :  { %s17234_s0 = inlined_call_operand.hbm [shape: bf16[32,128], index: 0, kind: input, shape index: {}]   ;;  %s17235_s1 = inlined_call_operand.vmem [shape: bf16[128,640], index: 1, kind: input, shape index: {}]   ;;  %s17236_s2 = inlined_call_operand.hbm [shape: f32[1,640], index: 2, kind: input, shape index: {}]   ;;  %s17237_s3 = inlined_call_operand.vmem [shape: bf16[640,128], index: 3, kind: input, shape index: {}]   ;;  %s17238_s4 = inlined_call_operand.hbm [shape: f32[1,128], index: 4, kind: input, shape index: {}]   ;;  %s17239_s5 = inlined_call_operand.vmem [shape: bf16[128,640], index: 5, kind: input, shape index: {}]   ;;  %s17240_s6 = inlined_call_operand.hbm [shape: bf16[128,640], index: 6, kind: input, shape index: {}]   ;;  %s17241_s7 = inlined_call_operand.hbm [shape: f32[1,640], index: 7, kind: input, shape index: {}]   ;;  %s17242_s8 = inlined_call_operand.vmem [shape: bf16[640,320], index: 8, kind: input, shape index: {}]   ;;  %s17243_s9 = inlined_call_operand.hbm [shape: f32[1,320], index: 9, kind: input, shape index: {}]   ;;  %s17244_s10 = inlined_call_operand.vmem [shape: bf16[320,640], index: 10, kind: input, shape index: {}]   ;;  %s17245_s11 = inlined_call_operand.hbm [shape: f32[1,640], index: 11, kind: input, shape index: {}]   ;;  %s17246_s12 = inlined_call_operand.hbm [shape: bf16[640,128], index: 12, kind: input, shape index: {}]   ;;  %s17247_s13 = inlined_call_operand.hbm [shape: f32[1,128], index: 13, kind: input, shape index: {}]   ;;  %s17248_s14 = inlined_call_operand.hbm [shape: bf16[32,128], index: 14, kind: output, shape index: {}]  }
   0x1   :  { %17254 = sst [smem:[#allocation24_spill]] %s17236_s2 }
   0x2   :  { %17255 = sst [smem:[#allocation25_spill]] %s17238_s4 }
   0x3   :  { %17256 = sst [smem:[#allocation26_spill]] %s17240_s6 }
   0x4   :  { %17257 = sst [smem:[#allocation27_spill]] %s17241_s7 }
   0x5   :  { %17258 = sst [smem:[#allocation28_spill]] %s17242_s8 }
   0x6   :  { %17259 = sst [smem:[#allocation29_spill]] %s17243_s9 }
   0x7   :  { %17260 = sst [smem:[#allocation30_spill]] %s17244_s10 }
   0x8   :  { %17261 = sst [smem:[#allocation31_spill]] %s17245_s11 }
   0x9   :  { %17262 = sst [smem:[#allocation32_spill]] %s17248_s14 }
   0xa   :  { %19 = vsyncpa [#allocation3], 0 }
   0xb   :  { %21 = vsyncpa [#allocation3 + $0x1], 0 }
   0xc   :  { %22 = vsyncpa [#allocation6], 0 }
   0xd   :  { %23 = vsyncpa [#allocation9], 0 }
   0xe   :  { %24 = vsyncpa [#allocation12], 0 }
   0xf   :  { %25 = vsyncpa [#allocation15], 0 }
  0x10   :  { %26 = vsyncpa [#allocation4], 0 }
  0x11   :  { %28 = vsyncpa [#allocation4 + $0x1], 0  ;;  %s12899_s29 = smov 0   ;;  %s12901_s30 = smov 0  }
  0x12   :  { %s12903_s15 = smov 0   ;;  %s12905_s16 = smov 0  }
  0x13 LB: > { %s17263_s2 = sld [smem:[#allocation24_spill]]  ;;  %s12923_s20 = sadd.s32 4294967295, %s12808_s16   ;;  %s12808_s16 = sphi %s12905_s16, %s17285_s16   ;;  %s12804_s15 = sphi %s12903_s15, %s17284_s15   ;;  %s12800_s30 = sphi %s12901_s30, %s17283_s30   ;;  %s12796_s29 = sphi %s12899_s29, %s17282_s29  }
  0x14   : > { %p8078_p0 = scmp.ge.s32.totalorder %s12808_s16, 1  ;;  %p55_p1 = scmp.eq.s32.totalorder %s12923_s20, 0 }
  0x15   : > { %p364_p2 = scmp.lt.s32.totalorder %s12808_s16, 3  ;;  %s12810_s22 = smov [#allocation5]  }
  0x16   : > { %s381_s23 = sshll.u32 %s12810_s22, 4  ;;  %s17265_s6 = sld [smem:[#allocation26_spill]]  ;;  %s382_s23 = int_to_ptr.vmem [resolvable:$true] %s381_s23 }
  0x17   : > { %p12928_p3 = pnand %p8078_p0, %p364_p2  ;;  %s12811_s28 = smov [#allocation8]  }
  0x18   : > { %s410_s17 = sshll.u32 %s12811_s28, 4  ;;  %s12812_s18 = smov 320   ;;  %s411_s17 = int_to_ptr.vmem [resolvable:$true] %s410_s17 }
  0x19   : > { %s379_s19 = sshll.u32 %s17263_s2, 4  ;;  %p12355_p5 = pneg %p12928_p3  ;;  %s380_s19 = int_to_ptr.hbm [resolvable:$true] %s379_s19 }
  0x1a   : > { %s12813_s22 = smov 20   ;;  %s17267_s9 = sld [smem:[#allocation29_spill]] }
  0x1b   : > { %p12940_p6 = pnand %p12355_p5, %p55_p1  ;;  %s464_s28 = sshll.u32 %s17246_s12, 4  ;;  %s465_s28 = int_to_ptr.hbm [resolvable:$true] %s464_s28 }
  0x1c   : > { %s408_s26 = sshll.u32 %s17265_s6, 4  ;;  %s12814_s6 = smov [#allocation11]   ;;  %s409_s26 = int_to_ptr.hbm [resolvable:$true] %s408_s26 }
  0x1d   : > { %12358 = dma.hbm_to_vmem [thread:$0]  (!%p12940_p6), %s380_s19, 80, %s382_s23, [#allocation6]  }
  0x1e   : > { %12364 = dma.hbm_to_vmem [thread:$0]  (!%p12940_p6), %s409_s26, 5120, %s411_s17, [#allocation9], %s12812_s18, %s12812_s18, %s12813_s22  }
  0x1f   : > { %s440_s14 = sshll.u32 %s12814_s6, 4  ;;  %s12815_s19 = smov [#allocation14]   ;;  %s441_s14 = int_to_ptr.vmem [resolvable:$true] %s440_s14 }
  0x20   : > { %s438_s2 = sshll.u32 %s17267_s9, 4  ;;  %s466_s23 = sshll.u32 %s12815_s19, 4  ;;  %s439_s2 = int_to_ptr.hbm [resolvable:$true] %s438_s2  ;;  %s467_s23 = int_to_ptr.vmem [resolvable:$true] %s466_s23 }
  0x21   : > { %12370 = dma.hbm_to_vmem [thread:$0]  (!%p12940_p6), %s439_s2, 48, %s441_s14, [#allocation12]  }
  0x22   : > { %s17252_s26 = smov 64   ;;  %s17253_s17 = smov 4  }
  0x23   : > { %12376 = dma.hbm_to_vmem [thread:$0]  (!%p12940_p6), %s465_s28, 5120, %s467_s23, [#allocation15], %s17252_s26, %s17252_s26, %s17253_s17  }
  0x24   : > { %s17268_s4 = sld [smem:[#allocation25_spill]]  ;;  %s12818_s10 = smov [#allocation7]  }
  0x25   : > { %s396_s22 = sshll.u32 %s12818_s10, 4  ;;  %s17269_s7 = sld [smem:[#allocation27_spill]]  ;;  %s397_s22 = int_to_ptr.vmem [resolvable:$true] %s396_s22 }
  0x26   : > { %s12819_s25 = smov [#allocation10]   ;;  %s17270_s11 = sld [smem:[#allocation31_spill]] }
  0x27   : > { %s425_s28 = sshll.u32 %s12819_s25, 4  ;;  %s12821_s14 = smov [#allocation16]   ;;  %s426_s28 = int_to_ptr.vmem [resolvable:$true] %s425_s28 }
  0x28   : > { %s8077_s25 = sadd.s32 4294967294, %s12808_s16   ;;  %s41_s23 = sadd.s32 1, %s12804_s15 }
  0x29   : > { %p48_p8 = scmp.ne.s32.totalorder %s12804_s15, %s12800_s30  ;;  %p49_p9 = scmp.eq.s32.totalorder %s12808_s16, 0 }
  0x2a   : > { %s394_s8 = sshll.u32 %s17268_s4, 4  ;;  %p54_p10 = scmp.ne.s32.totalorder %s12800_s30, %s12796_s29  ;;  %s395_s8 = int_to_ptr.hbm [resolvable:$true] %s394_s8 }
  0x2b   : > { %s423_s24 = sshll.u32 %s17269_s7, 4  ;;  %p12996_p11 = por %p49_p9, %p48_p8  ;;  %s424_s24 = int_to_ptr.hbm [resolvable:$true] %s423_s24 }
  0x2c   : > { %12361 = dma.hbm_to_vmem [thread:$0]  (!%p12940_p6), %s395_s8, 16, %s397_s22, [#allocation6]  }
  0x2d   : > { %s453_s6 = sshll.u32 %s17270_s11, 4  ;;  %s479_s8 = sshll.u32 %s17247_s13, 4  ;;  %s454_s6 = int_to_ptr.hbm [resolvable:$true] %s453_s6  ;;  %s480_s8 = int_to_ptr.hbm [resolvable:$true] %s479_s8 }
  0x2e   : > { %12367 = dma.hbm_to_vmem [thread:$0]  (!%p12940_p6), %s424_s24, 80, %s426_s28, [#allocation9]  }
  0x2f   : > { %s12820_s22 = smov [#allocation13]   ;;  %s481_s24 = sshll.u32 %s12821_s14, 4  ;;  %s482_s24 = int_to_ptr.vmem [resolvable:$true] %s481_s24 }
  0x30   : > { %s455_s2 = sshll.u32 %s12820_s22, 4  ;;  %s12983_s28 = sadd.s32 1, %s12808_s16   ;;  %s456_s2 = int_to_ptr.vmem [resolvable:$true] %s455_s2 }
  0x31   : > { %12373 = dma.hbm_to_vmem [thread:$0]  (!%p12940_p6), %s454_s6, 80, %s456_s2, [#allocation12]  }
  0x32   : > { %12379 = dma.hbm_to_vmem [thread:$0]  (!%p12940_p6), %s480_s8, 16, %s482_s24, [#allocation15]  }
  0x33   : > { %s38_s19 = ssub.s32 %s12808_s16, %s12983_s28  ;;  %p13002_p12 = por %p55_p1, %p54_p10 }
  0x34   : > { %p39_p7 = scmp.eq.s32.totalorder %s38_s19, 0  ;;  %p351_p13 = scmp.eq.s32.totalorder %s12923_s20, 1 }
  0x35   : > { %p357_p0 = scmp.eq.s32.totalorder %s8077_s25, 1  ;;  %p12396_p2 = scmp.lt.s32.totalorder %s12808_s16, 2 }
  0x36   : > { %s12994_s6 = scalar_select %p39_p7, %s12804_s15, %s41_s23  }
  0x37   : > { %s492_s10 = sand.u32 1, %s12804_s15   ;;  %p13009_p5 = por %p351_p13, %p48_p8 }
  0x38   : > { %p13013_p6 = por %p357_p0, %p54_p10  ;;  %s8088_s2 = sshll.u32 %s492_s10, 3 }
  0x39   : > { %s11477_s14 = sshll.u32 %s12808_s16, 3  ;;  %s496_s26 = scalar_lea.vmem [#allocation2], %s8088_s2 }
  0x3a   : > { %s501_s23 = scalar_lea.hbm %s17234_s0, %s11477_s14  ;;  %s504_s17 = sshll.u32 %s496_s26, 4  ;;  %s505_s17 = int_to_ptr.vmem [resolvable:$true] %s504_s17 }
  0x3b   : > { %s502_s4 = sshll.u32 %s501_s23, 4  ;;  %p13023_p7 = pnand %p12396_p2, %p12996_p11  ;;  %s503_s4 = int_to_ptr.hbm [resolvable:$true] %s502_s4 }
  0x3c   : > { %s493_s7 = scalar_lea.sflag [#allocation3], %s492_s10  ;;  %s12696_s9 = sshra.s32 %s503_s4, 4  ;;  %s12697_s9 = int_to_ptr.hbm [resolvable:$true] %s12696_s9 }
  0x3d   : > { %s12698_s11 = scalar_lea.hbm %s12697_s9, 8  ;;  %p12700_p9 = pneg %p13023_p7 }
  0x3e   : > { %p12699_p8 = scmp.ne.s32.totalorder %s12697_s9, %s12698_s11  ;;  %s12703_s14 = scalar_lea.hbm %s17234_s0, 16 }
  0x3f   : > { %p12704_p11 = scmp.lt.s32.totalorder %s12697_s9, %s17234_s0  ;;  %p12705_p0 = scmp.lt.s32.totalorder %s12703_s14, %s12698_s11 }
  0x40   : > { %p12701_p10 = pnand %p12700_p9, %p12699_p8 }
  0x41   : > { %p12706_p2 = por %p12705_p0, %p12704_p11 }
  0x42   : > { %p12702_p13 = pneg %p12701_p10 }
  0x44   : > { %p12707_p4 = pnand %p12706_p2, %p12702_p13 }
  0x46   : > { %12710 = shalt.err (!%p12707_p4)
}
  0x47   : > { %s17276_s10 = smov 4   ;;  %s17277_s19 = smov 64  }
  0x48   : > { %12383 = dma.hbm_to_vmem [thread:$0]  (!%p13023_p7), %s503_s4, 128, %s505_s17, %s493_s7, %s17277_s19, %s17277_s19, %s17276_s10  }
  0x49   : > { %516 = sbr.rel (%p12928_p3) target bundleno = 1889 (0x761), region = 76  ;;  %s13043_s23 = sand.u32 (!%p12928_p3), 1, %s12800_s30  }
  0x4a   : > { %s8092_s9 = sshll.u32 (!%p12928_p3), %s13043_s23, 3  ;;  %s519_s11 = scalar_lea.sflag (!%p12928_p3), [#allocation3], %s13043_s23 }
  0x4b   : > { %s13049_s2 = scalar_lea.vmem (!%p12928_p3), [#allocation2], %s8092_s9 }
  0x4e   : > { %12771 = dma.done.wait (%p13002_p12), %s519_s11, 128  }
  0x4f   : > { %12773 = vsyncadd (%p13002_p12), %s519_s11, 4294967168 }
  0x50   : > { %12775 = dma.done.wait (%p55_p1), [#allocation6], 96  }
  0x51   : > { %12777 = vsyncadd (%p55_p1), [#allocation6], 4294967200 }
  0x52   : > { %12779 = dma.done.wait (%p55_p1), [#allocation9], 5200  }
  0x53   : > { %12781 = vsyncadd (%p55_p1), [#allocation9], 4294962096 }
  0x54   : > { %12783 = dma.done.wait (%p55_p1), [#allocation12], 128  }
  0x55   : > { %12785 = vsyncadd (%p55_p1), [#allocation12], 4294967168 }
  0x56   : > { %12787 = dma.done.wait (%p55_p1), [#allocation15], 5136  }
  0x57   : > { %12789 = vsyncadd (%p55_p1), [#allocation15], 4294962160  ;;  %v8244_v0 = vld [vmem:[%s17235_s1 + $0x118] sm:$0xf]  ;;  %v11515_v1 = vld [vmem:[%s17235_s1 + $0x128] sm:$0xf0] }
  0x58   : > { %v8224_v2 = vld [vmem:[%s17235_s1 + $0xf0] sm:$0xf]  ;;  %v8245_v3 = vor.u32 %v11515_v1, %v8244_v0  ;;  %v11510_v4 = vld [vmem:[%s17235_s1 + $0x100] sm:$0xf0]  ;;  %v8252_v5 = vld [vmem:[%s17235_s1 + $0x120] sm:$0xf] }
  0x59   : > { %v11516_v6 = vld [vmem:[%s17235_s1 + $0x130] sm:$0xf0]  ;;  %v11513_v8 = vld [vmem:[%s17235_s1 + $0x11c] sm:$0xf]  ;;  %v8225_v9 = vor.u32 %v11510_v4, %v8224_v2  ;;  %v8246_v10 = vld [vmem:[%s17235_s1 + $0x12c] sm:$0xf0] }
  0x5a   : > { %v8253_v7 = vor.u32 %v11516_v6, %v8252_v5  ;;  %880 = vmatpush.bf16.msra.mxu0 %v8245_v3  ;;  %v8232_v11 = vld [vmem:[%s17235_s1 + $0xf8] sm:$0xf]  ;;  %v11511_v12 = vld [vmem:[%s17235_s1 + $0x108] sm:$0xf0]  ;;  %v8204_v13 = vld [vmem:[%s17235_s1 + $0xc8] sm:$0xf]  ;;  %v8249_v15 = vor.u32 %v11513_v8, %v8246_v10 }
  0x5b   : > { %v11505_v14 = vld [vmem:[%s17235_s1 + $0xd8] sm:$0xf0]  ;;  %v8233_v16 = vor.u32 %v11511_v12, %v8232_v11  ;;  %v11508_v17 = vld [vmem:[%s17235_s1 + $0xf4] sm:$0xf]  ;;  %v8226_v18 = vld [vmem:[%s17235_s1 + $0x104] sm:$0xf0] }
  0x5c   : > { %906 = vmatpush.bf16.msra.mxu2 %v8253_v7  ;;  %v8212_v19 = vld [vmem:[%s17235_s1 + $0xd0] sm:$0xf]  ;;  %v11506_v20 = vld [vmem:[%s17235_s1 + $0xe0] sm:$0xf0]  ;;  %893 = vmatpush.bf16.msra.mxu1 %v8249_v15  ;;  %v8229_v21 = vor.u32 %v11508_v17, %v8226_v18  ;;  %v8254_v23 = vld [vmem:[%s17235_s1 + $0x134] sm:$0xf0]  ;;  %v8205_v24 = vor.u32 %v11505_v14, %v8204_v13 }
  0x5d   : > { %v11514_v22 = vld [vmem:[%s17235_s1 + $0x124] sm:$0xf]  ;;  %v11503_v26 = vld [vmem:[%s17235_s1 + $0xcc] sm:$0xf]  ;;  %v8206_v27 = vld [vmem:[%s17235_s1 + $0xdc] sm:$0xf0]  ;;  %v8213_v30 = vor.u32 %v11506_v20, %v8212_v19 }
  0x5e   : > { %881 = vmatpush.bf16.msra.mxu0 %v8225_v9  ;;  %v8257_v25 = vor.u32 %v11514_v22, %v8254_v23  ;;  %v8184_v28 = vld [vmem:[%s17235_s1 + $0xa0] sm:$0xf]  ;;  %v11500_v29 = vld [vmem:[%s17235_s1 + $0xb0] sm:$0xf0]  ;;  %v11509_v31 = vld [vmem:[%s17235_s1 + $0xfc] sm:$0xf]  ;;  %v8209_v35 = vor.u32 %v11503_v26, %v8206_v27 }
  0x5f   : > { %v8192_v32 = vld [vmem:[%s17235_s1 + $0xa8] sm:$0xf]  ;;  %v11501_v33 = vld [vmem:[%s17235_s1 + $0xb8] sm:$0xf0]  ;;  %v8234_v34 = vld [vmem:[%s17235_s1 + $0x10c] sm:$0xf0]  ;;  %v8185_v38 = vor.u32 %v11500_v29, %v8184_v28 }
  0x60   : > { %907 = vmatpush.bf16.msra.mxu2 %v8233_v16  ;;  %919 = vmatpush.bf16.msra.mxu3 %v8257_v25  ;;  %v8237_v36 = vor.u32 %v11509_v31, %v8234_v34  ;;  %v11498_v37 = vld [vmem:[%s17235_s1 + $0xa4] sm:$0xf]  ;;  %v8186_v39 = vld [vmem:[%s17235_s1 + $0xb4] sm:$0xf0]  ;;  %v11504_v40 = vld [vmem:[%s17235_s1 + $0xd4] sm:$0xf]  ;;  %v8193_v44 = vor.u32 %v11501_v33, %v8192_v32 }
  0x61   : > { %894 = vmatpush.bf16.msra.mxu1 %v8229_v21  ;;  %v8214_v41 = vld [vmem:[%s17235_s1 + $0xe4] sm:$0xf0]  ;;  %v8164_v42 = vld [vmem:[%s17235_s1 + $0x78] sm:$0xf]  ;;  %v11495_v43 = vld [vmem:[%s17235_s1 + $0x88] sm:$0xf0]  ;;  %v8189_v48 = vor.u32 %v11498_v37, %v8186_v39 }
  0x62   : > { %882 = vmatpush.bf16.msra.mxu0 %v8205_v24  ;;  %v8172_v45 = vld [vmem:[%s17235_s1 + $0x80] sm:$0xf]  ;;  %v11496_v46 = vld [vmem:[%s17235_s1 + $0x90] sm:$0xf0]  ;;  %v8217_v47 = vor.u32 %v11504_v40, %v8214_v41  ;;  %v11499_v49 = vld [vmem:[%s17235_s1 + $0xac] sm:$0xf]  ;;  %v8165_v51 = vor.u32 %v11495_v43, %v8164_v42 }
  0x63   : > { %v8194_v50 = vld [vmem:[%s17235_s1 + $0xbc] sm:$0xf0]  ;;  %v11493_v52 = vld [vmem:[%s17235_s1 + $0x7c] sm:$0xf]  ;;  %v8166_v53 = vld [vmem:[%s17235_s1 + $0x8c] sm:$0xf0]  ;;  %v8173_v56 = vor.u32 %v11496_v46, %v8172_v45 }
  0x64   : > { %908 = vmatpush.bf16.msra.mxu2 %v8213_v30  ;;  %920 = vmatpush.bf16.msra.mxu3 %v8237_v36  ;;  %v8144_v54 = vld [vmem:[%s17235_s1 + $0x50] sm:$0xf]  ;;  %v11490_v55 = vld [vmem:[%s17235_s1 + $0x60] sm:$0xf0]  ;;  %v8152_v57 = vld [vmem:[%s17235_s1 + $0x58] sm:$0xf]  ;;  %v8197_v59 = vor.u32 %v11499_v49, %v8194_v50  ;;  %v8169_v60 = vor.u32 %v11493_v52, %v8166_v53 }
  0x65   : > { %895 = vmatpush.bf16.msra.mxu1 %v8209_v35  ;;  %v11491_v58 = vld [vmem:[%s17235_s1 + $0x68] sm:$0xf0]  ;;  %v11494_v61 = vld [vmem:[%s17235_s1 + $0x84] sm:$0xf]  ;;  %v8174_v62 = vld [vmem:[%s17235_s1 + $0x94] sm:$0xf0]  ;;  %v8145_v63 = vor.u32 %v11490_v55, %v8144_v54 }
  0x66   : > { %883 = vmatpush.bf16.msra.mxu0 %v8185_v38  ;;  %v11488_v0 = vld [vmem:[%s17235_s1 + $0x54] sm:$0xf]  ;;  %v8146_v1 = vld [vmem:[%s17235_s1 + $0x64] sm:$0xf0]  ;;  %v11485_v3 = vld [vmem:[%s17235_s1 + $0x38] sm:$0xf0]  ;;  %v8153_v4 = vor.u32 %v11491_v58, %v8152_v57  ;;  %v8177_v7 = vor.u32 %v11494_v61, %v8174_v62 }
  0x67   : > { %v8124_v2 = vld [vmem:[%s17235_s1 + $0x28] sm:$0xf]  ;;  %v8132_v5 = vld [vmem:[%s17235_s1 + $0x30] sm:$0xf]  ;;  %v11486_v6 = vld [vmem:[%s17235_s1 + $0x40] sm:$0xf0]  ;;  %v8149_v8 = vor.u32 %v11488_v0, %v8146_v1 }
  0x68   : > { %909 = vmatpush.bf16.msra.mxu2 %v8193_v44  ;;  %921 = vmatpush.bf16.msra.mxu3 %v8217_v47  ;;  %v11489_v9 = vld [vmem:[%s17235_s1 + $0x5c] sm:$0xf]  ;;  %v8154_v10 = vld [vmem:[%s17235_s1 + $0x6c] sm:$0xf0]  ;;  %v8125_v11 = vor.u32 %v11485_v3, %v8124_v2  ;;  %v8104_v12 = vld [vmem:[%s17235_s1] sm:$0xf]  ;;  %v8133_v16 = vor.u32 %v11486_v6, %v8132_v5 }
  0x69   : > { %896 = vmatpush.bf16.msra.mxu1 %v8189_v48  ;;  %v11483_v13 = vld [vmem:[%s17235_s1 + $0x2c] sm:$0xf]  ;;  %v8126_v14 = vld [vmem:[%s17235_s1 + $0x3c] sm:$0xf0]  ;;  %v11480_v15 = vld [vmem:[%s17235_s1 + $0x10] sm:$0xf0]  ;;  %v8157_v21 = vor.u32 %v11489_v9, %v8154_v10 }
  0x6a   : > { %884 = vmatpush.bf16.msra.mxu0 %v8165_v51  ;;  %v8260_v17 = vld [vmem:[%s17235_s1 + $0x128] sm:$0xf]  ;;  %v11517_v18 = vld [vmem:[%s17235_s1 + $0x138] sm:$0xf0]  ;;  %v11478_v22 = vld [vmem:[%s17235_s1 + $0x4] sm:$0xf]  ;;  %v8129_v23 = vor.u32 %v11483_v13, %v8126_v14  ;;  %v8105_v27 = vor.u32 %v11480_v15, %v8104_v12 }
  0x6b   : > { %v8112_v19 = vld [vmem:[%s17235_s1 + $0x8] sm:$0xf]  ;;  %v11481_v20 = vld [vmem:[%s17235_s1 + $0x18] sm:$0xf0]  ;;  %v8106_v24 = vld [vmem:[%s17235_s1 + $0x14] sm:$0xf0]  ;;  %v8261_v28 = vor.u32 %v11517_v18, %v8260_v17 }
  0x6c   : > { %910 = vmatpush.bf16.msra.mxu2 %v8173_v56  ;;  %922 = vmatpush.bf16.msra.mxu3 %v8197_v59  ;;  %v11484_v25 = vld [vmem:[%s17235_s1 + $0x34] sm:$0xf]  ;;  %v8134_v26 = vld [vmem:[%s17235_s1 + $0x44] sm:$0xf0]  ;;  %v8113_v29 = vor.u32 %v11481_v20, %v8112_v19  ;;  %v8240_v30 = vld [vmem:[%s17235_s1 + $0x100] sm:$0xf]  ;;  %v8109_v33 = vor.u32 %v11478_v22, %v8106_v24 }
  0x6d   : > { %897 = vmatpush.bf16.msra.mxu1 %v8169_v60  ;;  %v11512_v31 = vld [vmem:[%s17235_s1 + $0x110] sm:$0xf0]  ;;  %v8137_v32 = vor.u32 %v11484_v25, %v8134_v26  ;;  %v11479_v34 = vld [vmem:[%s17235_s1 + $0xc] sm:$0xf]  ;;  %v8114_v35 = vld [vmem:[%s17235_s1 + $0x1c] sm:$0xf0] }
  0x6e   : > { %885 = vmatpush.bf16.msra.mxu0 %v8145_v63  ;;  %v13276_v36 = vld [vmem:[%s13049_s2] sm:$0xf]  ;;  %v11525_v37 = vld [vmem:[%s17237_s3 + $0x38] sm:$0xff]  ;;  %v8241_v38 = vor.u32 %v11512_v31, %v8240_v30  ;;  %v11507_v41 = vld [vmem:[%s17235_s1 + $0xe8] sm:$0xf0]  ;;  %v8117_v42 = vor.u32 %v11479_v34, %v8114_v35  ;;  %s17278_s11 = sld [smem:[#allocation28_spill]] }
  0x6f   : > { %v11533_v39 = vld [vmem:[%s17237_s3 + $0x78] sm:$0xff]  ;;  %v11524_v44 = vld [vmem:[%s17237_s3 + $0x30] sm:$0xff]  ;;  %v11502_v47 = vld [vmem:[%s17235_s1 + $0xc0] sm:$0xf0]  ;;  %s17279_s4 = sld [smem:[#allocation30_spill]]  ;;  %vm3667_vm0 = vcmask 523264  }
  0x70   : > { %911 = vmatpush.bf16.msra.mxu2 %v8153_v4  ;;  %923 = vmatpush.bf16.msra.mxu3 %v8177_v7  ;;  %v8220_v40 = vld [vmem:[%s17235_s1 + $0xd8] sm:$0xf]  ;;  %v8200_v46 = vld [vmem:[%s17235_s1 + $0xb0] sm:$0xf]  ;;  %v11523_v50 = vld [vmem:[%s17237_s3 + $0x28] sm:$0xff]  ;;  %s15520_s24 = scalar_lea.vmem [#allocation17], %s8092_s9 }
  0x71   : > { %898 = vmatpush.bf16.msra.mxu1 %v8149_v8  ;;  %v11541_v43 = vld [vmem:[%s17237_s3 + $0xb8] sm:$0xff]  ;;  %v8221_v45 = vor.u32 %v11507_v41, %v8220_v40  ;;  %v11532_v48 = vld [vmem:[%s17237_s3 + $0x70] sm:$0xff]  ;;  %v8201_v51 = vor.u32 %v11502_v47, %v8200_v46  ;;  %v8180_v52 = vld [vmem:[%s17235_s1 + $0x88] sm:$0xf]  ;;  %s12318_s27 = sshll.u32 %s12923_s20, 3  ;;  %s17280_s14 = sld [smem:[#allocation32_spill]] }
  0x72   : > { %886 = vmatpush.bf16.msra.mxu0 %v8125_v11  ;;  %v11540_v49 = vld [vmem:[%s17237_s3 + $0xb0] sm:$0xff]  ;;  %v11497_v53 = vld [vmem:[%s17235_s1 + $0x98] sm:$0xf0]  ;;  %v11531_v54 = vld [vmem:[%s17237_s3 + $0x68] sm:$0xff]  ;;  %s7925_s18 = sshll.u32 %s15520_s24, 4  ;;  %s7913_s19 = scalar_lea.sflag [#allocation4], %s13043_s23  ;;  %s7926_s18 = int_to_ptr.vmem [resolvable:$true] %s7925_s18 }
  0x73   : > { %v11539_v55 = vld [vmem:[%s17237_s3 + $0xa8] sm:$0xff]  ;;  %v11522_v56 = vld [vmem:[%s17237_s3 + $0x20] sm:$0xff]  ;;  %v8181_v57 = vor.u32 %v11497_v53, %v8180_v52  ;;  %v11492_v59 = vld [vmem:[%s17235_s1 + $0x70] sm:$0xf0] }
  0x74   : > { %912 = vmatpush.bf16.msra.mxu2 %v8133_v16  ;;  %924 = vmatpush.bf16.msra.mxu3 %v8157_v21  ;;  %v8160_v58 = vld [vmem:[%s17235_s1 + $0x60] sm:$0xf]  ;;  %v11521_v62 = vld [vmem:[%s17237_s3 + $0x18] sm:$0xff]  ;;  %v11487_v1 = vld [vmem:[%s17235_s1 + $0x48] sm:$0xf0] }
  0x75   : > { %899 = vmatpush.bf16.msra.mxu1 %v8129_v23  ;;  %v11530_v60 = vld [vmem:[%s17237_s3 + $0x60] sm:$0xff]  ;;  %v8161_v63 = vor.u32 %v11492_v59, %v8160_v58  ;;  %v8140_v0 = vld [vmem:[%s17235_s1 + $0x38] sm:$0xf]  ;;  %v11520_v4 = vld [vmem:[%s17237_s3 + $0x10] sm:$0xff] }
  0x76   : > { %887 = vmatpush.bf16.msra.mxu0 %v8105_v27  ;;  %v11538_v61 = vld [vmem:[%s17237_s3 + $0xa0] sm:$0xff]  ;;  %v11529_v2 = vld [vmem:[%s17237_s3 + $0x58] sm:$0xff]  ;;  %v8141_v5 = vor.u32 %v11487_v1, %v8140_v0  ;;  %v8120_v6 = vld [vmem:[%s17235_s1 + $0x10] sm:$0xf] }
  0x77   : > { %v11537_v3 = vld [vmem:[%s17237_s3 + $0x98] sm:$0xff]  ;;  %v11482_v7 = vld [vmem:[%s17235_s1 + $0x20] sm:$0xf0]  ;;  %v11519_v8 = vld [vmem:[%s17237_s3 + $0x8] sm:$0xff]  ;;  %s7924_s9 = scalar_lea.hbm %s17280_s14, %s12318_s27  ;;  %s12746_s17 = scalar_lea.hbm %s17280_s14, 16 }
  0x78   : > { %913 = vmatpush.bf16.msra.mxu2 %v8113_v29  ;;  %925 = vmatpush.bf16.msra.mxu3 %v8137_v32  ;;  %v8121_v9 = vor.u32 %v11482_v7, %v8120_v6  ;;  %v11549_v10 = vld [vmem:[%s17237_s3 + $0xf8] sm:$0xff]  ;;  %v11518_v11 = vld [vmem:[%s17237_s3] sm:$0xff]  ;;  %v11548_v12 = vld [vmem:[%s17237_s3 + $0xf0] sm:$0xff]  ;;  %s7927_s10 = sshll.u32 %s7924_s9, 4  ;;  %s7928_s10 = int_to_ptr.hbm [resolvable:$true] %s7927_s10 }
  0x79   : > { %888 = vmatmul.bf16.vlgmr.msra.gmra.mxu0 %v13276_v36  ;;  %900 = vmatpush.bf16.msra.mxu1 %v8109_v33  ;;  %v11547_v13 = vld [vmem:[%s17237_s3 + $0xe8] sm:$0xff]  ;;  %v11528_v14 = vld [vmem:[%s17237_s3 + $0x50] sm:$0xff]  ;;  %v11557_v15 = vld [vmem:[%s17237_s3 + $0x138] sm:$0xff]  ;;  %s12740_s7 = sshra.s32 %s7928_s10, 4  ;;  %s12741_s7 = int_to_ptr.hbm [resolvable:$true] %s12740_s7 }
  0x7a   : > { %932 = vmatpush.bf16.msrb.mxu0 %v8261_v28  ;;  %v11536_v16 = vld [vmem:[%s17237_s3 + $0x90] sm:$0xff]  ;;  %v11546_v17 = vld [vmem:[%s17237_s3 + $0xe0] sm:$0xff]  ;;  %v11527_v18 = vld [vmem:[%s17237_s3 + $0x48] sm:$0xff]  ;;  %s12742_s20 = scalar_lea.hbm %s12741_s7, 8  ;;  %p12747_p12 = scmp.lt.s32.totalorder %s12741_s7, %s17280_s14 }
  0x7b   : > { %914 = vmatmul.bf16.vlgmr.msra.gmra.mxu2 %v13276_v36  ;;  %v11556_v19 = vld [vmem:[%s17237_s3 + $0x130] sm:$0xff]  ;;  %v11535_v20 = vld [vmem:[%s17237_s3 + $0x88] sm:$0xff]  ;;  %v11545_v21 = vld [vmem:[%s17237_s3 + $0xd8] sm:$0xff]  ;;  %p12743_p1 = scmp.ne.s32.totalorder %s12741_s7, %s12742_s20  ;;  %p12748_p7 = scmp.lt.s32.totalorder %s12746_s17, %s12742_s20 }
  0x7c   : > { %1292 = vmatpush.bf16.msrb.mxu2 %v11533_v39  ;;  %901 = vmatmul.bf16.vlgmr.msra.gmra.mxu1 %v13276_v36  ;;  %v11526_v22 = vld [vmem:[%s17237_s3 + $0x40] sm:$0xff]  ;;  %v11555_v23 = vld [vmem:[%s17237_s3 + $0x128] sm:$0xff]  ;;  %v11544_v25 = vld [vmem:[%s17237_s3 + $0xd0] sm:$0xff] }
  0x7d   : > { %1279 = vmatpush.bf16.msrb.mxu1 %v11525_v37  ;;  %926 = vmatpush.bf16.msra.mxu3 %v8117_v42  ;;  %v11534_v24 = vld [vmem:[%s17237_s3 + $0x80] sm:$0xff]  ;;  %v11543_v27 = vld [vmem:[%s17237_s3 + $0xc8] sm:$0xff]  ;;  %v11553_v28 = vld [vmem:[%s17237_s3 + $0x118] sm:$0xff]  ;;  %p12744_p3 = pnand %p12743_p1, %p13009_p5  ;;  %p12749_p8 = por %p12748_p7, %p12747_p12 }
  0x7e   : > { %933 = vmatpush.bf16.msrb.mxu0 %v8241_v38  ;;  %v11554_v26 = vld [vmem:[%s17237_s3 + $0x120] sm:$0xff]  ;;  %v11552_v30 = vld [vmem:[%s17237_s3 + $0x110] sm:$0xff]  ;;  %v11551_v32 = vld [vmem:[%s17237_s3 + $0x108] sm:$0xff] }
  0x7f   : > { %v11542_v29 = vld [vmem:[%s17237_s3 + $0xc0] sm:$0xff]  ;;  %v13433_v31 = vld [vmem:[#allocation5] sm:$0x1f]  ;;  %v8544_v46 = vld [vmem:[#allocation8 + $0xf0] sm:$0xf]  ;;  %p12745_p4 = pneg %p12744_p3 }
  0x80   : > { %927 = vmatmul.bf16.vlgmr.msra.gmra.mxu3 %v13276_v36  ;;  %1293 = vmatpush.bf16.msrb.mxu2 %v11532_v48  ;;  %v662_v33 = vperm.slane %v13433_v31, 0  ;;  %v11550_v34 = vld [vmem:[%s17237_s3 + $0x100] sm:$0xff]  ;;  %v663_v37 = vperm.slane %v13433_v31, 1  ;;  %v664_v42 = vperm.slane %v13433_v31, 2  ;;  %v11625_v58 = vld [vmem:[#allocation8 + $0xd8] sm:$0xf0] }
  0x81   : > { %1305 = vmatpush.bf16.msrb.mxu3 %v11541_v43  ;;  %1280 = vmatpush.bf16.msrb.mxu1 %v11524_v44  ;;  %v8564_v44 = vld [vmem:[#allocation8 + $0x118] sm:$0xf]  ;;  %v8566_v59 = vld [vmem:[#allocation8 + $0x12c] sm:$0xf0]  ;;  %p12750_p9 = pnand %p12749_p8, %p12745_p4 }
  0x82   : > { %934 = vmatpush.bf16.msrb.mxu0 %v8221_v45  ;;  %v11635_v45 = vld [vmem:[#allocation8 + $0x128] sm:$0xf0] }
  0x83   : > { %v8565_v48 = vor.u32 %v11635_v45, %v8564_v44 }
  0x84   : > { %1294 = vmatpush.bf16.msrb.mxu2 %v11531_v54  ;;  %v665_v54 = vperm.slane %v13433_v31, 3 }
  0x85   : > { %1306 = vmatpush.bf16.msrb.mxu3 %v11540_v49  ;;  %1281 = vmatpush.bf16.msrb.mxu1 %v11523_v50  ;;  %v11630_v49 = vld [vmem:[#allocation8 + $0x100] sm:$0xf0] }
  0x86   : > { %935 = vmatpush.bf16.msrb.mxu0 %v8201_v51 }
  0x88   : > { %1295 = vmatpush.bf16.msrb.mxu2 %v11530_v60 }
  0x89   : > { %1307 = vmatpush.bf16.msrb.mxu3 %v11539_v55  ;;  %1282 = vmatpush.bf16.msrb.mxu1 %v11522_v56  ;;  %v8545_v55 = vor.u32 %v11630_v49, %v8544_v46  ;;  %v11633_v56 = vld [vmem:[#allocation8 + $0x11c] sm:$0xf]  ;;  %v8512_v46 = vld [vmem:[#allocation8 + $0xa8] sm:$0xf]  ;;  %v8514_v49 = vld [vmem:[#allocation8 + $0xbc] sm:$0xf0] }
  0x8a   : > { %936 = vmatpush.bf16.msrb.mxu0 %v8181_v57  ;;  %v8524_v57 = vld [vmem:[#allocation8 + $0xc8] sm:$0xf] }
  0x8c   : > { %1296 = vmatpush.bf16.msrb.mxu2 %v11529_v2 }
  0x8d   : > { %1308 = vmatpush.bf16.msrb.mxu3 %v11538_v61  ;;  %1283 = vmatpush.bf16.msrb.mxu1 %v11521_v62  ;;  %v8569_v61 = vor.u32 %v11633_v56, %v8566_v59  ;;  %v11628_v62 = vld [vmem:[#allocation8 + $0xf4] sm:$0xf]  ;;  %v8466_v56 = vld [vmem:[#allocation8 + $0x64] sm:$0xf0]  ;;  %v8492_v59 = vld [vmem:[#allocation8 + $0x80] sm:$0xf] }
  0x8e   : > { %937 = vmatpush.bf16.msrb.mxu0 %v8161_v63  ;;  %v8546_v63 = vld [vmem:[#allocation8 + $0x104] sm:$0xf0] }
  0x8f   : > { %v8549_v6 = vor.u32 %v11628_v62, %v8546_v63  ;;  %v8494_v62 = vld [vmem:[#allocation8 + $0x94] sm:$0xf0] }
  0x90   : > { %1297 = vmatpush.bf16.msrb.mxu2 %v11528_v14 }
  0x91   : > { %1309 = vmatpush.bf16.msrb.mxu3 %v11537_v3  ;;  %1284 = vmatpush.bf16.msrb.mxu1 %v11520_v4  ;;  %v8525_v3 = vor.u32 %v11625_v58, %v8524_v57  ;;  %v8504_v4 = vld [vmem:[#allocation8 + $0xa0] sm:$0xf] }
  0x92   : > { %938 = vmatpush.bf16.msrb.mxu0 %v8141_v5  ;;  %v11620_v5 = vld [vmem:[#allocation8 + $0xb0] sm:$0xf0] }
  0x94   : > { %1298 = vmatpush.bf16.msrb.mxu2 %v11527_v18 }
  0x95   : > { %1285 = vmatpush.bf16.msrb.mxu1 %v11519_v8  ;;  %1310 = vmatpush.bf16.msrb.mxu3 %v11536_v16  ;;  %v11623_v8 = vld [vmem:[#allocation8 + $0xcc] sm:$0xf]  ;;  %v8484_v16 = vld [vmem:[#allocation8 + $0x78] sm:$0xf] }
  0x96   : > { %939 = vmatpush.bf16.msrb.mxu0 %v8121_v9  ;;  %v8526_v9 = vld [vmem:[#allocation8 + $0xdc] sm:$0xf0] }
  0x98   : > { %1299 = vmatpush.bf16.msrb.mxu2 %v11526_v22  ;;  %v11618_v22 = vld [vmem:[#allocation8 + $0xa4] sm:$0xf] }
  0x99   : > { %940 = vmatmul.bf16.vlgmr.msrb.gmra.mxu0 %v13276_v36  ;;  %1286 = vmatpush.bf16.msrb.mxu1 %v11518_v11  ;;  %v11636_v11 = vld [vmem:[#allocation8 + $0x130] sm:$0xf0] }
  0x9a   : > { %1318 = vmatpush.bf16.msra.mxu0 %v11549_v10  ;;  %1311 = vmatpush.bf16.msrb.mxu3 %v11535_v20  ;;  %v8572_v10 = vld [vmem:[#allocation8 + $0x120] sm:$0xf]  ;;  %v8505_v20 = vor.u32 %v11620_v5, %v8504_v4  ;;  %v11637_v4 = vld [vmem:[#allocation8 + $0x138] sm:$0xf0] }
  0x9b   : > { %v8573_v18 = vor.u32 %v11636_v11, %v8572_v10  ;;  %v8472_v10 = vld [vmem:[#allocation8 + $0x58] sm:$0xf]  ;;  %v11611_v11 = vld [vmem:[#allocation8 + $0x68] sm:$0xf0] }
  0x9c   : > { %1649 = vmatpush.bf16.msra.mxu2 %v8565_v48  ;;  %v11619_v48 = vld [vmem:[#allocation8 + $0xac] sm:$0xf] }
  0x9d   : > { %1331 = vmatpush.bf16.msra.mxu1 %v11557_v15  ;;  %v8517_v58 = vor.u32 %v11619_v48, %v8514_v49  ;;  %v8726_v48 = vld [vmem:[%s17239_s5 + $0x12c] sm:$0xf0] }
  0x9e   : > { %1319 = vmatpush.bf16.msra.mxu0 %v11548_v12  ;;  %1312 = vmatpush.bf16.msrb.mxu3 %v11534_v24  ;;  %v11634_v12 = vld [vmem:[#allocation8 + $0x124] sm:$0xf]  ;;  %v8552_v24 = vld [vmem:[#allocation8 + $0xf8] sm:$0xf] }
  0xa0   : > { %1650 = vmatpush.bf16.msra.mxu2 %v8545_v55  ;;  %v11608_v55 = vld [vmem:[#allocation8 + $0x54] sm:$0xf] }
  0xa1   : > { %1332 = vmatpush.bf16.msra.mxu1 %v11556_v19 }
  0xa2   : > { %1320 = vmatpush.bf16.msra.mxu0 %v11547_v13  ;;  %1662 = vmatpush.bf16.msra.mxu3 %v8569_v61  ;;  %v8574_v13 = vld [vmem:[#allocation8 + $0x134] sm:$0xf0]  ;;  %v11614_v61 = vld [vmem:[#allocation8 + $0x84] sm:$0xf] }
  0xa3   : > { %v8577_v19 = vor.u32 %v11634_v12, %v8574_v13  ;;  %v11609_v12 = vld [vmem:[#allocation8 + $0x5c] sm:$0xf]  ;;  %v8474_v13 = vld [vmem:[#allocation8 + $0x6c] sm:$0xf0] }
  0xa4   : > { %1651 = vmatpush.bf16.msra.mxu2 %v8525_v3  ;;  %v8580_v3 = vld [vmem:[#allocation8 + $0x128] sm:$0xf] }
  0xa5   : > { %1333 = vmatpush.bf16.msra.mxu1 %v11555_v23  ;;  %v8506_v23 = vld [vmem:[#allocation8 + $0xb4] sm:$0xf0] }
  0xa6   : > { %1321 = vmatpush.bf16.msra.mxu0 %v11546_v17  ;;  %v11615_v17 = vld [vmem:[#allocation8 + $0x88] sm:$0xf0]  ;;  %1663 = vmatpush.bf16.msra.mxu3 %v8549_v6  ;;  %v8497_v6 = vor.u32 %v11614_v61, %v8494_v62  ;;  %v8500_v62 = vld [vmem:[#allocation8 + $0x88] sm:$0xf] }
  0xa8   : > { %1652 = vmatpush.bf16.msra.mxu2 %v8505_v20 }
  0xa9   : > { %1334 = vmatpush.bf16.msra.mxu1 %v11554_v26  ;;  %v11631_v26 = vld [vmem:[#allocation8 + $0x108] sm:$0xf0] }
  0xaa   : > { %1322 = vmatpush.bf16.msra.mxu0 %v11545_v21  ;;  %v8529_v21 = vor.u32 %v11623_v8, %v8526_v9  ;;  %v11603_v8 = vld [vmem:[#allocation8 + $0x2c] sm:$0xf]  ;;  %v8446_v9 = vld [vmem:[#allocation8 + $0x3c] sm:$0xf0] }
  0xac   : > { %1664 = vmatpush.bf16.msra.mxu3 %v8529_v21  ;;  %v11598_v21 = vld [vmem:[#allocation8 + $0x4] sm:$0xf] }
  0xad   : > { %1335 = vmatpush.bf16.msra.mxu1 %v11553_v28  ;;  %v8554_v28 = vld [vmem:[#allocation8 + $0x10c] sm:$0xf0] }
  0xae   : > { %1323 = vmatpush.bf16.msra.mxu0 %v11544_v25 }
  0xb1   : > { %1336 = vmatpush.bf16.msra.mxu1 %v11552_v30 }
  0xb2   : > { %1324 = vmatpush.bf16.msra.mxu0 %v11543_v27  ;;  %v11629_v27 = vld [vmem:[#allocation8 + $0xfc] sm:$0xf] }
  0xb3   : > { %v8557_v30 = vor.u32 %v11629_v27, %v8554_v28  ;;  %v8452_v27 = vld [vmem:[#allocation8 + $0x30] sm:$0xf]  ;;  %v11606_v28 = vld [vmem:[#allocation8 + $0x40] sm:$0xf0] }
  0xb5   : > { %1337 = vmatpush.bf16.msra.mxu1 %v11551_v32  ;;  %v8532_v32 = vld [vmem:[#allocation8 + $0xd0] sm:$0xf] }
  0xb6   : > { %1325 = vmatpush.bf16.msra.mxu0 %v11542_v29  ;;  %v8553_v29 = vor.u32 %v11631_v26, %v8552_v24  ;;  %v8473_v24 = vor.u32 %v11611_v11, %v8472_v10  ;;  %v11595_v26 = vld [vmem:[%s17239_s5 + $0x128] sm:$0xf0]  ;;  %v8440_v10 = vld [vmem:[#allocation8 + $0x10] sm:$0xf]  ;;  %v11602_v11 = vld [vmem:[#allocation8 + $0x20] sm:$0xf0] }
  0xb9   : > { %1338 = vmatpush.bf16.msra.mxu1 %v11550_v34 }
  0xba   : > { %1675 = vmatpush.bf16.msrb.mxu0 %v8573_v18  ;;  %v11632_v18 = vld [vmem:[#allocation8 + $0x110] sm:$0xf0] }
  0xbe   : > { %1676 = vmatpush.bf16.msrb.mxu0 %v8553_v29  ;;  %v11604_v29 = vld [vmem:[#allocation8 + $0x34] sm:$0xf] }
  0xf6   : > { %v889_v35 = vpop.f32.mrf.mxu0 }
  0xf7   : > { %v890_v38 = vadd.f32 %v889_v35, %v662_v33  ;;  %v11626_v33 = vld [vmem:[#allocation8 + $0xe0] sm:$0xf0]  ;;  %v8485_v35 = vor.u32 %v11615_v17, %v8484_v16  ;;  %v8581_v16 = vor.u32 %v11637_v4, %v8580_v3  ;;  %v8560_v17 = vld [vmem:[#allocation8 + $0x100] sm:$0xf]  ;;  %v11612_v4 = vld [vmem:[#allocation8 + $0x70] sm:$0xf0] }
  0xf8   : > { %v8533_v44 = vor.u32 %v11626_v33, %v8532_v32  ;;  %v8561_v33 = vor.u32 %v11632_v18, %v8560_v17  ;;  %v8480_v3 = vld [vmem:[#allocation8 + $0x60] sm:$0xf]  ;;  %v11575_v17 = vld [vmem:[%s17239_s5 + $0x88] sm:$0xf0]  ;;  %v11588_v18 = vld [vmem:[%s17239_s5 + $0xf4] sm:$0xf] }
  0xf9   : > { %v945_v39 = vmax.f32 %v890_v38, 0.0  ;;  %v902_v40 = vpop.f32.mrf.mxu1  ;;  %v8509_v38 = vor.u32 %v11618_v22, %v8506_v23  ;;  %1653 = vmatpush.bf16.msra.mxu2 %v8485_v35  ;;  %v8426_v22 = vld [vmem:[#allocation8 + $0x14] sm:$0xf0]  ;;  %v8724_v23 = vld [vmem:[%s17239_s5 + $0x118] sm:$0xf] }
  0xfa   : > { %v903_v41 = vadd.f32 %v902_v40, %v663_v37  ;;  %v8464_v37 = vld [vmem:[#allocation8 + $0x50] sm:$0xf]  ;;  %v8534_v40 = vld [vmem:[#allocation8 + $0xe4] sm:$0xf0]  ;;  %1677 = vmatpush.bf16.msrb.mxu0 %v8533_v44  ;;  %v8429_v35 = vor.u32 %v11598_v21, %v8426_v22  ;;  %v11601_v44 = vld [vmem:[#allocation8 + $0x18] sm:$0xf0] }
  0xfb   : > { %v950_v43 = vpack.c.bf16 %v945_v39, %v945_v39  ;;  %v11624_v39 = vld [vmem:[#allocation8 + $0xd4] sm:$0xf]  ;;  %1665 = vmatpush.bf16.msra.mxu3 %v8509_v38  ;;  %v8725_v38 = vor.u32 %v11595_v26, %v8724_v23  ;;  %v8624_v26 = vld [vmem:[%s17239_s5 + $0x50] sm:$0xf] }
  0xfc   : > { %v946_v47 = vmax.f32 %v903_v41, 0.0  ;;  %v11610_v41 = vld [vmem:[#allocation8 + $0x60] sm:$0xf0]  ;;  %v8537_v45 = vor.u32 %v11624_v39, %v8534_v40  ;;  %v8704_v39 = vld [vmem:[%s17239_s5 + $0xf0] sm:$0xf] }
  0xfd   : > { %1287 = vmatmul.bf16.vlgmr.msrb.gmra.mxu1 %v950_v43  ;;  %v8486_v43 = vld [vmem:[#allocation8 + $0x8c] sm:$0xf0]  ;;  %v11590_v40 = vld [vmem:[%s17239_s5 + $0x100] sm:$0xf0]  ;;  %v11591_v21 = vld [vmem:[%s17239_s5 + $0x108] sm:$0xf0] }
  0xfe   : > { %v915_v50 = vpop.f32.mrf.mxu2  ;;  %v951_v51 = vpack.c.bf16 %v946_v47, %v946_v47  ;;  %v891_v53 = vpop.f32.mrf.mxu0  ;;  %1688 = vmatpush.bf16.msrb.mxu1 %v8577_v19  ;;  %v11621_v47 = vld [vmem:[#allocation8 + $0xb8] sm:$0xf0]  ;;  %v8449_v19 = vor.u32 %v11603_v8, %v8446_v9  ;;  %v11607_v8 = vld [vmem:[#allocation8 + $0x48] sm:$0xf0] }
  0xff   : > { %v916_v52 = vadd.f32 %v915_v50, %v664_v42  ;;  %v11613_v42 = vld [vmem:[#allocation8 + $0x7c] sm:$0xf]  ;;  %v666_v50 = vperm.slane %v13433_v31, 4  ;;  %v8513_v57 = vor.u32 %v11621_v47, %v8512_v46  ;;  %v8469_v31 = vor.u32 %v11608_v55, %v8466_v56  ;;  %v8434_v46 = vld [vmem:[#allocation8 + $0x1c] sm:$0xf0] }
 0x100   : > { %1300 = vmatmul.bf16.vlgmr.msrb.gmra.mxu2 %v951_v51  ;;  %v8465_v51 = vor.u32 %v11610_v41, %v8464_v37  ;;  %v11605_v53 = vld [vmem:[#allocation8 + $0x38] sm:$0xf0]  ;;  %v11627_v37 = vld [vmem:[#allocation8 + $0xe8] sm:$0xf0]  ;;  %v8453_v41 = vor.u32 %v11606_v28, %v8452_v27  ;;  %v11593_v47 = vld [vmem:[%s17239_s5 + $0x11c] sm:$0xf] }
 0x101   : > { %v947_v60 = vmax.f32 %v916_v52, 0.0  ;;  %v904_v0 = vpop.f32.mrf.mxu1  ;;  %v8444_v52 = vld [vmem:[#allocation8 + $0x28] sm:$0xf]  ;;  %1678 = vmatpush.bf16.msrb.mxu0 %v8513_v57  ;;  %v8684_v56 = vld [vmem:[%s17239_s5 + $0xc8] sm:$0xf] }
 0x102   : > { %1689 = vmatpush.bf16.msrb.mxu1 %v8557_v30  ;;  %1654 = vmatpush.bf16.msra.mxu2 %v8465_v51  ;;  %v8445_v63 = vor.u32 %v11605_v53, %v8444_v52  ;;  %v8424_v0 = vld [vmem:[#allocation8] sm:$0xf]  ;;  %v8454_v30 = vld [vmem:[#allocation8 + $0x44] sm:$0xf0]  ;;  %v11596_v51 = vld [vmem:[%s17239_s5 + $0x130] sm:$0xf0] }
 0x103   : > { %v952_v1 = vpack.c.bf16 %v947_v60, %v947_v60  ;;  %v928_v2 = vpop.f32.mrf.mxu3  ;;  %v11616_v60 = vld [vmem:[#allocation8 + $0x90] sm:$0xf0]  ;;  %v8520_v52 = vld [vmem:[#allocation8 + $0xb0] sm:$0xf]  ;;  %v11622_v53 = vld [vmem:[#allocation8 + $0xc0] sm:$0xf0] }
 0x104   : > { %v929_v7 = vadd.f32 %v928_v2, %v665_v54  ;;  %v8489_v54 = vor.u32 %v11613_v42, %v8486_v43  ;;  %v11600_v2 = vld [vmem:[#allocation8 + $0x10] sm:$0xf0]  ;;  %v8493_v5 = vor.u32 %v11616_v60, %v8492_v59  ;;  %v8457_v42 = vor.u32 %v11604_v29, %v8454_v30  ;;  %v8432_v43 = vld [vmem:[#allocation8 + $0x8] sm:$0xf]  ;;  %v11585_v57 = vld [vmem:[%s17239_s5 + $0xd8] sm:$0xf0] }
 0x105   : > { %1313 = vmatmul.bf16.vlgmr.msrb.gmra.mxu3 %v952_v1  ;;  %v8433_v55 = vor.u32 %v11601_v44, %v8432_v43  ;;  %v8729_v59 = vor.u32 %v11593_v47, %v8726_v48  ;;  %v8521_v61 = vor.u32 %v11622_v53, %v8520_v52  ;;  %v11570_v28 = vld [vmem:[%s17239_s5 + $0x60] sm:$0xf0]  ;;  %v11583_v29 = vld [vmem:[%s17239_s5 + $0xcc] sm:$0xf]  ;;  %v8686_v30 = vld [vmem:[%s17239_s5 + $0xdc] sm:$0xf0] }
 0x106   : > { %v917_v14 = vpop.f32.mrf.mxu2  ;;  %v948_v15 = vmax.f32 %v929_v7, 0.0  ;;  %1690 = vmatpush.bf16.msrb.mxu1 %v8537_v45  ;;  %1666 = vmatpush.bf16.msra.mxu3 %v8489_v54  ;;  %v11599_v45 = vld [vmem:[#allocation8 + $0xc] sm:$0xf]  ;;  %v8705_v54 = vor.u32 %v11590_v40, %v8704_v39  ;;  %v8694_v39 = vld [vmem:[%s17239_s5 + $0xe4] sm:$0xf0] }
 0x107   : > { %1655 = vmatpush.bf16.msra.mxu2 %v8445_v63  ;;  %1679 = vmatpush.bf16.msrb.mxu0 %v8493_v5  ;;  %v11617_v63 = vld [vmem:[#allocation8 + $0x98] sm:$0xf0]  ;;  %v11578_v44 = vld [vmem:[%s17239_s5 + $0xa4] sm:$0xf]  ;;  %v11581_v48 = vld [vmem:[%s17239_s5 + $0xb8] sm:$0xf0] }
 0x108   : > { %v953_v25 = vpack.c.bf16 %v948_v15, %v948_v15  ;;  %v8425_v15 = vor.u32 %v11600_v2, %v8424_v0  ;;  %v8685_v0 = vor.u32 %v11585_v57, %v8684_v56  ;;  %v8501_v2 = vor.u32 %v11617_v63, %v8500_v62  ;;  %v8584_v53 = vld [vmem:[%s17239_s5] sm:$0xf]  ;;  %v11573_v56 = vld [vmem:[%s17239_s5 + $0x7c] sm:$0xf]  ;;  %v8646_v57 = vld [vmem:[%s17239_s5 + $0x8c] sm:$0xf0] }
 0x109   : > { %v8654_v62 = vld [vmem:[%s17239_s5 + $0x94] sm:$0xf0] }
 0x10a   : > { %1326 = vmatmul.bf16.vlgmr.msra.gmra.mxu0 %v953_v25  ;;  %1691 = vmatpush.bf16.msrb.mxu1 %v8517_v58  ;;  %v8477_v25 = vor.u32 %v11609_v12, %v8474_v13  ;;  %v8437_v58 = vor.u32 %v11599_v45, %v8434_v46  ;;  %v11594_v12 = vld [vmem:[%s17239_s5 + $0x124] sm:$0xf]  ;;  %v8734_v13 = vld [vmem:[%s17239_s5 + $0x134] sm:$0xf0]  ;;  %v8672_v46 = vld [vmem:[%s17239_s5 + $0xa8] sm:$0xf] }
 0x10b   : > { %v930_v34 = vpop.f32.mrf.mxu3  ;;  %1667 = vmatpush.bf16.msra.mxu3 %v8469_v31  ;;  %1656 = vmatpush.bf16.msra.mxu2 %v8425_v15  ;;  %v8664_v31 = vld [vmem:[%s17239_s5 + $0xa0] sm:$0xf]  ;;  %v8737_v15 = vor.u32 %v11594_v12, %v8734_v13  ;;  %v8666_v45 = vld [vmem:[%s17239_s5 + $0xb4] sm:$0xf0]  ;;  %v11592_v13 = vld [vmem:[%s17239_s5 + $0x110] sm:$0xf0] }
 0x10c   : > { %v8540_v34 = vld [vmem:[#allocation8 + $0xd8] sm:$0xf]  ;;  %1680 = vmatpush.bf16.msrb.mxu0 %v8473_v24  ;;  %v11589_v24 = vld [vmem:[%s17239_s5 + $0xfc] sm:$0xf]  ;;  %v8669_v47 = vor.u32 %v11578_v44, %v8666_v45  ;;  %v8640_v44 = vld [vmem:[%s17239_s5 + $0x60] sm:$0xf] }
 0x10d   : > { %v8541_v49 = vor.u32 %v11627_v37, %v8540_v34  ;;  %v8692_v34 = vld [vmem:[%s17239_s5 + $0xd0] sm:$0xf]  ;;  %v11584_v37 = vld [vmem:[%s17239_s5 + $0xd4] sm:$0xf] }
 0x10e   : > { %1692 = vmatpush.bf16.msrb.mxu1 %v8497_v6  ;;  %v8481_v6 = vor.u32 %v11612_v4, %v8480_v3  ;;  %v8697_v40 = vor.u32 %v11584_v37, %v8694_v39  ;;  %v8626_v4 = vld [vmem:[%s17239_s5 + $0x64] sm:$0xf0]  ;;  %v8680_v37 = vld [vmem:[%s17239_s5 + $0xb0] sm:$0xf]  ;;  %v11572_v45 = vld [vmem:[%s17239_s5 + $0x70] sm:$0xf0] }
 0x10f   : > { %1701 = vmatpush.bf16.msrb.mxu2 %v8581_v16  ;;  %1668 = vmatpush.bf16.msra.mxu3 %v8449_v19  ;;  %v8644_v16 = vld [vmem:[%s17239_s5 + $0x78] sm:$0xf] }
 0x110   : > { %1657 = vmatmul.bf16.vlgmr.msra.gmra.mxu2 %v13276_v36  ;;  %1681 = vmatpush.bf16.msrb.mxu0 %v8453_v41  ;;  %v8645_v19 = vor.u32 %v11575_v17, %v8644_v16  ;;  %v8604_v41 = vld [vmem:[%s17239_s5 + $0x28] sm:$0xf]  ;;  %v8612_v17 = vld [vmem:[%s17239_s5 + $0x30] sm:$0xf] }
 0x112   : > { %1693 = vmatpush.bf16.msrb.mxu1 %v8477_v25  ;;  %v8714_v25 = vld [vmem:[%s17239_s5 + $0x10c] sm:$0xf0] }
 0x113   : > { %1702 = vmatpush.bf16.msrb.mxu2 %v8561_v33  ;;  %1669 = vmatpush.bf16.msra.mxu3 %v8429_v35  ;;  %v8717_v27 = vor.u32 %v11589_v24, %v8714_v25  ;;  %v8689_v33 = vor.u32 %v11583_v29, %v8686_v30  ;;  %v11586_v35 = vld [vmem:[%s17239_s5 + $0xe0] sm:$0xf0]  ;;  %v11561_v30 = vld [vmem:[%s17239_s5 + $0x18] sm:$0xf0] }
 0x114   : > { %1682 = vmatpush.bf16.msrb.mxu0 %v8433_v55 }
 0x116   : > { %v941_v1 = vpop.f32.mrf.mxu0  ;;  %1694 = vmatpush.bf16.msrb.mxu1 %v8457_v42  ;;  %1670 = vmatmul.bf16.vlgmr.msra.gmra.mxu3 %v13276_v36  ;;  %v11565_v42 = vld [vmem:[%s17239_s5 + $0x38] sm:$0xf0] }
 0x117   : > { %v942_v7 = vadd.f32 %v941_v1, %v666_v50  ;;  %v8732_v50 = vld [vmem:[%s17239_s5 + $0x120] sm:$0xf]  ;;  %1922 = vmatpush.bf16.msrb.mxu3 %v8725_v38  ;;  %1703 = vmatpush.bf16.msrb.mxu2 %v8541_v49  ;;  %v11580_v1 = vld [vmem:[%s17239_s5 + $0xb0] sm:$0xf0]  ;;  %v8693_v38 = vor.u32 %v11586_v35, %v8692_v34  ;;  %v8605_v43 = vor.u32 %v11565_v42, %v8604_v41  ;;  %v11579_v49 = vld [vmem:[%s17239_s5 + $0xac] sm:$0xf] }
 0x118   : > { %v8733_v60 = vor.u32 %v11596_v51, %v8732_v50  ;;  %1935 = vmatpush.bf16.msra.mxu0 %v8729_v59  ;;  %v8665_v5 = vor.u32 %v11580_v1, %v8664_v31  ;;  %v8674_v50 = vld [vmem:[%s17239_s5 + $0xbc] sm:$0xf0]  ;;  %v8673_v51 = vor.u32 %v11581_v48, %v8672_v46  ;;  %v8649_v59 = vor.u32 %v11573_v56, %v8646_v57  ;;  %v8740_v31 = vld [vmem:[%s17239_s5 + $0x128] sm:$0xf]  ;;  %v11597_v1 = vld [vmem:[%s17239_s5 + $0x138] sm:$0xf0] }
 0x119   : > { %v949_v14 = vmax.f32 %v942_v7, 0.0  ;;  %v8460_v7 = vld [vmem:[#allocation8 + $0x38] sm:$0xf]  ;;  %v8677_v52 = vor.u32 %v11579_v49, %v8674_v50  ;;  %v8741_v3 = vor.u32 %v11597_v1, %v8740_v31  ;;  %v8660_v41 = vld [vmem:[%s17239_s5 + $0x88] sm:$0xf]  ;;  %v8641_v46 = vor.u32 %v11572_v45, %v8640_v44 }
 0x11a   : > { %1695 = vmatpush.bf16.msrb.mxu1 %v8437_v58  ;;  %1683 = vmatmul.bf16.vlgmr.msrb.gmra.mxu0 %v13276_v36  ;;  %v8461_v9 = vor.u32 %v11607_v8, %v8460_v7  ;;  %v8652_v58 = vld [vmem:[%s17239_s5 + $0x80] sm:$0xf]  ;;  %v11577_v42 = vld [vmem:[%s17239_s5 + $0x98] sm:$0xf0]  ;;  %v11567_v48 = vld [vmem:[%s17239_s5 + $0x48] sm:$0xf0] }
 0x11b   : > { %v954_v20 = vpack.c.bf16 %v949_v14, %v949_v14  ;;  %1923 = vmatpush.bf16.msrb.mxu3 %v8705_v54  ;;  %1704 = vmatpush.bf16.msrb.mxu2 %v8521_v61  ;;  %v8441_v14 = vor.u32 %v11602_v11, %v8440_v10  ;;  %v11560_v54 = vld [vmem:[%s17239_s5 + $0x10] sm:$0xf0]  ;;  %v11574_v61 = vld [vmem:[%s17239_s5 + $0x84] sm:$0xf]  ;;  %v8634_v10 = vld [vmem:[%s17239_s5 + $0x6c] sm:$0xf0] }
 0x11c   : > { %v8585_v55 = vor.u32 %v11560_v54, %v8584_v53  ;;  %v8720_v11 = vld [vmem:[%s17239_s5 + $0x100] sm:$0xf]  ;;  %v11562_v53 = vld [vmem:[%s17239_s5 + $0x20] sm:$0xf0]  ;;  %v12452_v54 = vld [vmem:[#allocation7] ss:$0 sm:$0xff] }
 0x11d   : > { %1339 = vmatmul.bf16.vlgmr.msra.gmra.mxu1 %v954_v20  ;;  %v8706_v20 = vld [vmem:[%s17239_s5 + $0x104] sm:$0xf0]  ;;  %v8721_v16 = vor.u32 %v11592_v13, %v8720_v11  ;;  %v8912_v31 = vld [vmem:[%s17278_s11 + $0x150] sm:$0xf]  ;;  %v11681_v1 = vld [vmem:[%s17278_s11 + $0x158] sm:$0xf0] }
 0x11e   : > { %v943_v32 = vpop.f32.mrf.mxu0  ;;  %1948 = vmatpush.bf16.msra.mxu1 %v8733_v60  ;;  %v8709_v22 = vor.u32 %v11588_v18, %v8706_v20  ;;  %v11576_v60 = vld [vmem:[%s17239_s5 + $0x90] sm:$0xf0]  ;;  %v11566_v18 = vld [vmem:[%s17239_s5 + $0x40] sm:$0xf0]  ;;  %v8900_v13 = vld [vmem:[%s17278_s11 + $0x138] sm:$0xf] }
 0x11f   : > { %1924 = vmatpush.bf16.msrb.mxu3 %v8685_v0  ;;  %1705 = vmatpush.bf16.msrb.mxu2 %v8501_v2  ;;  %v8625_v32 = vor.u32 %v11570_v28, %v8624_v26  ;;  %v8653_v63 = vor.u32 %v11576_v60, %v8652_v58  ;;  %v8657_v0 = vor.u32 %v11574_v61, %v8654_v62  ;;  %v11568_v2 = vld [vmem:[%s17239_s5 + $0x54] sm:$0xf]  ;;  %v11558_v26 = vld [vmem:[%s17239_s5 + $0x4] sm:$0xf]  ;;  %v8592_v28 = vld [vmem:[%s17239_s5 + $0x8] sm:$0xf] }
 0x120   : > { %1936 = vmatpush.bf16.msra.mxu0 %v8709_v22  ;;  %v8629_v7 = vor.u32 %v11568_v2, %v8626_v4  ;;  %v11587_v22 = vld [vmem:[%s17239_s5 + $0xe8] sm:$0xf0]  ;;  %v8593_v34 = vor.u32 %v11561_v30, %v8592_v28  ;;  %v8924_v60 = vld [vmem:[%s17278_s11 + $0x168] sm:$0xf]  ;;  %v11684_v61 = vld [vmem:[%s17278_s11 + $0x170] sm:$0xf0] }
 0x121   : > { %v9020_v62 = vld [vmem:[%s17278_s11 + $0x228] sm:$0xf]  ;;  %v11732_v28 = vld [vmem:[%s17278_s11 + $0x2f0] sm:$0xf0]  ;;  %v11729_v44 = vld [vmem:[%s17278_s11 + $0x2d8] sm:$0xf0] }
 0x123   : > { %1925 = vmatpush.bf16.msrb.mxu3 %v8665_v5  ;;  %1706 = vmatpush.bf16.msrb.mxu2 %v8481_v6  ;;  %v8632_v5 = vld [vmem:[%s17239_s5 + $0x58] sm:$0xf]  ;;  %v11571_v6 = vld [vmem:[%s17239_s5 + $0x68] sm:$0xf0] }
 0x124   : > { %1937 = vmatpush.bf16.msra.mxu0 %v8689_v33  ;;  %v8633_v8 = vor.u32 %v11571_v6, %v8632_v5  ;;  %v8594_v33 = vld [vmem:[%s17239_s5 + $0x1c] sm:$0xf0]  ;;  %v9008_v5 = vld [vmem:[%s17278_s11 + $0x210] sm:$0xf]  ;;  %v11705_v6 = vld [vmem:[%s17278_s11 + $0x218] sm:$0xf0] }
 0x125   : > { %v9009_v11 = vor.u32 %v11705_v6, %v9008_v5  ;;  %v11723_v5 = vld [vmem:[%s17278_s11 + $0x2a8] sm:$0xf0] }
 0x127   : > { %1707 = vmatpush.bf16.msrb.mxu2 %v8461_v9  ;;  %1926 = vmatpush.bf16.msrb.mxu3 %v8645_v19  ;;  %v11569_v9 = vld [vmem:[%s17239_s5 + $0x5c] sm:$0xf]  ;;  %v11564_v19 = vld [vmem:[%s17239_s5 + $0x34] sm:$0xf] }
 0x128   : > { %1938 = vmatpush.bf16.msra.mxu0 %v8669_v47  ;;  %v8637_v12 = vor.u32 %v11569_v9, %v8634_v10  ;;  %v8620_v47 = vld [vmem:[%s17239_s5 + $0x38] sm:$0xf]  ;;  %v8913_v9 = vor.u32 %v11681_v1, %v8912_v31  ;;  %v11660_v10 = vld [vmem:[%s17278_s11 + $0xb0] sm:$0xf0]  ;;  %v8768_v1 = vld [vmem:[%s17278_s11 + $0x30] sm:$0xf] }
 0x12b   : > { %1708 = vmatpush.bf16.msrb.mxu2 %v8441_v14  ;;  %1927 = vmatpush.bf16.msrb.mxu3 %v8625_v32  ;;  %v11563_v14 = vld [vmem:[%s17239_s5 + $0x2c] sm:$0xf] }
 0x12c   : > { %1939 = vmatpush.bf16.msra.mxu0 %v8649_v59  ;;  %v11559_v32 = vld [vmem:[%s17239_s5 + $0xc] sm:$0xf] }
 0x12d   : > { %1696 = vmatmul.bf16.vlgmr.msrb.gmra.mxu1 %v13276_v36  ;;  %v8597_v35 = vor.u32 %v11559_v32, %v8594_v33  ;;  %v8984_v33 = vld [vmem:[%s17278_s11 + $0x1e0] sm:$0xf] }
 0x12e   : > { %1709 = vmatmul.bf16.vlgmr.msrb.gmra.mxu2 %v13276_v36  ;;  %v8712_v36 = vld [vmem:[%s17239_s5 + $0xf8] sm:$0xf] }
 0x12f   : > { %1961 = vmatpush.bf16.msra.mxu2 %v8737_v15  ;;  %v8713_v23 = vor.u32 %v11591_v21, %v8712_v36  ;;  %1928 = vmatpush.bf16.msrb.mxu3 %v8605_v43  ;;  %v8606_v15 = vld [vmem:[%s17239_s5 + $0x3c] sm:$0xf0]  ;;  %v8614_v36 = vld [vmem:[%s17239_s5 + $0x44] sm:$0xf0]  ;;  %v8700_v21 = vld [vmem:[%s17239_s5 + $0xd8] sm:$0xf]  ;;  %v8661_v43 = vor.u32 %v11577_v42, %v8660_v41 }
 0x130   : > { %1940 = vmatpush.bf16.msra.mxu0 %v8629_v7  ;;  %v8609_v20 = vor.u32 %v11563_v14, %v8606_v15  ;;  %v8617_v24 = vor.u32 %v11564_v19, %v8614_v36  ;;  %v8701_v25 = vor.u32 %v11587_v22, %v8700_v21  ;;  %v8828_v7 = vld [vmem:[%s17278_s11 + $0xa8] sm:$0xf]  ;;  %v11678_v14 = vld [vmem:[%s17278_s11 + $0x140] sm:$0xf0]  ;;  %v8996_v15 = vld [vmem:[%s17278_s11 + $0x1f8] sm:$0xf] }
 0x131   : > { %1949 = vmatpush.bf16.msra.mxu1 %v8713_v23  ;;  %v8613_v23 = vor.u32 %v11566_v18, %v8612_v17  ;;  %v8816_v17 = vld [vmem:[%s17278_s11 + $0x90] sm:$0xf]  ;;  %v11657_v18 = vld [vmem:[%s17278_s11 + $0x98] sm:$0xf0]  ;;  %v8901_v36 = vor.u32 %v11678_v14, %v8900_v13  ;;  %v8888_v21 = vld [vmem:[%s17278_s11 + $0x120] sm:$0xf] }
 0x132   : > { %v8756_v13 = vld [vmem:[%s17278_s11 + $0x18] sm:$0xf]  ;;  %v11642_v14 = vld [vmem:[%s17278_s11 + $0x20] sm:$0xf0] }
 0x133   : > { %1962 = vmatpush.bf16.msra.mxu2 %v8717_v27  ;;  %1929 = vmatpush.bf16.msrb.mxu3 %v8585_v55  ;;  %v8586_v27 = vld [vmem:[%s17239_s5 + $0x14] sm:$0xf0] }
 0x134   : > { %1941 = vmatpush.bf16.msra.mxu0 %v8609_v20  ;;  %v8589_v29 = vor.u32 %v11558_v26, %v8586_v27  ;;  %v8817_v20 = vor.u32 %v11657_v18, %v8816_v17  ;;  %v9116_v27 = vld [vmem:[%s17278_s11 + $0x2e8] sm:$0xf]  ;;  %v8830_v17 = vld [vmem:[%s17278_s11 + $0xb4] sm:$0xf0] }
 0x135   : > { %1950 = vmatpush.bf16.msra.mxu1 %v8693_v38  ;;  %v11582_v38 = vld [vmem:[%s17239_s5 + $0xc0] sm:$0xf0]  ;;  %v9117_v42 = vor.u32 %v11732_v28, %v9116_v27  ;;  %v8757_v27 = vor.u32 %v11642_v14, %v8756_v13  ;;  %v11647_v14 = vld [vmem:[%s17278_s11 + $0x4c] sm:$0xf] }
 0x136   : > { %v8681_v39 = vor.u32 %v11582_v38, %v8680_v37  ;;  %v11672_v38 = vld [vmem:[%s17278_s11 + $0x110] sm:$0xf0] }
 0x137   : > { %1963 = vmatpush.bf16.msra.mxu2 %v8697_v40  ;;  %1974 = vmatpush.bf16.msra.mxu3 %v8741_v3 }
 0x138   : > { %1942 = vmatpush.bf16.msra.mxu0 %v8589_v29 }
 0x139   : > { %1951 = vmatpush.bf16.msra.mxu1 %v8673_v51  ;;  %v8621_v51 = vor.u32 %v11567_v48, %v8620_v47  ;;  %v8972_v47 = vld [vmem:[%s17278_s11 + $0x1c8] sm:$0xf]  ;;  %v11696_v48 = vld [vmem:[%s17278_s11 + $0x1d0] sm:$0xf0] }
 0x13b   : > { %1964 = vmatpush.bf16.msra.mxu2 %v8677_v52  ;;  %1975 = vmatpush.bf16.msra.mxu3 %v8721_v16  ;;  %v8600_v52 = vld [vmem:[%s17239_s5 + $0x10] sm:$0xf]  ;;  %v11702_v16 = vld [vmem:[%s17278_s11 + $0x200] sm:$0xf0] }
 0x13c   : > { %v8601_v57 = vor.u32 %v11562_v53, %v8600_v52  ;;  %v8997_v22 = vor.u32 %v11702_v16, %v8996_v15  ;;  %v8780_v52 = vld [vmem:[%s17278_s11 + $0x48] sm:$0xf]  ;;  %v11648_v53 = vld [vmem:[%s17278_s11 + $0x50] sm:$0xf0]  ;;  %v11659_v16 = vld [vmem:[%s17278_s11 + $0xac] sm:$0xf] }
 0x13d   : > { %1952 = vmatpush.bf16.msra.mxu1 %v8653_v63  ;;  %v8925_v63 = vor.u32 %v11684_v61, %v8924_v60  ;;  %v8960_v60 = vld [vmem:[%s17278_s11 + $0x1b0] sm:$0xf]  ;;  %v11693_v61 = vld [vmem:[%s17278_s11 + $0x1b8] sm:$0xf0] }
 0x13e   : > { %v8961_v6 = vor.u32 %v11693_v61, %v8960_v60  ;;  %v11677_v61 = vld [vmem:[%s17278_s11 + $0x13c] sm:$0xf] }
 0x13f   : > { %1965 = vmatpush.bf16.msra.mxu2 %v8657_v0  ;;  %1976 = vmatpush.bf16.msra.mxu3 %v8701_v25  ;;  %v11708_v0 = vld [vmem:[%s17278_s11 + $0x230] sm:$0xf0]  ;;  %v11654_v25 = vld [vmem:[%s17278_s11 + $0x80] sm:$0xf0] }
 0x140   : > { %v9021_v4 = vor.u32 %v11708_v0, %v9020_v62  ;;  %v8781_v62 = vor.u32 %v11648_v53, %v8780_v52  ;;  %v11666_v0 = vld [vmem:[%s17278_s11 + $0xe0] sm:$0xf0]  ;;  %v9200_v52 = vld [vmem:[%s17278_s11 + $0x390] sm:$0xf]  ;;  %v11753_v53 = vld [vmem:[%s17278_s11 + $0x398] sm:$0xf0] }
 0x141   : > { %1953 = vmatpush.bf16.msra.mxu1 %v8633_v8 }
 0x143   : > { %1966 = vmatpush.bf16.msra.mxu2 %v8637_v12  ;;  %1977 = vmatpush.bf16.msra.mxu3 %v8681_v39  ;;  %v8829_v12 = vor.u32 %v11660_v10, %v8828_v7  ;;  %v8792_v39 = vld [vmem:[%s17278_s11 + $0x60] sm:$0xf] }
 0x145   : > { %1954 = vmatpush.bf16.msra.mxu1 %v8613_v23  ;;  %2817 = vmatpush.bf16.msrb.mxu0 %v8829_v12  ;;  %v11675_v23 = vld [vmem:[%s17278_s11 + $0x128] sm:$0xf0] }
 0x146   : > { %v8889_v32 = vor.u32 %v11675_v23, %v8888_v21  ;;  %v11663_v12 = vld [vmem:[%s17278_s11 + $0xc8] sm:$0xf0] }
 0x147   : > { %1967 = vmatpush.bf16.msra.mxu2 %v8617_v24  ;;  %1978 = vmatpush.bf16.msra.mxu3 %v8661_v43  ;;  %v8804_v24 = vld [vmem:[%s17278_s11 + $0x78] sm:$0xf]  ;;  %v9104_v43 = vld [vmem:[%s17278_s11 + $0x2d0] sm:$0xf] }
 0x148   : > { %v8805_v29 = vor.u32 %v11654_v25, %v8804_v24  ;;  %v11687_v24 = vld [vmem:[%s17278_s11 + $0x188] sm:$0xf0] }
 0x149   : > { %1955 = vmatpush.bf16.msra.mxu1 %v8593_v34  ;;  %2818 = vmatpush.bf16.msrb.mxu0 %v8817_v20  ;;  %v11699_v34 = vld [vmem:[%s17278_s11 + $0x1e8] sm:$0xf0]  ;;  %v9068_v20 = vld [vmem:[%s17278_s11 + $0x288] sm:$0xf] }
 0x14a   : > { %v8985_v45 = vor.u32 %v11699_v34, %v8984_v33  ;;  %v11683_v25 = vld [vmem:[%s17278_s11 + $0x16c] sm:$0xf]  ;;  %v8744_v33 = vld [vmem:[%s17278_s11] sm:$0xf] }
 0x14b   : > { %1968 = vmatpush.bf16.msra.mxu2 %v8597_v35  ;;  %1979 = vmatpush.bf16.msra.mxu3 %v8641_v46  ;;  %v8876_v35 = vld [vmem:[%s17278_s11 + $0x108] sm:$0xf]  ;;  %v11639_v34 = vld [vmem:[%s17278_s11 + $0x8] sm:$0xf0] }
 0x14c   : > { %v8877_v46 = vor.u32 %v11672_v38, %v8876_v35  ;;  %v8818_v35 = vld [vmem:[%s17278_s11 + $0x9c] sm:$0xf0]  ;;  %v11756_v38 = vld [vmem:[%s17278_s11 + $0x3b0] sm:$0xf0] }
 0x14d   : > { %2830 = vmatpush.bf16.msrb.mxu1 %v8925_v63  ;;  %2819 = vmatpush.bf16.msrb.mxu0 %v8805_v29  ;;  %v8852_v63 = vld [vmem:[%s17278_s11 + $0xd8] sm:$0xf]  ;;  %v8833_v29 = vor.u32 %v11659_v16, %v8830_v17  ;;  %v9176_v17 = vld [vmem:[%s17278_s11 + $0x360] sm:$0xf] }
 0x14e   : > { %v8853_v7 = vor.u32 %v11666_v0, %v8852_v63  ;;  %v9201_v63 = vor.u32 %v11753_v53, %v9200_v52  ;;  %v11650_v0 = vld [vmem:[%s17278_s11 + $0x64] sm:$0xf]  ;;  %v8782_v16 = vld [vmem:[%s17278_s11 + $0x54] sm:$0xf0]  ;;  %v11641_v53 = vld [vmem:[%s17278_s11 + $0x1c] sm:$0xf] }
 0x14f   : > { %1980 = vmatpush.bf16.msra.mxu3 %v8621_v51  ;;  %2843 = vmatpush.bf16.msrb.mxu2 %v9021_v4  ;;  %v11669_v51 = vld [vmem:[%s17278_s11 + $0xf8] sm:$0xf0]  ;;  %v9080_v4 = vld [vmem:[%s17278_s11 + $0x2a0] sm:$0xf] }
 0x151   : > { %2831 = vmatpush.bf16.msrb.mxu1 %v8913_v9  ;;  %v11690_v9 = vld [vmem:[%s17278_s11 + $0x1a0] sm:$0xf0] }
 0x153   : > { %1981 = vmatpush.bf16.msra.mxu3 %v8601_v57  ;;  %2844 = vmatpush.bf16.msrb.mxu2 %v9009_v11  ;;  %v8973_v57 = vor.u32 %v11696_v48, %v8972_v47  ;;  %v8840_v11 = vld [vmem:[%s17278_s11 + $0xc0] sm:$0xf]  ;;  %v11680_v47 = vld [vmem:[%s17278_s11 + $0x154] sm:$0xf] }
 0x154   : > { %v8841_v23 = vor.u32 %v11663_v12, %v8840_v11  ;;  %v8914_v48 = vld [vmem:[%s17278_s11 + $0x15c] sm:$0xf0]  ;;  %v11674_v11 = vld [vmem:[%s17278_s11 + $0x124] sm:$0xf]  ;;  %v8890_v12 = vld [vmem:[%s17278_s11 + $0x12c] sm:$0xf0] }
 0x155   : > { %2832 = vmatpush.bf16.msrb.mxu1 %v8901_v36  ;;  %v11720_v36 = vld [vmem:[%s17278_s11 + $0x290] sm:$0xf0] }
 0x157   : > { %2845 = vmatpush.bf16.msrb.mxu2 %v8997_v22  ;;  %v8936_v22 = vld [vmem:[%s17278_s11 + $0x180] sm:$0xf] }
 0x159   : > { %2833 = vmatpush.bf16.msrb.mxu1 %v8889_v32  ;;  %v11656_v32 = vld [vmem:[%s17278_s11 + $0x94] sm:$0xf] }
 0x15b   : > { %2846 = vmatpush.bf16.msrb.mxu2 %v8985_v45  ;;  %v8745_v45 = vor.u32 %v11639_v34, %v8744_v33  ;;  %v11701_v33 = vld [vmem:[%s17278_s11 + $0x1fc] sm:$0xf] }
 0x15d   : > { %2834 = vmatpush.bf16.msrb.mxu1 %v8877_v46  ;;  %v8821_v46 = vor.u32 %v11656_v32, %v8818_v35  ;;  %v8998_v35 = vld [vmem:[%s17278_s11 + $0x204] sm:$0xf0] }
 0x15f   : > { %2847 = vmatpush.bf16.msrb.mxu2 %v8973_v57  ;;  %v11714_v57 = vld [vmem:[%s17278_s11 + $0x260] sm:$0xf0] }
 0x163   : > { %2848 = vmatpush.bf16.msrb.mxu2 %v8961_v6  ;;  %v11711_v6 = vld [vmem:[%s17278_s11 + $0x248] sm:$0xf0] }
 0x17a   : > { %v1288_v40 = vpop.f32.mrf.mxu1 }
 0x17b   : > { %v1289_v58 = vadd.f32 %v12452_v54, %v1288_v40  ;;  %v11651_v40 = vld [vmem:[%s17278_s11 + $0x68] sm:$0xf0]  ;;  %v9105_v54 = vor.u32 %v11729_v44, %v9104_v43  ;;  %v11717_v43 = vld [vmem:[%s17278_s11 + $0x278] sm:$0xf0] }
 0x182   : > { %v1290_v49 = vpop.f32.mrf.mxu1 }
 0x183   : > { %v1301_v50 = vpop.f32.mrf.mxu2  ;;  %v8793_v49 = vor.u32 %v11651_v40, %v8792_v39  ;;  %v9069_v39 = vor.u32 %v11720_v36, %v9068_v20  ;;  %v8937_v40 = vor.u32 %v11687_v24, %v8936_v22  ;;  %v8893_v22 = vor.u32 %v11674_v11, %v8890_v12  ;;  %v8950_v11 = vld [vmem:[%s17278_s11 + $0x1a4] sm:$0xf0] }
 0x184   : > { %v1302_v2 = vadd.f32 %v1301_v50, %v1289_v58  ;;  %v8864_v50 = vld [vmem:[%s17278_s11 + $0xf0] sm:$0xf]  ;;  %v8785_v24 = vor.u32 %v11647_v14, %v8782_v16  ;;  %v11735_v14 = vld [vmem:[%s17278_s11 + $0x308] sm:$0xf0] }
 0x185   : > { %2820 = vmatpush.bf16.msrb.mxu0 %v8793_v49 }
 0x187   : > { %v1327_v55 = vpop.f32.mrf.mxu0 }
 0x188   : > { %v1314_v56 = vpop.f32.mrf.mxu3 }
 0x189   : > { %v1315_v19 = vadd.f32 %v1314_v56, %v1302_v2  ;;  %v11726_v56 = vld [vmem:[%s17278_s11 + $0x2c0] sm:$0xf0]  ;;  %v11645_v2 = vld [vmem:[%s17278_s11 + $0x38] sm:$0xf0]  ;;  %2821 = vmatpush.bf16.msrb.mxu0 %v8781_v62  ;;  %v8902_v62 = vld [vmem:[%s17278_s11 + $0x144] sm:$0xf0] }
 0x18a   : > { %v8769_v10 = vor.u32 %v11645_v2, %v8768_v1  ;;  %v8794_v1 = vld [vmem:[%s17278_s11 + $0x6c] sm:$0xf0]  ;;  %v9188_v2 = vld [vmem:[%s17278_s11 + $0x378] sm:$0xf] }
 0x18b   : > { %v1303_v59 = vpop.f32.mrf.mxu2  ;;  %v1328_v26 = vadd.f32 %v1327_v55, %v1315_v19  ;;  %v9092_v55 = vld [vmem:[%s17278_s11 + $0x2b8] sm:$0xf]  ;;  %v9081_v19 = vor.u32 %v11723_v5, %v9080_v4  ;;  %v9032_v5 = vld [vmem:[%s17278_s11 + $0x240] sm:$0xf] }
 0x18c   : > { %v8865_v59 = vor.u32 %v11669_v51, %v8864_v50  ;;  %v11653_v50 = vld [vmem:[%s17278_s11 + $0x7c] sm:$0xf]  ;;  %v9033_v20 = vor.u32 %v11711_v6, %v9032_v5  ;;  %v8842_v5 = vld [vmem:[%s17278_s11 + $0xcc] sm:$0xf0] }
 0x18d   : > { %2822 = vmatpush.bf16.msrb.mxu0 %v8769_v10  ;;  %v8797_v10 = vor.u32 %v11650_v0, %v8794_v1  ;;  %v11638_v1 = vld [vmem:[%s17278_s11 + $0x4] sm:$0xf] }
 0x18e   : > { %2835 = vmatpush.bf16.msrb.mxu1 %v8865_v59 }
 0x18f   : > { %v1329_v3 = vpop.f32.mrf.mxu0 }
 0x190   : > { %v1316_v8 = vpop.f32.mrf.mxu3  ;;  %v9093_v3 = vor.u32 %v11726_v56, %v9092_v55  ;;  %v9044_v56 = vld [vmem:[%s17278_s11 + $0x258] sm:$0xf] }
 0x191   : > { %v8948_v8 = vld [vmem:[%s17278_s11 + $0x198] sm:$0xf]  ;;  %2823 = vmatpush.bf16.msrb.mxu0 %v8757_v27  ;;  %v9045_v4 = vor.u32 %v11714_v57, %v9044_v56  ;;  %v8854_v57 = vld [vmem:[%s17278_s11 + $0xe4] sm:$0xf0] }
 0x192   : > { %v8949_v21 = vor.u32 %v11690_v9, %v8948_v8  ;;  %2836 = vmatpush.bf16.msrb.mxu1 %v8853_v7  ;;  %v11707_v7 = vld [vmem:[%s17278_s11 + $0x22c] sm:$0xf]  ;;  %v9022_v8 = vld [vmem:[%s17278_s11 + $0x234] sm:$0xf0]  ;;  %v8905_v9 = vor.u32 %v11677_v61, %v8902_v62  ;;  %v11692_v62 = vld [vmem:[%s17278_s11 + $0x1b4] sm:$0xf] }
 0x193   : > { %v13823_v31 = vpop.f32.mrf.mxu2  ;;  %v9025_v36 = vor.u32 %v11707_v7, %v9022_v8  ;;  %v9140_v7 = vld [vmem:[%s17278_s11 + $0x318] sm:$0xf]  ;;  %v11738_v8 = vld [vmem:[%s17278_s11 + $0x320] sm:$0xf0] }
 0x194   : > { %2849 = vmatpush.bf16.msrb.mxu2 %v8949_v21  ;;  %v11704_v21 = vld [vmem:[%s17278_s11 + $0x214] sm:$0xf] }
 0x195   : > { %2824 = vmatpush.bf16.msrb.mxu0 %v8745_v45  ;;  %v8986_v45 = vld [vmem:[%s17278_s11 + $0x1ec] sm:$0xf0] }
 0x196   : > { %2837 = vmatpush.bf16.msrb.mxu1 %v8841_v23  ;;  %v9010_v23 = vld [vmem:[%s17278_s11 + $0x21c] sm:$0xf0] }
 0x197   : > { %v13855_v15 = vpop.f32.mrf.mxu0  ;;  %v9013_v32 = vor.u32 %v11704_v21, %v9010_v23 }
 0x198   : > { %2850 = vmatpush.bf16.msrb.mxu2 %v8937_v40 }
 0x199   : > { %v13863_v18 = vpop.f32.mrf.mxu3 }
 0x19a   : > { %v1340_v30 = vpop.f32.mrf.mxu1 }
 0x19b   : > { %v1341_v37 = vadd.f32 %v1340_v30, %v1328_v26  ;;  %v8926_v26 = vld [vmem:[%s17278_s11 + $0x174] sm:$0xf0]  ;;  %v1660_v30 = vpop.f32.mrf.mxu2 }
 0x19c   : > { %v8929_v44 = vor.u32 %v11683_v25, %v8926_v26  ;;  %v11671_v25 = vld [vmem:[%s17278_s11 + $0x10c] sm:$0xf]  ;;  %v8878_v26 = vld [vmem:[%s17278_s11 + $0x114] sm:$0xf0]  ;;  %v8770_v30 = vld [vmem:[%s17278_s11 + $0x3c] sm:$0xf0] }
 0x19d   : > { %v13775_v41 = vpack.c.bf16 %v1341_v37, %v1341_v37  ;;  %v9212_v37 = vld [vmem:[%s17278_s11 + $0x3a8] sm:$0xf]  ;;  %v8881_v34 = vor.u32 %v11671_v25, %v8878_v26  ;;  %v11755_v26 = vld [vmem:[%s17278_s11 + $0x3ac] sm:$0xf] }
 0x19e   : > { %v9213_v49 = vor.u32 %v11756_v38, %v9212_v37  ;;  %v11668_v38 = vld [vmem:[%s17278_s11 + $0xf4] sm:$0xf] }
 0x19f   : > { %1930 = vmatmul.bf16.vlgmr.msrb.gmra.mxu3 %v13775_v41  ;;  %1943 = vmatmul.bf16.vlgmr.msra.gmra.mxu0 %v13775_v41  ;;  %v1686_v51 = vpop.f32.mrf.mxu0 }
 0x1a0   : > { %1956 = vmatmul.bf16.vlgmr.msra.gmra.mxu1 %v13775_v41  ;;  %1969 = vmatmul.bf16.vlgmr.msra.gmra.mxu2 %v13775_v41  ;;  %v11695_v51 = vld [vmem:[%s17278_s11 + $0x1cc] sm:$0xf] }
 0x1a1   : > { %2856 = vmatpush.bf16.msrb.mxu3 %v9117_v42  ;;  %v9056_v42 = vld [vmem:[%s17278_s11 + $0x270] sm:$0xf]  ;;  %2882 = vmatpush.bf16.msra.mxu1 %v8833_v29  ;;  %v11644_v29 = vld [vmem:[%s17278_s11 + $0x34] sm:$0xf] }
 0x1a2   : > { %v1342_v58 = vpop.f32.mrf.mxu1  ;;  %v9057_v55 = vor.u32 %v11717_v43, %v9056_v42  ;;  %2895 = vmatpush.bf16.msra.mxu2 %v8929_v44  ;;  %2869 = vmatpush.bf16.msra.mxu0 %v9213_v49  ;;  %v8773_v37 = vor.u32 %v11644_v29, %v8770_v30  ;;  %v9001_v42 = vor.u32 %v11701_v33, %v8998_v35  ;;  %v11698_v44 = vld [vmem:[%s17278_s11 + $0x1e4] sm:$0xf]  ;;  %v11744_v49 = vld [vmem:[%s17278_s11 + $0x350] sm:$0xf0]  ;;  %v8836_v30 = vld [vmem:[%s17278_s11 + $0xb0] sm:$0xf] }
 0x1a3   : > { %v8917_v58 = vor.u32 %v11680_v47, %v8914_v48  ;;  %v9164_v48 = vld [vmem:[%s17278_s11 + $0x348] sm:$0xf] }
 0x1a5   : > { %2857 = vmatpush.bf16.msrb.mxu3 %v9105_v54  ;;  %v1673_v54 = vpop.f32.mrf.mxu3  ;;  %2883 = vmatpush.bf16.msra.mxu1 %v8821_v46  ;;  %v8989_v46 = vor.u32 %v11698_v44, %v8986_v45  ;;  %v8824_v45 = vld [vmem:[%s17278_s11 + $0x98] sm:$0xf] }
 0x1a6   : > { %2896 = vmatpush.bf16.msra.mxu2 %v8917_v58  ;;  %2870 = vmatpush.bf16.msra.mxu0 %v9201_v63  ;;  %v8758_v54 = vld [vmem:[%s17278_s11 + $0x24] sm:$0xf0]  ;;  %v8962_v63 = vld [vmem:[%s17278_s11 + $0x1bc] sm:$0xf0] }
 0x1a7   : > { %v8761_v56 = vor.u32 %v11641_v53, %v8758_v54  ;;  %v8965_v0 = vor.u32 %v11692_v62, %v8962_v63  ;;  %v11685_v53 = vld [vmem:[%s17278_s11 + $0x178] sm:$0xf0] }
 0x1a9   : > { %2858 = vmatpush.bf16.msrb.mxu3 %v9093_v3  ;;  %v11750_v3 = vld [vmem:[%s17278_s11 + $0x380] sm:$0xf0] }
 0x1aa   : > { %v13883_v28 = vpop.f32.mrf.mxu1  ;;  %v9189_v13 = vor.u32 %v11750_v3, %v9188_v2  ;;  %2897 = vmatpush.bf16.msra.mxu2 %v8905_v9  ;;  %v8746_v2 = vld [vmem:[%s17278_s11 + $0xc] sm:$0xf0]  ;;  %v11662_v3 = vld [vmem:[%s17278_s11 + $0xc4] sm:$0xf]  ;;  %v9141_v9 = vor.u32 %v11738_v8, %v9140_v7 }
 0x1ab   : > { %v8845_v6 = vor.u32 %v11662_v3, %v8842_v5  ;;  %v11682_v5 = vld [vmem:[%s17278_s11 + $0x160] sm:$0xf0]  ;;  %v9178_v8 = vld [vmem:[%s17278_s11 + $0x36c] sm:$0xf0] }
 0x1ac   : > { %2871 = vmatpush.bf16.msra.mxu0 %v9189_v13  ;;  %v9128_v13 = vld [vmem:[%s17278_s11 + $0x300] sm:$0xf]  ;;  %v11746_v7 = vld [vmem:[%s17278_s11 + $0x364] sm:$0xf] }
 0x1ad   : > { %2859 = vmatpush.bf16.msrb.mxu3 %v9081_v19  ;;  %v11747_v19 = vld [vmem:[%s17278_s11 + $0x368] sm:$0xf0]  ;;  %v9129_v16 = vor.u32 %v11735_v14, %v9128_v13 }
 0x1ae   : > { %v9177_v27 = vor.u32 %v11747_v19, %v9176_v17  ;;  %2898 = vmatpush.bf16.msra.mxu2 %v8893_v22  ;;  %v11686_v17 = vld [vmem:[%s17278_s11 + $0x184] sm:$0xf]  ;;  %v8938_v19 = vld [vmem:[%s17278_s11 + $0x18c] sm:$0xf0] }
 0x1af   : > { %1982 = vmatmul.bf16.vlgmr.msra.gmra.mxu3 %v13775_v41  ;;  %v8806_v41 = vld [vmem:[%s17278_s11 + $0x84] sm:$0xf0] }
 0x1b0   : > { %v8809_v60 = vor.u32 %v11653_v50, %v8806_v41  ;;  %2872 = vmatpush.bf16.msra.mxu0 %v9177_v27  ;;  %v9165_v50 = vor.u32 %v11744_v49, %v9164_v48  ;;  %v8974_v41 = vld [vmem:[%s17278_s11 + $0x1d4] sm:$0xf0]  ;;  %v11731_v49 = vld [vmem:[%s17278_s11 + $0x2ec] sm:$0xf] }
 0x1b1   : > { %2860 = vmatpush.bf16.msrb.mxu3 %v9069_v39  ;;  %v8866_v39 = vld [vmem:[%s17278_s11 + $0xfc] sm:$0xf0]  ;;  %v14012_v40 = vpop.f32.mrf.mxu2  ;;  %v8977_v52 = vor.u32 %v11695_v51, %v8974_v41  ;;  %v9214_v27 = vld [vmem:[%s17278_s11 + $0x3b4] sm:$0xf0] }
 0x1b2   : > { %v1699_v59 = vpop.f32.mrf.mxu1  ;;  %2884 = vmatpush.bf16.msra.mxu1 %v8809_v60  ;;  %2899 = vmatpush.bf16.msra.mxu2 %v8881_v34  ;;  %v8869_v43 = vor.u32 %v11668_v38, %v8866_v39  ;;  %v11741_v60 = vld [vmem:[%s17278_s11 + $0x338] sm:$0xf0]  ;;  %v9217_v34 = vor.u32 %v11755_v26, %v9214_v27  ;;  %v9202_v39 = vld [vmem:[%s17278_s11 + $0x39c] sm:$0xf0]  ;;  %v8788_v26 = vld [vmem:[%s17278_s11 + $0x50] sm:$0xf] }
 0x1b3   : > { %v9152_v59 = vld [vmem:[%s17278_s11 + $0x330] sm:$0xf]  ;;  %v11649_v27 = vld [vmem:[%s17278_s11 + $0x58] sm:$0xf0] }
 0x1b4   : > { %2873 = vmatpush.bf16.msra.mxu0 %v9165_v50  ;;  %v9153_v61 = vor.u32 %v11741_v60, %v9152_v59  ;;  %v9118_v50 = vld [vmem:[%s17278_s11 + $0x2f4] sm:$0xf0]  ;;  %v8812_v60 = vld [vmem:[%s17278_s11 + $0x80] sm:$0xf] }
 0x1b5   : > { %2861 = vmatpush.bf16.msrb.mxu3 %v9057_v55  ;;  %v11665_v55 = vld [vmem:[%s17278_s11 + $0xdc] sm:$0xf]  ;;  %v9121_v59 = vor.u32 %v11731_v49, %v9118_v50  ;;  %v9070_v49 = vld [vmem:[%s17278_s11 + $0x294] sm:$0xf0] }
 0x1b6   : > { %2885 = vmatpush.bf16.msra.mxu1 %v8797_v10  ;;  %2900 = vmatpush.bf16.msra.mxu2 %v8869_v43  ;;  %v8857_v58 = vor.u32 %v11665_v55, %v8854_v57  ;;  %v11689_v10 = vld [vmem:[%s17278_s11 + $0x19c] sm:$0xf]  ;;  %v9190_v57 = vld [vmem:[%s17278_s11 + $0x384] sm:$0xf0] }
 0x1b7   : > { %v8953_v12 = vor.u32 %v11689_v10, %v8950_v11  ;;  %v8800_v11 = vld [vmem:[%s17278_s11 + $0x68] sm:$0xf] }
 0x1b8   : > { %2874 = vmatpush.bf16.msra.mxu0 %v9153_v61  ;;  %v11655_v61 = vld [vmem:[%s17278_s11 + $0x88] sm:$0xf0] }
 0x1b9   : > { %2862 = vmatpush.bf16.msrb.mxu3 %v9045_v4  ;;  %v1712_v47 = vpop.f32.mrf.mxu2  ;;  %v8749_v4 = vor.u32 %v11638_v1, %v8746_v2  ;;  %v9106_v1 = vld [vmem:[%s17278_s11 + $0x2dc] sm:$0xf0] }
 0x1ba   : > { %2886 = vmatpush.bf16.msra.mxu1 %v8785_v24  ;;  %2901 = vmatpush.bf16.msra.mxu2 %v8857_v58 }
 0x1bc   : > { %2875 = vmatpush.bf16.msra.mxu0 %v9141_v9 }
 0x1bd   : > { %2863 = vmatpush.bf16.msrb.mxu3 %v9033_v20  ;;  %v8941_v20 = vor.u32 %v11686_v17, %v8938_v19  ;;  %v9094_v17 = vld [vmem:[%s17278_s11 + $0x2c4] sm:$0xf0]  ;;  %v9181_v19 = vor.u32 %v11746_v7, %v9178_v8  ;;  %v9124_v8 = vld [vmem:[%s17278_s11 + $0x2f0] sm:$0xf] }
 0x1be   : > { %2887 = vmatpush.bf16.msra.mxu1 %v8773_v37  ;;  %2902 = vmatpush.bf16.msra.mxu2 %v8845_v6  ;;  %v8813_v6 = vor.u32 %v11655_v61, %v8812_v60  ;;  %v8872_v61 = vld [vmem:[%s17278_s11 + $0xf8] sm:$0xf] }
 0x1c0   : > { %2876 = vmatpush.bf16.msra.mxu0 %v9129_v16  ;;  %v11725_v16 = vld [vmem:[%s17278_s11 + $0x2bc] sm:$0xf] }
 0x1c1   : > { %2908 = vmatpush.bf16.msra.mxu3 %v9025_v36  ;;  %v14092_v36 = vld [vmem:[#allocation10] sm:$0x1f] }
 0x1c2   : > { %2888 = vmatpush.bf16.msra.mxu1 %v8761_v56  ;;  %v1990_v21 = vperm.slane %v14092_v36, 1  ;;  %v1991_v23 = vperm.slane %v14092_v36, 2  ;;  %v1989_v37 = vperm.slane %v14092_v36, 0  ;;  %v1992_v44 = vperm.slane %v14092_v36, 3 }
 0x1c5   : > { %2909 = vmatpush.bf16.msra.mxu3 %v9013_v32  ;;  %v11661_v32 = vld [vmem:[%s17278_s11 + $0xb8] sm:$0xf0] }
 0x1c6   : > { %2889 = vmatpush.bf16.msra.mxu1 %v8749_v4  ;;  %v8837_v38 = vor.u32 %v11661_v32, %v8836_v30  ;;  %v8920_v4 = vld [vmem:[%s17278_s11 + $0x158] sm:$0xf]  ;;  %v11722_v30 = vld [vmem:[%s17278_s11 + $0x2a4] sm:$0xf]  ;;  %v9082_v32 = vld [vmem:[%s17278_s11 + $0x2ac] sm:$0xf0] }
 0x1c7   : > { %v8921_v14 = vor.u32 %v11682_v5, %v8920_v4  ;;  %v8752_v4 = vld [vmem:[%s17278_s11 + $0x8] sm:$0xf]  ;;  %v11640_v5 = vld [vmem:[%s17278_s11 + $0x10] sm:$0xf0] }
 0x1c9   : > { %2910 = vmatpush.bf16.msra.mxu3 %v9001_v42 }
 0x1cd   : > { %2911 = vmatpush.bf16.msra.mxu3 %v8989_v46  ;;  %v11658_v46 = vld [vmem:[%s17278_s11 + $0xa0] sm:$0xf0] }
 0x1ce   : > { %v8825_v56 = vor.u32 %v11658_v46, %v8824_v45  ;;  %v8776_v45 = vld [vmem:[%s17278_s11 + $0x38] sm:$0xf] }
 0x1d1   : > { %2912 = vmatpush.bf16.msra.mxu3 %v8977_v52 }
 0x1d5   : > { %2913 = vmatpush.bf16.msra.mxu3 %v8965_v0  ;;  %v11728_v0 = vld [vmem:[%s17278_s11 + $0x2d4] sm:$0xf] }
 0x1d6   : > { %v9109_v10 = vor.u32 %v11728_v0, %v9106_v1  ;;  %v11734_v0 = vld [vmem:[%s17278_s11 + $0x304] sm:$0xf] }
 0x1d9   : > { %2914 = vmatpush.bf16.msra.mxu3 %v8953_v12  ;;  %v11652_v12 = vld [vmem:[%s17278_s11 + $0x70] sm:$0xf0] }
 0x1dd   : > { %2915 = vmatpush.bf16.msra.mxu3 %v8941_v20  ;;  %v8908_v20 = vld [vmem:[%s17278_s11 + $0x140] sm:$0xf] }
 0x21c   : > { %v1944_v22 = vpop.f32.mrf.mxu0 }
 0x21d   : > { %v1945_v24 = vadd.f32 %v1944_v22, %v13863_v18  ;;  %v1957_v25 = vpop.f32.mrf.mxu1  ;;  %v8801_v22 = vor.u32 %v11652_v12, %v8800_v11  ;;  %v11757_v12 = vld [vmem:[%s17278_s11 + $0x3b8] sm:$0xf0] }
 0x21e   : > { %v1958_v29 = vadd.f32 %v1957_v25, %v13855_v15  ;;  %v11752_v15 = vld [vmem:[%s17278_s11 + $0x394] sm:$0xf]  ;;  %v9097_v25 = vor.u32 %v11725_v16, %v9094_v17  ;;  %v8860_v17 = vld [vmem:[%s17278_s11 + $0xe0] sm:$0xf] }
 0x21f   : > { %v2000_v18 = vadd.f32 %v1990_v21, %v1945_v24  ;;  %v9205_v52 = vor.u32 %v11752_v15, %v9202_v39  ;;  %v11679_v21 = vld [vmem:[%s17278_s11 + $0x148] sm:$0xf0]  ;;  %v9166_v24 = vld [vmem:[%s17278_s11 + $0x354] sm:$0xf0]  ;;  %v11740_v15 = vld [vmem:[%s17278_s11 + $0x334] sm:$0xf] }
 0x220   : > { %v2001_v33 = vadd.f32 %v1991_v23, %v1958_v29  ;;  %v11743_v23 = vld [vmem:[%s17278_s11 + $0x34c] sm:$0xf]  ;;  %v8909_v29 = vor.u32 %v11679_v21, %v8908_v20  ;;  %v9154_v39 = vld [vmem:[%s17278_s11 + $0x33c] sm:$0xf0]  ;;  %v8753_v20 = vor.u32 %v11640_v5, %v8752_v4  ;;  %v11745_v4 = vld [vmem:[%s17278_s11 + $0x358] sm:$0xf0] }
 0x221   : > { %v14110_v35 = vpack.c.bf16 %v2000_v18, %v2000_v18  ;;  %v9169_v18 = vor.u32 %v11743_v23, %v9166_v24  ;;  %v9157_v50 = vor.u32 %v11740_v15, %v9154_v39 }
 0x222   : > { %v14119_v42 = vpack.c.bf16 %v2001_v33, %v2001_v33  ;;  %v1931_v43 = vpop.f32.mrf.mxu3  ;;  %v8896_v33 = vld [vmem:[%s17278_s11 + $0x128] sm:$0xf] }
 0x223   : > { %v1932_v47 = vadd.f32 %v1931_v43, %v13823_v31  ;;  %v1970_v48 = vpop.f32.mrf.mxu2  ;;  %2838 = vmatmul.bf16.vlgmr.msrb.gmra.mxu1 %v14110_v35  ;;  %v8932_v31 = vld [vmem:[%s17278_s11 + $0x170] sm:$0xf] }
 0x224   : > { %v1971_v51 = vadd.f32 %v1970_v48, %v13883_v28  ;;  %2851 = vmatmul.bf16.vlgmr.msrb.gmra.mxu2 %v14119_v42  ;;  %2934 = vmatpush.bf16.msrb.mxu1 %v9217_v34  ;;  %v1946_v41 = vpop.f32.mrf.mxu0  ;;  %v11749_v28 = vld [vmem:[%s17278_s11 + $0x37c] sm:$0xf]  ;;  %v8933_v63 = vor.u32 %v11685_v53, %v8932_v31  ;;  %v11676_v34 = vld [vmem:[%s17278_s11 + $0x130] sm:$0xf0]  ;;  %v11719_v48 = vld [vmem:[%s17278_s11 + $0x28c] sm:$0xf] }
 0x225   : > { %v1999_v54 = vadd.f32 %v1989_v37, %v1932_v47  ;;  %2947 = vmatpush.bf16.msrb.mxu2 %v8837_v38  ;;  %v1959_v55 = vpop.f32.mrf.mxu1  ;;  %v9193_v3 = vor.u32 %v11749_v28, %v9190_v57  ;;  %v1993_v37 = vperm.slane %v14092_v36, 4  ;;  %v8789_v38 = vor.u32 %v11649_v27, %v8788_v26  ;;  %v11646_v36 = vld [vmem:[%s17278_s11 + $0x40] sm:$0xf0]  ;;  %v11737_v31 = vld [vmem:[%s17278_s11 + $0x31c] sm:$0xf] }
 0x226   : > { %v2002_v58 = vadd.f32 %v1992_v44, %v1971_v51  ;;  %v9085_v44 = vor.u32 %v11722_v30, %v9082_v32  ;;  %v8897_v47 = vor.u32 %v11676_v34, %v8896_v33  ;;  %v11673_v51 = vld [vmem:[%s17278_s11 + $0x118] sm:$0xf0]  ;;  %v9142_v53 = vld [vmem:[%s17278_s11 + $0x324] sm:$0xf0]  ;;  %v8764_v55 = vld [vmem:[%s17278_s11 + $0x20] sm:$0xf] }
 0x227   : > { %v14156_v62 = vpack.c.bf16 %v1999_v54, %v1999_v54  ;;  %v9073_v54 = vor.u32 %v11719_v48, %v9070_v49  ;;  %v9145_v60 = vor.u32 %v11737_v31, %v9142_v53  ;;  %v9208_v26 = vld [vmem:[%s17278_s11 + $0x398] sm:$0xf]  ;;  %v11754_v27 = vld [vmem:[%s17278_s11 + $0x3a0] sm:$0xf0]  ;;  %v9034_v32 = vld [vmem:[%s17278_s11 + $0x24c] sm:$0xf0] }
 0x228   : > { %v14164_v2 = vpack.c.bf16 %v2002_v58, %v2002_v58  ;;  %2935 = vmatpush.bf16.msrb.mxu1 %v9205_v52  ;;  %v8777_v52 = vor.u32 %v11646_v36, %v8776_v45  ;;  %v11716_v58 = vld [vmem:[%s17278_s11 + $0x274] sm:$0xf]  ;;  %v11710_v30 = vld [vmem:[%s17278_s11 + $0x244] sm:$0xf]  ;;  %v9028_v34 = vld [vmem:[%s17278_s11 + $0x230] sm:$0xf]  ;;  %v9209_v15 = vor.u32 %v11754_v27, %v9208_v26 }
 0x229   : > { %2948 = vmatpush.bf16.msrb.mxu2 %v8825_v56  ;;  %2825 = vmatmul.bf16.vlgmr.msrb.gmra.mxu0 %v14156_v62  ;;  %v11643_v56 = vld [vmem:[%s17278_s11 + $0x28] sm:$0xf0]  ;;  %v11664_v33 = vld [vmem:[%s17278_s11 + $0xd0] sm:$0xf0]  ;;  %v9037_v39 = vor.u32 %v11710_v30, %v9034_v32  ;;  %v9016_v48 = vld [vmem:[%s17278_s11 + $0x218] sm:$0xf] }
 0x22a   : > { %2864 = vmatmul.bf16.vlgmr.msrb.gmra.mxu3 %v14164_v2  ;;  %2921 = vmatpush.bf16.msrb.mxu0 %v9121_v59  ;;  %v1933_v9 = vpop.f32.mrf.mxu3  ;;  %v9058_v59 = vld [vmem:[%s17278_s11 + $0x27c] sm:$0xf0]  ;;  %v8765_v1 = vor.u32 %v11643_v56, %v8764_v55  ;;  %v11706_v49 = vld [vmem:[%s17278_s11 + $0x220] sm:$0xf0]  ;;  %v9184_v53 = vld [vmem:[%s17278_s11 + $0x368] sm:$0xf] }
 0x22b   : > { %v1972_v13 = vpop.f32.mrf.mxu2  ;;  %2960 = vmatpush.bf16.msrb.mxu3 %v8933_v63  ;;  %v11670_v63 = vld [vmem:[%s17278_s11 + $0x100] sm:$0xf0]  ;;  %v9061_v7 = vor.u32 %v11716_v58, %v9058_v59  ;;  %v11733_v9 = vld [vmem:[%s17278_s11 + $0x2f8] sm:$0xf0]  ;;  %v9017_v31 = vor.u32 %v11706_v49, %v9016_v48  ;;  %v9004_v55 = vld [vmem:[%s17278_s11 + $0x200] sm:$0xf] }
 0x22c   : > { %2936 = vmatpush.bf16.msrb.mxu1 %v9193_v3  ;;  %v9130_v3 = vld [vmem:[%s17278_s11 + $0x30c] sm:$0xf0]  ;;  %v8873_v11 = vor.u32 %v11670_v63, %v8872_v61  ;;  %v11713_v13 = vld [vmem:[%s17278_s11 + $0x25c] sm:$0xf]  ;;  %v9125_v21 = vor.u32 %v11733_v9, %v9124_v8  ;;  %v11790_v59 = vld [vmem:[%s17279_s4 + $0x100] sm:$0xf0] }
 0x22d   : > { %2949 = vmatpush.bf16.msrb.mxu2 %v8813_v6  ;;  %v9133_v16 = vor.u32 %v11734_v0, %v9130_v3  ;;  %v9344_v58 = vld [vmem:[%s17279_s4 + $0xf0] sm:$0xf]  ;;  %v11721_v0 = vld [vmem:[%s17278_s11 + $0x298] sm:$0xf0]  ;;  %v11715_v26 = vld [vmem:[%s17278_s11 + $0x268] sm:$0xf0] }
 0x22e   : > { %2922 = vmatpush.bf16.msrb.mxu0 %v9109_v10  ;;  %v9220_v10 = vld [vmem:[%s17278_s11 + $0x3b0] sm:$0xf]  ;;  %v9345_v5 = vor.u32 %v11790_v59, %v9344_v58  ;;  %v11785_v8 = vld [vmem:[%s17279_s4 + $0xd8] sm:$0xf0]  ;;  %v11739_v30 = vld [vmem:[%s17278_s11 + $0x328] sm:$0xf0] }
 0x22f   : > { %2961 = vmatpush.bf16.msrb.mxu3 %v8921_v14  ;;  %v9046_v14 = vld [vmem:[%s17278_s11 + $0x264] sm:$0xf0]  ;;  %v9221_v23 = vor.u32 %v11757_v12, %v9220_v10  ;;  %v9076_v63 = vld [vmem:[%s17278_s11 + $0x290] sm:$0xf]  ;;  %v11718_v12 = vld [vmem:[%s17278_s11 + $0x280] sm:$0xf0] }
 0x230   : > { %2937 = vmatpush.bf16.msrb.mxu1 %v9181_v19  ;;  %v11667_v19 = vld [vmem:[%s17278_s11 + $0xe8] sm:$0xf0]  ;;  %v9049_v24 = vor.u32 %v11713_v13, %v9046_v14  ;;  %v9172_v3 = vld [vmem:[%s17278_s11 + $0x350] sm:$0xf]  ;;  %v9077_v9 = vor.u32 %v11721_v0, %v9076_v63  ;;  %v9160_v14 = vld [vmem:[%s17278_s11 + $0x338] sm:$0xf] }
 0x231   : > { %2950 = vmatpush.bf16.msrb.mxu2 %v8801_v22  ;;  %v9112_v22 = vld [vmem:[%s17278_s11 + $0x2d8] sm:$0xf]  ;;  %v9173_v10 = vor.u32 %v11745_v4, %v9172_v3  ;;  %v11691_v48 = vld [vmem:[%s17278_s11 + $0x1a8] sm:$0xf0]  ;;  %v9264_v49 = vld [vmem:[%s17279_s4 + $0x50] sm:$0xf] }
 0x232   : > { %2923 = vmatpush.bf16.msrb.mxu0 %v9097_v25  ;;  %v1983_v43 = vpop.f32.mrf.mxu3  ;;  %v11730_v25 = vld [vmem:[%s17278_s11 + $0x2e0] sm:$0xf0]  ;;  %v8968_v32 = vld [vmem:[%s17278_s11 + $0x1b8] sm:$0xf]  ;;  %v11833_v63 = vld [vmem:[%s17279_s4 + $0x25c] sm:$0xf] }
 0x233   : > { %v1984_v46 = vadd.f32 %v1983_v43, %v14012_v40  ;;  %2962 = vmatpush.bf16.msrb.mxu3 %v8909_v29  ;;  %2890 = vmatmul.bf16.vlgmr.msra.gmra.mxu1 %v14156_v62  ;;  %v8884_v40 = vld [vmem:[%s17278_s11 + $0x110] sm:$0xf]  ;;  %v8861_v29 = vor.u32 %v11667_v19, %v8860_v17  ;;  %v9100_v43 = vld [vmem:[%s17278_s11 + $0x2c0] sm:$0xf]  ;;  %v9346_v3 = vld [vmem:[%s17279_s4 + $0x104] sm:$0xf0] }
 0x234   : > { %2903 = vmatmul.bf16.vlgmr.msra.gmra.mxu2 %v14110_v35  ;;  %2938 = vmatpush.bf16.msrb.mxu1 %v9169_v18  ;;  %v8885_v57 = vor.u32 %v11673_v51, %v8884_v40  ;;  %v8848_v18 = vld [vmem:[%s17278_s11 + $0xc8] sm:$0xf]  ;;  %v8980_v17 = vld [vmem:[%s17278_s11 + $0x1d0] sm:$0xf] }
 0x235   : > { %v2003_v41 = vadd.f32 %v1993_v37, %v1984_v46  ;;  %2951 = vmatpush.bf16.msrb.mxu2 %v8789_v38  ;;  %v11709_v37 = vld [vmem:[%s17278_s11 + $0x238] sm:$0xf0]  ;;  %v9113_v38 = vor.u32 %v11730_v25, %v9112_v22  ;;  %v8849_v45 = vor.u32 %v11664_v33, %v8848_v18  ;;  %v9196_v46 = vld [vmem:[%s17278_s11 + $0x380] sm:$0xf]  ;;  %v9088_v40 = vld [vmem:[%s17278_s11 + $0x2a8] sm:$0xf] }
 0x236   : > { %2924 = vmatpush.bf16.msrb.mxu0 %v9085_v44  ;;  %v11727_v44 = vld [vmem:[%s17278_s11 + $0x2c8] sm:$0xf0]  ;;  %v9029_v36 = vor.u32 %v11709_v37, %v9028_v34  ;;  %v11780_v22 = vld [vmem:[%s17279_s4 + $0xb0] sm:$0xf0]  ;;  %v9052_v25 = vld [vmem:[%s17278_s11 + $0x260] sm:$0xf] }
 0x237   : > { %v14262_v28 = vpack.c.bf16 %v2003_v41, %v2003_v41  ;;  %2963 = vmatpush.bf16.msrb.mxu3 %v8897_v47  ;;  %v11751_v47 = vld [vmem:[%s17278_s11 + $0x388] sm:$0xf0]  ;;  %v9364_v41 = vld [vmem:[%s17279_s4 + $0x118] sm:$0xf]  ;;  %v11694_v33 = vld [vmem:[%s17278_s11 + $0x1c0] sm:$0xf0] }
 0x238   : > { %2939 = vmatpush.bf16.msrb.mxu1 %v9157_v50  ;;  %v9101_v50 = vor.u32 %v11727_v44, %v9100_v43  ;;  %v9197_v51 = vor.u32 %v11751_v47, %v9196_v46  ;;  %v9284_v34 = vld [vmem:[%s17279_s4 + $0x78] sm:$0xf]  ;;  %v11775_v37 = vld [vmem:[%s17279_s4 + $0x88] sm:$0xf0]  ;;  %v11712_v43 = vld [vmem:[%s17278_s11 + $0x250] sm:$0xf0]  ;;  %v8969_v44 = vor.u32 %v11694_v33, %v8968_v32 }
 0x239   : > { %2952 = vmatpush.bf16.msrb.mxu2 %v8777_v52  ;;  %2877 = vmatmul.bf16.vlgmr.msra.gmra.mxu0 %v14262_v28  ;;  %v11795_v52 = vld [vmem:[%s17279_s4 + $0x128] sm:$0xf0]  ;;  %v8956_v46 = vld [vmem:[%s17278_s11 + $0x1a0] sm:$0xf]  ;;  %v9285_v47 = vor.u32 %v11775_v37, %v9284_v34  ;;  %v9526_v0 = vld [vmem:[%s17279_s4 + $0x26c] sm:$0xf0] }
 0x23a   : > { %2916 = vmatmul.bf16.vlgmr.msra.gmra.mxu3 %v14119_v42  ;;  %2925 = vmatpush.bf16.msrb.mxu0 %v9073_v54  ;;  %v1985_v6 = vpop.f32.mrf.mxu3  ;;  %v11748_v54 = vld [vmem:[%s17278_s11 + $0x370] sm:$0xf0]  ;;  %v9365_v56 = vor.u32 %v11795_v52, %v9364_v41  ;;  %v8957_v52 = vor.u32 %v11691_v48, %v8956_v46  ;;  %v9286_v32 = vld [vmem:[%s17279_s4 + $0x8c] sm:$0xf0]  ;;  %v9464_v33 = vld [vmem:[%s17279_s4 + $0x1e0] sm:$0xf] }
 0x23b   : > { %2964 = vmatpush.bf16.msrb.mxu3 %v8885_v57  ;;  %v11703_v57 = vld [vmem:[%s17278_s11 + $0x208] sm:$0xf0]  ;;  %v9185_v61 = vor.u32 %v11748_v54, %v9184_v53  ;;  %v11700_v6 = vld [vmem:[%s17278_s11 + $0x1f0] sm:$0xf0] }
 0x23c   : > { %2940 = vmatpush.bf16.msrb.mxu1 %v9145_v60  ;;  %v11688_v54 = vld [vmem:[%s17278_s11 + $0x190] sm:$0xf0]  ;;  %v11815_v46 = vld [vmem:[%s17279_s4 + $0x1c8] sm:$0xf0] }
 0x23d   : > { %2953 = vmatpush.bf16.msrb.mxu2 %v8765_v1  ;;  %v9005_v1 = vor.u32 %v11703_v57, %v9004_v55  ;;  %v9244_v55 = vld [vmem:[%s17279_s4 + $0x28] sm:$0xf]  ;;  %v11820_v34 = vld [vmem:[%s17279_s4 + $0x1f0] sm:$0xf0] }
 0x23e   : > { %2926 = vmatpush.bf16.msrb.mxu0 %v9061_v7  ;;  %v9324_v7 = vld [vmem:[%s17279_s4 + $0xc8] sm:$0xf]  ;;  %v9465_v37 = vor.u32 %v11820_v34, %v9464_v33  ;;  %v11808_v48 = vld [vmem:[%s17279_s4 + $0x194] sm:$0xf] }
 0x23f   : > { %2965 = vmatpush.bf16.msrb.mxu3 %v8873_v11  ;;  %v9064_v11 = vld [vmem:[%s17278_s11 + $0x278] sm:$0xf]  ;;  %v9325_v19 = vor.u32 %v11785_v8, %v9324_v7  ;;  %v9506_v7 = vld [vmem:[%s17279_s4 + $0x244] sm:$0xf0]  ;;  %v11783_v8 = vld [vmem:[%s17279_s4 + $0xcc] sm:$0xf] }
 0x240   : > { %2941 = vmatpush.bf16.msrb.mxu1 %v9133_v16  ;;  %v11742_v16 = vld [vmem:[%s17278_s11 + $0x340] sm:$0xf0] }
 0x241   : > { %2954 = vmatpush.bf16.msrb.mxu2 %v8753_v20  ;;  %v11697_v20 = vld [vmem:[%s17278_s11 + $0x1d8] sm:$0xf0] }
 0x242   : > { %2927 = vmatpush.bf16.msrb.mxu0 %v9049_v24  ;;  %v9161_v24 = vor.u32 %v11742_v16, %v9160_v14  ;;  %v8981_v27 = vor.u32 %v11697_v20, %v8980_v17  ;;  %v11823_v16 = vld [vmem:[%s17279_s4 + $0x20c] sm:$0xf]  ;;  %v9486_v17 = vld [vmem:[%s17279_s4 + $0x21c] sm:$0xf0]  ;;  %v11778_v20 = vld [vmem:[%s17279_s4 + $0xa4] sm:$0xf] }
 0x243   : > { %2966 = vmatpush.bf16.msrb.mxu3 %v8861_v29  ;;  %2942 = vmatmul.bf16.vlgmr.msrb.gmra.mxu1 %v14262_v28  ;;  %v9148_v29 = vld [vmem:[%s17278_s11 + $0x320] sm:$0xf] }
 0x244   : > { %2986 = vmatpush.bf16.msra.mxu1 %v9125_v21  ;;  %2955 = vmatmul.bf16.vlgmr.msrb.gmra.mxu2 %v14156_v62  ;;  %v11724_v62 = vld [vmem:[%s17278_s11 + $0x2b0] sm:$0xf0]  ;;  %v9304_v21 = vld [vmem:[%s17279_s4 + $0xa0] sm:$0xf] }
 0x245   : > { %2999 = vmatpush.bf16.msra.mxu2 %v9221_v23  ;;  %v9089_v60 = vor.u32 %v11724_v62, %v9088_v40  ;;  %v9065_v23 = vor.u32 %v11718_v12, %v9064_v11  ;;  %v9305_v18 = vor.u32 %v11780_v22, %v9304_v21  ;;  %v9366_v62 = vld [vmem:[%s17279_s4 + $0x12c] sm:$0xf0]  ;;  %v9306_v21 = vld [vmem:[%s17279_s4 + $0xb4] sm:$0xf0] }
 0x246   : > { %2928 = vmatpush.bf16.msrb.mxu0 %v9037_v39  ;;  %v9040_v39 = vld [vmem:[%s17278_s11 + $0x248] sm:$0xf]  ;;  %v9504_v12 = vld [vmem:[%s17279_s4 + $0x230] sm:$0xf]  ;;  %v9309_v22 = vor.u32 %v11778_v20, %v9306_v21  ;;  %v11781_v21 = vld [vmem:[%s17279_s4 + $0xb8] sm:$0xf0] }
 0x247   : > { %2967 = vmatpush.bf16.msrb.mxu3 %v8849_v45  ;;  %v9136_v45 = vld [vmem:[%s17278_s11 + $0x308] sm:$0xf]  ;;  %v9041_v40 = vor.u32 %v11712_v43, %v9040_v39  ;;  %v11768_v43 = vld [vmem:[%s17279_s4 + $0x54] sm:$0xf] }
 0x248   : > { %2987 = vmatpush.bf16.msra.mxu1 %v9113_v38  ;;  %v9053_v38 = vor.u32 %v11715_v26, %v9052_v25  ;;  %v11818_v26 = vld [vmem:[%s17279_s4 + $0x1e4] sm:$0xf]  ;;  %v9312_v20 = vld [vmem:[%s17279_s4 + $0xa8] sm:$0xf] }
 0x249   : > { %3000 = vmatpush.bf16.msra.mxu2 %v9209_v15  ;;  %2929 = vmatmul.bf16.vlgmr.msrb.gmra.mxu0 %v14164_v2  ;;  %v9149_v15 = vor.u32 %v11739_v30, %v9148_v29  ;;  %v11773_v30 = vld [vmem:[%s17279_s4 + $0x7c] sm:$0xf] }
 0x24a   : > { %2973 = vmatpush.bf16.msra.mxu0 %v9029_v36  ;;  %2968 = vmatmul.bf16.vlgmr.msrb.gmra.mxu3 %v14110_v35  ;;  %v8992_v35 = vld [vmem:[%s17278_s11 + $0x1e8] sm:$0xf]  ;;  %v11736_v36 = vld [vmem:[%s17278_s11 + $0x310] sm:$0xf0] }
 0x24b   : > { %3671 = vmatpush.bf16.msra.mxu3 %v9365_v56  ;;  %v8993_v13 = vor.u32 %v11700_v6, %v8992_v35  ;;  %v9137_v41 = vor.u32 %v11736_v36, %v9136_v45  ;;  %v11765_v56 = vld [vmem:[%s17279_s4 + $0x38] sm:$0xf0]  ;;  %v9524_v35 = vld [vmem:[%s17279_s4 + $0x258] sm:$0xf] }
 0x24c   : > { %2988 = vmatpush.bf16.msra.mxu1 %v9101_v50  ;;  %v11770_v50 = vld [vmem:[%s17279_s4 + $0x60] sm:$0xf0]  ;;  %v9245_v59 = vor.u32 %v11765_v56, %v9244_v55  ;;  %v9444_v36 = vld [vmem:[%s17279_s4 + $0x1b8] sm:$0xf] }
 0x24d   : > { %3001 = vmatpush.bf16.msra.mxu2 %v9197_v51  ;;  %v11793_v51 = vld [vmem:[%s17279_s4 + $0x11c] sm:$0xf]  ;;  %v9265_v53 = vor.u32 %v11770_v50, %v9264_v49  ;;  %v9426_v49 = vld [vmem:[%s17279_s4 + $0x1a4] sm:$0xf0]  ;;  %v11758_v56 = vld [vmem:[%s17279_s4 + $0x4] sm:$0xf] }
 0x24e   : > { %2974 = vmatpush.bf16.msra.mxu0 %v9017_v31  ;;  %v8944_v31 = vld [vmem:[%s17278_s11 + $0x188] sm:$0xf]  ;;  %v9369_v57 = vor.u32 %v11793_v51, %v9366_v62  ;;  %v9429_v50 = vor.u32 %v11808_v48, %v9426_v49  ;;  %v9246_v51 = vld [vmem:[%s17279_s4 + $0x3c] sm:$0xf0]  ;;  %v11794_v48 = vld [vmem:[%s17279_s4 + $0x124] sm:$0xf] }
 0x24f   : > { %3672 = vmatpush.bf16.msra.mxu3 %v9345_v5  ;;  %v8945_v58 = vor.u32 %v11688_v54, %v8944_v31  ;;  %v11835_v5 = vld [vmem:[%s17279_s4 + $0x268] sm:$0xf0]  ;;  %v9406_v54 = vld [vmem:[%s17279_s4 + $0x17c] sm:$0xf0]  ;;  %v9374_v49 = vld [vmem:[%s17279_s4 + $0x134] sm:$0xf0] }
 0x250   : > { %2989 = vmatpush.bf16.msra.mxu1 %v9089_v60  ;;  %v9224_v60 = vld [vmem:[%s17279_s4] sm:$0xf]  ;;  %v9525_v6 = vor.u32 %v11835_v5, %v9524_v35  ;;  %v11796_v35 = vld [vmem:[%s17279_s4 + $0x130] sm:$0xf0] }
 0x251   : > { %3002 = vmatpush.bf16.msra.mxu2 %v9185_v61  ;;  %v11760_v61 = vld [vmem:[%s17279_s4 + $0x10] sm:$0xf0] }
 0x252   : > { %2975 = vmatpush.bf16.msra.mxu0 %v9005_v1  ;;  %v9529_v1 = vor.u32 %v11833_v63, %v9526_v0  ;;  %v11798_v63 = vld [vmem:[%s17279_s4 + $0x144] sm:$0xf]  ;;  %v9386_v0 = vld [vmem:[%s17279_s4 + $0x154] sm:$0xf0] }
 0x253   : > { %3673 = vmatpush.bf16.msra.mxu3 %v9325_v19  ;;  %v9489_v19 = vor.u32 %v11823_v16, %v9486_v17 }
 0x254   : > { %2990 = vmatpush.bf16.msra.mxu1 %v9077_v9  ;;  %v9326_v9 = vld [vmem:[%s17279_s4 + $0xdc] sm:$0xf0] }
 0x255   : > { %3003 = vmatpush.bf16.msra.mxu2 %v9173_v10  ;;  %v9329_v11 = vor.u32 %v11783_v8, %v9326_v9  ;;  %v14669_v9 = vld [vmem:[#allocation11] sm:$0x7] }
 0x256   : > { %2976 = vmatpush.bf16.msra.mxu0 %v8993_v13  ;;  %v11830_v13 = vld [vmem:[%s17279_s4 + $0x240] sm:$0xf0] }
 0x257   : > { %3674 = vmatpush.bf16.msra.mxu3 %v9305_v18  ;;  %v9505_v14 = vor.u32 %v11830_v13, %v9504_v12  ;;  %v9289_v18 = vor.u32 %v11773_v30, %v9286_v32  ;;  %v11786_v12 = vld [vmem:[%s17279_s4 + $0xe0] sm:$0xf0]  ;;  %v9612_v30 = vld [vmem:[%s17279_s4 + $0x300] sm:$0xf]  ;;  %v11856_v32 = vld [vmem:[%s17279_s4 + $0x310] sm:$0xf0] }
 0x258   : > { %2991 = vmatpush.bf16.msra.mxu1 %v9065_v23  ;;  %v9484_v23 = vld [vmem:[%s17279_s4 + $0x208] sm:$0xf]  ;;  %v9613_v33 = vor.u32 %v11856_v32, %v9612_v30 }
 0x259   : > { %3004 = vmatpush.bf16.msra.mxu2 %v9161_v24  ;;  %v11825_v24 = vld [vmem:[%s17279_s4 + $0x218] sm:$0xf0] }
 0x25a   : > { %2977 = vmatpush.bf16.msra.mxu0 %v8981_v27  ;;  %v9485_v25 = vor.u32 %v11825_v24, %v9484_v23  ;;  %v9466_v27 = vld [vmem:[%s17279_s4 + $0x1f4] sm:$0xf0] }
 0x25b   : > { %3675 = vmatpush.bf16.msra.mxu3 %v9285_v47  ;;  %v9469_v29 = vor.u32 %v11818_v26, %v9466_v27  ;;  %v9445_v47 = vor.u32 %v11815_v46, %v9444_v36  ;;  %v11776_v26 = vld [vmem:[%s17279_s4 + $0x90] sm:$0xf0]  ;;  %v11851_v36 = vld [vmem:[%s17279_s4 + $0x2e8] sm:$0xf0] }
 0x25c   : > { %2992 = vmatpush.bf16.msra.mxu1 %v9053_v38  ;;  %v11813_v38 = vld [vmem:[%s17279_s4 + $0x1bc] sm:$0xf] }
 0x25d   : > { %3005 = vmatpush.bf16.msra.mxu2 %v9149_v15  ;;  %v9446_v15 = vld [vmem:[%s17279_s4 + $0x1cc] sm:$0xf0] }
 0x25e   : > { %2978 = vmatpush.bf16.msra.mxu0 %v8969_v44  ;;  %v9449_v39 = vor.u32 %v11813_v38, %v9446_v15  ;;  %v9266_v44 = vld [vmem:[%s17279_s4 + $0x64] sm:$0xf0]  ;;  %v11855_v38 = vld [vmem:[%s17279_s4 + $0x308] sm:$0xf0]  ;;  %v9272_v15 = vld [vmem:[%s17279_s4 + $0x58] sm:$0xf] }
 0x25f   : > { %3676 = vmatpush.bf16.msra.mxu3 %v9265_v53  ;;  %v9269_v45 = vor.u32 %v11768_v43, %v9266_v44  ;;  %v11803_v53 = vld [vmem:[%s17279_s4 + $0x16c] sm:$0xf] }
 0x260   : > { %2993 = vmatpush.bf16.msra.mxu1 %v9041_v40  ;;  %v11763_v40 = vld [vmem:[%s17279_s4 + $0x2c] sm:$0xf]  ;;  %v9409_v55 = vor.u32 %v11803_v53, %v9406_v54  ;;  %v9572_v53 = vld [vmem:[%s17279_s4 + $0x2b0] sm:$0xf] }
 0x261   : > { %3006 = vmatpush.bf16.msra.mxu2 %v9137_v41  ;;  %v9249_v62 = vor.u32 %v11763_v40, %v9246_v51  ;;  %v9424_v41 = vld [vmem:[%s17279_s4 + $0x190] sm:$0xf]  ;;  %v11771_v44 = vld [vmem:[%s17279_s4 + $0x68] sm:$0xf0]  ;;  %v11850_v40 = vld [vmem:[%s17279_s4 + $0x2e0] sm:$0xf0] }
 0x262   : > { %2979 = vmatpush.bf16.msra.mxu0 %v8957_v52  ;;  %v11810_v52 = vld [vmem:[%s17279_s4 + $0x1a0] sm:$0xf0]  ;;  %v9273_v46 = vor.u32 %v11771_v44, %v9272_v15  ;;  %v11848_v15 = vld [vmem:[%s17279_s4 + $0x2d4] sm:$0xf] }
 0x263   : > { %2994 = vmatmul.bf16.vlgmr.msra.gmra.mxu1 %v14164_v2  ;;  %3677 = vmatpush.bf16.msra.mxu3 %v9245_v59  ;;  %v9225_v2 = vor.u32 %v11760_v61, %v9224_v60  ;;  %v9425_v31 = vor.u32 %v11810_v52, %v9424_v41  ;;  %v9404_v59 = vld [vmem:[%s17279_s4 + $0x168] sm:$0xf]  ;;  %v11805_v60 = vld [vmem:[%s17279_s4 + $0x178] sm:$0xf0]  ;;  %v9252_v52 = vld [vmem:[%s17279_s4 + $0x30] sm:$0xf] }
 0x264   : > { %3007 = vmatmul.bf16.vlgmr.msra.gmra.mxu2 %v14262_v28  ;;  %v11788_v28 = vld [vmem:[%s17279_s4 + $0xf4] sm:$0xf]  ;;  %v9405_v61 = vor.u32 %v11805_v60, %v9404_v59  ;;  %v11789_v59 = vld [vmem:[%s17279_s4 + $0xfc] sm:$0xf] }
 0x265   : > { %3710 = vmatpush.bf16.msrb.mxu2 %v9369_v57  ;;  %v9349_v4 = vor.u32 %v11788_v28, %v9346_v3  ;;  %v9226_v57 = vld [vmem:[%s17279_s4 + $0x14] sm:$0xf0]  ;;  %v11800_v28 = vld [vmem:[%s17279_s4 + $0x150] sm:$0xf0] }
 0x266   : > { %2980 = vmatpush.bf16.msra.mxu0 %v8945_v58  ;;  %v9229_v58 = vor.u32 %v11758_v56, %v9226_v57  ;;  %v11846_v56 = vld [vmem:[%s17279_s4 + $0x2c0] sm:$0xf0] }
 0x267   : > { %3678 = vmatpush.bf16.msra.mxu3 %v9225_v2  ;;  %v9389_v2 = vor.u32 %v11798_v63, %v9386_v0  ;;  %v9573_v60 = vor.u32 %v11846_v56, %v9572_v53  ;;  %v9377_v63 = vor.u32 %v11794_v48, %v9374_v49  ;;  %v9354_v0 = vld [vmem:[%s17279_s4 + $0x10c] sm:$0xf0]  ;;  %v9474_v56 = vld [vmem:[%s17279_s4 + $0x1fc] sm:$0xf0] }
 0x269   : > { %2981 = vmatmul.bf16.vlgmr.msra.gmra.mxu0 %v14119_v42  ;;  %v11828_v42 = vld [vmem:[%s17279_s4 + $0x234] sm:$0xf]  ;;  %3711 = vmatpush.bf16.msrb.mxu2 %v9349_v4  ;;  %v9372_v4 = vld [vmem:[%s17279_s4 + $0x120] sm:$0xf] }
 0x26a   : > { %v9509_v10 = vor.u32 %v11828_v42, %v9506_v7  ;;  %3684 = vmatpush.bf16.msrb.mxu0 %v9525_v6  ;;  %v9373_v5 = vor.u32 %v11796_v35, %v9372_v4  ;;  %v9352_v6 = vld [vmem:[%s17279_s4 + $0xf8] sm:$0xf]  ;;  %v11791_v7 = vld [vmem:[%s17279_s4 + $0x108] sm:$0xf0]  ;;  %v9232_v4 = vld [vmem:[%s17279_s4 + $0x8] sm:$0xf] }
 0x26b   : > { %3723 = vmatpush.bf16.msrb.mxu3 %v9529_v1  ;;  %v9384_v1 = vld [vmem:[%s17279_s4 + $0x140] sm:$0xf]  ;;  %v9353_v8 = vor.u32 %v11791_v7, %v9352_v6  ;;  %v11761_v35 = vld [vmem:[%s17279_s4 + $0x18] sm:$0xf0]  ;;  %v2172_v7 = vperm.slane %v14669_v9, 1 }
 0x26c   : > { %v9385_v3 = vor.u32 %v11800_v28, %v9384_v1  ;;  %v11845_v1 = vld [vmem:[%s17279_s4 + $0x2b8] sm:$0xf0] }
 0x26d   : > { %3712 = vmatpush.bf16.msrb.mxu2 %v9329_v11  ;;  %v9332_v11 = vld [vmem:[%s17279_s4 + $0xd0] sm:$0xf]  ;;  %v11841_v6 = vld [vmem:[%s17279_s4 + $0x298] sm:$0xf0] }
 0x26e   : > { %3685 = vmatpush.bf16.msrb.mxu0 %v9505_v14  ;;  %v9333_v14 = vor.u32 %v11786_v12, %v9332_v11  ;;  %v9534_v11 = vld [vmem:[%s17279_s4 + $0x274] sm:$0xf0]  ;;  %v9357_v12 = vor.u32 %v11789_v59, %v9354_v0  ;;  %v11769_v59 = vld [vmem:[%s17279_s4 + $0x5c] sm:$0xf]  ;;  %v11838_v0 = vld [vmem:[%s17279_s4 + $0x284] sm:$0xf] }
 0x26f   : > { %3724 = vmatpush.bf16.msrb.mxu3 %v9509_v10  ;;  %v2171_v10 = vperm.slane %v14669_v9, 0 }
 0x271   : > { %3713 = vmatpush.bf16.msrb.mxu2 %v9309_v22  ;;  %v9313_v22 = vor.u32 %v11781_v21, %v9312_v20  ;;  %v9334_v20 = vld [vmem:[%s17279_s4 + $0xe4] sm:$0xf0] }
 0x272   : > { %3686 = vmatpush.bf16.msrb.mxu0 %v9485_v25  ;;  %v9292_v25 = vld [vmem:[%s17279_s4 + $0x80] sm:$0xf] }
 0x273   : > { %3725 = vmatpush.bf16.msrb.mxu3 %v9489_v19 }
 0x275   : > { %3714 = vmatpush.bf16.msrb.mxu2 %v9289_v18 }
 0x276   : > { %3687 = vmatpush.bf16.msrb.mxu0 %v9465_v37  ;;  %v9604_v37 = vld [vmem:[%s17279_s4 + $0x2f8] sm:$0xf] }
 0x277   : > { %3726 = vmatpush.bf16.msrb.mxu3 %v9469_v29  ;;  %v9293_v29 = vor.u32 %v11776_v26, %v9292_v25  ;;  %v9605_v43 = vor.u32 %v11855_v38, %v9604_v37  ;;  %v11829_v26 = vld [vmem:[%s17279_s4 + $0x23c] sm:$0xf]  ;;  %v9314_v38 = vld [vmem:[%s17279_s4 + $0xbc] sm:$0xf0] }
 0x279   : > { %3715 = vmatpush.bf16.msrb.mxu2 %v9269_v45  ;;  %v9592_v45 = vld [vmem:[%s17279_s4 + $0x2d8] sm:$0xf]  ;;  %3701 = vmatpush.bf16.msrb.mxu1 %v9605_v43 }
 0x27a   : > { %3688 = vmatpush.bf16.msrb.mxu0 %v9445_v47  ;;  %v9593_v47 = vor.u32 %v11851_v36, %v9592_v45  ;;  %v9494_v45 = vld [vmem:[%s17279_s4 + $0x224] sm:$0xf0] }
 0x27b   : > { %3727 = vmatpush.bf16.msrb.mxu3 %v9449_v39 }
 0x27d   : > { %3716 = vmatpush.bf16.msrb.mxu2 %v9249_v62 }
 0x27e   : > { %3689 = vmatpush.bf16.msrb.mxu0 %v9425_v31  ;;  %v11766_v31 = vld [vmem:[%s17279_s4 + $0x40] sm:$0xf0] }
 0x27f   : > { %3728 = vmatpush.bf16.msrb.mxu3 %v9429_v50  ;;  %v9584_v50 = vld [vmem:[%s17279_s4 + $0x2d0] sm:$0xf] }
 0x280   : > { %v9585_v41 = vor.u32 %v11850_v40, %v9584_v50  ;;  %v9294_v50 = vld [vmem:[%s17279_s4 + $0x94] sm:$0xf0]  ;;  %v11843_v40 = vld [vmem:[%s17279_s4 + $0x2ac] sm:$0xf] }
 0x281   : > { %3717 = vmatpush.bf16.msrb.mxu2 %v9229_v58 }
 0x282   : > { %3690 = vmatpush.bf16.msrb.mxu0 %v9405_v61  ;;  %3702 = vmatpush.bf16.msrb.mxu1 %v9585_v41  ;;  %v11854_v41 = vld [vmem:[%s17279_s4 + $0x304] sm:$0xf] }
 0x283   : > { %3729 = vmatpush.bf16.msrb.mxu3 %v9409_v55  ;;  %v9253_v55 = vor.u32 %v11766_v31, %v9252_v52 }
 0x285   : > { %3779 = vmatpush.bf16.msra.mxu2 %v9613_v33  ;;  %v11779_v33 = vld [vmem:[%s17279_s4 + $0xac] sm:$0xf] }
 0x286   : > { %3691 = vmatpush.bf16.msrb.mxu0 %v9385_v3  ;;  %v9317_v36 = vor.u32 %v11779_v33, %v9314_v38  ;;  %v9414_v33 = vld [vmem:[%s17279_s4 + $0x184] sm:$0xf0] }
 0x287   : > { %3730 = vmatpush.bf16.msrb.mxu3 %v9389_v2  ;;  %v9564_v2 = vld [vmem:[%s17279_s4 + $0x2a8] sm:$0xf] }
 0x288   : > { %v9565_v3 = vor.u32 %v11845_v1, %v9564_v2  ;;  %v9546_v2 = vld [vmem:[%s17279_s4 + $0x294] sm:$0xf0] }
 0x289   : > { %3780 = vmatpush.bf16.msra.mxu2 %v9593_v47 }
 0x28a   : > { %3749 = vmatpush.bf16.msra.mxu0 %v9373_v5  ;;  %v9552_v5 = vld [vmem:[%s17279_s4 + $0x288] sm:$0xf]  ;;  %3703 = vmatpush.bf16.msrb.mxu1 %v9565_v3  ;;  %v11849_v3 = vld [vmem:[%s17279_s4 + $0x2dc] sm:$0xf] }
 0x28d   : > { %3781 = vmatpush.bf16.msra.mxu2 %v9573_v60 }
 0x28e   : > { %3750 = vmatpush.bf16.msra.mxu0 %v9353_v8  ;;  %v9553_v8 = vor.u32 %v11841_v6, %v9552_v5  ;;  %v9594_v5 = vld [vmem:[%s17279_s4 + $0x2ec] sm:$0xf0]  ;;  %v9454_v6 = vld [vmem:[%s17279_s4 + $0x1d4] sm:$0xf0] }
 0x291   : > { %3782 = vmatpush.bf16.msra.mxu2 %v9553_v8 }
 0x292   : > { %3751 = vmatpush.bf16.msra.mxu0 %v9333_v14 }
 0x296   : > { %3752 = vmatpush.bf16.msra.mxu0 %v9313_v22  ;;  %v11853_v22 = vld [vmem:[%s17279_s4 + $0x2fc] sm:$0xf] }
 0x29a   : > { %3753 = vmatpush.bf16.msra.mxu0 %v9293_v29 }
 0x29e   : > { %3754 = vmatpush.bf16.msra.mxu0 %v9273_v46  ;;  %v11774_v46 = vld [vmem:[%s17279_s4 + $0x84] sm:$0xf] }
 0x2a0   : > { %v2839_v42 = vpop.f32.mrf.mxu1 }
 0x2a2   : > { %3755 = vmatpush.bf16.msra.mxu0 %v9253_v55  ;;  %v11819_v55 = vld [vmem:[%s17279_s4 + $0x1ec] sm:$0xf] }
 0x2a3   : > { %v9477_v60 = vor.u32 %v11819_v55, %v9474_v56  ;;  %v9480_v55 = vld [vmem:[%s17279_s4 + $0x1f0] sm:$0xf]  ;;  %v11822_v56 = vld [vmem:[%s17279_s4 + $0x200] sm:$0xf0] }
 0x2a6   : > { %v2826_v13 = vpop.f32.mrf.mxu0 }
 0x2a7   : > { %v2852_v16 = vpop.f32.mrf.mxu2  ;;  %v2827_v19 = vadd.f32 %v2826_v13, %v2171_v10  ;;  %v11834_v10 = vld [vmem:[%s17279_s4 + $0x264] sm:$0xf]  ;;  %v11784_v13 = vld [vmem:[%s17279_s4 + $0xd4] sm:$0xf] }
 0x2a8   : > { %v2841_v17 = vpop.f32.mrf.mxu1  ;;  %v9537_v14 = vor.u32 %v11834_v10, %v9534_v11  ;;  %v11764_v11 = vld [vmem:[%s17279_s4 + $0x34] sm:$0xf] }
 0x2a9   : > { %v2840_v23 = vadd.f32 %v2839_v42, %v2827_v19  ;;  %v9233_v42 = vor.u32 %v11761_v35, %v9232_v4  ;;  %v11840_v17 = vld [vmem:[%s17279_s4 + $0x290] sm:$0xf0]  ;;  %v9549_v4 = vor.u32 %v11838_v0, %v9546_v2  ;;  %v11817_v0 = vld [vmem:[%s17279_s4 + $0x1d8] sm:$0xf0] }
 0x2ab   : > { %v2853_v39 = vadd.f32 %v2852_v16, %v2840_v23  ;;  %v9544_v16 = vld [vmem:[%s17279_s4 + $0x280] sm:$0xf]  ;;  %3756 = vmatpush.bf16.msra.mxu0 %v9233_v42  ;;  %v9606_v23 = vld [vmem:[%s17279_s4 + $0x30c] sm:$0xf0]  ;;  %v11814_v42 = vld [vmem:[%s17279_s4 + $0x1c4] sm:$0xf] }
 0x2ac   : > { %v9545_v21 = vor.u32 %v11840_v17, %v9544_v16  ;;  %v9609_v25 = vor.u32 %v11853_v22, %v9606_v23  ;;  %v9457_v8 = vor.u32 %v11814_v42, %v9454_v6  ;;  %v11844_v16 = vld [vmem:[%s17279_s4 + $0x2b4] sm:$0xf] }
 0x2ad   : > { %v2865_v24 = vpop.f32.mrf.mxu3 }
 0x2ae   : > { %v2828_v27 = vpop.f32.mrf.mxu0  ;;  %v2866_v51 = vadd.f32 %v2865_v24, %v2853_v39  ;;  %3704 = vmatpush.bf16.msrb.mxu1 %v9545_v21  ;;  %v9586_v39 = vld [vmem:[%s17279_s4 + $0x2e4] sm:$0xf0]  ;;  %v9434_v21 = vld [vmem:[%s17279_s4 + $0x1ac] sm:$0xf0] }
 0x2af   : > { %v2854_v18 = vpop.f32.mrf.mxu2  ;;  %v9514_v27 = vld [vmem:[%s17279_s4 + $0x24c] sm:$0xf0]  ;;  %v9589_v43 = vor.u32 %v11848_v15, %v9586_v39 }
 0x2b0   : > { %v14696_v34 = vpop.f32.mrf.mxu1  ;;  %v9517_v30 = vor.u32 %v11829_v26, %v9514_v27  ;;  %v9337_v18 = vor.u32 %v11784_v13, %v9334_v20  ;;  %v11809_v20 = vld [vmem:[%s17279_s4 + $0x19c] sm:$0xf]  ;;  %v9540_v26 = vld [vmem:[%s17279_s4 + $0x268] sm:$0xf] }
 0x2b1   : > { %v2892_v37 = vadd.f32 %v14696_v34, %v2172_v7  ;;  %v11824_v34 = vld [vmem:[%s17279_s4 + $0x214] sm:$0xf]  ;;  %v9437_v23 = vor.u32 %v11809_v20, %v9434_v21  ;;  %v11837_v27 = vld [vmem:[%s17279_s4 + $0x278] sm:$0xf0]  ;;  %v11831_v21 = vld [vmem:[%s17279_s4 + $0x248] sm:$0xf0] }
 0x2b2   : > { %3740 = vmatpush.bf16.msra.mxu1 %v9609_v25  ;;  %v9497_v47 = vor.u32 %v11824_v34, %v9494_v45  ;;  %v9234_v25 = vld [vmem:[%s17279_s4 + $0x1c] sm:$0xf0]  ;;  %v9541_v39 = vor.u32 %v11837_v27, %v9540_v26  ;;  %v9620_v45 = vld [vmem:[%s17279_s4 + $0x308] sm:$0xf] }
 0x2b5   : > { %v2867_v62 = vpop.f32.mrf.mxu3 }
 0x2b6   : > { %v2878_v54 = vpop.f32.mrf.mxu0  ;;  %3741 = vmatpush.bf16.msra.mxu1 %v9589_v43  ;;  %v9520_v43 = vld [vmem:[%s17279_s4 + $0x240] sm:$0xf] }
 0x2b7   : > { %v2879_v57 = vadd.f32 %v2878_v54, %v2866_v51  ;;  %v2904_v58 = vpop.f32.mrf.mxu2  ;;  %v9566_v51 = vld [vmem:[%s17279_s4 + $0x2bc] sm:$0xf0]  ;;  %v9614_v54 = vld [vmem:[%s17279_s4 + $0x314] sm:$0xf0] }
 0x2b8   : > { %v2893_v61 = vpop.f32.mrf.mxu1  ;;  %v2905_v44 = vadd.f32 %v2904_v58, %v2892_v37  ;;  %v9569_v52 = vor.u32 %v11843_v40, %v9566_v51  ;;  %v9297_v58 = vor.u32 %v11774_v46, %v9294_v50  ;;  %v9617_v1 = vor.u32 %v11854_v41, %v9614_v54  ;;  %v11799_v46 = vld [vmem:[%s17279_s4 + $0x14c] sm:$0xf]  ;;  %v9500_v50 = vld [vmem:[%s17279_s4 + $0x218] sm:$0xf]  ;;  %v11852_v41 = vld [vmem:[%s17279_s4 + $0x2f0] sm:$0xf0] }
 0x2b9   : > { %v14752_v28 = vpack.c.bf16 %v2879_v57, %v2879_v57  ;;  %v11827_v40 = vld [vmem:[%s17279_s4 + $0x228] sm:$0xf0] }
 0x2ba   : > { %3742 = vmatpush.bf16.msra.mxu1 %v9569_v52  ;;  %v2173_v52 = vperm.slane %v14669_v9, 2  ;;  %v9501_v54 = vor.u32 %v11827_v40, %v9500_v50  ;;  %v9580_v9 = vld [vmem:[%s17279_s4 + $0x2b8] sm:$0xf]  ;;  %v9392_v50 = vld [vmem:[%s17279_s4 + $0x148] sm:$0xf] }
 0x2bb   : > { %3679 = vmatmul.bf16.vlgmr.msra.gmra.mxu3 %v14752_v28  ;;  %3718 = vmatmul.bf16.vlgmr.msrb.gmra.mxu2 %v14752_v28  ;;  %v11801_v40 = vld [vmem:[%s17279_s4 + $0x158] sm:$0xf0] }
 0x2bc   : > { %3788 = vmatpush.bf16.msra.mxu3 %v9377_v63  ;;  %3801 = vmatpush.bf16.msrb.mxu2 %v9537_v14  ;;  %v9274_v63 = vld [vmem:[%s17279_s4 + $0x6c] sm:$0xf0]  ;;  %v9597_v14 = vor.u32 %v11849_v3, %v9594_v5 }
 0x2bd   : > { %v2917_v19 = vpop.f32.mrf.mxu3  ;;  %v9277_v7 = vor.u32 %v11769_v59, %v9274_v63  ;;  %v9460_v63 = vld [vmem:[%s17279_s4 + $0x1c8] sm:$0xf]  ;;  %v9560_v3 = vld [vmem:[%s17279_s4 + $0x290] sm:$0xf] }
 0x2be   : > { %v2880_v24 = vpop.f32.mrf.mxu0  ;;  %v2918_v48 = vadd.f32 %v2917_v19, %v2905_v44  ;;  %3743 = vmatpush.bf16.msra.mxu1 %v9549_v4  ;;  %v9574_v19 = vld [vmem:[%s17279_s4 + $0x2c4] sm:$0xf0]  ;;  %v11832_v44 = vld [vmem:[%s17279_s4 + $0x250] sm:$0xf0]  ;;  %v9461_v6 = vor.u32 %v11817_v0, %v9460_v63  ;;  %v9280_v0 = vld [vmem:[%s17279_s4 + $0x60] sm:$0xf] }
 0x2bf   : > { %v2906_v29 = vpop.f32.mrf.mxu2  ;;  %v11759_v24 = vld [vmem:[%s17279_s4 + $0xc] sm:$0xf] }
 0x2c0   : > { %3789 = vmatpush.bf16.msra.mxu3 %v9357_v12  ;;  %v2943_v32 = vpop.f32.mrf.mxu1  ;;  %3802 = vmatpush.bf16.msrb.mxu2 %v9517_v30  ;;  %v9254_v12 = vld [vmem:[%s17279_s4 + $0x44] sm:$0xf0]  ;;  %v9577_v29 = vor.u32 %v11844_v16, %v9574_v19  ;;  %v11839_v30 = vld [vmem:[%s17279_s4 + $0x28c] sm:$0xf]  ;;  %v9237_v37 = vor.u32 %v11759_v24, %v9234_v25  ;;  %v9512_v19 = vld [vmem:[%s17279_s4 + $0x238] sm:$0xf] }
 0x2c1   : > { %v9257_v22 = vor.u32 %v11764_v11, %v9254_v12  ;;  %v9440_v11 = vld [vmem:[%s17279_s4 + $0x1a0] sm:$0xf]  ;;  %v11812_v12 = vld [vmem:[%s17279_s4 + $0x1b0] sm:$0xf0]  ;;  %v9513_v26 = vor.u32 %v11831_v21, %v9512_v19  ;;  %v11872_v19 = vld [vmem:[#allocation14 + $0x70] sm:$0xff] }
 0x2c2   : > { %v11871_v21 = vld [vmem:[#allocation14 + $0x68] sm:$0xff] }
 0x2c4   : > { %3790 = vmatpush.bf16.msra.mxu3 %v9337_v18  ;;  %3803 = vmatpush.bf16.msrb.mxu2 %v9497_v47  ;;  %v11804_v18 = vld [vmem:[%s17279_s4 + $0x174] sm:$0xf]  ;;  %v9394_v47 = vld [vmem:[%s17279_s4 + $0x15c] sm:$0xf0] }
 0x2c5   : > { %v2919_v49 = vpop.f32.mrf.mxu3  ;;  %v9417_v38 = vor.u32 %v11804_v18, %v9414_v33  ;;  %v11802_v18 = vld [vmem:[%s17279_s4 + $0x160] sm:$0xf0] }
 0x2c6   : > { %v2930_v62 = vpop.f32.mrf.mxu0  ;;  %v9521_v49 = vor.u32 %v11832_v44, %v9520_v43  ;;  %v9452_v43 = vld [vmem:[%s17279_s4 + $0x1c0] sm:$0xf]  ;;  %v11816_v44 = vld [vmem:[%s17279_s4 + $0x1d0] sm:$0xf0] }
 0x2c7   : > { %v2931_v31 = vadd.f32 %v2930_v62, %v2918_v48  ;;  %v14833_v53 = vpop.f32.mrf.mxu2  ;;  %v9397_v48 = vor.u32 %v11799_v46, %v9394_v47  ;;  %v9600_v62 = vld [vmem:[%s17279_s4 + $0x2e0] sm:$0xf]  ;;  %v9412_v47 = vld [vmem:[%s17279_s4 + $0x170] sm:$0xf] }
 0x2c8   : > { %3791 = vmatpush.bf16.msra.mxu3 %v9317_v36  ;;  %v2945_v57 = vpop.f32.mrf.mxu1  ;;  %3804 = vmatpush.bf16.msrb.mxu2 %v9477_v60  ;;  %v11857_v36 = vld [vmem:[%s17279_s4 + $0x318] sm:$0xf0]  ;;  %v2957_v59 = vadd.f32 %v14833_v53, %v2173_v52  ;;  %v9481_v60 = vor.u32 %v11822_v56, %v9480_v55  ;;  %v11842_v53 = vld [vmem:[%s17279_s4 + $0x2a0] sm:$0xf0]  ;;  %v9340_v56 = vld [vmem:[%s17279_s4 + $0xd8] sm:$0xf] }
 0x2c9   : > { %v2944_v61 = vadd.f32 %v2943_v32, %v2931_v31  ;;  %v9554_v32 = vld [vmem:[%s17279_s4 + $0x29c] sm:$0xf0]  ;;  %v9621_v51 = vor.u32 %v11857_v36, %v9620_v45  ;;  %v9601_v57 = vor.u32 %v11852_v41, %v9600_v62  ;;  %v9432_v45 = vld [vmem:[%s17279_s4 + $0x198] sm:$0xf]  ;;  %v11811_v36 = vld [vmem:[%s17279_s4 + $0x1a8] sm:$0xf0]  ;;  %v9393_v41 = vor.u32 %v11801_v40, %v9392_v50 }
 0x2ca   : > { %v9557_v34 = vor.u32 %v11839_v30, %v9554_v32  ;;  %v11826_v30 = vld [vmem:[%s17279_s4 + $0x220] sm:$0xf0]  ;;  %v9400_v32 = vld [vmem:[%s17279_s4 + $0x150] sm:$0xf]  ;;  %v9433_v46 = vor.u32 %v11811_v36, %v9432_v45  ;;  %v11797_v62 = vld [vmem:[%s17279_s4 + $0x138] sm:$0xf0] }
 0x2cb   : > { %v14859_v35 = vpack.c.bf16 %v2944_v61, %v2944_v61  ;;  %v11866_v36 = vld [vmem:[#allocation14 + $0x40] sm:$0xff]  ;;  %v11877_v50 = vld [vmem:[#allocation14 + $0x98] sm:$0xff]  ;;  %v9929_v40 = vld [vmem:[%s17235_s1 + $0x118] sm:$0xf] }
 0x2cc   : > { %3792 = vmatpush.bf16.msra.mxu3 %v9297_v58  ;;  %3805 = vmatpush.bf16.msrb.mxu2 %v9457_v8  ;;  %v11847_v58 = vld [vmem:[%s17279_s4 + $0x2c8] sm:$0xf0] }
 0x2cd   : > { %v14870_v10 = vpop.f32.mrf.mxu3  ;;  %3692 = vmatmul.bf16.vlgmr.msrb.gmra.mxu0 %v14859_v35  ;;  %3731 = vmatmul.bf16.vlgmr.msrb.gmra.mxu3 %v14859_v35  ;;  %v9581_v2 = vor.u32 %v11847_v58, %v9580_v9  ;;  %v9320_v58 = vld [vmem:[%s17279_s4 + $0xb0] sm:$0xf] }
 0x2ce   : > { %v2932_v13 = vpop.f32.mrf.mxu0  ;;  %3818 = vmatpush.bf16.msrb.mxu0 %v9617_v1  ;;  %v2970_v61 = vadd.f32 %v14870_v10, %v2957_v59  ;;  %v11836_v10 = vld [vmem:[%s17279_s4 + $0x270] sm:$0xf0]  ;;  %v11782_v59 = vld [vmem:[%s17279_s4 + $0xc0] sm:$0xf0] }
 0x2cf   : > { %v2958_v17 = vpop.f32.mrf.mxu2  ;;  %v9561_v13 = vor.u32 %v11842_v53, %v9560_v3  ;;  %v9260_v3 = vld [vmem:[%s17279_s4 + $0x38] sm:$0xf]  ;;  %v11767_v53 = vld [vmem:[%s17279_s4 + $0x48] sm:$0xf0] }
 0x2d0   : > { %3793 = vmatpush.bf16.msra.mxu3 %v9277_v7  ;;  %3806 = vmatpush.bf16.msrb.mxu2 %v9437_v23  ;;  %v9532_v7 = vld [vmem:[%s17279_s4 + $0x260] sm:$0xf]  ;;  %v9441_v17 = vor.u32 %v11812_v12, %v9440_v11  ;;  %v11807_v23 = vld [vmem:[%s17279_s4 + $0x188] sm:$0xf0] }
 0x2d1   : > { %v9533_v16 = vor.u32 %v11836_v10, %v9532_v7  ;;  %v11865_v7 = vld [vmem:[#allocation14 + $0x38] sm:$0xff]  ;;  %v11863_v10 = vld [vmem:[#allocation14 + $0x28] sm:$0xff]  ;;  %v11862_v11 = vld [vmem:[#allocation14 + $0x20] sm:$0xff] }
 0x2d2   : > { %3819 = vmatpush.bf16.msrb.mxu0 %v9597_v14  ;;  %v11873_v12 = vld [vmem:[#allocation14 + $0x78] sm:$0xff] }
 0x2d4   : > { %3794 = vmatpush.bf16.msra.mxu3 %v9257_v22  ;;  %3807 = vmatpush.bf16.msrb.mxu2 %v9417_v38  ;;  %v9420_v22 = vld [vmem:[%s17279_s4 + $0x178] sm:$0xf]  ;;  %v9472_v38 = vld [vmem:[%s17279_s4 + $0x1e8] sm:$0xf] }
 0x2d5   : > { %v2971_v15 = vpop.f32.mrf.mxu3  ;;  %v9421_v27 = vor.u32 %v11807_v23, %v9420_v22 }
 0x2d6   : > { %3820 = vmatpush.bf16.msrb.mxu0 %v9577_v29  ;;  %v9492_v29 = vld [vmem:[%s17279_s4 + $0x210] sm:$0xf]  ;;  %v11821_v15 = vld [vmem:[%s17279_s4 + $0x1f8] sm:$0xf0] }
 0x2d7   : > { %v9493_v33 = vor.u32 %v11826_v30, %v9492_v29  ;;  %v11869_v29 = vld [vmem:[#allocation14 + $0x58] sm:$0xff]  ;;  %v11887_v30 = vld [vmem:[#allocation14 + $0xe8] sm:$0xff] }
 0x2d8   : > { %3795 = vmatpush.bf16.msra.mxu3 %v9237_v37  ;;  %3808 = vmatpush.bf16.msrb.mxu2 %v9397_v48  ;;  %v9401_v37 = vor.u32 %v11802_v18, %v9400_v32  ;;  %v11806_v48 = vld [vmem:[%s17279_s4 + $0x180] sm:$0xf0] }
 0x2d9   : > { %v11881_v18 = vld [vmem:[#allocation14 + $0xb8] sm:$0xff] }
 0x2da   : > { %3821 = vmatpush.bf16.msrb.mxu0 %v9557_v34  ;;  %v9453_v34 = vor.u32 %v11816_v44, %v9452_v43  ;;  %v11885_v43 = vld [vmem:[#allocation14 + $0xd8] sm:$0xff] }
 0x2dc   : > { %3840 = vmatpush.bf16.msrb.mxu3 %v9541_v39  ;;  %v9473_v39 = vor.u32 %v11821_v15, %v9472_v38  ;;  %v11886_v38 = vld [vmem:[#allocation14 + $0xe0] sm:$0xff]  ;;  %v11880_v15 = vld [vmem:[#allocation14 + $0xb0] sm:$0xff] }
 0x2dd   : > { %3757 = vmatmul.bf16.vlgmr.msra.gmra.mxu0 %v14752_v28  ;;  %3796 = vmatmul.bf16.vlgmr.msra.gmra.mxu3 %v14752_v28 }
 0x2de   : > { %3857 = vmatpush.bf16.msra.mxu0 %v9621_v51  ;;  %v9380_v51 = vld [vmem:[%s17279_s4 + $0x128] sm:$0xf] }
 0x2df   : > { %v9381_v52 = vor.u32 %v11797_v62, %v9380_v51  ;;  %v11935_v51 = vld [vmem:[%s17235_s1 + $0x128] sm:$0xf0] }
 0x2e0   : > { %v2995_v31 = vpop.f32.mrf.mxu1  ;;  %3841 = vmatpush.bf16.msrb.mxu3 %v9521_v49  ;;  %v9413_v49 = vor.u32 %v11806_v48, %v9412_v47  ;;  %v11878_v47 = vld [vmem:[#allocation14 + $0xa0] sm:$0xff]  ;;  %v11883_v48 = vld [vmem:[#allocation14 + $0xc8] sm:$0xff] }
 0x2e2   : > { %3858 = vmatpush.bf16.msra.mxu0 %v9601_v57  ;;  %v11787_v57 = vld [vmem:[%s17279_s4 + $0xe8] sm:$0xf0] }
 0x2e3   : > { %v9341_v9 = vor.u32 %v11787_v57, %v9340_v56  ;;  %v11876_v56 = vld [vmem:[#allocation14 + $0x90] sm:$0xff]  ;;  %v9909_v57 = vld [vmem:[%s17235_s1 + $0xf0] sm:$0xf] }
 0x2e4   : > { %3842 = vmatpush.bf16.msrb.mxu3 %v9501_v54  ;;  %v11792_v54 = vld [vmem:[%s17279_s4 + $0x110] sm:$0xf0] }
 0x2e6   : > { %v2982_v1 = vpop.f32.mrf.mxu0  ;;  %3859 = vmatpush.bf16.msra.mxu0 %v9581_v2  ;;  %v11772_v2 = vld [vmem:[%s17279_s4 + $0x70] sm:$0xf0] }
 0x2e7   : > { %v2983_v4 = vadd.f32 %v2982_v1, %v2970_v61  ;;  %v3008_v5 = vpop.f32.mrf.mxu2  ;;  %v9300_v61 = vld [vmem:[%s17279_s4 + $0x88] sm:$0xf]  ;;  %v9281_v1 = vor.u32 %v11772_v2, %v9280_v0  ;;  %v11925_v0 = vld [vmem:[%s17235_s1 + $0xd8] sm:$0xf0] }
 0x2e8   : > { %v2997_v42 = vpop.f32.mrf.mxu1  ;;  %3843 = vmatpush.bf16.msrb.mxu3 %v9481_v60  ;;  %v9321_v60 = vor.u32 %v11782_v59, %v9320_v58  ;;  %v11896_v58 = vld [vmem:[#allocation14 + $0x130] sm:$0xff] }
 0x2e9   : > { %v2996_v8 = vadd.f32 %v2995_v31, %v2983_v4  ;;  %v9360_v31 = vld [vmem:[%s17279_s4 + $0x100] sm:$0xf]  ;;  %v9261_v4 = vor.u32 %v11767_v53, %v9260_v3  ;;  %v11762_v42 = vld [vmem:[%s17279_s4 + $0x20] sm:$0xf0]  ;;  %v11895_v3 = vld [vmem:[#allocation14 + $0x128] sm:$0xff] }
 0x2ea   : > { %3860 = vmatpush.bf16.msra.mxu0 %v9561_v13  ;;  %v9361_v55 = vor.u32 %v11792_v54, %v9360_v31  ;;  %v11861_v13 = vld [vmem:[#allocation14 + $0x18] sm:$0xff] }
 0x2eb   : > { %v3009_v14 = vadd.f32 %v3008_v5, %v2996_v8  ;;  %v9240_v5 = vld [vmem:[%s17279_s4 + $0x10] sm:$0xf]  ;;  %v11864_v8 = vld [vmem:[#allocation14 + $0x30] sm:$0xff] }
 0x2ec   : > { %3844 = vmatpush.bf16.msrb.mxu3 %v9461_v6  ;;  %v9241_v6 = vor.u32 %v11762_v42, %v9240_v5 }
 0x2ed   : > { %v3014_v20 = vpack.c.bf16 %v3009_v14, %v3009_v14 }
 0x2ee   : > { %v2984_v24 = vpop.f32.mrf.mxu0 }
 0x2ef   : > { %v3010_v25 = vpop.f32.mrf.mxu2  ;;  %9622 = vmatmul.msk.bf16.vlgmr.msrb.gmra.mxu1 %vm3667_vm0, %v3014_v20  ;;  %9624 = vmatmul.msk.bf16.vlgmr.msra.gmra.mxu2 %vm3667_vm0, %v3014_v20 }
 0x2f0   : > { %3762 = vmatpush.bf16.msrb.mxu1 %v9533_v16  ;;  %3845 = vmatpush.bf16.msrb.mxu3 %v9441_v17  ;;  %v11860_v17 = vld [vmem:[#allocation14 + $0x10] sm:$0xff]  ;;  %v11858_v25 = vld [vmem:[#allocation14] sm:$0xff] }
 0x2f1   : > { %9625 = vmatmul.msk.bf16.vlgmr.msrb.gmra.mxu0 %vm3667_vm0, %v3014_v20  ;;  %4195 = vmatpush.bf16.msra.mxu2 %v11865_v7  ;;  %v9869_v7 = vld [vmem:[%s17235_s1 + $0xa0] sm:$0xf] }
 0x2f2   : > { %4208 = vmatpush.bf16.msrb.mxu0 %v11873_v12  ;;  %v9937_v12 = vld [vmem:[%s17235_s1 + $0x120] sm:$0xf] }
 0x2f4   : > { %3763 = vmatpush.bf16.msrb.mxu1 %v9513_v26  ;;  %3846 = vmatpush.bf16.msrb.mxu3 %v9421_v27  ;;  %v11870_v26 = vld [vmem:[#allocation14 + $0x60] sm:$0xff]  ;;  %v11888_v27 = vld [vmem:[#allocation14 + $0xf0] sm:$0xff] }
 0x2f5   : > { %4196 = vmatpush.bf16.msra.mxu2 %v11864_v8  ;;  %v11920_v8 = vld [vmem:[%s17235_s1 + $0xb0] sm:$0xf0] }
 0x2f6   : > { %4209 = vmatpush.bf16.msrb.mxu0 %v11872_v19  ;;  %v9849_v19 = vld [vmem:[%s17235_s1 + $0x78] sm:$0xf] }
 0x2f8   : > { %3764 = vmatpush.bf16.msrb.mxu1 %v9493_v33  ;;  %3847 = vmatpush.bf16.msrb.mxu3 %v9401_v37  ;;  %v11868_v37 = vld [vmem:[#allocation14 + $0x50] sm:$0xff] }
 0x2f9   : > { %4197 = vmatpush.bf16.msra.mxu2 %v11863_v10  ;;  %v11894_v10 = vld [vmem:[#allocation14 + $0x120] sm:$0xff] }
 0x2fa   : > { %4210 = vmatpush.bf16.msrb.mxu0 %v11871_v21  ;;  %v11893_v21 = vld [vmem:[#allocation14 + $0x118] sm:$0xff] }
 0x2fb   : > { %3848 = vmatmul.bf16.vlgmr.msrb.gmra.mxu3 %v14859_v35 }
 0x2fc   : > { %3765 = vmatpush.bf16.msrb.mxu1 %v9473_v39  ;;  %v11867_v39 = vld [vmem:[#allocation14 + $0x48] sm:$0xff] }
 0x2fd   : > { %4198 = vmatpush.bf16.msra.mxu2 %v11862_v11  ;;  %v9870_v11 = vor.u32 %v11920_v8, %v9869_v7 }
 0x2fe   : > { %4211 = vmatpush.bf16.msrb.mxu0 %v11870_v26 }
 0x2ff   : > { %9623 = vmatmul.msk.bf16.vlgmr.msra.gmra.mxu1 %vm3667_vm0, %v3014_v20  ;;  %3809 = vmatmul.bf16.vlgmr.msrb.gmra.mxu2 %v14859_v35 }
 0x300   : > { %3766 = vmatpush.bf16.msrb.mxu1 %v9453_v34  ;;  %v11879_v34 = vld [vmem:[#allocation14 + $0xa8] sm:$0xff] }
 0x301   : > { %9626 = vmatmul.msk.bf16.vlgmr.msra.gmra.mxu0 %vm3667_vm0, %v3014_v20  ;;  %4199 = vmatpush.bf16.msra.mxu2 %v11861_v13  ;;  %v11889_v20 = vld [vmem:[#allocation14 + $0xf8] sm:$0xff]  ;;  %v11936_v13 = vld [vmem:[%s17235_s1 + $0x130] sm:$0xf0] }
 0x302   : > { %4234 = vmatpush.bf16.msra.mxu3 %v11889_v20  ;;  %4212 = vmatpush.bf16.msrb.mxu0 %v11869_v29  ;;  %v11915_v20 = vld [vmem:[%s17235_s1 + $0x88] sm:$0xf0] }
 0x303   : > { %v11931_v29 = vld [vmem:[%s17235_s1 + $0x108] sm:$0xf0] }
 0x304   : > { %3767 = vmatpush.bf16.msrb.mxu1 %v9433_v46  ;;  %v11884_v46 = vld [vmem:[#allocation14 + $0xd0] sm:$0xff] }
 0x305   : > { %4200 = vmatpush.bf16.msra.mxu2 %v11860_v17 }
 0x306   : > { %4235 = vmatpush.bf16.msra.mxu3 %v11888_v27  ;;  %4213 = vmatpush.bf16.msrb.mxu0 %v11868_v37  ;;  %v9917_v27 = vld [vmem:[%s17235_s1 + $0xf8] sm:$0xf]  ;;  %v9829_v37 = vld [vmem:[%s17235_s1 + $0x50] sm:$0xf] }
 0x308   : > { %3768 = vmatpush.bf16.msrb.mxu1 %v9413_v49  ;;  %v15106_v49 = vld [vmem:[#allocation13] sm:$0x1f] }
 0x309   : > { %v3137_v31 = vperm.slane %v15106_v49, 0 }
 0x30a   : > { %4236 = vmatpush.bf16.msra.mxu3 %v11887_v30  ;;  %4214 = vmatpush.bf16.msrb.mxu0 %v11867_v39  ;;  %v11892_v30 = vld [vmem:[#allocation14 + $0x110] sm:$0xff] }
 0x30c   : > { %3769 = vmatpush.bf16.msrb.mxu1 %v9393_v41  ;;  %v11897_v41 = vld [vmem:[#allocation14 + $0x138] sm:$0xff] }
 0x30e   : > { %4237 = vmatpush.bf16.msra.mxu3 %v11886_v38  ;;  %4215 = vmatpush.bf16.msrb.mxu0 %v11866_v36  ;;  %v11910_v38 = vld [vmem:[%s17235_s1 + $0x60] sm:$0xf0] }
 0x30f   : > { %3770 = vmatmul.bf16.vlgmr.msrb.gmra.mxu1 %v14859_v35  ;;  %v11777_v35 = vld [vmem:[%s17279_s4 + $0x98] sm:$0xf0]  ;;  %v9830_v39 = vor.u32 %v11910_v38, %v9829_v37 }
 0x310   : > { %3827 = vmatpush.bf16.msra.mxu1 %v9381_v52  ;;  %v9301_v63 = vor.u32 %v11777_v35, %v9300_v61  ;;  %v9930_v52 = vor.u32 %v11935_v51, %v9929_v40  ;;  %v11875_v35 = vld [vmem:[#allocation14 + $0x88] sm:$0xff]  ;;  %v11923_v40 = vld [vmem:[%s17235_s1 + $0xcc] sm:$0xf]  ;;  %v9891_v51 = vld [vmem:[%s17235_s1 + $0xdc] sm:$0xf0] }
 0x312   : > { %4238 = vmatpush.bf16.msra.mxu3 %v11885_v43  ;;  %4531 = vmatpush.bf16.msra.mxu0 %v9930_v52  ;;  %v9911_v43 = vld [vmem:[%s17235_s1 + $0x104] sm:$0xf0]  ;;  %v3140_v52 = vperm.slane %v15106_v49, 3 }
 0x314   : > { %3828 = vmatpush.bf16.msra.mxu1 %v9361_v55  ;;  %v11882_v55 = vld [vmem:[#allocation14 + $0xc0] sm:$0xff] }
 0x316   : > { %4239 = vmatpush.bf16.msra.mxu3 %v11884_v46 }
 0x318   : > { %3829 = vmatpush.bf16.msra.mxu1 %v9341_v9  ;;  %v11930_v9 = vld [vmem:[%s17235_s1 + $0x100] sm:$0xf0] }
 0x319   : > { %v9910_v59 = vor.u32 %v11930_v9, %v9909_v57  ;;  %v9894_v9 = vor.u32 %v11923_v40, %v9891_v51 }
 0x31a   : > { %4240 = vmatpush.bf16.msra.mxu3 %v11883_v48  ;;  %v11905_v48 = vld [vmem:[%s17235_s1 + $0x38] sm:$0xf0] }
 0x31b   : > { %4532 = vmatpush.bf16.msra.mxu0 %v9910_v59  ;;  %v11918_v59 = vld [vmem:[%s17235_s1 + $0xa4] sm:$0xf] }
 0x31c   : > { %3830 = vmatpush.bf16.msra.mxu1 %v9321_v60 }
 0x31e   : > { %4241 = vmatpush.bf16.msra.mxu3 %v11882_v55 }
 0x320   : > { %3831 = vmatpush.bf16.msra.mxu1 %v9301_v63  ;;  %v9889_v63 = vld [vmem:[%s17235_s1 + $0xc8] sm:$0xf] }
 0x321   : > { %v9890_v53 = vor.u32 %v11925_v0, %v9889_v63  ;;  %v11916_v63 = vld [vmem:[%s17235_s1 + $0x90] sm:$0xf0]  ;;  %v11934_v0 = vld [vmem:[%s17235_s1 + $0x124] sm:$0xf] }
 0x323   : > { %4533 = vmatpush.bf16.msra.mxu0 %v9890_v53  ;;  %v11937_v53 = vld [vmem:[%s17235_s1 + $0x138] sm:$0xf0] }
 0x324   : > { %3832 = vmatpush.bf16.msra.mxu1 %v9281_v1 }
 0x327   : > { %4534 = vmatpush.bf16.msra.mxu0 %v9870_v11 }
 0x328   : > { %3833 = vmatpush.bf16.msra.mxu1 %v9261_v4 }
 0x32c   : > { %3834 = vmatpush.bf16.msra.mxu1 %v9241_v6  ;;  %v11874_v6 = vld [vmem:[#allocation14 + $0x80] sm:$0xff] }
 0x32f   : > { %3835 = vmatmul.bf16.vlgmr.msra.gmra.mxu1 %v14752_v28  ;;  %v11859_v28 = vld [vmem:[#allocation14 + $0x8] sm:$0xff] }
 0x330   : > { %4201 = vmatpush.bf16.msra.mxu2 %v11859_v28  ;;  %4221 = vmatpush.bf16.msrb.mxu1 %v11881_v18 }
 0x334   : > { %4202 = vmatpush.bf16.msra.mxu2 %v11858_v25  ;;  %4222 = vmatpush.bf16.msrb.mxu1 %v11880_v15  ;;  %v3138_v25 = vperm.slane %v15106_v49, 1  ;;  %v11928_v15 = vld [vmem:[%s17235_s1 + $0xf4] sm:$0xf] }
 0x335   : > { %v9914_v36 = vor.u32 %v11928_v15, %v9911_v43 }
 0x338   : > { %4223 = vmatpush.bf16.msrb.mxu1 %v11879_v34  ;;  %4247 = vmatpush.bf16.msrb.mxu2 %v11897_v41  ;;  %v11926_v34 = vld [vmem:[%s17235_s1 + $0xe0] sm:$0xf0]  ;;  %v9877_v41 = vld [vmem:[%s17235_s1 + $0xa8] sm:$0xf] }
 0x33c   : > { %4224 = vmatpush.bf16.msrb.mxu1 %v11878_v47  ;;  %4248 = vmatpush.bf16.msrb.mxu2 %v11896_v58  ;;  %v9809_v47 = vld [vmem:[%s17235_s1 + $0x28] sm:$0xf]  ;;  %v11900_v58 = vld [vmem:[%s17235_s1 + $0x10] sm:$0xf0] }
 0x33d   : > { %v9810_v55 = vor.u32 %v11905_v48, %v9809_v47  ;;  %v11924_v47 = vld [vmem:[%s17235_s1 + $0xd4] sm:$0xf]  ;;  %v9899_v48 = vld [vmem:[%s17235_s1 + $0xe4] sm:$0xf0] }
 0x33e   : > { %v15098_v14 = vpop.f32.mrf.mxu3  ;;  %v15100_v16 = vpop.f32.mrf.mxu2  ;;  %v9902_v51 = vor.u32 %v11924_v47, %v9899_v48  ;;  %v11945_v47 = vld [vmem:[%s17237_s3 + $0x38] sm:$0xff]  ;;  %v11942_v48 = vld [vmem:[%s17237_s3 + $0x20] sm:$0xff] }
 0x33f   : > { %v3681_v60 = vadd.f32 %v15098_v14, %v3137_v31  ;;  %v9938_v14 = vor.u32 %v11936_v13, %v9937_v12  ;;  %v11913_v12 = vld [vmem:[%s17235_s1 + $0x7c] sm:$0xf]  ;;  %v9851_v13 = vld [vmem:[%s17235_s1 + $0x8c] sm:$0xf0] }
 0x340   : > { %4225 = vmatpush.bf16.msrb.mxu1 %v11877_v50  ;;  %4249 = vmatpush.bf16.msrb.mxu2 %v11895_v3  ;;  %v3720_v50 = vadd.f32 %v15100_v16, %v3138_v25  ;;  %v11921_v16 = vld [vmem:[%s17235_s1 + $0xb8] sm:$0xf0]  ;;  %v9945_v3 = vld [vmem:[%s17235_s1 + $0x128] sm:$0xf]  ;;  %v11932_v25 = vld [vmem:[%s17235_s1 + $0x110] sm:$0xf0] }
 0x341   : > { %4557 = vmatpush.bf16.msrb.mxu3 %v9938_v14 }
 0x344   : > { %4226 = vmatpush.bf16.msrb.mxu1 %v11876_v56  ;;  %4250 = vmatpush.bf16.msrb.mxu2 %v11894_v10  ;;  %v9789_v56 = vld [vmem:[%s17235_s1] sm:$0xf] }
 0x345   : > { %v9790_v7 = vor.u32 %v11900_v58, %v9789_v56  ;;  %v9811_v56 = vld [vmem:[%s17235_s1 + $0x3c] sm:$0xf0]  ;;  %v11901_v58 = vld [vmem:[%s17235_s1 + $0x18] sm:$0xf0] }
 0x346   : > { %v3682_v22 = vpop.f32.mrf.mxu3  ;;  %v3721_v23 = vpop.f32.mrf.mxu2 }
 0x347   : > { %v9850_v22 = vor.u32 %v11915_v20, %v9849_v19  ;;  %v11933_v23 = vld [vmem:[%s17235_s1 + $0x11c] sm:$0xf]  ;;  %v9946_v19 = vor.u32 %v11937_v53, %v9945_v3  ;;  %v9837_v20 = vld [vmem:[%s17235_s1 + $0x58] sm:$0xf]  ;;  %v11914_v53 = vld [vmem:[%s17235_s1 + $0x84] sm:$0xf] }
 0x348   : > { %4227 = vmatpush.bf16.msrb.mxu1 %v11875_v35  ;;  %4251 = vmatpush.bf16.msrb.mxu2 %v11893_v21  ;;  %v9878_v35 = vor.u32 %v11921_v16, %v9877_v41  ;;  %v9919_v21 = vld [vmem:[%s17235_s1 + $0x10c] sm:$0xf0]  ;;  %v9905_v41 = vld [vmem:[%s17235_s1 + $0xd8] sm:$0xf]  ;;  %v11903_v16 = vld [vmem:[%s17235_s1 + $0x2c] sm:$0xf] }
 0x349   : > { %4535 = vmatpush.bf16.msra.mxu0 %v9850_v22  ;;  %v9791_v3 = vld [vmem:[%s17235_s1 + $0x14] sm:$0xf0] }
 0x34a   : > { %v3693_v24 = vpop.f32.mrf.mxu0 }
 0x34b   : > { %v3694_v61 = vadd.f32 %v3693_v24, %v3681_v60  ;;  %v9931_v24 = vld [vmem:[%s17235_s1 + $0x12c] sm:$0xf0]  ;;  %v9871_v60 = vld [vmem:[%s17235_s1 + $0xb4] sm:$0xf0] }
 0x34c   : > { %4228 = vmatpush.bf16.msrb.mxu1 %v11874_v6  ;;  %v9934_v26 = vor.u32 %v11933_v23, %v9931_v24  ;;  %4252 = vmatpush.bf16.msrb.mxu2 %v11892_v30  ;;  %v11890_v6 = vld [vmem:[#allocation14 + $0x100] sm:$0xff]  ;;  %v9874_v10 = vor.u32 %v11918_v59, %v9871_v60  ;;  %v9925_v24 = vld [vmem:[%s17235_s1 + $0x100] sm:$0xf] }
 0x34d   : > { %4536 = vmatpush.bf16.msra.mxu0 %v9830_v39  ;;  %v11911_v23 = vld [vmem:[%s17235_s1 + $0x68] sm:$0xf0]  ;;  %v3139_v39 = vperm.slane %v15106_v49, 2  ;;  %v9879_v60 = vld [vmem:[%s17235_s1 + $0xbc] sm:$0xf0] }
 0x34e   : > { %v11919_v59 = vld [vmem:[%s17235_s1 + $0xac] sm:$0xf] }
 0x350   : > { %v15102_v32 = vpop.f32.mrf.mxu3  ;;  %4544 = vmatpush.bf16.msra.mxu1 %v9934_v26 }
 0x351   : > { %v3733_v57 = vadd.f32 %v15102_v32, %v3720_v50  ;;  %v9857_v32 = vld [vmem:[%s17235_s1 + $0x80] sm:$0xf]  ;;  %4537 = vmatpush.bf16.msra.mxu0 %v9810_v55 }
 0x352   : > { %v3695_v33 = vpop.f32.mrf.mxu0  ;;  %v9858_v14 = vor.u32 %v11916_v63, %v9857_v32  ;;  %v9885_v32 = vld [vmem:[%s17235_s1 + $0xb0] sm:$0xf]  ;;  %v11922_v63 = vld [vmem:[%s17235_s1 + $0xc0] sm:$0xf0] }
 0x353   : > { %v9918_v33 = vor.u32 %v11931_v29, %v9917_v27 }
 0x354   : > { %4545 = vmatpush.bf16.msra.mxu1 %v9914_v36 }
 0x355   : > { %4558 = vmatpush.bf16.msrb.mxu3 %v9918_v33  ;;  %4538 = vmatpush.bf16.msra.mxu0 %v9790_v7  ;;  %v9926_v33 = vor.u32 %v11932_v25, %v9925_v24  ;;  %v15325_v7 = vld [vmem:[%s13049_s2 + $0x4] sm:$0xf]  ;;  %v11904_v24 = vld [vmem:[%s17235_s1 + $0x34] sm:$0xf]  ;;  %v9819_v25 = vld [vmem:[%s17235_s1 + $0x44] sm:$0xf0] }
 0x358   : > { %v3734_v44 = vpop.f32.mrf.mxu3  ;;  %4546 = vmatpush.bf16.msra.mxu1 %v9894_v9 }
 0x359   : > { %v9897_v44 = vld [vmem:[%s17235_s1 + $0xd0] sm:$0xf] }
 0x35a   : > { %v15104_v45 = vpop.f32.mrf.mxu0  ;;  %v9898_v46 = vor.u32 %v11926_v34, %v9897_v44  ;;  %v11908_v44 = vld [vmem:[%s17235_s1 + $0x54] sm:$0xf]  ;;  %v9831_v34 = vld [vmem:[%s17235_s1 + $0x64] sm:$0xf0] }
 0x35b   : > { %v9834_v36 = vor.u32 %v11908_v44, %v9831_v34 }
 0x35c   : > { %4559 = vmatpush.bf16.msrb.mxu3 %v9898_v46  ;;  %4547 = vmatpush.bf16.msra.mxu1 %v9874_v10  ;;  %v11906_v46 = vld [vmem:[%s17235_s1 + $0x40] sm:$0xf0]  ;;  %v9865_v10 = vld [vmem:[%s17235_s1 + $0x88] sm:$0xf] }
 0x360   : > { %v15114_v62 = vpop.f32.mrf.mxu3  ;;  %4560 = vmatpush.bf16.msrb.mxu3 %v9878_v35  ;;  %v9882_v35 = vor.u32 %v11919_v59, %v9879_v60  ;;  %v11950_v59 = vld [vmem:[%s17237_s3 + $0x60] sm:$0xff]  ;;  %v11977_v60 = vld [vmem:[%s17237_s3 + $0x138] sm:$0xff] }
 0x361   : > { %v3798_v22 = vadd.f32 %v15114_v62, %v3140_v52  ;;  %v9854_v62 = vor.u32 %v11913_v12, %v9851_v13  ;;  %v11927_v52 = vld [vmem:[%s17235_s1 + $0xe8] sm:$0xf0]  ;;  %v11917_v12 = vld [vmem:[%s17235_s1 + $0x98] sm:$0xf0] }
 0x362   : > { %v3760_v54 = vpop.f32.mrf.mxu0  ;;  %v11909_v13 = vld [vmem:[%s17235_s1 + $0x5c] sm:$0xf] }
 0x363   : > { %v11891_v54 = vld [vmem:[#allocation14 + $0x108] sm:$0xff]  ;;  %4548 = vmatpush.bf16.msra.mxu1 %v9854_v62  ;;  %v9822_v62 = vor.u32 %v11904_v24, %v9819_v25  ;;  %v11954_v25 = vld [vmem:[%s17237_s3 + $0x80] sm:$0xff] }
 0x364   : > { %4253 = vmatpush.bf16.msrb.mxu2 %v11891_v54  ;;  %4561 = vmatpush.bf16.msrb.mxu3 %v9858_v14  ;;  %v9906_v54 = vor.u32 %v11927_v52, %v9905_v41  ;;  %v9839_v14 = vld [vmem:[%s17235_s1 + $0x6c] sm:$0xf0] }
 0x365   : > { %v11940_v41 = vld [vmem:[%s17237_s3 + $0x10] sm:$0xff] }
 0x366   : > { %v11952_v52 = vld [vmem:[%s17237_s3 + $0x70] sm:$0xff] }
 0x367   : > { %4549 = vmatpush.bf16.msra.mxu1 %v9834_v36 }
 0x368   : > { %v3799_v1 = vpop.f32.mrf.mxu3  ;;  %4254 = vmatpush.bf16.msrb.mxu2 %v11890_v6 }
 0x369   : > { %v9939_v1 = vld [vmem:[%s17235_s1 + $0x134] sm:$0xf0] }
 0x36a   : > { %v9942_v11 = vor.u32 %v11934_v0, %v9939_v1  ;;  %v11898_v1 = vld [vmem:[%s17235_s1 + $0x4] sm:$0xf] }
 0x36c   : > { %v3706_v2 = vpop.f32.mrf.mxu1 }
 0x36d   : > { %v3707_v4 = vadd.f32 %v3706_v2, %v3694_v61 }
 0x36e   : > { %v15130_v5 = vpop.f32.mrf.mxu0 }
 0x36f   : > { %v3866_v42 = vpack.c.bf16 %v3707_v4, %v3707_v4 }
 0x371   : > { %4203 = vmatmul.bf16.vlgmr.msra.gmra.mxu2 %v3866_v42 }
 0x372   : > { %v15144_v17 = vpop.f32.mrf.mxu2  ;;  %4570 = vmatpush.bf16.msra.mxu2 %v9942_v11 }
 0x374   : > { %v3708_v28 = vpop.f32.mrf.mxu1 }
 0x375   : > { %v11929_v28 = vld [vmem:[%s17235_s1 + $0xfc] sm:$0xf] }
 0x376   : > { %v3825_v18 = vpop.f32.mrf.mxu0  ;;  %v9922_v29 = vor.u32 %v11929_v28, %v9919_v21  ;;  %v11912_v28 = vld [vmem:[%s17235_s1 + $0x70] sm:$0xf0] }
 0x377   : > { %v9838_v18 = vor.u32 %v11911_v23, %v9837_v20  ;;  %v9845_v20 = vld [vmem:[%s17235_s1 + $0x60] sm:$0xf] }
 0x378   : > { %4571 = vmatpush.bf16.msra.mxu2 %v9922_v29  ;;  %v9846_v23 = vor.u32 %v11912_v28, %v9845_v20  ;;  %v11967_v20 = vld [vmem:[%s17237_s3 + $0xe8] sm:$0xff] }
 0x379   : > { %4562 = vmatpush.bf16.msrb.mxu3 %v9838_v18  ;;  %v9799_v18 = vld [vmem:[%s17235_s1 + $0x1c] sm:$0xf0] }
 0x37a   : > { %v3786_v31 = vpop.f32.mrf.mxu2 }
 0x37b   : > { %v3759_v31 = vadd.f32 %v15104_v45, %v3139_v39  ;;  %v9814_v45 = vor.u32 %v11903_v16, %v9811_v56  ;;  %v3141_v39 = vperm.slane %v15106_v49, 4  ;;  %v11944_v49 = vld [vmem:[%s17237_s3 + $0x30] sm:$0xff]  ;;  %v11939_v56 = vld [vmem:[%s17237_s3 + $0x8] sm:$0xff] }
 0x37c   : > { %v3745_v61 = vpop.f32.mrf.mxu1  ;;  %4572 = vmatpush.bf16.msra.mxu2 %v9902_v51  ;;  %v11961_v51 = vld [vmem:[%s17237_s3 + $0xb8] sm:$0xff] }
 0x37d   : > { %v3746_v2 = vadd.f32 %v3745_v61, %v3733_v57  ;;  %v9797_v57 = vld [vmem:[%s17235_s1 + $0x8] sm:$0xf]  ;;  %4550 = vmatpush.bf16.msra.mxu1 %v9814_v45  ;;  %v11968_v45 = vld [vmem:[%s17237_s3 + $0xf0] sm:$0xff] }
 0x37e   : > { %v15234_v4 = vpop.f32.mrf.mxu3  ;;  %v15236_v42 = vpop.f32.mrf.mxu0  ;;  %v9798_v61 = vor.u32 %v11901_v58, %v9797_v57  ;;  %v11951_v57 = vld [vmem:[%s17237_s3 + $0x68] sm:$0xff]  ;;  %v11938_v58 = vld [vmem:[%s17237_s3] sm:$0xff] }
 0x37f   : > { %v3867_v8 = vpack.c.bf16 %v3746_v2, %v3746_v2  ;;  %v9886_v2 = vor.u32 %v11922_v63, %v9885_v32  ;;  %v11949_v32 = vld [vmem:[%s17237_s3 + $0x58] sm:$0xff]  ;;  %v11976_v63 = vld [vmem:[%s17237_s3 + $0x130] sm:$0xff] }
 0x380   : > { %4573 = vmatpush.bf16.msra.mxu2 %v9882_v35 }
 0x381   : > { %4216 = vmatmul.bf16.vlgmr.msrb.gmra.mxu0 %v3867_v8  ;;  %v9859_v8 = vld [vmem:[%s17235_s1 + $0x94] sm:$0xf0] }
 0x382   : > { %v3810_v26 = vpop.f32.mrf.mxu2  ;;  %4583 = vmatpush.bf16.msrb.mxu0 %v9946_v19  ;;  %v9862_v11 = vor.u32 %v11914_v53, %v9859_v8  ;;  %v9866_v19 = vor.u32 %v11917_v12, %v9865_v10  ;;  %v11956_v53 = vld [vmem:[%s17237_s3 + $0x90] sm:$0xff]  ;;  %v11947_v8 = vld [vmem:[%s17237_s3 + $0x48] sm:$0xff] }
 0x383   : > { %v3811_v27 = vadd.f32 %v3810_v26, %v3798_v22  ;;  %v9842_v22 = vor.u32 %v11909_v13, %v9839_v14  ;;  %v9825_v26 = vld [vmem:[%s17235_s1 + $0x38] sm:$0xf] }
 0x384   : > { %v3747_v30 = vpop.f32.mrf.mxu1  ;;  %4574 = vmatpush.bf16.msra.mxu2 %v9862_v11  ;;  %v11974_v11 = vld [vmem:[%s17237_s3 + $0x120] sm:$0xff] }
 0x385   : > { %v3824_v37 = vadd.f32 %v15130_v5, %v3811_v27  ;;  %v9817_v5 = vld [vmem:[%s17235_s1 + $0x30] sm:$0xf]  ;;  %v11907_v27 = vld [vmem:[%s17235_s1 + $0x48] sm:$0xf0] }
 0x386   : > { %v3851_v38 = vpop.f32.mrf.mxu3  ;;  %v3864_v15 = vpop.f32.mrf.mxu0  ;;  %4584 = vmatpush.bf16.msrb.mxu0 %v9926_v33  ;;  %v9818_v40 = vor.u32 %v11906_v46, %v9817_v5  ;;  %v9826_v29 = vor.u32 %v11907_v27, %v9825_v26  ;;  %v11899_v30 = vld [vmem:[%s17235_s1 + $0xc] sm:$0xf]  ;;  %v9805_v33 = vld [vmem:[%s17235_s1 + $0x10] sm:$0xf]  ;;  %v11966_v26 = vld [vmem:[%s17237_s3 + $0xe0] sm:$0xff] }
 0x387   : > { %v3869_v43 = vpack.c.bf16 %v3824_v37, %v3824_v37  ;;  %v11902_v37 = vld [vmem:[%s17235_s1 + $0x20] sm:$0xf0]  ;;  %v9802_v38 = vor.u32 %v11899_v30, %v9799_v18  ;;  %v11965_v30 = vld [vmem:[%s17237_s3 + $0xd8] sm:$0xff] }
 0x388   : > { %4563 = vmatpush.bf16.msrb.mxu3 %v9818_v40  ;;  %4575 = vmatpush.bf16.msra.mxu2 %v9842_v22  ;;  %v9806_v15 = vor.u32 %v11902_v37, %v9805_v33  ;;  %v11953_v40 = vld [vmem:[%s17237_s3 + $0x78] sm:$0xff]  ;;  %v11946_v22 = vld [vmem:[%s17237_s3 + $0x40] sm:$0xff] }
 0x389   : > { %4242 = vmatmul.bf16.vlgmr.msra.gmra.mxu3 %v3869_v43 }
 0x38a   : > { %v3812_v50 = vpop.f32.mrf.mxu2  ;;  %4585 = vmatpush.bf16.msrb.mxu0 %v9906_v54 }
 0x38b   : > { %v11941_v50 = vld [vmem:[%s17237_s3 + $0x18] sm:$0xff] }
 0x38c   : > { %v3771_v55 = vpop.f32.mrf.mxu1  ;;  %4564 = vmatpush.bf16.msrb.mxu3 %v9798_v61  ;;  %4576 = vmatpush.bf16.msra.mxu2 %v9822_v62  ;;  %v11958_v61 = vld [vmem:[%s17237_s3 + $0xa0] sm:$0xff] }
 0x38d   : > { %v3772_v9 = vadd.f32 %v3771_v55, %v3759_v31  ;;  %v11960_v31 = vld [vmem:[%s17237_s3 + $0xb0] sm:$0xff]  ;;  %v11969_v55 = vld [vmem:[%s17237_s3 + $0xf8] sm:$0xff] }
 0x38e   : > { %4586 = vmatpush.bf16.msrb.mxu0 %v9886_v2  ;;  %v15450_v2 = vld [vmem:[#allocation5] sm:$0x1f] }
 0x38f   : > { %v3785_v0 = vadd.f32 %v15144_v17, %v3772_v9  ;;  %v9794_v17 = vor.u32 %v11898_v1, %v9791_v3  ;;  %v11959_v9 = vld [vmem:[%s17237_s3 + $0xa8] sm:$0xff]  ;;  %v11948_v1 = vld [vmem:[%s17237_s3 + $0x50] sm:$0xff]  ;;  %v4315_v62 = vperm.slane %v15450_v2, 2  ;;  %v4314_v33 = vperm.slane %v15450_v2, 1 }
 0x390   : > { %4577 = vmatpush.bf16.msra.mxu2 %v9802_v38  ;;  %4943 = vmatpush.bf16.msra.mxu3 %v11953_v40  ;;  %v11975_v3 = vld [vmem:[%s17237_s3 + $0x128] sm:$0xff] }
 0x391   : > { %v3868_v6 = vpack.c.bf16 %v3785_v0, %v3785_v0  ;;  %4539 = vmatmul.bf16.vlgmr.msra.gmra.mxu0 %v15325_v7  ;;  %4551 = vmatpush.bf16.msra.mxu1 %v9794_v17  ;;  %v11957_v0 = vld [vmem:[%s17237_s3 + $0x98] sm:$0xff]  ;;  %v4313_v17 = vperm.slane %v15450_v2, 0  ;;  %v11971_v38 = vld [vmem:[%s17237_s3 + $0x108] sm:$0xff] }
 0x392   : > { %4587 = vmatpush.bf16.msrb.mxu0 %v9866_v19  ;;  %v11955_v19 = vld [vmem:[%s17237_s3 + $0x88] sm:$0xff] }
 0x393   : > { %4229 = vmatmul.bf16.vlgmr.msrb.gmra.mxu1 %v3868_v6 }
 0x394   : > { %v3773_v21 = vpop.f32.mrf.mxu1  ;;  %4944 = vmatpush.bf16.msra.mxu3 %v11952_v52  ;;  %v12453_v52 = vld [vmem:[#allocation16] ss:$0 sm:$0xff] }
 0x395   : > { %4930 = vmatpush.bf16.msrb.mxu1 %v11945_v47 }
 0x396   : > { %4588 = vmatpush.bf16.msrb.mxu0 %v9846_v23  ;;  %v11973_v23 = vld [vmem:[%s17237_s3 + $0x118] sm:$0xff] }
 0x398   : > { %4945 = vmatpush.bf16.msra.mxu3 %v11951_v57  ;;  %v12055_v57 = vld [vmem:[#allocation8 + $0x128] sm:$0xf0] }
 0x399   : > { %4565 = vmatmul.bf16.vlgmr.msrb.gmra.mxu3 %v15325_v7  ;;  %4931 = vmatpush.bf16.msrb.mxu1 %v11944_v49 }
 0x39a   : > { %4589 = vmatpush.bf16.msrb.mxu0 %v9826_v29  ;;  %v11972_v29 = vld [vmem:[%s17237_s3 + $0x110] sm:$0xff] }
 0x39c   : > { %4946 = vmatpush.bf16.msra.mxu3 %v11950_v59  ;;  %v12050_v59 = vld [vmem:[#allocation8 + $0x100] sm:$0xf0] }
 0x39e   : > { %4590 = vmatpush.bf16.msrb.mxu0 %v9806_v15  ;;  %v11964_v15 = vld [vmem:[%s17237_s3 + $0xd0] sm:$0xff] }
 0x3a0   : > { %4947 = vmatpush.bf16.msra.mxu3 %v11949_v32  ;;  %v10251_v32 = vld [vmem:[#allocation8 + $0x12c] sm:$0xf0] }
 0x3a1   : > { %4591 = vmatmul.bf16.vlgmr.msrb.gmra.mxu0 %v15325_v7 }
 0x3a2   : > { %4969 = vmatpush.bf16.msra.mxu0 %v11969_v55 }
 0x3a3   : > { %4552 = vmatmul.bf16.vlgmr.msra.gmra.mxu1 %v15325_v7 }
 0x3a4   : > { %4948 = vmatpush.bf16.msra.mxu3 %v11948_v1 }
 0x3a6   : > { %4970 = vmatpush.bf16.msra.mxu0 %v11968_v45 }
 0x3a8   : > { %4949 = vmatpush.bf16.msra.mxu3 %v11947_v8 }
 0x3aa   : > { %4971 = vmatpush.bf16.msra.mxu0 %v11967_v20  ;;  %v12054_v20 = vld [vmem:[#allocation8 + $0x124] sm:$0xf] }
 0x3ac   : > { %v3836_v43 = vpop.f32.mrf.mxu1  ;;  %4950 = vmatpush.bf16.msra.mxu3 %v11946_v22  ;;  %v10259_v22 = vld [vmem:[#allocation8 + $0x134] sm:$0xf0] }
 0x3ad   : > { %v3837_v44 = vadd.f32 %v3836_v43, %v3141_v39  ;;  %v4317_v39 = vperm.slane %v15450_v2, 4 }
 0x3ae   : > { %4972 = vmatpush.bf16.msra.mxu0 %v11966_v26  ;;  %v10262_v26 = vor.u32 %v12054_v20, %v10259_v22  ;;  %v12029_v20 = vld [vmem:[#allocation8 + $0x5c] sm:$0xf] }
 0x3af   : > { %v3850_v34 = vadd.f32 %v15234_v4, %v3837_v44  ;;  %v11943_v4 = vld [vmem:[%s17237_s3 + $0x28] sm:$0xff]  ;;  %v11970_v44 = vld [vmem:[%s17237_s3 + $0x100] sm:$0xff] }
 0x3b0   : > { %4932 = vmatpush.bf16.msrb.mxu1 %v11943_v4  ;;  %v11963_v4 = vld [vmem:[%s17237_s3 + $0xc8] sm:$0xff] }
 0x3b1   : > { %v3863_v5 = vadd.f32 %v15236_v42, %v3850_v34 }
 0x3b2   : > { %4973 = vmatpush.bf16.msra.mxu0 %v11965_v30  ;;  %v12049_v30 = vld [vmem:[#allocation8 + $0xfc] sm:$0xf] }
 0x3b3   : > { %v3870_v36 = vpack.c.bf16 %v3863_v5, %v3863_v5 }
 0x3b4   : > { %v3838_v46 = vpop.f32.mrf.mxu1  ;;  %4933 = vmatpush.bf16.msrb.mxu1 %v11942_v48 }
 0x3b5   : > { %4255 = vmatmul.bf16.vlgmr.msrb.gmra.mxu2 %v3870_v36 }
 0x3b6   : > { %4956 = vmatpush.bf16.msrb.mxu2 %v11961_v51  ;;  %4974 = vmatpush.bf16.msra.mxu0 %v11964_v15 }
 0x3b8   : > { %4934 = vmatpush.bf16.msrb.mxu1 %v11941_v50 }
 0x3ba   : > { %4957 = vmatpush.bf16.msrb.mxu2 %v11960_v31  ;;  %4975 = vmatpush.bf16.msra.mxu0 %v11963_v4 }
 0x3bc   : > { %4935 = vmatpush.bf16.msrb.mxu1 %v11940_v41  ;;  %v11962_v41 = vld [vmem:[%s17237_s3 + $0xc0] sm:$0xff] }
 0x3be   : > { %4958 = vmatpush.bf16.msrb.mxu2 %v11959_v9  ;;  %4976 = vmatpush.bf16.msra.mxu0 %v11962_v41  ;;  %v10229_v9 = vld [vmem:[#allocation8 + $0xf0] sm:$0xf]  ;;  %v12041_v41 = vld [vmem:[#allocation8 + $0xb8] sm:$0xf0] }
 0x3c0   : > { %4936 = vmatpush.bf16.msrb.mxu1 %v11939_v56  ;;  %v10249_v56 = vld [vmem:[#allocation8 + $0x118] sm:$0xf] }
 0x3c2   : > { %4959 = vmatpush.bf16.msrb.mxu2 %v11958_v61  ;;  %v10230_v61 = vor.u32 %v12050_v59, %v10229_v9  ;;  %v10151_v9 = vld [vmem:[#allocation8 + $0x64] sm:$0xf0] }
 0x3c4   : > { %4937 = vmatpush.bf16.msrb.mxu1 %v11938_v58  ;;  %v10250_v58 = vor.u32 %v12055_v57, %v10249_v56  ;;  %v10129_v56 = vld [vmem:[#allocation8 + $0x28] sm:$0xf]  ;;  %v12028_v57 = vld [vmem:[#allocation8 + $0x54] sm:$0xf] }
 0x3c5   : > { %4578 = vmatmul.bf16.vlgmr.msra.gmra.mxu2 %v15325_v7 }
 0x3c6   : > { %4960 = vmatpush.bf16.msrb.mxu2 %v11957_v0  ;;  %5300 = vmatpush.bf16.msrb.mxu3 %v10250_v58  ;;  %v12045_v0 = vld [vmem:[#allocation8 + $0xd8] sm:$0xf0] }
 0x3c7   : > { %v12025_v58 = vld [vmem:[#allocation8 + $0x38] sm:$0xf0] }
 0x3c8   : > { %4982 = vmatpush.bf16.msra.mxu1 %v11977_v60 }
 0x3ca   : > { %4961 = vmatpush.bf16.msrb.mxu2 %v11956_v53  ;;  %v10231_v53 = vld [vmem:[#allocation8 + $0x104] sm:$0xf0]  ;;  %5301 = vmatpush.bf16.msrb.mxu3 %v10230_v61  ;;  %v12036_v61 = vld [vmem:[#allocation8 + $0x90] sm:$0xf0] }
 0x3cc   : > { %4983 = vmatpush.bf16.msra.mxu1 %v11976_v63  ;;  %v10209_v63 = vld [vmem:[#allocation8 + $0xc8] sm:$0xf] }
 0x3ce   : > { %4962 = vmatpush.bf16.msrb.mxu2 %v11955_v19  ;;  %v12056_v19 = vld [vmem:[#allocation8 + $0x130] sm:$0xf0] }
 0x3d0   : > { %4984 = vmatpush.bf16.msra.mxu1 %v11975_v3  ;;  %v12048_v3 = vld [vmem:[#allocation8 + $0xf4] sm:$0xf] }
 0x3d2   : > { %4963 = vmatpush.bf16.msrb.mxu2 %v11954_v25  ;;  %v10191_v25 = vld [vmem:[#allocation8 + $0xb4] sm:$0xf0] }
 0x3d4   : > { %4985 = vmatpush.bf16.msra.mxu1 %v11974_v11  ;;  %v12043_v11 = vld [vmem:[#allocation8 + $0xcc] sm:$0xf] }
 0x3d8   : > { %4986 = vmatpush.bf16.msra.mxu1 %v11973_v23 }
 0x3dc   : > { %4987 = vmatpush.bf16.msra.mxu1 %v11972_v29  ;;  %v12051_v29 = vld [vmem:[#allocation8 + $0x108] sm:$0xf0] }
 0x3e0   : > { %4988 = vmatpush.bf16.msra.mxu1 %v11971_v38 }
 0x3e4   : > { %4989 = vmatpush.bf16.msra.mxu1 %v11970_v44  ;;  %v12046_v44 = vld [vmem:[#allocation8 + $0xe0] sm:$0xf0] }
 0x3f4   : > { %v15389_v42 = vpop.f32.mrf.mxu2 }
 0x3f5   : > { %v4205_v55 = vadd.f32 %v12453_v52, %v15389_v42  ;;  %v10234_v42 = vor.u32 %v12048_v3, %v10231_v53  ;;  %v12039_v52 = vld [vmem:[#allocation8 + $0xac] sm:$0xf]  ;;  %v10131_v53 = vld [vmem:[#allocation8 + $0x3c] sm:$0xf0] }
 0x3f6   : > { %v12023_v3 = vld [vmem:[#allocation8 + $0x2c] sm:$0xf] }
 0x3fc   : > { %v4206_v54 = vpop.f32.mrf.mxu2 }
 0x3fe   : > { %v15415_v16 = vpop.f32.mrf.mxu0 }
 0x3ff   : > { %v4218_v45 = vadd.f32 %v15415_v16, %v4205_v55  ;;  %v10210_v16 = vor.u32 %v12045_v0, %v10209_v63  ;;  %v10179_v63 = vld [vmem:[#allocation8 + $0x94] sm:$0xf0]  ;;  %v10154_v0 = vor.u32 %v12028_v57, %v10151_v9  ;;  %v10369_v57 = vld [vmem:[%s17239_s5 + $0xc8] sm:$0xf]  ;;  %v12005_v9 = vld [vmem:[%s17239_s5 + $0xd8] sm:$0xf0] }
 0x401   : > { %5302 = vmatpush.bf16.msrb.mxu3 %v10210_v16  ;;  %v12020_v16 = vld [vmem:[#allocation8 + $0x10] sm:$0xf0] }
 0x406   : > { %v4219_v35 = vpop.f32.mrf.mxu0 }
 0x407   : > { %v12053_v35 = vld [vmem:[#allocation8 + $0x11c] sm:$0xf] }
 0x408   : > { %v10254_v1 = vor.u32 %v12053_v35, %v10251_v32  ;;  %v4316_v35 = vperm.slane %v15450_v2, 3  ;;  %v12034_v32 = vld [vmem:[#allocation8 + $0x84] sm:$0xf]  ;;  %v12031_v2 = vld [vmem:[#allocation8 + $0x68] sm:$0xf0] }
 0x40a   : > { %5313 = vmatpush.bf16.msra.mxu2 %v10254_v1  ;;  %v10130_v1 = vor.u32 %v12025_v58, %v10129_v56  ;;  %v10205_v58 = vld [vmem:[#allocation8 + $0xb0] sm:$0xf] }
 0x40c   : > { %v15461_v6 = vpop.f32.mrf.mxu3 }
 0x40e   : > { %v4540_v10 = vpop.f32.mrf.mxu0  ;;  %5314 = vmatpush.bf16.msra.mxu2 %v10234_v42 }
 0x40f   : > { %v4541_v13 = vadd.f32 %v4540_v10, %v4313_v17  ;;  %v10189_v17 = vld [vmem:[#allocation8 + $0xa0] sm:$0xf]  ;;  %v12040_v10 = vld [vmem:[#allocation8 + $0xb0] sm:$0xf0] }
 0x410   : > { %v15470_v12 = vpop.f32.mrf.mxu1 }
 0x411   : > { %v4596_v14 = vmax.f32 %v4541_v13, 0.0  ;;  %v4231_v60 = vadd.f32 %v15470_v12, %v4218_v45  ;;  %v10211_v13 = vld [vmem:[#allocation8 + $0xdc] sm:$0xf0] }
 0x412   : > { %v10214_v23 = vor.u32 %v12043_v11, %v10211_v13  ;;  %v10182_v11 = vor.u32 %v12034_v32, %v10179_v63  ;;  %v10370_v32 = vor.u32 %v12005_v9, %v10369_v57  ;;  %v10269_v57 = vld [vmem:[%s17239_s5] sm:$0xf]  ;;  %v11980_v9 = vld [vmem:[%s17239_s5 + $0x10] sm:$0xf0] }
 0x413   : > { %v4601_v21 = vpack.c.bf16 %v4596_v14, %v4596_v14  ;;  %v4244_v8 = vadd.f32 %v15461_v6, %v4231_v60  ;;  %v10257_v14 = vld [vmem:[#allocation8 + $0x120] sm:$0xf] }
 0x414   : > { %v4245_v28 = vpop.f32.mrf.mxu3  ;;  %5315 = vmatpush.bf16.msra.mxu2 %v10214_v23  ;;  %v10177_v60 = vld [vmem:[#allocation8 + $0x80] sm:$0xf]  ;;  %v12018_v23 = vld [vmem:[#allocation8 + $0x4] sm:$0xf] }
 0x415   : > { %4938 = vmatmul.bf16.vlgmr.msrb.gmra.mxu1 %v4601_v21  ;;  %v10258_v21 = vor.u32 %v12056_v19, %v10257_v14  ;;  %v10157_v14 = vld [vmem:[#allocation8 + $0x58] sm:$0xf]  ;;  %v10134_v19 = vor.u32 %v12023_v3, %v10131_v53  ;;  %v10185_v3 = vld [vmem:[#allocation8 + $0x88] sm:$0xf]  ;;  %v12037_v53 = vld [vmem:[#allocation8 + $0x98] sm:$0xf0] }
 0x416   : > { %v4542_v24 = vpop.f32.mrf.mxu0  ;;  %5339 = vmatpush.bf16.msrb.mxu1 %v10262_v26  ;;  %v10245_v26 = vld [vmem:[#allocation8 + $0x100] sm:$0xf] }
 0x417   : > { %v12038_v24 = vld [vmem:[#allocation8 + $0xa4] sm:$0xf]  ;;  %5326 = vmatpush.bf16.msrb.mxu0 %v10258_v21 }
 0x418   : > { %v4232_v27 = vpop.f32.mrf.mxu1 }
 0x419   : > { %v10237_v27 = vld [vmem:[#allocation8 + $0xf8] sm:$0xf] }
 0x41a   : > { %v10238_v38 = vor.u32 %v12051_v29, %v10237_v27  ;;  %v10409_v27 = vld [vmem:[%s17239_s5 + $0x118] sm:$0xf] }
 0x41c   : > { %v4566_v18 = vpop.f32.mrf.mxu3  ;;  %5327 = vmatpush.bf16.msrb.mxu0 %v10238_v38 }
 0x41d   : > { %v4567_v37 = vadd.f32 %v4566_v18, %v4315_v62  ;;  %v10190_v62 = vor.u32 %v12040_v10, %v10189_v17  ;;  %v10239_v18 = vld [vmem:[#allocation8 + $0x10c] sm:$0xf0]  ;;  %v10178_v17 = vor.u32 %v12036_v61, %v10177_v60  ;;  %v10265_v10 = vld [vmem:[#allocation8 + $0x128] sm:$0xf] }
 0x41e   : > { %v4592_v46 = vpop.f32.mrf.mxu0  ;;  %v10242_v15 = vor.u32 %v12049_v30, %v10239_v18  ;;  %v12052_v30 = vld [vmem:[#allocation8 + $0x110] sm:$0xf0] }
 0x41f   : > { %v4598_v43 = vmax.f32 %v4567_v37, 0.0  ;;  %v4593_v47 = vadd.f32 %v4592_v46, %v4317_v39  ;;  %v12035_v37 = vld [vmem:[#allocation8 + $0x88] sm:$0xf0]  ;;  %v10217_v39 = vld [vmem:[#allocation8 + $0xd0] sm:$0xf]  ;;  %5303 = vmatpush.bf16.msrb.mxu3 %v10190_v62  ;;  %v10158_v62 = vor.u32 %v12031_v2, %v10157_v14 }
 0x420   : > { %v4553_v34 = vpop.f32.mrf.mxu1  ;;  %v10149_v46 = vld [vmem:[#allocation8 + $0x50] sm:$0xf]  ;;  %v10218_v4 = vor.u32 %v12046_v44, %v10217_v39  ;;  %5340 = vmatpush.bf16.msrb.mxu1 %v10242_v15  ;;  %v12024_v15 = vld [vmem:[#allocation8 + $0x34] sm:$0xf]  ;;  %v10139_v39 = vld [vmem:[#allocation8 + $0x44] sm:$0xf0] }
 0x421   : > { %v4554_v5 = vadd.f32 %v4553_v34, %v4314_v33  ;;  %v4603_v36 = vpack.c.bf16 %v4598_v43, %v4598_v43  ;;  %v4600_v50 = vmax.f32 %v4593_v47, 0.0  ;;  %v10169_v33 = vld [vmem:[#allocation8 + $0x78] sm:$0xf]  ;;  %v10194_v43 = vor.u32 %v12038_v24, %v10191_v25  ;;  %v12044_v34 = vld [vmem:[#allocation8 + $0xd4] sm:$0xf] }
 0x422   : > { %v12033_v47 = vld [vmem:[#allocation8 + $0x7c] sm:$0xf]  ;;  %5328 = vmatpush.bf16.msrb.mxu0 %v10218_v4  ;;  %v10111_v24 = vld [vmem:[#allocation8 + $0x14] sm:$0xf0]  ;;  %v10142_v4 = vor.u32 %v12024_v15, %v10139_v39  ;;  %v10125_v14 = vld [vmem:[#allocation8 + $0x10] sm:$0xf] }
 0x423   : > { %v4597_v49 = vmax.f32 %v4554_v5, 0.0  ;;  %4964 = vmatmul.bf16.vlgmr.msrb.gmra.mxu2 %v4603_v36  ;;  %v4605_v51 = vpack.c.bf16 %v4600_v50, %v4600_v50  ;;  %v10219_v5 = vld [vmem:[#allocation8 + $0xe4] sm:$0xf0]  ;;  %v10170_v36 = vor.u32 %v12035_v37, %v10169_v33  ;;  %v12030_v50 = vld [vmem:[#allocation8 + $0x60] sm:$0xf0]  ;;  %v10114_v38 = vor.u32 %v12018_v23, %v10111_v24 }
 0x424   : > { %v4568_v48 = vpop.f32.mrf.mxu3  ;;  %5316 = vmatpush.bf16.msra.mxu2 %v10194_v43  ;;  %v10150_v55 = vor.u32 %v12030_v50, %v10149_v46  ;;  %v10137_v33 = vld [vmem:[#allocation8 + $0x30] sm:$0xf]  ;;  %v12026_v37 = vld [vmem:[#allocation8 + $0x40] sm:$0xf0]  ;;  %v10225_v43 = vld [vmem:[#allocation8 + $0xd8] sm:$0xf] }
 0x425   : > { %v4602_v40 = vpack.c.bf16 %v4597_v49, %v4597_v49  ;;  %4990 = vmatmul.bf16.vlgmr.msra.gmra.mxu1 %v4605_v51  ;;  %v10171_v49 = vld [vmem:[#allocation8 + $0x8c] sm:$0xf0]  ;;  %v10197_v51 = vld [vmem:[#allocation8 + $0xa8] sm:$0xf]  ;;  %5304 = vmatpush.bf16.msrb.mxu3 %v10170_v36  ;;  %v12047_v36 = vld [vmem:[#allocation8 + $0xe8] sm:$0xf0] }
 0x426   : > { %v4594_v54 = vpop.f32.mrf.mxu0  ;;  %v10198_v45 = vor.u32 %v12041_v41, %v10197_v51  ;;  %v10389_v46 = vld [vmem:[%s17239_s5 + $0xf0] sm:$0xf]  ;;  %v12021_v50 = vld [vmem:[#allocation8 + $0x18] sm:$0xf0]  ;;  %v10119_v51 = vld [vmem:[#allocation8 + $0x1c] sm:$0xf0]  ;;  %v10226_v56 = vor.u32 %v12047_v36, %v10225_v43 }
 0x427   : > { %4951 = vmatmul.bf16.vlgmr.msra.gmra.mxu3 %v4602_v40  ;;  %v10222_v40 = vor.u32 %v12044_v34, %v10219_v5  ;;  %v10174_v54 = vor.u32 %v12033_v47, %v10171_v49  ;;  %v10246_v5 = vor.u32 %v12052_v30, %v10245_v26  ;;  %v12010_v47 = vld [vmem:[%s17239_s5 + $0x100] sm:$0xf0]  ;;  %v10138_v49 = vor.u32 %v12026_v37, %v10137_v33  ;;  %v12013_v41 = vld [vmem:[%s17239_s5 + $0x11c] sm:$0xf]  ;;  %v11995_v23 = vld [vmem:[%s17239_s5 + $0x88] sm:$0xf0] }
 0x428   : > { %v4555_v31 = vpop.f32.mrf.mxu1  ;;  %5329 = vmatpush.bf16.msrb.mxu0 %v10198_v45  ;;  %v12022_v2 = vld [vmem:[#allocation8 + $0x20] sm:$0xf0]  ;;  %v12008_v24 = vld [vmem:[%s17239_s5 + $0xf4] sm:$0xf]  ;;  %v10391_v26 = vld [vmem:[%s17239_s5 + $0x104] sm:$0xf0] }
 0x429   : > { %v10199_v31 = vld [vmem:[#allocation8 + $0xbc] sm:$0xf0]  ;;  %5341 = vmatpush.bf16.msrb.mxu1 %v10222_v40  ;;  %5317 = vmatpush.bf16.msra.mxu2 %v10174_v54  ;;  %v12019_v40 = vld [vmem:[#allocation8 + $0xc] sm:$0xf]  ;;  %v10417_v54 = vld [vmem:[%s17239_s5 + $0x120] sm:$0xf] }
 0x42a   : > { %v10202_v59 = vor.u32 %v12039_v52, %v10199_v31  ;;  %5305 = vmatpush.bf16.msrb.mxu3 %v10150_v55  ;;  %v10411_v52 = vld [vmem:[%s17239_s5 + $0x12c] sm:$0xf0]  ;;  %v10390_v31 = vor.u32 %v12010_v47, %v10389_v46  ;;  %v12016_v55 = vld [vmem:[%s17239_s5 + $0x130] sm:$0xf0]  ;;  %v10122_v60 = vor.u32 %v12019_v40, %v10119_v51  ;;  %v11990_v37 = vld [vmem:[%s17239_s5 + $0x60] sm:$0xf0] }
 0x42b   : > { %v10414_v61 = vor.u32 %v12013_v41, %v10411_v52  ;;  %v10399_v30 = vld [vmem:[%s17239_s5 + $0x10c] sm:$0xf0]  ;;  %v10371_v15 = vld [vmem:[%s17239_s5 + $0xdc] sm:$0xf0]  ;;  %v10379_v46 = vld [vmem:[%s17239_s5 + $0xe4] sm:$0xf0] }
 0x42c   : > { %5330 = vmatpush.bf16.msrb.mxu0 %v10178_v17  ;;  %v10351_v40 = vld [vmem:[%s17239_s5 + $0xb4] sm:$0xf0]  ;;  %v10357_v51 = vld [vmem:[%s17239_s5 + $0xa8] sm:$0xf]  ;;  %v12001_v52 = vld [vmem:[%s17239_s5 + $0xb8] sm:$0xf0] }
 0x42d   : > { %5342 = vmatpush.bf16.msrb.mxu1 %v10202_v59  ;;  %5318 = vmatpush.bf16.msra.mxu2 %v10154_v0  ;;  %v12042_v59 = vld [vmem:[#allocation8 + $0xc0] sm:$0xf0]  ;;  %v10349_v0 = vld [vmem:[%s17239_s5 + $0xa0] sm:$0xf] }
 0x42e   : > { %5306 = vmatpush.bf16.msrb.mxu3 %v10130_v1  ;;  %v10206_v63 = vor.u32 %v12042_v59, %v10205_v58  ;;  %v12000_v1 = vld [vmem:[%s17239_s5 + $0xb0] sm:$0xf0]  ;;  %v10270_v58 = vor.u32 %v11980_v9, %v10269_v57  ;;  %v10331_v59 = vld [vmem:[%s17239_s5 + $0x8c] sm:$0xf0]  ;;  %v10305_v9 = vld [vmem:[%s17239_s5 + $0x38] sm:$0xf] }
 0x42f   : > { %v10350_v17 = vor.u32 %v12000_v1, %v10349_v0  ;;  %v10339_v0 = vld [vmem:[%s17239_s5 + $0x94] sm:$0xf0]  ;;  %v10425_v1 = vld [vmem:[%s17239_s5 + $0x128] sm:$0xf] }
 0x430   : > { %5331 = vmatpush.bf16.msrb.mxu0 %v10158_v62 }
 0x431   : > { %5343 = vmatpush.bf16.msrb.mxu1 %v10182_v11  ;;  %5319 = vmatpush.bf16.msra.mxu2 %v10134_v19  ;;  %v10145_v11 = vld [vmem:[#allocation8 + $0x38] sm:$0xf]  ;;  %v12014_v19 = vld [vmem:[%s17239_s5 + $0x124] sm:$0xf] }
 0x434   : > { %5332 = vmatpush.bf16.msrb.mxu0 %v10138_v49  ;;  %v10289_v49 = vld [vmem:[%s17239_s5 + $0x28] sm:$0xf] }
 0x435   : > { %5320 = vmatpush.bf16.msra.mxu2 %v10114_v38  ;;  %v12003_v38 = vld [vmem:[%s17239_s5 + $0xcc] sm:$0xf] }
 0x436   : > { %v10374_v43 = vor.u32 %v12003_v38, %v10371_v15 }
 0x438   : > { %v4256_v12 = vpop.f32.mrf.mxu2  ;;  %5321 = vmatmul.bf16.vlgmr.msra.gmra.mxu2 %v15325_v7 }
 0x439   : > { %v4257_v28 = vadd.f32 %v4256_v12, %v4244_v8  ;;  %v10109_v8 = vld [vmem:[#allocation8] sm:$0xf]  ;;  %v12057_v12 = vld [vmem:[#allocation8 + $0x138] sm:$0xf0] }
 0x43a   : > { %v10110_v22 = vor.u32 %v12020_v16, %v10109_v8  ;;  %v10266_v25 = vor.u32 %v12057_v12, %v10265_v10  ;;  %v10165_v8 = vld [vmem:[#allocation8 + $0x60] sm:$0xf]  ;;  %v12032_v16 = vld [vmem:[#allocation8 + $0x70] sm:$0xf0] }
 0x43b   : > { %v4260_v6 = vpack.c.bf16 %v4257_v28, %v4257_v28  ;;  %v10159_v28 = vld [vmem:[#allocation8 + $0x6c] sm:$0xf0]  ;;  %v10166_v10 = vor.u32 %v12032_v16, %v10165_v8  ;;  %v10317_v16 = vld [vmem:[%s17239_s5 + $0x58] sm:$0xf] }
 0x43c   : > { %v10162_v18 = vor.u32 %v12029_v20, %v10159_v28  ;;  %5307 = vmatpush.bf16.msrb.mxu3 %v10110_v22  ;;  %v10419_v20 = vld [vmem:[%s17239_s5 + $0x134] sm:$0xf0]  ;;  %v10126_v28 = vor.u32 %v12022_v2, %v10125_v14  ;;  %v10311_v8 = vld [vmem:[%s17239_s5 + $0x64] sm:$0xf0]  ;;  %v10319_v14 = vld [vmem:[%s17239_s5 + $0x6c] sm:$0xf0] }
 0x43d   : > { %4261 = vst [vmem:[%s15520_s24] sm:$0xf] %v4260_v6  ;;  %v12015_v6 = vld [vmem:[%s17239_s5 + $0x128] sm:$0xf0]  ;;  %v10329_v22 = vld [vmem:[%s17239_s5 + $0x78] sm:$0xf] }
 0x43e   : > { %v10410_v44 = vor.u32 %v12015_v6, %v10409_v27  ;;  %5344 = vmatpush.bf16.msrb.mxu1 %v10162_v18  ;;  %v12011_v27 = vld [vmem:[%s17239_s5 + $0x108] sm:$0xf0]  ;;  %v10394_v6 = vor.u32 %v12008_v24, %v10391_v26  ;;  %v10309_v18 = vld [vmem:[%s17239_s5 + $0x50] sm:$0xf]  ;;  %v10291_v26 = vld [vmem:[%s17239_s5 + $0x3c] sm:$0xf0] }
 0x43f   : > { %5308 = vmatmul.bf16.vlgmr.msrb.gmra.mxu3 %v15325_v7  ;;  %v10310_v39 = vor.u32 %v11990_v37, %v10309_v18  ;;  %v12007_v37 = vld [vmem:[%s17239_s5 + $0xe8] sm:$0xf0] }
 0x440   : > { %v4258_v48 = vpop.f32.mrf.mxu2  ;;  %5352 = vmatpush.bf16.msra.mxu3 %v10266_v25  ;;  %5573 = vmatpush.bf16.msrb.mxu2 %v10410_v44  ;;  %v10330_v25 = vor.u32 %v11995_v23, %v10329_v22  ;;  %v10377_v44 = vld [vmem:[%s17239_s5 + $0xd0] sm:$0xf] }
 0x441   : > { %v10117_v48 = vld [vmem:[#allocation8 + $0x8] sm:$0xf] }
 0x442   : > { %v10118_v45 = vor.u32 %v12021_v50, %v10117_v48  ;;  %5345 = vmatpush.bf16.msrb.mxu1 %v10142_v4  ;;  %v11985_v4 = vld [vmem:[%s17239_s5 + $0x38] sm:$0xf0]  ;;  %v11998_v50 = vld [vmem:[%s17239_s5 + $0xa4] sm:$0xf] }
 0x443   : > { %v10290_v48 = vor.u32 %v11985_v4, %v10289_v49  ;;  %v10354_v41 = vor.u32 %v11998_v50, %v10351_v40  ;;  %v10365_v4 = vld [vmem:[%s17239_s5 + $0xb0] sm:$0xf] }
 0x444   : > { %5353 = vmatpush.bf16.msra.mxu3 %v10246_v5  ;;  %5574 = vmatpush.bf16.msrb.mxu2 %v10390_v31  ;;  %v12004_v5 = vld [vmem:[%s17239_s5 + $0xd4] sm:$0xf]  ;;  %v11999_v31 = vld [vmem:[%s17239_s5 + $0xac] sm:$0xf] }
 0x445   : > { %5333 = vmatpush.bf16.msrb.mxu0 %v10118_v45  ;;  %v10382_v47 = vor.u32 %v12004_v5, %v10379_v46  ;;  %v11993_v45 = vld [vmem:[%s17239_s5 + $0x7c] sm:$0xf]  ;;  %v10279_v46 = vld [vmem:[%s17239_s5 + $0x1c] sm:$0xf0] }
 0x446   : > { %5346 = vmatpush.bf16.msrb.mxu1 %v10122_v60  ;;  %v10337_v60 = vld [vmem:[%s17239_s5 + $0x80] sm:$0xf]  ;;  %v11981_v5 = vld [vmem:[%s17239_s5 + $0x18] sm:$0xf0] }
 0x448   : > { %v4579_v42 = vpop.f32.mrf.mxu2  ;;  %5354 = vmatpush.bf16.msra.mxu3 %v10226_v56  ;;  %5575 = vmatpush.bf16.msrb.mxu2 %v10370_v32 }
 0x449   : > { %v4580_v13 = vadd.f32 %v4579_v42, %v4316_v35  ;;  %v10418_v35 = vor.u32 %v12016_v55, %v10417_v54  ;;  %v10186_v42 = vor.u32 %v12037_v53, %v10185_v3  ;;  %5347 = vmatmul.bf16.vlgmr.msrb.gmra.mxu1 %v15325_v7  ;;  %v10359_v54 = vld [vmem:[%s17239_s5 + $0xbc] sm:$0xf0]  ;;  %v10358_v55 = vor.u32 %v12001_v52, %v10357_v51  ;;  %v12017_v53 = vld [vmem:[%s17239_s5 + $0x138] sm:$0xf0] }
 0x44a   : > { %v10362_v56 = vor.u32 %v11999_v31, %v10359_v54  ;;  %v11997_v52 = vld [vmem:[%s17239_s5 + $0x98] sm:$0xf0]  ;;  %v10325_v54 = vld [vmem:[%s17239_s5 + $0x60] sm:$0xf] }
 0x44b   : > { %v4599_v21 = vmax.f32 %v4580_v13, 0.0  ;;  %5599 = vmatpush.bf16.msra.mxu1 %v10418_v35  ;;  %v12027_v13 = vld [vmem:[#allocation8 + $0x48] sm:$0xf0]  ;;  %v10334_v35 = vor.u32 %v11993_v45, %v10331_v59  ;;  %v11987_v45 = vld [vmem:[%s17239_s5 + $0x48] sm:$0xf0] }
 0x44c   : > { %5355 = vmatpush.bf16.msra.mxu3 %v10206_v63  ;;  %5576 = vmatpush.bf16.msrb.mxu2 %v10350_v17  ;;  %v10146_v12 = vor.u32 %v12027_v13, %v10145_v11  ;;  %v11994_v63 = vld [vmem:[%s17239_s5 + $0x84] sm:$0xf]  ;;  %v10426_v17 = vor.u32 %v12017_v53, %v10425_v1  ;;  %v11991_v13 = vld [vmem:[%s17239_s5 + $0x68] sm:$0xf0]  ;;  %v10285_v59 = vld [vmem:[%s17239_s5 + $0x10] sm:$0xf] }
 0x44d   : > { %v4604_v29 = vpack.c.bf16 %v4599_v21, %v4599_v21  ;;  %v10422_v21 = vor.u32 %v12014_v19, %v10419_v20  ;;  %v10342_v3 = vor.u32 %v11994_v63, %v10339_v0  ;;  %v10318_v2 = vor.u32 %v11991_v13, %v10317_v16  ;;  %v10405_v20 = vld [vmem:[%s17239_s5 + $0x100] sm:$0xf]  ;;  %v10609_v63 = vld [vmem:[%s17278_s11 + $0x168] sm:$0xf]  ;;  %v12104_v0 = vld [vmem:[%s17278_s11 + $0x170] sm:$0xf0] }
 0x44e   : > { %v10705_v1 = vld [vmem:[%s17278_s11 + $0x228] sm:$0xf]  ;;  %v12128_v53 = vld [vmem:[%s17278_s11 + $0x230] sm:$0xf0]  ;;  %v10693_v16 = vld [vmem:[%s17278_s11 + $0x210] sm:$0xf] }
 0x44f   : > { %4977 = vmatmul.bf16.vlgmr.msra.gmra.mxu0 %v4604_v29  ;;  %v12009_v29 = vld [vmem:[%s17239_s5 + $0xfc] sm:$0xf] }
 0x450   : > { %v4581_v34 = vpop.f32.mrf.mxu2  ;;  %5586 = vmatpush.bf16.msra.mxu0 %v10414_v61  ;;  %5356 = vmatpush.bf16.msra.mxu3 %v10186_v42  ;;  %v10402_v33 = vor.u32 %v12009_v29, %v10399_v30  ;;  %v11996_v61 = vld [vmem:[%s17239_s5 + $0x90] sm:$0xf0]  ;;  %v10299_v29 = vld [vmem:[%s17239_s5 + $0x44] sm:$0xf0] }
 0x451   : > { %5577 = vmatpush.bf16.msrb.mxu2 %v10330_v25  ;;  %v12006_v34 = vld [vmem:[%s17239_s5 + $0xe0] sm:$0xf0]  ;;  %v10338_v32 = vor.u32 %v11996_v61, %v10337_v60  ;;  %v11988_v42 = vld [vmem:[%s17239_s5 + $0x54] sm:$0xf]  ;;  %v11983_v25 = vld [vmem:[%s17239_s5 + $0x2c] sm:$0xf] }
 0x452   : > { %v10378_v36 = vor.u32 %v12006_v34, %v10377_v44  ;;  %v10314_v11 = vor.u32 %v11988_v42, %v10311_v8  ;;  %v10277_v44 = vld [vmem:[%s17239_s5 + $0x8] sm:$0xf]  ;;  %v11982_v60 = vld [vmem:[%s17239_s5 + $0x20] sm:$0xf0]  ;;  %v12101_v42 = vld [vmem:[%s17278_s11 + $0x158] sm:$0xf0]  ;;  %v10706_v8 = vor.u32 %v12128_v53, %v10705_v1 }
 0x453   : > { %v10286_v61 = vor.u32 %v11982_v60, %v10285_v59  ;;  %v12146_v59 = vld [vmem:[%s17278_s11 + $0x2c0] sm:$0xf0]  ;;  %v10537_v1 = vld [vmem:[%s17278_s11 + $0xd8] sm:$0xf]  ;;  %v10453_v53 = vld [vmem:[%s17278_s11 + $0x30] sm:$0xf] }
 0x454   : > { %5357 = vmatpush.bf16.msra.mxu3 %v10166_v10  ;;  %5587 = vmatpush.bf16.msra.mxu0 %v10394_v6  ;;  %v11986_v6 = vld [vmem:[%s17239_s5 + $0x40] sm:$0xf0] }
 0x455   : > { %5578 = vmatpush.bf16.msrb.mxu2 %v10310_v39  ;;  %v11978_v39 = vld [vmem:[%s17239_s5 + $0x4] sm:$0xf] }
 0x458   : > { %5358 = vmatpush.bf16.msra.mxu3 %v10146_v12  ;;  %5588 = vmatpush.bf16.msra.mxu0 %v10374_v43  ;;  %v11989_v12 = vld [vmem:[%s17239_s5 + $0x5c] sm:$0xf]  ;;  %v10271_v43 = vld [vmem:[%s17239_s5 + $0x14] sm:$0xf0] }
 0x459   : > { %5579 = vmatpush.bf16.msrb.mxu2 %v10290_v48  ;;  %v10322_v19 = vor.u32 %v11989_v12, %v10319_v14  ;;  %v10274_v34 = vor.u32 %v11978_v39, %v10271_v43  ;;  %v12002_v48 = vld [vmem:[%s17239_s5 + $0xc0] sm:$0xf0]  ;;  %v12080_v12 = vld [vmem:[%s17278_s11 + $0xb0] sm:$0xf0] }
 0x45a   : > { %v10366_v40 = vor.u32 %v12002_v48, %v10365_v4 }
 0x45c   : > { %5359 = vmatpush.bf16.msra.mxu3 %v10126_v28  ;;  %5589 = vmatpush.bf16.msra.mxu0 %v10354_v41  ;;  %v12012_v28 = vld [vmem:[%s17239_s5 + $0x110] sm:$0xf0]  ;;  %v10345_v41 = vld [vmem:[%s17239_s5 + $0x88] sm:$0xf] }
 0x45d   : > { %5580 = vmatpush.bf16.msrb.mxu2 %v10270_v58  ;;  %v10346_v31 = vor.u32 %v11997_v52, %v10345_v41  ;;  %v10306_v58 = vor.u32 %v11987_v45, %v10305_v9  ;;  %v10657_v41 = vld [vmem:[%s17278_s11 + $0x1c8] sm:$0xf]  ;;  %v12116_v52 = vld [vmem:[%s17278_s11 + $0x1d0] sm:$0xf0] }
 0x45e   : > { %v10658_v60 = vor.u32 %v12116_v52, %v10657_v41 }
 0x45f   : > { %5334 = vmatmul.bf16.vlgmr.msrb.gmra.mxu0 %v15325_v7  ;;  %5360 = vmatmul.bf16.vlgmr.msra.gmra.mxu3 %v15325_v7  ;;  %v10397_v7 = vld [vmem:[%s17239_s5 + $0xf8] sm:$0xf] }
 0x460   : > { %5612 = vmatpush.bf16.msrb.mxu3 %v10422_v21  ;;  %v10398_v62 = vor.u32 %v12011_v27, %v10397_v7  ;;  %5590 = vmatpush.bf16.msra.mxu0 %v10334_v35  ;;  %v10406_v21 = vor.u32 %v12012_v28, %v10405_v20  ;;  %v10297_v7 = vld [vmem:[%s17239_s5 + $0x30] sm:$0xf]  ;;  %v10294_v27 = vor.u32 %v11983_v25, %v10291_v26  ;;  %v12454_v35 = vld [vmem:[#allocation7] ss:$0 sm:$0xff]  ;;  %v10585_v20 = vld [vmem:[%s17278_s11 + $0x138] sm:$0xf] }
 0x461   : > { %5625 = vmatpush.bf16.msra.mxu2 %v10426_v17  ;;  %v10298_v30 = vor.u32 %v11986_v6, %v10297_v7  ;;  %v10597_v17 = vld [vmem:[%s17278_s11 + $0x150] sm:$0xf]  ;;  %v12098_v28 = vld [vmem:[%s17278_s11 + $0x140] sm:$0xf0]  ;;  %v12077_v26 = vld [vmem:[%s17278_s11 + $0x98] sm:$0xf0] }
 0x462   : > { %5600 = vmatpush.bf16.msra.mxu1 %v10398_v62  ;;  %v11984_v62 = vld [vmem:[%s17239_s5 + $0x34] sm:$0xf]  ;;  %v10598_v13 = vor.u32 %v12101_v42, %v10597_v17  ;;  %v10501_v25 = vld [vmem:[%s17278_s11 + $0x90] sm:$0xf]  ;;  %v10573_v6 = vld [vmem:[%s17278_s11 + $0x120] sm:$0xf] }
 0x463   : > { %v10302_v18 = vor.u32 %v11984_v62, %v10299_v29  ;;  %v10502_v7 = vor.u32 %v12077_v26, %v10501_v25  ;;  %v12065_v17 = vld [vmem:[%s17278_s11 + $0x38] sm:$0xf0]  ;;  %v12079_v25 = vld [vmem:[%s17278_s11 + $0xac] sm:$0xf]  ;;  %v10515_v26 = vld [vmem:[%s17278_s11 + $0xb4] sm:$0xf0] }
 0x464   : > { %5613 = vmatpush.bf16.msrb.mxu3 %v10402_v33  ;;  %5591 = vmatpush.bf16.msra.mxu0 %v10314_v11  ;;  %v10385_v33 = vld [vmem:[%s17239_s5 + $0xd8] sm:$0xf]  ;;  %v10513_v11 = vld [vmem:[%s17278_s11 + $0xa8] sm:$0xf] }
 0x465   : > { %5626 = vmatpush.bf16.msra.mxu2 %v10406_v21  ;;  %v10386_v38 = vor.u32 %v12007_v37, %v10385_v33  ;;  %v10681_v21 = vld [vmem:[%s17278_s11 + $0x1f8] sm:$0xf]  ;;  %v12074_v33 = vld [vmem:[%s17278_s11 + $0x80] sm:$0xf0] }
 0x466   : > { %5601 = vmatpush.bf16.msra.mxu1 %v10378_v36  ;;  %v11979_v36 = vld [vmem:[%s17239_s5 + $0xc] sm:$0xf] }
 0x467   : > { %v10282_v49 = vor.u32 %v11979_v36, %v10279_v46  ;;  %v12092_v46 = vld [vmem:[%s17278_s11 + $0x110] sm:$0xf0] }
 0x468   : > { %5614 = vmatpush.bf16.msrb.mxu3 %v10382_v47  ;;  %5592 = vmatpush.bf16.msra.mxu0 %v10294_v27  ;;  %v10278_v47 = vor.u32 %v11981_v5, %v10277_v44  ;;  %v10586_v27 = vor.u32 %v12098_v28, %v10585_v20  ;;  %v10669_v44 = vld [vmem:[%s17278_s11 + $0x1e0] sm:$0xf]  ;;  %v10561_v5 = vld [vmem:[%s17278_s11 + $0x108] sm:$0xf]  ;;  %v12083_v28 = vld [vmem:[%s17278_s11 + $0xc8] sm:$0xf0] }
 0x469   : > { %5627 = vmatpush.bf16.msra.mxu2 %v10386_v38  ;;  %v10525_v20 = vld [vmem:[%s17278_s11 + $0xc0] sm:$0xf] }
 0x46a   : > { %5602 = vmatpush.bf16.msra.mxu1 %v10358_v55  ;;  %v11992_v55 = vld [vmem:[%s17239_s5 + $0x70] sm:$0xf0] }
 0x46b   : > { %v10326_v57 = vor.u32 %v11992_v55, %v10325_v54  ;;  %v10549_v54 = vld [vmem:[%s17278_s11 + $0xf0] sm:$0xf]  ;;  %v12089_v55 = vld [vmem:[%s17278_s11 + $0xf8] sm:$0xf0] }
 0x46c   : > { %5615 = vmatpush.bf16.msrb.mxu3 %v10362_v56  ;;  %5593 = vmatpush.bf16.msra.mxu0 %v10274_v34  ;;  %v12119_v34 = vld [vmem:[%s17278_s11 + $0x1e8] sm:$0xf0] }
 0x46d   : > { %5628 = vmatpush.bf16.msra.mxu2 %v10366_v40  ;;  %v10670_v40 = vor.u32 %v12119_v34, %v10669_v44  ;;  %v10429_v44 = vld [vmem:[%s17278_s11] sm:$0xf]  ;;  %v12059_v34 = vld [vmem:[%s17278_s11 + $0x8] sm:$0xf0] }
 0x46e   : > { %5603 = vmatpush.bf16.msra.mxu1 %v10338_v32  ;;  %v10430_v41 = vor.u32 %v12059_v34, %v10429_v44  ;;  %v12121_v34 = vld [vmem:[%s17278_s11 + $0x1fc] sm:$0xf] }
 0x470   : > { %5616 = vmatpush.bf16.msrb.mxu3 %v10342_v3  ;;  %v10610_v3 = vor.u32 %v12104_v0, %v10609_v63  ;;  %v12113_v63 = vld [vmem:[%s17278_s11 + $0x1b8] sm:$0xf0] }
 0x471   : > { %5629 = vmatpush.bf16.msra.mxu2 %v10346_v31 }
 0x472   : > { %5604 = vmatpush.bf16.msra.mxu1 %v10318_v2 }
 0x474   : > { %5617 = vmatpush.bf16.msrb.mxu3 %v10322_v19  ;;  %v10514_v19 = vor.u32 %v12080_v12, %v10513_v11 }
 0x475   : > { %5630 = vmatpush.bf16.msra.mxu2 %v10326_v57  ;;  %v12068_v57 = vld [vmem:[%s17278_s11 + $0x50] sm:$0xf0] }
 0x476   : > { %5605 = vmatpush.bf16.msra.mxu1 %v10298_v30  ;;  %6468 = vmatpush.bf16.msrb.mxu0 %v10514_v19  ;;  %v12095_v30 = vld [vmem:[%s17278_s11 + $0x128] sm:$0xf0]  ;;  %v10454_v19 = vor.u32 %v12065_v17, %v10453_v53  ;;  %v10479_v53 = vld [vmem:[%s17278_s11 + $0x6c] sm:$0xf0]  ;;  %v10873_v17 = vld [vmem:[%s17278_s11 + $0x378] sm:$0xf] }
 0x477   : > { %v10574_v43 = vor.u32 %v12095_v30, %v10573_v6  ;;  %v10753_v6 = vld [vmem:[%s17278_s11 + $0x288] sm:$0xf]  ;;  %v10621_v30 = vld [vmem:[%s17278_s11 + $0x180] sm:$0xf] }
 0x478   : > { %5618 = vmatpush.bf16.msrb.mxu3 %v10302_v18  ;;  %v10489_v18 = vld [vmem:[%s17278_s11 + $0x78] sm:$0xf] }
 0x479   : > { %5631 = vmatpush.bf16.msra.mxu2 %v10306_v58  ;;  %v10490_v39 = vor.u32 %v12074_v33, %v10489_v18  ;;  %v10777_v58 = vld [vmem:[%s17278_s11 + $0x2b8] sm:$0xf]  ;;  %v10526_v33 = vor.u32 %v12083_v28, %v10525_v20  ;;  %v12094_v20 = vld [vmem:[%s17278_s11 + $0x124] sm:$0xf]  ;;  %v10575_v28 = vld [vmem:[%s17278_s11 + $0x12c] sm:$0xf0] }
 0x47a   : > { %5606 = vmatpush.bf16.msra.mxu1 %v10278_v47  ;;  %6469 = vmatpush.bf16.msrb.mxu0 %v10502_v7  ;;  %v10477_v47 = vld [vmem:[%s17278_s11 + $0x60] sm:$0xf] }
 0x47c   : > { %5619 = vmatpush.bf16.msrb.mxu3 %v10282_v49  ;;  %v12071_v49 = vld [vmem:[%s17278_s11 + $0x68] sm:$0xf0] }
 0x47d   : > { %5632 = vmatpush.bf16.msra.mxu2 %v10286_v61  ;;  %v10478_v31 = vor.u32 %v12071_v49, %v10477_v47 }
 0x47e   : > { %6481 = vmatpush.bf16.msrb.mxu1 %v10610_v3  ;;  %6470 = vmatpush.bf16.msrb.mxu0 %v10490_v39  ;;  %v12086_v3 = vld [vmem:[%s17278_s11 + $0xe0] sm:$0xf0]  ;;  %v10518_v39 = vor.u32 %v12079_v25, %v10515_v26  ;;  %v10467_v25 = vld [vmem:[%s17278_s11 + $0x54] sm:$0xf0]  ;;  %v10861_v26 = vld [vmem:[%s17278_s11 + $0x360] sm:$0xf] }
 0x47f   : > { %v10538_v12 = vor.u32 %v12086_v3, %v10537_v1  ;;  %v12070_v3 = vld [vmem:[%s17278_s11 + $0x64] sm:$0xf] }
 0x480   : > { %6494 = vmatpush.bf16.msra.mxu3 %v10706_v8  ;;  %v10778_v8 = vor.u32 %v12146_v59, %v10777_v58  ;;  %v10729_v59 = vld [vmem:[%s17278_s11 + $0x258] sm:$0xf] }
 0x482   : > { %6482 = vmatpush.bf16.msrb.mxu1 %v10598_v13  ;;  %6471 = vmatpush.bf16.msrb.mxu0 %v10478_v31  ;;  %v12100_v31 = vld [vmem:[%s17278_s11 + $0x154] sm:$0xf] }
 0x486   : > { %6483 = vmatpush.bf16.msrb.mxu1 %v10586_v27 }
 0x48a   : > { %6484 = vmatpush.bf16.msrb.mxu1 %v10574_v43  ;;  %v12076_v43 = vld [vmem:[%s17278_s11 + $0x94] sm:$0xf] }
 0x492   : > { %v15682_v10 = vpop.f32.mrf.mxu1 }
 0x493   : > { %v4940_v32 = vadd.f32 %v12454_v35, %v15682_v10  ;;  %v12125_v10 = vld [vmem:[%s17278_s11 + $0x218] sm:$0xf0]  ;;  %v10550_v35 = vor.u32 %v12089_v55, %v10549_v54  ;;  %v10599_v54 = vld [vmem:[%s17278_s11 + $0x15c] sm:$0xf0] }
 0x494   : > { %v10694_v2 = vor.u32 %v12125_v10, %v10693_v16  ;;  %v10765_v16 = vld [vmem:[%s17278_s11 + $0x2a0] sm:$0xf]  ;;  %v12143_v10 = vld [vmem:[%s17278_s11 + $0x2a8] sm:$0xf0] }
 0x495   : > { %v10766_v27 = vor.u32 %v12143_v10, %v10765_v16  ;;  %v10717_v10 = vld [vmem:[%s17278_s11 + $0x240] sm:$0xf] }
 0x496   : > { %6495 = vmatpush.bf16.msra.mxu3 %v10694_v2  ;;  %v12110_v2 = vld [vmem:[%s17278_s11 + $0x1a0] sm:$0xf0] }
 0x49a   : > { %v4941_v22 = vpop.f32.mrf.mxu1 }
 0x49b   : > { %v12122_v22 = vld [vmem:[%s17278_s11 + $0x200] sm:$0xf0] }
 0x49c   : > { %v10682_v29 = vor.u32 %v12122_v22, %v10681_v21  ;;  %v10441_v21 = vld [vmem:[%s17278_s11 + $0x18] sm:$0xf]  ;;  %v12062_v22 = vld [vmem:[%s17278_s11 + $0x20] sm:$0xf0] }
 0x49e   : > { %6496 = vmatpush.bf16.msra.mxu3 %v10682_v29 }
 0x4a2   : > { %v15699_v23 = vpop.f32.mrf.mxu1  ;;  %6497 = vmatpush.bf16.msra.mxu3 %v10670_v40  ;;  %v12137_v40 = vld [vmem:[%s17278_s11 + $0x278] sm:$0xf0] }
 0x4a6   : > { %v15701_v24 = vpop.f32.mrf.mxu2  ;;  %6498 = vmatpush.bf16.msra.mxu3 %v10658_v60  ;;  %v12134_v60 = vld [vmem:[%s17278_s11 + $0x260] sm:$0xf0] }
 0x4a7   : > { %v10730_v16 = vor.u32 %v12134_v60, %v10729_v59  ;;  %v10539_v59 = vld [vmem:[%s17278_s11 + $0xe4] sm:$0xf0] }
 0x4aa   : > { %v4952_v15 = vpop.f32.mrf.mxu3  ;;  %v4993_v50 = vpop.f32.mrf.mxu1 }
 0x4ab   : > { %v4953_v14 = vadd.f32 %v4952_v15, %v4940_v32  ;;  %v12152_v15 = vld [vmem:[%s17278_s11 + $0x2f0] sm:$0xf0]  ;;  %v12149_v50 = vld [vmem:[%s17278_s11 + $0x2d8] sm:$0xf0]  ;;  %v10645_v32 = vld [vmem:[%s17278_s11 + $0x1b0] sm:$0xf] }
 0x4ac   : > { %v10646_v11 = vor.u32 %v12113_v63, %v10645_v32  ;;  %v12097_v63 = vld [vmem:[%s17278_s11 + $0x13c] sm:$0xf] }
 0x4ad   : > { %v4966_v62 = vadd.f32 %v15701_v24, %v4953_v14  ;;  %v10801_v24 = vld [vmem:[%s17278_s11 + $0x2e8] sm:$0xf]  ;;  %v10633_v14 = vld [vmem:[%s17278_s11 + $0x198] sm:$0xf] }
 0x4ae   : > { %v4967_v51 = vpop.f32.mrf.mxu2  ;;  %v10802_v48 = vor.u32 %v12152_v15, %v10801_v24  ;;  %6499 = vmatpush.bf16.msra.mxu3 %v10646_v11  ;;  %v10634_v29 = vor.u32 %v12110_v2, %v10633_v14  ;;  %v10611_v24 = vld [vmem:[%s17278_s11 + $0x174] sm:$0xf0]  ;;  %v10442_v15 = vor.u32 %v12062_v22, %v10441_v21  ;;  %v12131_v11 = vld [vmem:[%s17278_s11 + $0x248] sm:$0xf0] }
 0x4af   : > { %v10562_v51 = vor.u32 %v12092_v46, %v10561_v5  ;;  %v10503_v5 = vld [vmem:[%s17278_s11 + $0x9c] sm:$0xf0]  ;;  %v12176_v46 = vld [vmem:[%s17278_s11 + $0x3b0] sm:$0xf0]  ;;  %v10707_v14 = vld [vmem:[%s17278_s11 + $0x234] sm:$0xf0] }
 0x4b0   : > { %v10506_v52 = vor.u32 %v12076_v43, %v10503_v5  ;;  %v12067_v22 = vld [vmem:[%s17278_s11 + $0x4c] sm:$0xf] }
 0x4b1   : > { %6485 = vmatpush.bf16.msrb.mxu1 %v10562_v51 }
 0x4b2   : > { %v4954_v56 = vpop.f32.mrf.mxu3  ;;  %6500 = vmatpush.bf16.msra.mxu3 %v10634_v29  ;;  %v12124_v29 = vld [vmem:[%s17278_s11 + $0x214] sm:$0xf] }
 0x4b3   : > { %v10465_v56 = vld [vmem:[%s17278_s11 + $0x48] sm:$0xf] }
 0x4b4   : > { %v10466_v0 = vor.u32 %v12068_v57, %v10465_v56  ;;  %v12073_v56 = vld [vmem:[%s17278_s11 + $0x7c] sm:$0xf]  ;;  %v10491_v57 = vld [vmem:[%s17278_s11 + $0x84] sm:$0xf0] }
 0x4b5   : > { %6486 = vmatpush.bf16.msrb.mxu1 %v10550_v35  ;;  %v10602_v35 = vor.u32 %v12100_v31, %v10599_v54  ;;  %v10494_v32 = vor.u32 %v12073_v56, %v10491_v57  ;;  %v12164_v31 = vld [vmem:[%s17278_s11 + $0x350] sm:$0xf0]  ;;  %v10659_v56 = vld [vmem:[%s17278_s11 + $0x1d4] sm:$0xf0] }
 0x4b6   : > { %6472 = vmatpush.bf16.msrb.mxu0 %v10466_v0  ;;  %v10587_v0 = vld [vmem:[%s17278_s11 + $0x144] sm:$0xf0] }
 0x4b7   : > { %v10590_v2 = vor.u32 %v12097_v63, %v10587_v0  ;;  %v12112_v0 = vld [vmem:[%s17278_s11 + $0x1b4] sm:$0xf] }
 0x4b9   : > { %6487 = vmatpush.bf16.msrb.mxu1 %v10538_v12  ;;  %v12127_v12 = vld [vmem:[%s17278_s11 + $0x22c] sm:$0xf] }
 0x4ba   : > { %6473 = vmatpush.bf16.msrb.mxu0 %v10454_v19  ;;  %v10482_v19 = vor.u32 %v12070_v3, %v10479_v53  ;;  %v12058_v53 = vld [vmem:[%s17278_s11 + $0x4] sm:$0xf] }
 0x4bb   : > { %v15918_v42 = vpop.f32.mrf.mxu2 }
 0x4bd   : > { %6488 = vmatpush.bf16.msrb.mxu1 %v10526_v33  ;;  %v10470_v33 = vor.u32 %v12067_v22, %v10467_v25  ;;  %v12155_v22 = vld [vmem:[%s17278_s11 + $0x308] sm:$0xf0] }
 0x4be   : > { %6474 = vmatpush.bf16.msrb.mxu0 %v10442_v15  ;;  %v12064_v15 = vld [vmem:[%s17278_s11 + $0x34] sm:$0xf] }
 0x4c2   : > { %v15898_v61 = vpop.f32.mrf.mxu3  ;;  %6475 = vmatpush.bf16.msrb.mxu0 %v10430_v41 }
 0x4c3   : > { %v5324_v47 = vpop.f32.mrf.mxu2 }
 0x4c4   : > { %v12088_v47 = vld [vmem:[%s17278_s11 + $0xf4] sm:$0xf] }
 0x4c6   : > { %v15926_v13 = vpop.f32.mrf.mxu1 }
 0x4ca   : > { %v5311_v18 = vpop.f32.mrf.mxu3 }
 0x4cb   : > { %v10695_v18 = vld [vmem:[%s17278_s11 + $0x21c] sm:$0xf0] }
 0x4cc   : > { %v4978_v37 = vpop.f32.mrf.mxu0  ;;  %v10698_v43 = vor.u32 %v12124_v29, %v10695_v18 }
 0x4cd   : > { %v4979_v38 = vadd.f32 %v4978_v37, %v4966_v62  ;;  %v12140_v62 = vld [vmem:[%s17278_s11 + $0x290] sm:$0xf0]  ;;  %v12107_v37 = vld [vmem:[%s17278_s11 + $0x188] sm:$0xf0] }
 0x4ce   : > { %v10754_v49 = vor.u32 %v12140_v62, %v10753_v6  ;;  %v10718_v6 = vor.u32 %v12131_v11, %v10717_v10  ;;  %v10710_v62 = vor.u32 %v12127_v12, %v10707_v14  ;;  %v10527_v10 = vld [vmem:[%s17278_s11 + $0xcc] sm:$0xf0]  ;;  %v10825_v12 = vld [vmem:[%s17278_s11 + $0x318] sm:$0xf]  ;;  %v12158_v14 = vld [vmem:[%s17278_s11 + $0x320] sm:$0xf0] }
 0x4cf   : > { %v4992_v36 = vadd.f32 %v15699_v23, %v4979_v38  ;;  %v10789_v23 = vld [vmem:[%s17278_s11 + $0x2d0] sm:$0xf]  ;;  %v12103_v38 = vld [vmem:[%s17278_s11 + $0x16c] sm:$0xf] }
 0x4d0   : > { %v10790_v45 = vor.u32 %v12149_v50, %v10789_v23  ;;  %v5350_v23 = vpop.f32.mrf.mxu1  ;;  %v10741_v50 = vld [vmem:[%s17278_s11 + $0x270] sm:$0xf]  ;;  %v10614_v51 = vor.u32 %v12103_v38, %v10611_v24  ;;  %v10563_v38 = vld [vmem:[%s17278_s11 + $0x114] sm:$0xf0] }
 0x4d1   : > { %v15862_v4 = vpack.c.bf16 %v4992_v36, %v4992_v36  ;;  %v10897_v36 = vld [vmem:[%s17278_s11 + $0x3a8] sm:$0xf]  ;;  %v10742_v58 = vor.u32 %v12137_v40, %v10741_v50  ;;  %v12118_v50 = vld [vmem:[%s17278_s11 + $0x1e4] sm:$0xf]  ;;  %v10671_v40 = vld [vmem:[%s17278_s11 + $0x1ec] sm:$0xf0] }
 0x4d2   : > { %v10898_v55 = vor.u32 %v12176_v46, %v10897_v36  ;;  %v10683_v36 = vld [vmem:[%s17278_s11 + $0x204] sm:$0xf0] }
 0x4d3   : > { %5581 = vmatmul.bf16.vlgmr.msrb.gmra.mxu2 %v15862_v4  ;;  %5594 = vmatmul.bf16.vlgmr.msra.gmra.mxu0 %v15862_v4 }
 0x4d4   : > { %5607 = vmatmul.bf16.vlgmr.msra.gmra.mxu1 %v15862_v4  ;;  %5620 = vmatmul.bf16.vlgmr.msrb.gmra.mxu3 %v15862_v4  ;;  %v4980_v9 = vpop.f32.mrf.mxu0 }
 0x4d5   : > { %6507 = vmatpush.bf16.msrb.mxu2 %v10802_v48  ;;  %v10622_v48 = vor.u32 %v12107_v37, %v10621_v30  ;;  %6533 = vmatpush.bf16.msra.mxu1 %v10518_v39  ;;  %v12173_v9 = vld [vmem:[%s17278_s11 + $0x398] sm:$0xf0]  ;;  %v10578_v30 = vor.u32 %v12094_v20, %v10575_v28  ;;  %v12091_v37 = vld [vmem:[%s17278_s11 + $0x10c] sm:$0xf]  ;;  %v10455_v39 = vld [vmem:[%s17278_s11 + $0x3c] sm:$0xf0] }
 0x4d6   : > { %6520 = vmatpush.bf16.msra.mxu0 %v10898_v55  ;;  %v10566_v5 = vor.u32 %v12091_v37, %v10563_v38  ;;  %v10458_v46 = vor.u32 %v12064_v15, %v10455_v39  ;;  %v12115_v55 = vld [vmem:[%s17278_s11 + $0x1cc] sm:$0xf]  ;;  %v10635_v20 = vld [vmem:[%s17278_s11 + $0x1a4] sm:$0xf0]  ;;  %v10521_v39 = vld [vmem:[%s17278_s11 + $0xb0] sm:$0xf] }
 0x4d7   : > { %6501 = vmatpush.bf16.msra.mxu3 %v10622_v48  ;;  %v10686_v48 = vor.u32 %v12121_v34, %v10683_v36  ;;  %v10662_v57 = vor.u32 %v12115_v55, %v10659_v56  ;;  %v12175_v38 = vld [vmem:[%s17278_s11 + $0x3ac] sm:$0xf] }
 0x4d9   : > { %6508 = vmatpush.bf16.msrb.mxu2 %v10790_v45  ;;  %6534 = vmatpush.bf16.msra.mxu1 %v10506_v52  ;;  %v10849_v52 = vld [vmem:[%s17278_s11 + $0x348] sm:$0xf] }
 0x4da   : > { %v10850_v54 = vor.u32 %v12164_v31, %v10849_v52  ;;  %v12151_v31 = vld [vmem:[%s17278_s11 + $0x2ec] sm:$0xf] }
 0x4db   : > { %6546 = vmatpush.bf16.msrb.mxu3 %v10614_v51  ;;  %v10674_v51 = vor.u32 %v12118_v50, %v10671_v40  ;;  %v10509_v40 = vld [vmem:[%s17278_s11 + $0x98] sm:$0xf] }
 0x4dc   : > { %v15952_v7 = vpop.f32.mrf.mxu0 }
 0x4dd   : > { %6509 = vmatpush.bf16.msrb.mxu2 %v10778_v8  ;;  %v12170_v8 = vld [vmem:[%s17278_s11 + $0x380] sm:$0xf0]  ;;  %6535 = vmatpush.bf16.msra.mxu1 %v10494_v32  ;;  %v12161_v32 = vld [vmem:[%s17278_s11 + $0x338] sm:$0xf0] }
 0x4de   : > { %v10874_v21 = vor.u32 %v12170_v8, %v10873_v17  ;;  %v10431_v17 = vld [vmem:[%s17278_s11 + $0xc] sm:$0xf0]  ;;  %v12082_v8 = vld [vmem:[%s17278_s11 + $0xc4] sm:$0xf] }
 0x4df   : > { %6547 = vmatpush.bf16.msrb.mxu3 %v10602_v35  ;;  %v10837_v35 = vld [vmem:[%s17278_s11 + $0x330] sm:$0xf]  ;;  %v10530_v11 = vor.u32 %v12082_v8, %v10527_v10  ;;  %v12102_v10 = vld [vmem:[%s17278_s11 + $0x160] sm:$0xf0] }
 0x4e0   : > { %v10838_v63 = vor.u32 %v12161_v32, %v10837_v35  ;;  %v10497_v32 = vld [vmem:[%s17278_s11 + $0x80] sm:$0xf] }
 0x4e1   : > { %6510 = vmatpush.bf16.msrb.mxu2 %v10766_v27  ;;  %v12167_v27 = vld [vmem:[%s17278_s11 + $0x368] sm:$0xf0]  ;;  %6536 = vmatpush.bf16.msra.mxu1 %v10482_v19  ;;  %v12109_v19 = vld [vmem:[%s17278_s11 + $0x19c] sm:$0xf] }
 0x4e2   : > { %v10862_v24 = vor.u32 %v12167_v27, %v10861_v26  ;;  %v16087_v44 = vpop.f32.mrf.mxu3  ;;  %v10638_v28 = vor.u32 %v12109_v19, %v10635_v20  ;;  %v12106_v26 = vld [vmem:[%s17278_s11 + $0x184] sm:$0xf]  ;;  %v10623_v27 = vld [vmem:[%s17278_s11 + $0x18c] sm:$0xf0]  ;;  %v10485_v20 = vld [vmem:[%s17278_s11 + $0x68] sm:$0xf] }
 0x4e3   : > { %5633 = vmatmul.bf16.vlgmr.msra.gmra.mxu2 %v15862_v4  ;;  %v10885_v4 = vld [vmem:[%s17278_s11 + $0x390] sm:$0xf]  ;;  %6548 = vmatpush.bf16.msrb.mxu3 %v10590_v2  ;;  %v10826_v2 = vor.u32 %v12158_v14, %v10825_v12  ;;  %v12166_v12 = vld [vmem:[%s17278_s11 + $0x364] sm:$0xf] }
 0x4e4   : > { %v5337_v45 = vpop.f32.mrf.mxu0  ;;  %v10886_v1 = vor.u32 %v12173_v9, %v10885_v4  ;;  %v12061_v4 = vld [vmem:[%s17278_s11 + $0x1c] sm:$0xf]  ;;  %v10443_v9 = vld [vmem:[%s17278_s11 + $0x24] sm:$0xf0]  ;;  %v10863_v14 = vld [vmem:[%s17278_s11 + $0x36c] sm:$0xf0] }
 0x4e5   : > { %6511 = vmatpush.bf16.msrb.mxu2 %v10754_v49  ;;  %6537 = vmatpush.bf16.msra.mxu1 %v10470_v33  ;;  %v10551_v49 = vld [vmem:[%s17278_s11 + $0xfc] sm:$0xf0]  ;;  %v12085_v45 = vld [vmem:[%s17278_s11 + $0xdc] sm:$0xf] }
 0x4e6   : > { %6521 = vmatpush.bf16.msra.mxu0 %v10886_v1  ;;  %v10554_v23 = vor.u32 %v12088_v47, %v10551_v49  ;;  %v10542_v60 = vor.u32 %v12085_v45, %v10539_v59  ;;  %v10647_v1 = vld [vmem:[%s17278_s11 + $0x1bc] sm:$0xf0]  ;;  %v10875_v59 = vld [vmem:[%s17278_s11 + $0x384] sm:$0xf0] }
 0x4e7   : > { %6549 = vmatpush.bf16.msrb.mxu3 %v10578_v30  ;;  %v10650_v3 = vor.u32 %v12112_v0, %v10647_v1  ;;  %v10887_v49 = vld [vmem:[%s17278_s11 + $0x39c] sm:$0xf0] }
 0x4e9   : > { %6512 = vmatpush.bf16.msrb.mxu2 %v10742_v58  ;;  %6538 = vmatpush.bf16.msra.mxu1 %v10458_v46  ;;  %v10446_v58 = vor.u32 %v12061_v4, %v10443_v9  ;;  %v12105_v4 = vld [vmem:[%s17278_s11 + $0x178] sm:$0xf0] }
 0x4ea   : > { %6522 = vmatpush.bf16.msra.mxu0 %v10874_v21  ;;  %v5363_v41 = vpop.f32.mrf.mxu3  ;;  %v10813_v21 = vld [vmem:[%s17278_s11 + $0x300] sm:$0xf] }
 0x4eb   : > { %6550 = vmatpush.bf16.msrb.mxu3 %v10566_v5  ;;  %v10814_v25 = vor.u32 %v12155_v22, %v10813_v21 }
 0x4ed   : > { %6513 = vmatpush.bf16.msrb.mxu2 %v10730_v16  ;;  %6539 = vmatpush.bf16.msra.mxu1 %v10446_v58  ;;  %v10434_v16 = vor.u32 %v12058_v53, %v10431_v17  ;;  %v10791_v53 = vld [vmem:[%s17278_s11 + $0x2dc] sm:$0xf0] }
 0x4ee   : > { %6523 = vmatpush.bf16.msra.mxu0 %v10862_v24  ;;  %v10899_v24 = vld [vmem:[%s17278_s11 + $0x3b4] sm:$0xf0] }
 0x4ef   : > { %6551 = vmatpush.bf16.msrb.mxu3 %v10554_v23  ;;  %v10902_v5 = vor.u32 %v12175_v38, %v10899_v24  ;;  %v10473_v38 = vld [vmem:[%s17278_s11 + $0x50] sm:$0xf]  ;;  %v12069_v24 = vld [vmem:[%s17278_s11 + $0x58] sm:$0xf0] }
 0x4f1   : > { %6514 = vmatpush.bf16.msrb.mxu2 %v10718_v6  ;;  %6540 = vmatpush.bf16.msra.mxu1 %v10434_v16  ;;  %v10626_v6 = vor.u32 %v12106_v26, %v10623_v27  ;;  %v10605_v16 = vld [vmem:[%s17278_s11 + $0x158] sm:$0xf]  ;;  %v10779_v26 = vld [vmem:[%s17278_s11 + $0x2c4] sm:$0xf0]  ;;  %v10866_v27 = vor.u32 %v12166_v12, %v10863_v14  ;;  %v10809_v14 = vld [vmem:[%s17278_s11 + $0x2f0] sm:$0xf] }
 0x4f2   : > { %6524 = vmatpush.bf16.msra.mxu0 %v10850_v54  ;;  %v10803_v54 = vld [vmem:[%s17278_s11 + $0x2f4] sm:$0xf0]  ;;  %v10606_v22 = vor.u32 %v12102_v10, %v10605_v16  ;;  %v10437_v16 = vld [vmem:[%s17278_s11 + $0x8] sm:$0xf]  ;;  %v12060_v10 = vld [vmem:[%s17278_s11 + $0x10] sm:$0xf0] }
 0x4f3   : > { %6552 = vmatpush.bf16.msrb.mxu3 %v10542_v60  ;;  %v10806_v35 = vor.u32 %v12151_v31, %v10803_v54  ;;  %v10755_v31 = vld [vmem:[%s17278_s11 + $0x294] sm:$0xf0] }
 0x4f5   : > { %6559 = vmatpush.bf16.msra.mxu2 %v10710_v62  ;;  %v16179_v62 = vld [vmem:[#allocation10] sm:$0x1f] }
 0x4f6   : > { %6525 = vmatpush.bf16.msra.mxu0 %v10838_v63  ;;  %v5641_v29 = vperm.slane %v16179_v62, 1  ;;  %v5642_v18 = vperm.slane %v16179_v62, 2  ;;  %v5640_v46 = vperm.slane %v16179_v62, 0  ;;  %v5643_v50 = vperm.slane %v16179_v62, 3  ;;  %v12075_v63 = vld [vmem:[%s17278_s11 + $0x88] sm:$0xf0] }
 0x4f7   : > { %6553 = vmatpush.bf16.msrb.mxu3 %v10530_v11  ;;  %v10498_v11 = vor.u32 %v12075_v63, %v10497_v32  ;;  %v10557_v63 = vld [vmem:[%s17278_s11 + $0xf8] sm:$0xf] }
 0x4f9   : > { %6560 = vmatpush.bf16.msra.mxu2 %v10698_v43  ;;  %v12081_v43 = vld [vmem:[%s17278_s11 + $0xb8] sm:$0xf0] }
 0x4fa   : > { %6526 = vmatpush.bf16.msra.mxu0 %v10826_v2  ;;  %v10522_v47 = vor.u32 %v12081_v43, %v10521_v39  ;;  %v12142_v39 = vld [vmem:[%s17278_s11 + $0x2a4] sm:$0xf]  ;;  %v10767_v43 = vld [vmem:[%s17278_s11 + $0x2ac] sm:$0xf0] }
 0x4fd   : > { %6561 = vmatpush.bf16.msra.mxu2 %v10686_v48 }
 0x4fe   : > { %6527 = vmatpush.bf16.msra.mxu0 %v10814_v25  ;;  %v12145_v25 = vld [vmem:[%s17278_s11 + $0x2bc] sm:$0xf] }
 0x501   : > { %6562 = vmatpush.bf16.msra.mxu2 %v10674_v51  ;;  %v12078_v51 = vld [vmem:[%s17278_s11 + $0xa0] sm:$0xf0] }
 0x502   : > { %v10510_v58 = vor.u32 %v12078_v51, %v10509_v40  ;;  %v10461_v40 = vld [vmem:[%s17278_s11 + $0x38] sm:$0xf] }
 0x505   : > { %6563 = vmatpush.bf16.msra.mxu2 %v10662_v57 }
 0x509   : > { %6564 = vmatpush.bf16.msra.mxu2 %v10650_v3  ;;  %v12148_v3 = vld [vmem:[%s17278_s11 + $0x2d4] sm:$0xf] }
 0x50a   : > { %v10794_v19 = vor.u32 %v12148_v3, %v10791_v53  ;;  %v12154_v3 = vld [vmem:[%s17278_s11 + $0x304] sm:$0xf] }
 0x50d   : > { %6565 = vmatpush.bf16.msra.mxu2 %v10638_v28  ;;  %v12072_v28 = vld [vmem:[%s17278_s11 + $0x70] sm:$0xf0] }
 0x511   : > { %6566 = vmatpush.bf16.msra.mxu2 %v10626_v6  ;;  %v10593_v6 = vld [vmem:[%s17278_s11 + $0x140] sm:$0xf] }
 0x550   : > { %v5595_v30 = vpop.f32.mrf.mxu0 }
 0x551   : > { %v5596_v33 = vadd.f32 %v5595_v30, %v15918_v42  ;;  %v5608_v37 = vpop.f32.mrf.mxu1  ;;  %v10486_v30 = vor.u32 %v12072_v28, %v10485_v20  ;;  %v12177_v28 = vld [vmem:[%s17278_s11 + $0x3b8] sm:$0xf0] }
 0x552   : > { %v5609_v15 = vadd.f32 %v5608_v37, %v15952_v7  ;;  %v12172_v7 = vld [vmem:[%s17278_s11 + $0x394] sm:$0xf]  ;;  %v10782_v37 = vor.u32 %v12145_v25, %v10779_v26  ;;  %v10545_v26 = vld [vmem:[%s17278_s11 + $0xe0] sm:$0xf] }
 0x553   : > { %v5651_v42 = vadd.f32 %v5641_v29, %v5596_v33  ;;  %v10890_v57 = vor.u32 %v12172_v7, %v10887_v49  ;;  %v12099_v29 = vld [vmem:[%s17278_s11 + $0x148] sm:$0xf0]  ;;  %v10851_v33 = vld [vmem:[%s17278_s11 + $0x354] sm:$0xf0]  ;;  %v12160_v7 = vld [vmem:[%s17278_s11 + $0x334] sm:$0xf] }
 0x554   : > { %v5652_v34 = vadd.f32 %v5642_v18, %v5609_v15  ;;  %v12163_v18 = vld [vmem:[%s17278_s11 + $0x34c] sm:$0xf]  ;;  %v10594_v15 = vor.u32 %v12099_v29, %v10593_v6  ;;  %v10839_v49 = vld [vmem:[%s17278_s11 + $0x33c] sm:$0xf0]  ;;  %v10438_v6 = vor.u32 %v12060_v10, %v10437_v16 }
 0x555   : > { %v16197_v36 = vpack.c.bf16 %v5651_v42, %v5651_v42  ;;  %v10854_v42 = vor.u32 %v12163_v18, %v10851_v33  ;;  %v10842_v54 = vor.u32 %v12160_v7, %v10839_v49 }
 0x556   : > { %v16206_v48 = vpack.c.bf16 %v5652_v34, %v5652_v34  ;;  %v5582_v23 = vpop.f32.mrf.mxu2  ;;  %v10581_v34 = vld [vmem:[%s17278_s11 + $0x128] sm:$0xf] }
 0x557   : > { %v5583_v41 = vadd.f32 %v5582_v23, %v15898_v61  ;;  %v5621_v52 = vpop.f32.mrf.mxu3  ;;  %6489 = vmatmul.bf16.vlgmr.msrb.gmra.mxu1 %v16197_v36  ;;  %v10617_v61 = vld [vmem:[%s17278_s11 + $0x170] sm:$0xf] }
 0x558   : > { %v5622_v55 = vadd.f32 %v5621_v52, %v15926_v13  ;;  %6502 = vmatmul.bf16.vlgmr.msra.gmra.mxu3 %v16206_v48  ;;  %6585 = vmatpush.bf16.msrb.mxu1 %v10902_v5  ;;  %v5597_v56 = vpop.f32.mrf.mxu0  ;;  %v12169_v13 = vld [vmem:[%s17278_s11 + $0x37c] sm:$0xf]  ;;  %v10618_v1 = vor.u32 %v12105_v4, %v10617_v61  ;;  %v12096_v5 = vld [vmem:[%s17278_s11 + $0x130] sm:$0xf0]  ;;  %v12139_v52 = vld [vmem:[%s17278_s11 + $0x28c] sm:$0xf] }
 0x559   : > { %v5650_v9 = vadd.f32 %v5640_v46, %v5583_v41  ;;  %6598 = vmatpush.bf16.msra.mxu3 %v10522_v47  ;;  %v5610_v45 = vpop.f32.mrf.mxu1  ;;  %v10878_v8 = vor.u32 %v12169_v13, %v10875_v59  ;;  %v5644_v46 = vperm.slane %v16179_v62, 4  ;;  %v10474_v47 = vor.u32 %v12069_v24, %v10473_v38  ;;  %v12066_v62 = vld [vmem:[%s17278_s11 + $0x40] sm:$0xf0]  ;;  %v12157_v61 = vld [vmem:[%s17278_s11 + $0x31c] sm:$0xf] }
 0x55a   : > { %v5653_v60 = vadd.f32 %v5643_v50, %v5622_v55  ;;  %v10770_v50 = vor.u32 %v12142_v39, %v10767_v43  ;;  %v10582_v41 = vor.u32 %v12096_v5, %v10581_v34  ;;  %v12093_v55 = vld [vmem:[%s17278_s11 + $0x118] sm:$0xf0]  ;;  %v10827_v4 = vld [vmem:[%s17278_s11 + $0x324] sm:$0xf0]  ;;  %v10449_v45 = vld [vmem:[%s17278_s11 + $0x20] sm:$0xf] }
 0x55b   : > { %v16243_v0 = vpack.c.bf16 %v5650_v9, %v5650_v9  ;;  %v10758_v9 = vor.u32 %v12139_v52, %v10755_v31  ;;  %v10830_v32 = vor.u32 %v12157_v61, %v10827_v4  ;;  %v10893_v38 = vld [vmem:[%s17278_s11 + $0x398] sm:$0xf]  ;;  %v12174_v24 = vld [vmem:[%s17278_s11 + $0x3a0] sm:$0xf0]  ;;  %v10719_v43 = vld [vmem:[%s17278_s11 + $0x24c] sm:$0xf0] }
 0x55c   : > { %v16251_v17 = vpack.c.bf16 %v5653_v60, %v5653_v60  ;;  %6586 = vmatpush.bf16.msrb.mxu1 %v10890_v57  ;;  %v10462_v57 = vor.u32 %v12066_v62, %v10461_v40  ;;  %v12136_v60 = vld [vmem:[%s17278_s11 + $0x274] sm:$0xf]  ;;  %v12130_v39 = vld [vmem:[%s17278_s11 + $0x244] sm:$0xf]  ;;  %v10713_v5 = vld [vmem:[%s17278_s11 + $0x230] sm:$0xf]  ;;  %v10894_v7 = vor.u32 %v12174_v24, %v10893_v38 }
 0x55d   : > { %6599 = vmatpush.bf16.msra.mxu3 %v10510_v58  ;;  %6476 = vmatmul.bf16.vlgmr.msrb.gmra.mxu0 %v16243_v0  ;;  %v12063_v58 = vld [vmem:[%s17278_s11 + $0x28] sm:$0xf0]  ;;  %v12084_v34 = vld [vmem:[%s17278_s11 + $0xd0] sm:$0xf0]  ;;  %v10722_v49 = vor.u32 %v12130_v39, %v10719_v43  ;;  %v10701_v52 = vld [vmem:[%s17278_s11 + $0x218] sm:$0xf] }
 0x55e   : > { %6515 = vmatmul.bf16.vlgmr.msrb.gmra.mxu2 %v16251_v17  ;;  %6572 = vmatpush.bf16.msrb.mxu0 %v10806_v35  ;;  %v5584_v2 = vpop.f32.mrf.mxu2  ;;  %v10743_v35 = vld [vmem:[%s17278_s11 + $0x27c] sm:$0xf0]  ;;  %v10450_v53 = vor.u32 %v12063_v58, %v10449_v45  ;;  %v12126_v31 = vld [vmem:[%s17278_s11 + $0x220] sm:$0xf0]  ;;  %v12168_v61 = vld [vmem:[%s17278_s11 + $0x370] sm:$0xf0] }
 0x55f   : > { %v5623_v21 = vpop.f32.mrf.mxu3  ;;  %6611 = vmatpush.bf16.msrb.mxu2 %v10618_v1  ;;  %v12090_v1 = vld [vmem:[%s17278_s11 + $0x100] sm:$0xf0]  ;;  %v10746_v12 = vor.u32 %v12136_v60, %v10743_v35  ;;  %v12153_v2 = vld [vmem:[%s17278_s11 + $0x2f8] sm:$0xf0]  ;;  %v10689_v4 = vld [vmem:[%s17278_s11 + $0x200] sm:$0xf] }
 0x560   : > { %6587 = vmatpush.bf16.msrb.mxu1 %v10878_v8  ;;  %v10815_v8 = vld [vmem:[%s17278_s11 + $0x30c] sm:$0xf0]  ;;  %v10558_v20 = vor.u32 %v12090_v1, %v10557_v63  ;;  %v12133_v21 = vld [vmem:[%s17278_s11 + $0x25c] sm:$0xf]  ;;  %v10810_v29 = vor.u32 %v12153_v2, %v10809_v14  ;;  %v11049_v45 = vld [vmem:[%s17279_s4 + $0x118] sm:$0xf] }
 0x561   : > { %6600 = vmatpush.bf16.msra.mxu3 %v10498_v11  ;;  %v10818_v25 = vor.u32 %v12154_v3, %v10815_v8  ;;  %v12215_v58 = vld [vmem:[%s17279_s4 + $0x128] sm:$0xf0]  ;;  %v12141_v63 = vld [vmem:[%s17278_s11 + $0x298] sm:$0xf0]  ;;  %v10857_v3 = vld [vmem:[%s17278_s11 + $0x350] sm:$0xf] }
 0x562   : > { %6573 = vmatpush.bf16.msrb.mxu0 %v10794_v19  ;;  %v10905_v19 = vld [vmem:[%s17278_s11 + $0x3b0] sm:$0xf]  ;;  %v11050_v60 = vor.u32 %v12215_v58, %v11049_v45  ;;  %v12120_v8 = vld [vmem:[%s17278_s11 + $0x1f0] sm:$0xf0]  ;;  %v10845_v2 = vld [vmem:[%s17278_s11 + $0x338] sm:$0xf] }
 0x563   : > { %6612 = vmatpush.bf16.msrb.mxu2 %v10606_v22  ;;  %v10731_v22 = vld [vmem:[%s17278_s11 + $0x264] sm:$0xf0]  ;;  %v10906_v18 = vor.u32 %v12177_v28, %v10905_v19  ;;  %v12162_v19 = vld [vmem:[%s17278_s11 + $0x340] sm:$0xf0]  ;;  %v12117_v28 = vld [vmem:[%s17278_s11 + $0x1d8] sm:$0xf0] }
 0x564   : > { %6588 = vmatpush.bf16.msrb.mxu1 %v10866_v27  ;;  %v12087_v27 = vld [vmem:[%s17278_s11 + $0xe8] sm:$0xf0]  ;;  %v10734_v33 = vor.u32 %v12133_v21, %v10731_v22  ;;  %v10846_v22 = vor.u32 %v12162_v19, %v10845_v2  ;;  %v10725_v38 = vld [vmem:[%s17278_s11 + $0x248] sm:$0xf]  ;;  %v12132_v24 = vld [vmem:[%s17278_s11 + $0x250] sm:$0xf0] }
 0x565   : > { %6601 = vmatpush.bf16.msra.mxu3 %v10486_v30  ;;  %v10797_v30 = vld [vmem:[%s17278_s11 + $0x2d8] sm:$0xf]  ;;  %v10821_v39 = vld [vmem:[%s17278_s11 + $0x308] sm:$0xf]  ;;  %v12156_v43 = vld [vmem:[%s17278_s11 + $0x310] sm:$0xf0] }
 0x566   : > { %6574 = vmatpush.bf16.msrb.mxu0 %v10782_v37  ;;  %v5634_v23 = vpop.f32.mrf.mxu2  ;;  %v12150_v37 = vld [vmem:[%s17278_s11 + $0x2e0] sm:$0xf0]  ;;  %v11109_v2 = vld [vmem:[%s17279_s4 + $0x190] sm:$0xf] }
 0x567   : > { %v5635_v51 = vadd.f32 %v5634_v23, %v16087_v44  ;;  %6613 = vmatpush.bf16.msrb.mxu2 %v10594_v15  ;;  %6541 = vmatmul.bf16.vlgmr.msra.gmra.mxu1 %v16243_v0  ;;  %v10569_v44 = vld [vmem:[%s17278_s11 + $0x110] sm:$0xf]  ;;  %v10546_v15 = vor.u32 %v12087_v27, %v10545_v26  ;;  %v10785_v23 = vld [vmem:[%s17278_s11 + $0x2c0] sm:$0xf]  ;;  %v12135_v26 = vld [vmem:[%s17278_s11 + $0x268] sm:$0xf0] }
 0x568   : > { %6554 = vmatmul.bf16.vlgmr.msrb.gmra.mxu3 %v16197_v36  ;;  %6589 = vmatpush.bf16.msrb.mxu1 %v10854_v42  ;;  %v10570_v59 = vor.u32 %v12093_v55, %v10569_v44  ;;  %v10533_v42 = vld [vmem:[%s17278_s11 + $0xc8] sm:$0xf]  ;;  %v12230_v19 = vld [vmem:[%s17279_s4 + $0x1a0] sm:$0xf0] }
 0x569   : > { %v5654_v56 = vadd.f32 %v5644_v46, %v5635_v51  ;;  %6602 = vmatpush.bf16.msra.mxu3 %v10474_v47  ;;  %v12129_v46 = vld [vmem:[%s17278_s11 + $0x238] sm:$0xf0]  ;;  %v10798_v47 = vor.u32 %v12150_v37, %v10797_v30  ;;  %v10534_v40 = vor.u32 %v12084_v34, %v10533_v42  ;;  %v10881_v51 = vld [vmem:[%s17278_s11 + $0x380] sm:$0xf]  ;;  %v10773_v55 = vld [vmem:[%s17278_s11 + $0x2a8] sm:$0xf] }
 0x56a   : > { %6575 = vmatpush.bf16.msrb.mxu0 %v10770_v50  ;;  %v12147_v50 = vld [vmem:[%s17278_s11 + $0x2c8] sm:$0xf0]  ;;  %v10714_v62 = vor.u32 %v12129_v46, %v10713_v5  ;;  %v10653_v30 = vld [vmem:[%s17278_s11 + $0x1b8] sm:$0xf]  ;;  %v10641_v42 = vld [vmem:[%s17278_s11 + $0x1a0] sm:$0xf] }
 0x56b   : > { %v16349_v13 = vpack.c.bf16 %v5654_v56, %v5654_v56  ;;  %6614 = vmatpush.bf16.msrb.mxu2 %v10582_v41  ;;  %v12171_v41 = vld [vmem:[%s17278_s11 + $0x388] sm:$0xf0]  ;;  %v10702_v56 = vor.u32 %v12126_v31, %v10701_v52  ;;  %v12213_v5 = vld [vmem:[%s17279_s4 + $0x11c] sm:$0xf]  ;;  %v11051_v46 = vld [vmem:[%s17279_s4 + $0x12c] sm:$0xf0] }
 0x56c   : > { %6590 = vmatpush.bf16.msrb.mxu1 %v10842_v54  ;;  %v10786_v54 = vor.u32 %v12147_v50, %v10785_v23  ;;  %v10882_v44 = vor.u32 %v12171_v41, %v10881_v51  ;;  %v12111_v34 = vld [vmem:[%s17278_s11 + $0x1a8] sm:$0xf0]  ;;  %v11054_v23 = vor.u32 %v12213_v5, %v11051_v46  ;;  %v10629_v50 = vld [vmem:[%s17278_s11 + $0x188] sm:$0xf]  ;;  %v11189_v31 = vld [vmem:[%s17279_s4 + $0x230] sm:$0xf] }
 0x56d   : > { %6603 = vmatpush.bf16.msra.mxu3 %v10462_v57  ;;  %6528 = vmatmul.bf16.vlgmr.msra.gmra.mxu0 %v16349_v13  ;;  %v10869_v57 = vld [vmem:[%s17278_s11 + $0x368] sm:$0xf]  ;;  %v12255_v51 = vld [vmem:[%s17279_s4 + $0x268] sm:$0xf0]  ;;  %v12185_v5 = vld [vmem:[%s17279_s4 + $0x38] sm:$0xf0] }
 0x56e   : > { %6567 = vmatmul.bf16.vlgmr.msra.gmra.mxu2 %v16206_v48  ;;  %6576 = vmatpush.bf16.msrb.mxu0 %v10758_v9  ;;  %v5636_v11 = vpop.f32.mrf.mxu2  ;;  %v12123_v9 = vld [vmem:[%s17278_s11 + $0x208] sm:$0xf0]  ;;  %v10870_v35 = vor.u32 %v12168_v61, %v10869_v57  ;;  %v12208_v57 = vld [vmem:[%s17279_s4 + $0xf4] sm:$0xf] }
 0x56f   : > { %6615 = vmatpush.bf16.msrb.mxu2 %v10570_v59  ;;  %v10690_v1 = vor.u32 %v12123_v9, %v10689_v4  ;;  %v10749_v11 = vld [vmem:[%s17278_s11 + $0x278] sm:$0xf]  ;;  %v11149_v4 = vld [vmem:[%s17279_s4 + $0x1e0] sm:$0xf]  ;;  %v12240_v9 = vld [vmem:[%s17279_s4 + $0x1f0] sm:$0xf0] }
 0x570   : > { %6591 = vmatpush.bf16.msrb.mxu1 %v10830_v32  ;;  %v10761_v32 = vld [vmem:[%s17278_s11 + $0x290] sm:$0xf]  ;;  %v11150_v58 = vor.u32 %v12240_v9, %v11149_v4  ;;  %v12183_v46 = vld [vmem:[%s17279_s4 + $0x2c] sm:$0xf]  ;;  %v11289_v9 = vld [vmem:[%s17279_s4 + $0x2f8] sm:$0xf] }
 0x571   : > { %6604 = vmatpush.bf16.msra.mxu3 %v10450_v53  ;;  %v12165_v53 = vld [vmem:[%s17278_s11 + $0x358] sm:$0xf0]  ;;  %v10762_v16 = vor.u32 %v12141_v63, %v10761_v32  ;;  %v11011_v63 = vld [vmem:[%s17279_s4 + $0xdc] sm:$0xf0] }
 0x572   : > { %6577 = vmatpush.bf16.msrb.mxu0 %v10746_v12  ;;  %v10858_v10 = vor.u32 %v12165_v53, %v10857_v3  ;;  %v12138_v12 = vld [vmem:[%s17278_s11 + $0x280] sm:$0xf0]  ;;  %v11129_v3 = vld [vmem:[%s17279_s4 + $0x1b8] sm:$0xf]  ;;  %v12235_v53 = vld [vmem:[%s17279_s4 + $0x1c8] sm:$0xf0] }
 0x573   : > { %6616 = vmatpush.bf16.msrb.mxu2 %v10558_v20  ;;  %v10665_v20 = vld [vmem:[%s17278_s11 + $0x1d0] sm:$0xf]  ;;  %v10750_v21 = vor.u32 %v12138_v12, %v10749_v11  ;;  %v10991_v12 = vld [vmem:[%s17279_s4 + $0xb4] sm:$0xf0] }
 0x574   : > { %6592 = vmatpush.bf16.msrb.mxu1 %v10818_v25  ;;  %v10737_v25 = vld [vmem:[%s17278_s11 + $0x260] sm:$0xf]  ;;  %v10666_v27 = vor.u32 %v12117_v28, %v10665_v20  ;;  %v11110_v20 = vor.u32 %v12230_v19, %v11109_v2  ;;  %v10969_v28 = vld [vmem:[%s17279_s4 + $0x78] sm:$0xf] }
 0x575   : > { %6605 = vmatpush.bf16.msra.mxu3 %v10438_v6  ;;  %v10833_v6 = vld [vmem:[%s17278_s11 + $0x320] sm:$0xf]  ;;  %v10957_v19 = vld [vmem:[%s17279_s4 + $0x58] sm:$0xf] }
 0x576   : > { %6578 = vmatpush.bf16.msrb.mxu0 %v10734_v33  ;;  %v10738_v33 = vor.u32 %v12135_v26, %v10737_v25  ;;  %v10971_v26 = vld [vmem:[%s17279_s4 + $0x8c] sm:$0xf0] }
 0x577   : > { %6617 = vmatpush.bf16.msrb.mxu2 %v10546_v15  ;;  %6593 = vmatmul.bf16.vlgmr.msrb.gmra.mxu1 %v16349_v13 }
 0x578   : > { %6637 = vmatpush.bf16.msra.mxu1 %v10810_v29  ;;  %6606 = vmatmul.bf16.vlgmr.msra.gmra.mxu3 %v16243_v0  ;;  %v12144_v0 = vld [vmem:[%s17278_s11 + $0x2b0] sm:$0xf0]  ;;  %v12159_v29 = vld [vmem:[%s17278_s11 + $0x328] sm:$0xf0] }
 0x579   : > { %6650 = vmatpush.bf16.msrb.mxu3 %v10906_v18  ;;  %v10774_v59 = vor.u32 %v12144_v0, %v10773_v55  ;;  %v12114_v18 = vld [vmem:[%s17278_s11 + $0x1c0] sm:$0xf0]  ;;  %v10834_v37 = vor.u32 %v12159_v29, %v10833_v6  ;;  %v11169_v55 = vld [vmem:[%s17279_s4 + $0x208] sm:$0xf]  ;;  %v11029_v0 = vld [vmem:[%s17279_s4 + $0xf0] sm:$0xf] }
 0x57a   : > { %6579 = vmatpush.bf16.msrb.mxu0 %v10722_v49  ;;  %v10654_v15 = vor.u32 %v12114_v18, %v10653_v30  ;;  %v10642_v49 = vor.u32 %v12111_v34, %v10641_v42  ;;  %v11089_v6 = vld [vmem:[%s17279_s4 + $0x168] sm:$0xf]  ;;  %v12225_v29 = vld [vmem:[%s17279_s4 + $0x178] sm:$0xf0]  ;;  %v10949_v18 = vld [vmem:[%s17279_s4 + $0x50] sm:$0xf] }
 0x57b   : > { %6618 = vmatpush.bf16.msrb.mxu2 %v10534_v40  ;;  %v12108_v40 = vld [vmem:[%s17278_s11 + $0x190] sm:$0xf0]  ;;  %v11090_v30 = vor.u32 %v12225_v29, %v11089_v6  ;;  %v10929_v34 = vld [vmem:[%s17279_s4 + $0x28] sm:$0xf]  ;;  %v11251_v29 = vld [vmem:[%s17279_s4 + $0x2bc] sm:$0xf0] }
 0x57c   : > { %6638 = vmatpush.bf16.msra.mxu1 %v10798_v47  ;;  %v10726_v47 = vor.u32 %v12132_v24, %v10725_v38  ;;  %v10630_v41 = vor.u32 %v12108_v40, %v10629_v50  ;;  %v12188_v38 = vld [vmem:[%s17279_s4 + $0x54] sm:$0xf]  ;;  %v10951_v24 = vld [vmem:[%s17279_s4 + $0x64] sm:$0xf0] }
 0x57d   : > { %6651 = vmatpush.bf16.msrb.mxu3 %v10894_v7  ;;  %6580 = vmatmul.bf16.vlgmr.msrb.gmra.mxu0 %v16251_v17  ;;  %v10822_v7 = vor.u32 %v12156_v43, %v10821_v39  ;;  %v11069_v39 = vld [vmem:[%s17279_s4 + $0x140] sm:$0xf]  ;;  %v12220_v43 = vld [vmem:[%s17279_s4 + $0x150] sm:$0xf0] }
 0x57e   : > { %6624 = vmatpush.bf16.msra.mxu0 %v10714_v62  ;;  %6619 = vmatmul.bf16.vlgmr.msrb.gmra.mxu2 %v16197_v36  ;;  %v10677_v36 = vld [vmem:[%s17278_s11 + $0x1e8] sm:$0xf]  ;;  %v11209_v62 = vld [vmem:[%s17279_s4 + $0x258] sm:$0xf]  ;;  %v11070_v42 = vor.u32 %v12220_v43, %v11069_v39  ;;  %v12260_v39 = vld [vmem:[%s17279_s4 + $0x290] sm:$0xf0] }
 0x57f   : > { %7321 = vmatpush.bf16.msra.mxu2 %v11050_v60  ;;  %v10678_v14 = vor.u32 %v12120_v8, %v10677_v36  ;;  %v11210_v52 = vor.u32 %v12255_v51, %v11209_v62  ;;  %v12205_v60 = vld [vmem:[%s17279_s4 + $0xd8] sm:$0xf0]  ;;  %v11130_v36 = vor.u32 %v12235_v53, %v11129_v3  ;;  %v10989_v8 = vld [vmem:[%s17279_s4 + $0xa0] sm:$0xf]  ;;  %v12180_v51 = vld [vmem:[%s17279_s4 + $0x10] sm:$0xf0] }
 0x580   : > { %6639 = vmatpush.bf16.msra.mxu1 %v10786_v54  ;;  %v12250_v54 = vld [vmem:[%s17279_s4 + $0x240] sm:$0xf0]  ;;  %v10909_v62 = vld [vmem:[%s17279_s4] sm:$0xf] }
 0x581   : > { %6652 = vmatpush.bf16.msrb.mxu3 %v10882_v44  ;;  %v11190_v44 = vor.u32 %v12250_v54, %v11189_v31  ;;  %v10911_v31 = vld [vmem:[%s17279_s4 + $0x14] sm:$0xf0]  ;;  %v12258_v43 = vld [vmem:[%s17279_s4 + $0x284] sm:$0xf] }
 0x582   : > { %6625 = vmatpush.bf16.msra.mxu0 %v10702_v56  ;;  %v12210_v56 = vld [vmem:[%s17279_s4 + $0x100] sm:$0xf0]  ;;  %v11037_v54 = vld [vmem:[%s17279_s4 + $0xf8] sm:$0xf] }
 0x583   : > { %v11030_v61 = vor.u32 %v12210_v56, %v11029_v0  ;;  %v12206_v0 = vld [vmem:[%s17279_s4 + $0xe0] sm:$0xf0] }
 0x584   : > { %6640 = vmatpush.bf16.msra.mxu1 %v10774_v59  ;;  %v11009_v59 = vld [vmem:[%s17279_s4 + $0xc8] sm:$0xf] }
 0x585   : > { %6653 = vmatpush.bf16.msrb.mxu3 %v10870_v35  ;;  %v12203_v35 = vld [vmem:[%s17279_s4 + $0xcc] sm:$0xf]  ;;  %7322 = vmatpush.bf16.msra.mxu2 %v11030_v61  ;;  %v11010_v32 = vor.u32 %v12205_v60, %v11009_v59  ;;  %v12201_v61 = vld [vmem:[%s17279_s4 + $0xb8] sm:$0xf0] }
 0x586   : > { %6626 = vmatpush.bf16.msra.mxu0 %v10690_v1  ;;  %v11014_v1 = vor.u32 %v12203_v35, %v11011_v63  ;;  %v16729_v59 = vld [vmem:[#allocation11] sm:$0x7]  ;;  %v11291_v35 = vld [vmem:[%s17279_s4 + $0x30c] sm:$0xf0] }
 0x587   : > { %v10977_v63 = vld [vmem:[%s17279_s4 + $0x80] sm:$0xf]  ;;  %v5822_v3 = vperm.slane %v16729_v59, 0 }
 0x588   : > { %6641 = vmatpush.bf16.msra.mxu1 %v10762_v16  ;;  %v12200_v16 = vld [vmem:[%s17279_s4 + $0xb0] sm:$0xf0] }
 0x589   : > { %6654 = vmatpush.bf16.msrb.mxu3 %v10858_v10  ;;  %7323 = vmatpush.bf16.msra.mxu2 %v11010_v32  ;;  %v12198_v10 = vld [vmem:[%s17279_s4 + $0xa4] sm:$0xf]  ;;  %v10990_v11 = vor.u32 %v12200_v16, %v10989_v8  ;;  %v12268_v16 = vld [vmem:[%s17279_s4 + $0x2d4] sm:$0xf] }
 0x58a   : > { %6627 = vmatpush.bf16.msra.mxu0 %v10678_v14  ;;  %v10994_v14 = vor.u32 %v12198_v10, %v10991_v12  ;;  %v12270_v8 = vld [vmem:[%s17279_s4 + $0x2e0] sm:$0xf0]  ;;  %v11271_v12 = vld [vmem:[%s17279_s4 + $0x2e4] sm:$0xf0] }
 0x58b   : > { %v11274_v2 = vor.u32 %v12268_v16, %v11271_v12  ;;  %v12251_v12 = vld [vmem:[%s17279_s4 + $0x248] sm:$0xf0] }
 0x58c   : > { %6642 = vmatpush.bf16.msra.mxu1 %v10750_v21  ;;  %v12195_v21 = vld [vmem:[%s17279_s4 + $0x88] sm:$0xf0] }
 0x58d   : > { %6655 = vmatpush.bf16.msrb.mxu3 %v10846_v22  ;;  %7324 = vmatpush.bf16.msra.mxu2 %v10990_v11  ;;  %v12193_v22 = vld [vmem:[%s17279_s4 + $0x7c] sm:$0xf]  ;;  %v10970_v25 = vor.u32 %v12195_v21, %v10969_v28 }
 0x58e   : > { %6628 = vmatpush.bf16.msra.mxu0 %v10666_v27  ;;  %v10974_v27 = vor.u32 %v12193_v22, %v10971_v26  ;;  %v12265_v26 = vld [vmem:[%s17279_s4 + $0x2b8] sm:$0xf0] }
 0x590   : > { %6643 = vmatpush.bf16.msra.mxu1 %v10738_v33  ;;  %v12190_v33 = vld [vmem:[%s17279_s4 + $0x60] sm:$0xf0] }
 0x591   : > { %6656 = vmatpush.bf16.msrb.mxu3 %v10834_v37  ;;  %7325 = vmatpush.bf16.msra.mxu2 %v10970_v25  ;;  %v10950_v37 = vor.u32 %v12190_v33, %v10949_v18  ;;  %v11249_v25 = vld [vmem:[%s17279_s4 + $0x2a8] sm:$0xf]  ;;  %v10937_v18 = vld [vmem:[%s17279_s4 + $0x30] sm:$0xf]  ;;  %v12186_v33 = vld [vmem:[%s17279_s4 + $0x40] sm:$0xf0] }
 0x592   : > { %6629 = vmatpush.bf16.msra.mxu0 %v10654_v15  ;;  %v10954_v15 = vor.u32 %v12188_v38, %v10951_v24  ;;  %v11250_v6 = vor.u32 %v12265_v26, %v11249_v25  ;;  %v5823_v25 = vperm.slane %v16729_v59, 1 }
 0x594   : > { %6644 = vmatpush.bf16.msra.mxu1 %v10726_v47  ;;  %v10930_v47 = vor.u32 %v12185_v5, %v10929_v34  ;;  %v11231_v5 = vld [vmem:[%s17279_s4 + $0x294] sm:$0xf0] }
 0x595   : > { %6657 = vmatpush.bf16.msrb.mxu3 %v10822_v7  ;;  %7326 = vmatpush.bf16.msra.mxu2 %v10950_v37  ;;  %v10931_v7 = vld [vmem:[%s17279_s4 + $0x3c] sm:$0xf0]  ;;  %v10938_v37 = vor.u32 %v12186_v33, %v10937_v18  ;;  %v12233_v18 = vld [vmem:[%s17279_s4 + $0x1bc] sm:$0xf]  ;;  %v11131_v33 = vld [vmem:[%s17279_s4 + $0x1cc] sm:$0xf0] }
 0x596   : > { %6630 = vmatpush.bf16.msra.mxu0 %v10642_v49  ;;  %v11057_v49 = vld [vmem:[%s17279_s4 + $0x120] sm:$0xf]  ;;  %v10934_v50 = vor.u32 %v12183_v46, %v10931_v7  ;;  %v12253_v46 = vld [vmem:[%s17279_s4 + $0x25c] sm:$0xf] }
 0x597   : > { %6645 = vmatmul.bf16.vlgmr.msra.gmra.mxu1 %v16251_v17  ;;  %v12245_v17 = vld [vmem:[%s17279_s4 + $0x218] sm:$0xf0] }
 0x598   : > { %6658 = vmatmul.bf16.vlgmr.msrb.gmra.mxu3 %v16349_v13  ;;  %v11170_v13 = vor.u32 %v12245_v17, %v11169_v55 }
 0x599   : > { %7360 = vmatpush.bf16.msra.mxu3 %v11054_v23  ;;  %v12216_v23 = vld [vmem:[%s17279_s4 + $0x130] sm:$0xf0]  ;;  %7327 = vmatpush.bf16.msra.mxu2 %v10930_v47  ;;  %v11211_v47 = vld [vmem:[%s17279_s4 + $0x26c] sm:$0xf0] }
 0x59a   : > { %6631 = vmatpush.bf16.msra.mxu0 %v10630_v41  ;;  %v11058_v40 = vor.u32 %v12216_v23, %v11057_v49  ;;  %v12178_v41 = vld [vmem:[%s17279_s4 + $0x4] sm:$0xf]  ;;  %v11234_v49 = vor.u32 %v12258_v43, %v11231_v5  ;;  %v11214_v23 = vor.u32 %v12253_v46, %v11211_v47  ;;  %v12241_v5 = vld [vmem:[%s17279_s4 + $0x1f8] sm:$0xf0]  ;;  %v12228_v47 = vld [vmem:[%s17279_s4 + $0x194] sm:$0xf] }
 0x59b   : > { %v10914_v55 = vor.u32 %v12178_v41, %v10911_v31  ;;  %v12181_v41 = vld [vmem:[%s17279_s4 + $0x18] sm:$0xf0] }
 0x59d   : > { %6632 = vmatmul.bf16.vlgmr.msra.gmra.mxu0 %v16206_v48  ;;  %v11031_v48 = vld [vmem:[%s17279_s4 + $0x104] sm:$0xf0] }
 0x59e   : > { %7334 = vmatpush.bf16.msrb.mxu0 %v11210_v52  ;;  %v11034_v45 = vor.u32 %v12208_v57, %v11031_v48  ;;  %v10910_v52 = vor.u32 %v12180_v51, %v10909_v62  ;;  %v10997_v57 = vld [vmem:[%s17279_s4 + $0xa8] sm:$0xf]  ;;  %v12276_v62 = vld [vmem:[%s17279_s4 + $0x310] sm:$0xf0] }
 0x59f   : > { %v10998_v4 = vor.u32 %v12201_v61, %v10997_v57  ;;  %v10917_v51 = vld [vmem:[%s17279_s4 + $0x8] sm:$0xf] }
 0x5a0   : > { %7361 = vmatpush.bf16.msra.mxu3 %v11034_v45  ;;  %7328 = vmatpush.bf16.msra.mxu2 %v10910_v52  ;;  %v12275_v45 = vld [vmem:[%s17279_s4 + $0x308] sm:$0xf0] }
 0x5a1   : > { %v11290_v60 = vor.u32 %v12275_v45, %v11289_v9  ;;  %v12243_v9 = vld [vmem:[%s17279_s4 + $0x20c] sm:$0xf]  ;;  %v11171_v45 = vld [vmem:[%s17279_s4 + $0x21c] sm:$0xf0] }
 0x5a2   : > { %7335 = vmatpush.bf16.msrb.mxu0 %v11190_v44  ;;  %v12211_v44 = vld [vmem:[%s17279_s4 + $0x108] sm:$0xf0] }
 0x5a3   : > { %v11038_v17 = vor.u32 %v12211_v44, %v11037_v54  ;;  %7351 = vmatpush.bf16.msrb.mxu1 %v11290_v60  ;;  %v10918_v54 = vor.u32 %v12181_v41, %v10917_v51  ;;  %v12248_v44 = vld [vmem:[%s17279_s4 + $0x234] sm:$0xf]  ;;  %v11174_v60 = vor.u32 %v12243_v9, %v11171_v45 }
 0x5a4   : > { %7362 = vmatpush.bf16.msra.mxu3 %v11014_v1  ;;  %v12196_v1 = vld [vmem:[%s17279_s4 + $0x90] sm:$0xf0] }
 0x5a5   : > { %v10978_v53 = vor.u32 %v12196_v1, %v10977_v63 }
 0x5a6   : > { %7336 = vmatpush.bf16.msrb.mxu0 %v11170_v13  ;;  %v11017_v13 = vld [vmem:[%s17279_s4 + $0xd0] sm:$0xf] }
 0x5a7   : > { %v11018_v56 = vor.u32 %v12206_v0, %v11017_v13  ;;  %v11277_v13 = vld [vmem:[%s17279_s4 + $0x2d8] sm:$0xf]  ;;  %v12271_v0 = vld [vmem:[%s17279_s4 + $0x2e8] sm:$0xf0] }
 0x5a8   : > { %7363 = vmatpush.bf16.msra.mxu3 %v10994_v14  ;;  %v11278_v57 = vor.u32 %v12271_v0, %v11277_v13  ;;  %v11091_v13 = vld [vmem:[%s17279_s4 + $0x17c] sm:$0xf0] }
 0x5aa   : > { %7337 = vmatpush.bf16.msrb.mxu0 %v11150_v58  ;;  %v12273_v58 = vld [vmem:[%s17279_s4 + $0x2fc] sm:$0xf] }
 0x5ab   : > { %v11294_v32 = vor.u32 %v12273_v58, %v11291_v35  ;;  %v11257_v35 = vld [vmem:[%s17279_s4 + $0x2b0] sm:$0xf] }
 0x5ac   : > { %7364 = vmatpush.bf16.msra.mxu3 %v10974_v27  ;;  %v12263_v27 = vld [vmem:[%s17279_s4 + $0x2ac] sm:$0xf] }
 0x5ad   : > { %7390 = vmatpush.bf16.msrb.mxu2 %v11294_v32  ;;  %v12266_v32 = vld [vmem:[%s17279_s4 + $0x2c0] sm:$0xf0] }
 0x5ae   : > { %7338 = vmatpush.bf16.msrb.mxu0 %v11130_v36  ;;  %v11269_v36 = vld [vmem:[%s17279_s4 + $0x2d0] sm:$0xf]  ;;  %v11258_v16 = vor.u32 %v12266_v32, %v11257_v35  ;;  %v12231_v35 = vld [vmem:[%s17279_s4 + $0x1a8] sm:$0xf0] }
 0x5af   : > { %v11270_v11 = vor.u32 %v12270_v8, %v11269_v36  ;;  %v11197_v8 = vld [vmem:[%s17279_s4 + $0x238] sm:$0xf] }
 0x5b0   : > { %7365 = vmatpush.bf16.msra.mxu3 %v10954_v15  ;;  %v11229_v15 = vld [vmem:[%s17279_s4 + $0x280] sm:$0xf] }
 0x5b1   : > { %7352 = vmatpush.bf16.msrb.mxu1 %v11270_v11  ;;  %7391 = vmatpush.bf16.msrb.mxu2 %v11274_v2  ;;  %v11230_v34 = vor.u32 %v12260_v39, %v11229_v15  ;;  %v11237_v2 = vld [vmem:[%s17279_s4 + $0x288] sm:$0xf]  ;;  %v11199_v15 = vld [vmem:[%s17279_s4 + $0x24c] sm:$0xf0] }
 0x5b2   : > { %7339 = vmatpush.bf16.msrb.mxu0 %v11110_v20  ;;  %v12191_v20 = vld [vmem:[%s17279_s4 + $0x68] sm:$0xf0] }
 0x5b3   : > { %v10958_v21 = vor.u32 %v12191_v20, %v10957_v19  ;;  %v12261_v19 = vld [vmem:[%s17279_s4 + $0x298] sm:$0xf0]  ;;  %v12254_v20 = vld [vmem:[%s17279_s4 + $0x264] sm:$0xf] }
 0x5b4   : > { %7366 = vmatpush.bf16.msra.mxu3 %v10934_v50  ;;  %v11297_v50 = vld [vmem:[%s17279_s4 + $0x300] sm:$0xf] }
 0x5b5   : > { %7353 = vmatpush.bf16.msrb.mxu1 %v11250_v6  ;;  %v11298_v31 = vor.u32 %v12276_v62, %v11297_v50  ;;  %v12246_v6 = vld [vmem:[%s17279_s4 + $0x220] sm:$0xf0]  ;;  %v12244_v50 = vld [vmem:[%s17279_s4 + $0x214] sm:$0xf] }
 0x5b6   : > { %7340 = vmatpush.bf16.msrb.mxu0 %v11090_v30  ;;  %v11254_v30 = vor.u32 %v12263_v27, %v11251_v29  ;;  %v11177_v27 = vld [vmem:[%s17279_s4 + $0x210] sm:$0xf] }
 0x5b7   : > { %v11178_v43 = vor.u32 %v12246_v6, %v11177_v27  ;;  %v11259_v27 = vld [vmem:[%s17279_s4 + $0x2c4] sm:$0xf0]  ;;  %v12229_v6 = vld [vmem:[%s17279_s4 + $0x19c] sm:$0xf] }
 0x5b8   : > { %7367 = vmatpush.bf16.msra.mxu3 %v10914_v55  ;;  %7392 = vmatpush.bf16.msrb.mxu2 %v11254_v30  ;;  %v11191_v55 = vld [vmem:[%s17279_s4 + $0x244] sm:$0xf0] }
 0x5b9   : > { %7354 = vmatpush.bf16.msrb.mxu1 %v11230_v34  ;;  %v11157_v34 = vld [vmem:[%s17279_s4 + $0x1e8] sm:$0xf] }
 0x5ba   : > { %7341 = vmatpush.bf16.msrb.mxu0 %v11070_v42  ;;  %v11158_v62 = vor.u32 %v12241_v5, %v11157_v34 }
 0x5bc   : > { %7393 = vmatpush.bf16.msrb.mxu2 %v11234_v49  ;;  %7429 = vmatpush.bf16.msrb.mxu3 %v11298_v31  ;;  %v12236_v31 = vld [vmem:[%s17279_s4 + $0x1d0] sm:$0xf0] }
 0x5bd   : > { %7373 = vmatpush.bf16.msra.mxu1 %v11214_v23 }
 0x5be   : > { %7399 = vmatpush.bf16.msra.mxu0 %v11058_v40 }
 0x5c0   : > { %7430 = vmatpush.bf16.msrb.mxu3 %v11278_v57  ;;  %v11299_v57 = vld [vmem:[%s17279_s4 + $0x314] sm:$0xf0] }
 0x5c2   : > { %7400 = vmatpush.bf16.msra.mxu0 %v11038_v17  ;;  %v11194_v17 = vor.u32 %v12248_v44, %v11191_v55  ;;  %v12274_v55 = vld [vmem:[%s17279_s4 + $0x304] sm:$0xf] }
 0x5c4   : > { %7374 = vmatpush.bf16.msra.mxu1 %v11194_v17  ;;  %7431 = vmatpush.bf16.msrb.mxu3 %v11258_v16  ;;  %v12223_v17 = vld [vmem:[%s17279_s4 + $0x16c] sm:$0xf] }
 0x5c6   : > { %7401 = vmatpush.bf16.msra.mxu0 %v11018_v56  ;;  %v11217_v56 = vld [vmem:[%s17279_s4 + $0x260] sm:$0xf] }
 0x5c8   : > { %7375 = vmatpush.bf16.msra.mxu1 %v11174_v60  ;;  %v11117_v60 = vld [vmem:[%s17279_s4 + $0x198] sm:$0xf] }
 0x5ca   : > { %7402 = vmatpush.bf16.msra.mxu0 %v10998_v4  ;;  %v12256_v4 = vld [vmem:[%s17279_s4 + $0x270] sm:$0xf0] }
 0x5cb   : > { %v11218_v36 = vor.u32 %v12256_v4, %v11217_v56  ;;  %v11159_v4 = vld [vmem:[%s17279_s4 + $0x1fc] sm:$0xf0] }
 0x5ce   : > { %7403 = vmatpush.bf16.msra.mxu0 %v10978_v53 }
 0x5d2   : > { %7404 = vmatpush.bf16.msra.mxu0 %v10958_v21  ;;  %v11198_v21 = vor.u32 %v12251_v12, %v11197_v8  ;;  %v11279_v8 = vld [vmem:[%s17279_s4 + $0x2ec] sm:$0xf0]  ;;  %v12234_v12 = vld [vmem:[%s17279_s4 + $0x1c4] sm:$0xf] }
 0x5d4   : > { %v6490_v48 = vpop.f32.mrf.mxu1 }
 0x5d6   : > { %7405 = vmatpush.bf16.msra.mxu0 %v10938_v37 }
 0x5da   : > { %v6477_v10 = vpop.f32.mrf.mxu0  ;;  %7406 = vmatpush.bf16.msra.mxu0 %v10918_v54 }
 0x5db   : > { %v6503_v14 = vpop.f32.mrf.mxu3  ;;  %v6478_v22 = vadd.f32 %v6477_v10, %v5822_v3  ;;  %v12238_v3 = vld [vmem:[%s17279_s4 + $0x1e4] sm:$0xf]  ;;  %v11151_v10 = vld [vmem:[%s17279_s4 + $0x1f4] sm:$0xf0] }
 0x5dc   : > { %v6492_v28 = vpop.f32.mrf.mxu1 }
 0x5dd   : > { %v6491_v38 = vadd.f32 %v6490_v48, %v6478_v22  ;;  %v11219_v28 = vld [vmem:[%s17279_s4 + $0x274] sm:$0xf0]  ;;  %v11238_v22 = vor.u32 %v12261_v19, %v11237_v2  ;;  %v11097_v19 = vld [vmem:[%s17279_s4 + $0x170] sm:$0xf] }
 0x5de   : > { %v11222_v29 = vor.u32 %v12254_v20, %v11219_v28  ;;  %v12226_v20 = vld [vmem:[%s17279_s4 + $0x180] sm:$0xf0] }
 0x5df   : > { %v6504_v52 = vadd.f32 %v6503_v14, %v6491_v38  ;;  %v11154_v14 = vor.u32 %v12238_v3, %v11151_v10  ;;  %v11134_v38 = vor.u32 %v12233_v18, %v11131_v33  ;;  %7432 = vmatpush.bf16.msrb.mxu3 %v11238_v22  ;;  %v11071_v3 = vld [vmem:[%s17279_s4 + $0x154] sm:$0xf0]  ;;  %v11118_v10 = vor.u32 %v12231_v35, %v11117_v60  ;;  %v11077_v18 = vld [vmem:[%s17279_s4 + $0x148] sm:$0xf]  ;;  %v12221_v33 = vld [vmem:[%s17279_s4 + $0x158] sm:$0xf0] }
 0x5e0   : > { %v11065_v60 = vld [vmem:[%s17279_s4 + $0x128] sm:$0xf]  ;;  %v12217_v35 = vld [vmem:[%s17279_s4 + $0x138] sm:$0xf0] }
 0x5e1   : > { %v6516_v24 = vpop.f32.mrf.mxu2  ;;  %7376 = vmatpush.bf16.msra.mxu1 %v11154_v14  ;;  %v11139_v14 = vld [vmem:[%s17279_s4 + $0x1d4] sm:$0xf0] }
 0x5e2   : > { %v6479_v42 = vpop.f32.mrf.mxu0  ;;  %v6517_v61 = vadd.f32 %v6516_v24, %v6504_v52  ;;  %v12249_v24 = vld [vmem:[%s17279_s4 + $0x23c] sm:$0xf]  ;;  %v11137_v52 = vld [vmem:[%s17279_s4 + $0x1c0] sm:$0xf]  ;;  %v11142_v28 = vor.u32 %v12234_v12, %v11139_v14 }
 0x5e3   : > { %v6505_v7 = vpop.f32.mrf.mxu3  ;;  %v11202_v46 = vor.u32 %v12249_v24, %v11199_v15  ;;  %v11138_v45 = vor.u32 %v12236_v31, %v11137_v52  ;;  %v12259_v24 = vld [vmem:[%s17279_s4 + $0x28c] sm:$0xf]  ;;  %v11239_v15 = vld [vmem:[%s17279_s4 + $0x29c] sm:$0xf0] }
 0x5e4   : > { %v16798_v40 = vpop.f32.mrf.mxu1  ;;  %v11111_v7 = vld [vmem:[%s17279_s4 + $0x1a4] sm:$0xf0] }
 0x5e5   : > { %v6543_v42 = vadd.f32 %v16798_v40, %v5823_v25  ;;  %7377 = vmatpush.bf16.msra.mxu1 %v11134_v38  ;;  %v11114_v23 = vor.u32 %v12228_v47, %v11111_v7  ;;  %v11179_v40 = vld [vmem:[%s17279_s4 + $0x224] sm:$0xf0]  ;;  %v12257_v7 = vld [vmem:[%s17279_s4 + $0x278] sm:$0xf0] }
 0x5e6   : > { %v11182_v54 = vor.u32 %v12244_v50, %v11179_v40  ;;  %v11225_v47 = vld [vmem:[%s17279_s4 + $0x268] sm:$0xf] }
 0x5e7   : > { %v11226_v40 = vor.u32 %v12257_v7, %v11225_v47  ;;  %v12194_v7 = vld [vmem:[%s17279_s4 + $0x84] sm:$0xf] }
 0x5e9   : > { %v6518_v48 = vpop.f32.mrf.mxu2  ;;  %7378 = vmatpush.bf16.msra.mxu1 %v11114_v23  ;;  %v11079_v23 = vld [vmem:[%s17279_s4 + $0x15c] sm:$0xf0] }
 0x5ea   : > { %v6529_v58 = vpop.f32.mrf.mxu0  ;;  %v12239_v48 = vld [vmem:[%s17279_s4 + $0x1ec] sm:$0xf] }
 0x5eb   : > { %v6530_v63 = vadd.f32 %v6529_v58, %v6517_v61  ;;  %v6555_v1 = vpop.f32.mrf.mxu3  ;;  %v11094_v61 = vor.u32 %v12223_v17, %v11091_v13  ;;  %v11162_v32 = vor.u32 %v12239_v48, %v11159_v4 }
 0x5ec   : > { %v6544_v53 = vpop.f32.mrf.mxu1  ;;  %v6556_v49 = vadd.f32 %v6555_v1, %v6543_v42  ;;  %v12218_v1 = vld [vmem:[%s17279_s4 + $0x144] sm:$0xf]  ;;  %v11099_v42 = vld [vmem:[%s17279_s4 + $0x184] sm:$0xf0] }
 0x5ed   : > { %v16848_v11 = vpack.c.bf16 %v6530_v63, %v6530_v63  ;;  %7379 = vmatpush.bf16.msra.mxu1 %v11094_v61  ;;  %v11302_v63 = vor.u32 %v12274_v55, %v11299_v57  ;;  %v11074_v16 = vor.u32 %v12218_v1, %v11071_v3  ;;  %v12242_v57 = vld [vmem:[%s17279_s4 + $0x200] sm:$0xf0]  ;;  %v12237_v1 = vld [vmem:[%s17279_s4 + $0x1d8] sm:$0xf0] }
 0x5ef   : > { %7329 = vmatmul.bf16.vlgmr.msra.gmra.mxu2 %v16848_v11  ;;  %7368 = vmatmul.bf16.vlgmr.msra.gmra.mxu3 %v16848_v11 }
 0x5f0   : > { %7412 = vmatpush.bf16.msra.mxu2 %v11218_v36  ;;  %7451 = vmatpush.bf16.msra.mxu3 %v11222_v29  ;;  %v12269_v36 = vld [vmem:[%s17279_s4 + $0x2dc] sm:$0xf]  ;;  %v11098_v29 = vor.u32 %v12226_v20, %v11097_v19  ;;  %v12212_v19 = vld [vmem:[%s17279_s4 + $0x110] sm:$0xf0] }
 0x5f1   : > { %v6568_v26 = vpop.f32.mrf.mxu2  ;;  %v11282_v22 = vor.u32 %v12269_v36, %v11279_v8  ;;  %7380 = vmatpush.bf16.msra.mxu1 %v11074_v16  ;;  %v11066_v8 = vor.u32 %v12217_v35, %v11065_v60  ;;  %v12209_v16 = vld [vmem:[%s17279_s4 + $0xfc] sm:$0xf] }
 0x5f2   : > { %v6531_v30 = vpop.f32.mrf.mxu0  ;;  %v6569_v51 = vadd.f32 %v6568_v26, %v6556_v49  ;;  %v12264_v26 = vld [vmem:[%s17279_s4 + $0x2b4] sm:$0xf]  ;;  %v12219_v49 = vld [vmem:[%s17279_s4 + $0x14c] sm:$0xf] }
 0x5f3   : > { %v6557_v37 = vpop.f32.mrf.mxu3  ;;  %v11119_v30 = vld [vmem:[%s17279_s4 + $0x1ac] sm:$0xf0]  ;;  %v11262_v38 = vor.u32 %v12264_v26, %v11259_v27  ;;  %v11082_v50 = vor.u32 %v12219_v49, %v11079_v23  ;;  %v12204_v26 = vld [vmem:[%s17279_s4 + $0xd4] sm:$0xf]  ;;  %v11019_v27 = vld [vmem:[%s17279_s4 + $0xe4] sm:$0xf0] }
 0x5f4   : > { %v6594_v39 = vpop.f32.mrf.mxu1  ;;  %7413 = vmatpush.bf16.msra.mxu2 %v11198_v21  ;;  %7452 = vmatpush.bf16.msra.mxu3 %v11202_v46  ;;  %v11122_v37 = vor.u32 %v12229_v6, %v11119_v30  ;;  %v11242_v46 = vor.u32 %v12259_v24, %v11239_v15  ;;  %v12207_v30 = vld [vmem:[%s17279_s4 + $0xe8] sm:$0xf0]  ;;  %v10999_v15 = vld [vmem:[%s17279_s4 + $0xbc] sm:$0xf0]  ;;  %v10979_v49 = vld [vmem:[%s17279_s4 + $0x94] sm:$0xf0] }
 0x5f5   : > { %v12199_v24 = vld [vmem:[%s17279_s4 + $0xac] sm:$0xf] }
 0x5f8   : > { %7414 = vmatpush.bf16.msra.mxu2 %v11178_v43  ;;  %7453 = vmatpush.bf16.msra.mxu3 %v11182_v54  ;;  %v11078_v43 = vor.u32 %v12221_v33, %v11077_v18  ;;  %v11185_v54 = vld [vmem:[%s17279_s4 + $0x218] sm:$0xf]  ;;  %v12227_v33 = vld [vmem:[%s17279_s4 + $0x188] sm:$0xf0] }
 0x5f9   : > { %v6570_v41 = vpop.f32.mrf.mxu2  ;;  %v11105_v18 = vld [vmem:[%s17279_s4 + $0x178] sm:$0xf] }
 0x5fa   : > { %v6581_v44 = vpop.f32.mrf.mxu0  ;;  %v5824_v41 = vperm.slane %v16729_v59, 2 }
 0x5fb   : > { %v6582_v0 = vadd.f32 %v6581_v44, %v6569_v51  ;;  %v16920_v56 = vpop.f32.mrf.mxu3  ;;  %v12252_v51 = vld [vmem:[%s17279_s4 + $0x250] sm:$0xf0]  ;;  %v12247_v44 = vld [vmem:[%s17279_s4 + $0x228] sm:$0xf0] }
 0x5fc   : > { %v6596_v9 = vpop.f32.mrf.mxu1  ;;  %7415 = vmatpush.bf16.msra.mxu2 %v11158_v62  ;;  %7454 = vmatpush.bf16.msra.mxu3 %v11162_v32  ;;  %v11205_v62 = vld [vmem:[%s17279_s4 + $0x240] sm:$0xf]  ;;  %v6608_v55 = vadd.f32 %v16920_v56, %v5824_v41  ;;  %v11186_v13 = vor.u32 %v12247_v44, %v11185_v54  ;;  %v12214_v56 = vld [vmem:[%s17279_s4 + $0x124] sm:$0xf]  ;;  %v12189_v41 = vld [vmem:[%s17279_s4 + $0x5c] sm:$0xf] }
 0x5fd   : > { %v6595_v58 = vadd.f32 %v6594_v39, %v6582_v0  ;;  %v12224_v39 = vld [vmem:[%s17279_s4 + $0x174] sm:$0xf]  ;;  %v11206_v31 = vor.u32 %v12252_v51, %v11205_v62  ;;  %v11165_v0 = vld [vmem:[%s17279_s4 + $0x1f0] sm:$0xf]  ;;  %v10982_v62 = vor.u32 %v12194_v7, %v10979_v49 }
 0x5fe   : > { %v11102_v5 = vor.u32 %v12224_v39, %v11099_v42  ;;  %v11106_v39 = vor.u32 %v12227_v33, %v11105_v18  ;;  %v12202_v42 = vld [vmem:[%s17279_s4 + $0xc0] sm:$0xf0]  ;;  %v12192_v54 = vld [vmem:[%s17279_s4 + $0x70] sm:$0xf0] }
 0x5ff   : > { %v16943_v53 = vpack.c.bf16 %v6595_v58, %v6595_v58  ;;  %v11059_v58 = vld [vmem:[%s17279_s4 + $0x134] sm:$0xf0]  ;;  %v12291_v18 = vld [vmem:[#allocation14 + $0x68] sm:$0xff] }
 0x600   : > { %7416 = vmatpush.bf16.msra.mxu2 %v11138_v45  ;;  %7455 = vmatpush.bf16.msra.mxu3 %v11142_v28  ;;  %v11166_v45 = vor.u32 %v12242_v57, %v11165_v0  ;;  %v11062_v3 = vor.u32 %v12214_v56, %v11059_v58  ;;  %v11125_v28 = vld [vmem:[%s17279_s4 + $0x1a0] sm:$0xf]  ;;  %v12187_v0 = vld [vmem:[%s17279_s4 + $0x48] sm:$0xf0]  ;;  %v12277_v56 = vld [vmem:[%s17279_s4 + $0x318] sm:$0xf0] }
 0x601   : > { %v6620_v2 = vpop.f32.mrf.mxu2  ;;  %7342 = vmatmul.bf16.vlgmr.msrb.gmra.mxu0 %v16943_v53  ;;  %v12287_v7 = vld [vmem:[#allocation14 + $0x48] sm:$0xff] }
 0x602   : > { %v6583_v21 = vpop.f32.mrf.mxu0  ;;  %7468 = vmatpush.bf16.msrb.mxu0 %v11302_v63  ;;  %v6621_v17 = vadd.f32 %v6620_v2, %v6608_v55  ;;  %v11145_v63 = vld [vmem:[%s17279_s4 + $0x1c8] sm:$0xf]  ;;  %v11045_v2 = vld [vmem:[%s17279_s4 + $0x100] sm:$0xf] }
 0x603   : > { %v6609_v25 = vpop.f32.mrf.mxu3  ;;  %v11146_v14 = vor.u32 %v12237_v1, %v11145_v63  ;;  %v12232_v21 = vld [vmem:[%s17279_s4 + $0x1b0] sm:$0xf0] }
 0x604   : > { %7417 = vmatpush.bf16.msra.mxu2 %v11118_v10  ;;  %7456 = vmatpush.bf16.msra.mxu3 %v11122_v37  ;;  %v11039_v10 = vld [vmem:[%s17279_s4 + $0x10c] sm:$0xf0]  ;;  %v11046_v25 = vor.u32 %v12212_v19, %v11045_v2  ;;  %v11126_v6 = vor.u32 %v12232_v21, %v11125_v28  ;;  %v11022_v37 = vor.u32 %v12204_v26, %v11019_v27  ;;  %v12272_v63 = vld [vmem:[%s17279_s4 + $0x2f0] sm:$0xf0]  ;;  %v12285_v2 = vld [vmem:[#allocation14 + $0x38] sm:$0xff] }
 0x605   : > { %v12284_v19 = vld [vmem:[#allocation14 + $0x30] sm:$0xff]  ;;  %v12293_v28 = vld [vmem:[#allocation14 + $0x78] sm:$0xff] }
 0x606   : > { %7469 = vmatpush.bf16.msrb.mxu0 %v11282_v22  ;;  %v11042_v22 = vor.u32 %v12209_v16, %v11039_v10  ;;  %v11245_v10 = vld [vmem:[%s17279_s4 + $0x290] sm:$0xf]  ;;  %v12281_v21 = vld [vmem:[#allocation14 + $0x18] sm:$0xff]  ;;  %v12280_v26 = vld [vmem:[#allocation14 + $0x10] sm:$0xff] }
 0x607   : > { %v12292_v27 = vld [vmem:[#allocation14 + $0x70] sm:$0xff] }
 0x608   : > { %7418 = vmatpush.bf16.msra.mxu2 %v11098_v29  ;;  %7457 = vmatpush.bf16.msra.mxu3 %v11102_v5  ;;  %v11025_v29 = vld [vmem:[%s17279_s4 + $0xd8] sm:$0xf]  ;;  %v12222_v5 = vld [vmem:[%s17279_s4 + $0x160] sm:$0xf0] }
 0x609   : > { %v6622_v34 = vpop.f32.mrf.mxu2 }
 0x60a   : > { %7470 = vmatpush.bf16.msrb.mxu0 %v11262_v38  ;;  %v11026_v38 = vor.u32 %v12207_v30, %v11025_v29  ;;  %v11085_v34 = vld [vmem:[%s17279_s4 + $0x150] sm:$0xf] }
 0x60b   : > { %v11086_v23 = vor.u32 %v12222_v5, %v11085_v34  ;;  %v12309_v34 = vld [vmem:[#allocation14 + $0xf8] sm:$0xff]  ;;  %v12288_v5 = vld [vmem:[#allocation14 + $0x50] sm:$0xff] }
 0x60c   : > { %7419 = vmatpush.bf16.msra.mxu2 %v11078_v43  ;;  %7458 = vmatpush.bf16.msra.mxu3 %v11082_v50  ;;  %v11005_v43 = vld [vmem:[%s17279_s4 + $0xb0] sm:$0xf]  ;;  %v10985_v50 = vld [vmem:[%s17279_s4 + $0x88] sm:$0xf] }
 0x60d   : > { %v11006_v47 = vor.u32 %v12202_v42, %v11005_v43  ;;  %v12298_v42 = vld [vmem:[#allocation14 + $0xa0] sm:$0xff] }
 0x60e   : > { %7471 = vmatpush.bf16.msrb.mxu0 %v11242_v46  ;;  %v11002_v46 = vor.u32 %v12199_v24, %v10999_v15  ;;  %v12290_v24 = vld [vmem:[#allocation14 + $0x60] sm:$0xff]  ;;  %v12299_v15 = vld [vmem:[#allocation14 + $0xa8] sm:$0xff] }
 0x611   : > { %7407 = vmatmul.bf16.vlgmr.msra.gmra.mxu0 %v16848_v11 }
 0x612   : > { %7490 = vmatpush.bf16.msra.mxu0 %v11226_v40  ;;  %v12197_v40 = vld [vmem:[%s17279_s4 + $0x98] sm:$0xf0] }
 0x613   : > { %v10986_v51 = vor.u32 %v12197_v40, %v10985_v50  ;;  %v12307_v50 = vld [vmem:[#allocation14 + $0xe8] sm:$0xff]  ;;  %v12286_v40 = vld [vmem:[#allocation14 + $0x40] sm:$0xff] }
 0x614   : > { %v6646_v52 = vpop.f32.mrf.mxu1 }
 0x616   : > { %7491 = vmatpush.bf16.msra.mxu0 %v11206_v31  ;;  %v10965_v31 = vld [vmem:[%s17279_s4 + $0x60] sm:$0xf] }
 0x617   : > { %v10966_v55 = vor.u32 %v12192_v54, %v10965_v31 }
 0x61a   : > { %v6633_v59 = vpop.f32.mrf.mxu0  ;;  %7492 = vmatpush.bf16.msra.mxu0 %v11186_v13  ;;  %v10939_v13 = vld [vmem:[%s17279_s4 + $0x44] sm:$0xf0] }
 0x61b   : > { %v6634_v61 = vadd.f32 %v6633_v59, %v6621_v17  ;;  %v6659_v48 = vpop.f32.mrf.mxu3  ;;  %v12184_v17 = vld [vmem:[%s17279_s4 + $0x34] sm:$0xf]  ;;  %v10945_v59 = vld [vmem:[%s17279_s4 + $0x38] sm:$0xf] }
 0x61c   : > { %v6648_v4 = vpop.f32.mrf.mxu1  ;;  %v10942_v57 = vor.u32 %v12184_v17, %v10939_v13  ;;  %v12316_v17 = vld [vmem:[#allocation14 + $0x130] sm:$0xff] }
 0x61d   : > { %v6647_v9 = vadd.f32 %v6646_v52, %v6634_v61  ;;  %v10959_v52 = vld [vmem:[%s17279_s4 + $0x6c] sm:$0xf0]  ;;  %v12179_v61 = vld [vmem:[%s17279_s4 + $0xc] sm:$0xf] }
 0x61e   : > { %7493 = vmatpush.bf16.msra.mxu0 %v11166_v45  ;;  %v10962_v44 = vor.u32 %v12189_v41, %v10959_v52  ;;  %v10925_v4 = vld [vmem:[%s17279_s4 + $0x10] sm:$0xf]  ;;  %v11305_v45 = vld [vmem:[%s17279_s4 + $0x308] sm:$0xf]  ;;  %v12317_v41 = vld [vmem:[#allocation14 + $0x138] sm:$0xff] }
 0x61f   : > { %v6660_v32 = vadd.f32 %v6659_v48, %v6647_v9  ;;  %v10919_v48 = vld [vmem:[%s17279_s4 + $0x1c] sm:$0xf0]  ;;  %v12182_v9 = vld [vmem:[%s17279_s4 + $0x20] sm:$0xf0]  ;;  %v11306_v35 = vor.u32 %v12277_v56, %v11305_v45  ;;  %v12302_v56 = vld [vmem:[#allocation14 + $0xc0] sm:$0xff] }
 0x620   : > { %v10922_v58 = vor.u32 %v12179_v61, %v10919_v48  ;;  %v10926_v60 = vor.u32 %v12182_v9, %v10925_v4  ;;  %v17191_v52 = vld [vmem:[#allocation13] sm:$0x1f]  ;;  %v12303_v48 = vld [vmem:[#allocation14 + $0xc8] sm:$0xff]  ;;  %v12314_v4 = vld [vmem:[#allocation14 + $0x120] sm:$0xff] }
 0x621   : > { %v17045_v36 = vpack.c.bf16 %v6660_v32, %v6660_v32  ;;  %v11285_v32 = vld [vmem:[%s17279_s4 + $0x2e0] sm:$0xf]  ;;  %v6788_v31 = vperm.slane %v17191_v52, 0 }
 0x622   : > { %v6635_v12 = vpop.f32.mrf.mxu0  ;;  %7494 = vmatpush.bf16.msra.mxu0 %v11146_v14  ;;  %v11286_v1 = vor.u32 %v12272_v63, %v11285_v32  ;;  %v12312_v63 = vld [vmem:[#allocation14 + $0x110] sm:$0xff] }
 0x623   : > { %v6661_v20 = vpop.f32.mrf.mxu3  ;;  %11307 = vmatmul.msk.bf16.vlgmr.msrb.gmra.mxu1 %vm3667_vm0, %v17045_v36  ;;  %11308 = vmatmul.msk.bf16.vlgmr.msrb.gmra.mxu2 %vm3667_vm0, %v17045_v36  ;;  %v12262_v12 = vld [vmem:[%s17279_s4 + $0x2a0] sm:$0xf0] }
 0x624   : > { %11309 = vmatmul.msk.bf16.vlgmr.msrb.gmra.mxu3 %vm3667_vm0, %v17045_v36  ;;  %7438 = vmatpush.bf16.msrb.mxu1 %v11062_v3  ;;  %v11265_v3 = vld [vmem:[%s17279_s4 + $0x2b8] sm:$0xf]  ;;  %v11246_v14 = vor.u32 %v12262_v12, %v11245_v10  ;;  %v12282_v20 = vld [vmem:[#allocation14 + $0x20] sm:$0xff] }
 0x625   : > { %7477 = vmatpush.bf16.msrb.mxu2 %v11066_v8  ;;  %11310 = vmatmul.msk.bf16.vlgmr.msrb.gmra.mxu0 %vm3667_vm0, %v17045_v36  ;;  %v12267_v8 = vld [vmem:[%s17279_s4 + $0x2c8] sm:$0xf0] }
 0x626   : > { %7495 = vmatpush.bf16.msra.mxu0 %v11126_v6  ;;  %v11266_v16 = vor.u32 %v12267_v8, %v11265_v3  ;;  %7845 = vmatpush.bf16.msrb.mxu3 %v12285_v2  ;;  %v12301_v6 = vld [vmem:[#allocation14 + $0xb8] sm:$0xff]  ;;  %v6789_v3 = vperm.slane %v17191_v52, 1  ;;  %v12311_v8 = vld [vmem:[#allocation14 + $0x108] sm:$0xff]  ;;  %v6790_v2 = vperm.slane %v17191_v52, 2 }
 0x628   : > { %7439 = vmatpush.bf16.msrb.mxu1 %v11042_v22 }
 0x629   : > { %7478 = vmatpush.bf16.msrb.mxu2 %v11046_v25 }
 0x62a   : > { %7496 = vmatpush.bf16.msra.mxu0 %v11106_v39  ;;  %7846 = vmatpush.bf16.msrb.mxu3 %v12284_v19  ;;  %v12289_v39 = vld [vmem:[#allocation14 + $0x58] sm:$0xff] }
 0x62c   : > { %7440 = vmatpush.bf16.msrb.mxu1 %v11022_v37  ;;  %v12278_v37 = vld [vmem:[#allocation14] sm:$0xff] }
 0x62d   : > { %7479 = vmatpush.bf16.msrb.mxu2 %v11026_v38  ;;  %v12300_v38 = vld [vmem:[#allocation14 + $0xb0] sm:$0xff] }
 0x62e   : > { %7497 = vmatpush.bf16.msra.mxu0 %v11086_v23  ;;  %v12296_v23 = vld [vmem:[#allocation14 + $0x90] sm:$0xff] }
 0x630   : > { %7441 = vmatpush.bf16.msrb.mxu1 %v11002_v46  ;;  %v12297_v46 = vld [vmem:[#allocation14 + $0x98] sm:$0xff] }
 0x631   : > { %7480 = vmatpush.bf16.msrb.mxu2 %v11006_v47  ;;  %v12308_v47 = vld [vmem:[#allocation14 + $0xf0] sm:$0xff] }
 0x632   : > { %7884 = vmatpush.bf16.msrb.mxu0 %v12309_v34 }
 0x633   : > { %7381 = vmatmul.bf16.vlgmr.msra.gmra.mxu1 %v16943_v53  ;;  %7420 = vmatmul.bf16.vlgmr.msra.gmra.mxu2 %v16943_v53 }
 0x634   : > { %7459 = vmatmul.bf16.vlgmr.msra.gmra.mxu3 %v16943_v53  ;;  %7442 = vmatpush.bf16.msrb.mxu1 %v10982_v62  ;;  %v12295_v62 = vld [vmem:[#allocation14 + $0x88] sm:$0xff] }
 0x635   : > { %7481 = vmatpush.bf16.msrb.mxu2 %v10986_v51  ;;  %7498 = vmatmul.bf16.vlgmr.msra.gmra.mxu0 %v16943_v53  ;;  %v10946_v53 = vor.u32 %v12187_v0, %v10945_v59  ;;  %v12306_v51 = vld [vmem:[#allocation14 + $0xe0] sm:$0xff]  ;;  %v12304_v59 = vld [vmem:[#allocation14 + $0xd0] sm:$0xff]  ;;  %v12315_v0 = vld [vmem:[#allocation14 + $0x128] sm:$0xff] }
 0x636   : > { %7885 = vmatpush.bf16.msrb.mxu0 %v12308_v47 }
 0x638   : > { %7443 = vmatpush.bf16.msrb.mxu1 %v10962_v44  ;;  %v12294_v44 = vld [vmem:[#allocation14 + $0x80] sm:$0xff] }
 0x639   : > { %7482 = vmatpush.bf16.msrb.mxu2 %v10966_v55  ;;  %v12305_v55 = vld [vmem:[#allocation14 + $0xd8] sm:$0xff] }
 0x63a   : > { %7886 = vmatpush.bf16.msrb.mxu0 %v12307_v50 }
 0x63c   : > { %7444 = vmatpush.bf16.msrb.mxu1 %v10942_v57 }
 0x63d   : > { %7483 = vmatpush.bf16.msrb.mxu2 %v10946_v53 }
 0x63e   : > { %7887 = vmatpush.bf16.msrb.mxu0 %v12306_v51 }
 0x640   : > { %7445 = vmatpush.bf16.msrb.mxu1 %v10922_v58  ;;  %v12313_v58 = vld [vmem:[#allocation14 + $0x118] sm:$0xff] }
 0x641   : > { %7484 = vmatpush.bf16.msrb.mxu2 %v10926_v60 }
 0x642   : > { %7888 = vmatpush.bf16.msrb.mxu0 %v12305_v55  ;;  %v12455_v55 = vld [vmem:[#allocation16] ss:$0 sm:$0xff] }
 0x643   : > { %7446 = vmatmul.bf16.vlgmr.msrb.gmra.mxu1 %v16848_v11 }
 0x644   : > { %7507 = vmatpush.bf16.msra.mxu1 %v11306_v35  ;;  %7485 = vmatmul.bf16.vlgmr.msrb.gmra.mxu2 %v16848_v11  ;;  %v12283_v11 = vld [vmem:[#allocation14 + $0x28] sm:$0xff] }
 0x645   : > { %7847 = vmatpush.bf16.msrb.mxu3 %v12283_v11  ;;  %7871 = vmatpush.bf16.msra.mxu2 %v12301_v6  ;;  %v12310_v11 = vld [vmem:[#allocation14 + $0x100] sm:$0xff] }
 0x646   : > { %7889 = vmatpush.bf16.msrb.mxu0 %v12304_v59 }
 0x648   : > { %7508 = vmatpush.bf16.msra.mxu1 %v11286_v1 }
 0x649   : > { %7848 = vmatpush.bf16.msrb.mxu3 %v12282_v20  ;;  %7872 = vmatpush.bf16.msra.mxu2 %v12300_v38 }
 0x64a   : > { %7890 = vmatpush.bf16.msrb.mxu0 %v12303_v48 }
 0x64c   : > { %7509 = vmatpush.bf16.msra.mxu1 %v11266_v16 }
 0x64d   : > { %7849 = vmatpush.bf16.msrb.mxu3 %v12281_v21  ;;  %7873 = vmatpush.bf16.msra.mxu2 %v12299_v15 }
 0x64e   : > { %7891 = vmatpush.bf16.msrb.mxu0 %v12302_v56 }
 0x650   : > { %7510 = vmatpush.bf16.msra.mxu1 %v11246_v14 }
 0x651   : > { %7850 = vmatpush.bf16.msrb.mxu3 %v12280_v26  ;;  %7874 = vmatpush.bf16.msra.mxu2 %v12298_v42  ;;  %v6792_v42 = vperm.slane %v17191_v52, 4 }
 0x653   : > { %11311 = vmatmul.msk.bf16.vlgmr.msra.gmra.mxu1 %vm3667_vm0, %v17045_v36  ;;  %v12279_v36 = vld [vmem:[#allocation14 + $0x8] sm:$0xff] }
 0x654   : > { %7858 = vmatpush.bf16.msrb.mxu1 %v12293_v28 }
 0x655   : > { %7851 = vmatpush.bf16.msrb.mxu3 %v12279_v36  ;;  %7875 = vmatpush.bf16.msra.mxu2 %v12297_v46 }
 0x658   : > { %7859 = vmatpush.bf16.msrb.mxu1 %v12292_v27 }
 0x659   : > { %7852 = vmatpush.bf16.msrb.mxu3 %v12278_v37  ;;  %7876 = vmatpush.bf16.msra.mxu2 %v12296_v23 }
 0x65c   : > { %7860 = vmatpush.bf16.msrb.mxu1 %v12291_v18  ;;  %v6791_v18 = vperm.slane %v17191_v52, 3 }
 0x65d   : > { %7877 = vmatpush.bf16.msra.mxu2 %v12295_v62  ;;  %7897 = vmatpush.bf16.msra.mxu3 %v12317_v41 }
 0x660   : > { %7861 = vmatpush.bf16.msrb.mxu1 %v12290_v24 }
 0x661   : > { %7878 = vmatpush.bf16.msra.mxu2 %v12294_v44  ;;  %7898 = vmatpush.bf16.msra.mxu3 %v12316_v17 }
 0x664   : > { %7862 = vmatpush.bf16.msrb.mxu1 %v12289_v39 }
 0x665   : > { %7899 = vmatpush.bf16.msra.mxu3 %v12315_v0 }
 0x668   : > { %7863 = vmatpush.bf16.msrb.mxu1 %v12288_v5 }
 0x669   : > { %7900 = vmatpush.bf16.msra.mxu3 %v12314_v4 }
 0x66c   : > { %7864 = vmatpush.bf16.msrb.mxu1 %v12287_v7 }
 0x66d   : > { %7901 = vmatpush.bf16.msra.mxu3 %v12313_v58 }
 0x670   : > { %7865 = vmatpush.bf16.msrb.mxu1 %v12286_v40 }
 0x671   : > { %7902 = vmatpush.bf16.msra.mxu3 %v12312_v63 }
 0x672   : > { %v7330_v22 = vpop.f32.mrf.mxu2  ;;  %v17189_v25 = vpop.f32.mrf.mxu3 }
 0x673   : > { %v7331_v13 = vadd.f32 %v7330_v22, %v6788_v31  ;;  %v7370_v10 = vadd.f32 %v17189_v25, %v6789_v3 }
 0x675   : > { %7903 = vmatpush.bf16.msra.mxu3 %v12311_v8 }
 0x679   : > { %7904 = vmatpush.bf16.msra.mxu3 %v12310_v11 }
 0x67a   : > { %v7332_v29 = vpop.f32.mrf.mxu2  ;;  %v7371_v30 = vpop.f32.mrf.mxu3 }
 0x67e   : > { %v7343_v33 = vpop.f32.mrf.mxu0 }
 0x67f   : > { %v7344_v57 = vadd.f32 %v7343_v33, %v7331_v13 }
 0x686   : > { %v7345_v43 = vpop.f32.mrf.mxu0 }
 0x68e   : > { %v7408_v49 = vpop.f32.mrf.mxu0 }
 0x68f   : > { %v7409_v21 = vadd.f32 %v7408_v49, %v6790_v2 }
 0x696   : > { %v7410_v54 = vpop.f32.mrf.mxu0 }
 0x6a0   : > { %v7356_v53 = vpop.f32.mrf.mxu1 }
 0x6a1   : > { %v7357_v61 = vadd.f32 %v7356_v53, %v7344_v57 }
 0x6a2   : > { %v7473_v9 = vpop.f32.mrf.mxu0 }
 0x6a3   : > { %v7516_v45 = vpack.c.bf16 %v7357_v61, %v7357_v61 }
 0x6a5   : > { %7853 = vmatmul.bf16.vlgmr.msrb.gmra.mxu3 %v7516_v45 }
 0x6a6   : > { %v7395_v60 = vpop.f32.mrf.mxu2 }
 0x6a7   : > { %v7434_v35 = vpop.f32.mrf.mxu3 }
 0x6a8   : > { %v7358_v32 = vpop.f32.mrf.mxu1 }
 0x6aa   : > { %v7475_v1 = vpop.f32.mrf.mxu0 }
 0x6ae   : > { %v7397_v16 = vpop.f32.mrf.mxu2 }
 0x6af   : > { %v7436_v12 = vpop.f32.mrf.mxu3 }
 0x6b0   : > { %v7382_v14 = vpop.f32.mrf.mxu1 }
 0x6b1   : > { %v7383_v19 = vadd.f32 %v7382_v14, %v7370_v10 }
 0x6b2   : > { %v7499_v20 = vpop.f32.mrf.mxu0 }
 0x6b3   : > { %v7396_v28 = vadd.f32 %v7395_v60, %v7383_v19 }
 0x6b5   : > { %v7517_v22 = vpack.c.bf16 %v7396_v28, %v7396_v28 }
 0x6b6   : > { %v7421_v26 = vpop.f32.mrf.mxu2 }
 0x6b7   : > { %v7422_v27 = vadd.f32 %v7421_v26, %v7409_v21  ;;  %v7460_v6 = vpop.f32.mrf.mxu3  ;;  %7866 = vmatmul.bf16.vlgmr.msrb.gmra.mxu1 %v7517_v22 }
 0x6b8   : > { %v7384_v36 = vpop.f32.mrf.mxu1 }
 0x6b9   : > { %v7435_v29 = vadd.f32 %v7434_v35, %v7422_v27 }
 0x6ba   : > { %v7501_v30 = vpop.f32.mrf.mxu0 }
 0x6bb   : > { %v7518_v25 = vpack.c.bf16 %v7435_v29, %v7435_v29 }
 0x6bd   : > { %7879 = vmatmul.bf16.vlgmr.msra.gmra.mxu2 %v7518_v25 }
 0x6be   : > { %v7423_v33 = vpop.f32.mrf.mxu2 }
 0x6bf   : > { %v7462_v37 = vpop.f32.mrf.mxu3 }
 0x6c0   : > { %v7447_v38 = vpop.f32.mrf.mxu1 }
 0x6c1   : > { %v7448_v24 = vadd.f32 %v7447_v38, %v6791_v18 }
 0x6c3   : > { %v7461_v15 = vadd.f32 %v7460_v6, %v7448_v24 }
 0x6c5   : > { %v7474_v39 = vadd.f32 %v7473_v9, %v7461_v15 }
 0x6c7   : > { %v7519_v43 = vpack.c.bf16 %v7474_v39, %v7474_v39  ;;  %v7486_v34 = vpop.f32.mrf.mxu2 }
 0x6c8   : > { %v7449_v5 = vpop.f32.mrf.mxu1  ;;  %v7487_v46 = vadd.f32 %v7486_v34, %v6792_v42 }
 0x6c9   : > { %7892 = vmatmul.bf16.vlgmr.msrb.gmra.mxu0 %v7519_v43 }
 0x6ca   : > { %v7500_v7 = vadd.f32 %v7499_v20, %v7487_v46 }
 0x6cf   : > { %v7488_v47 = vpop.f32.mrf.mxu2 }
 0x6d0   : > { %v7512_v49 = vpop.f32.mrf.mxu1 }
 0x6d1   : > { %v7513_v23 = vadd.f32 %v7512_v49, %v7500_v7 }
 0x6d3   : > { %v7520_v50 = vpack.c.bf16 %v7513_v23, %v7513_v23 }
 0x6d5   : > { %7905 = vmatmul.bf16.vlgmr.msra.gmra.mxu3 %v7520_v50 }
 0x6d8   : > { %v7514_v40 = vpop.f32.mrf.mxu1 }
 0x728   : > { %v7854_v62 = vpop.f32.mrf.mxu3 }
 0x729   : > { %v7855_v13 = vadd.f32 %v12455_v55, %v7854_v62 }
 0x730   : > { %v7856_v51 = vpop.f32.mrf.mxu3 }
 0x734   : > { %v7867_v41 = vpop.f32.mrf.mxu1 }
 0x735   : > { %v7868_v59 = vadd.f32 %v7867_v41, %v7855_v13 }
 0x73c   : > { %v7869_v31 = vpop.f32.mrf.mxu1 }
 0x740   : > { %v7880_v54 = vpop.f32.mrf.mxu2 }
 0x741   : > { %v7881_v0 = vadd.f32 %v7880_v54, %v7868_v59 }
 0x746   : > { %v7893_v44 = vpop.f32.mrf.mxu0 }
 0x747   : > { %v7894_v57 = vadd.f32 %v7893_v44, %v7881_v0 }
 0x748   : > { %v7882_v52 = vpop.f32.mrf.mxu2 }
 0x74e   : > { %v7895_v17 = vpop.f32.mrf.mxu0 }
 0x758   : > { %v7906_v53 = vpop.f32.mrf.mxu3 }
 0x759   : > { %v7907_v61 = vadd.f32 %v7906_v53, %v7894_v57 }
 0x75b   : > { %v7910_v48 = vpack.c.bf16 %v7907_v61, %v7907_v61 }
 0x75d   : > { %7911 = vst [vmem:[%s15520_s24 + $0x4] sm:$0xf] %v7910_v48 }
 0x75e   : > { %12753 = shalt.err (!%p12750_p9)
}
 0x75f   : > { %s12822_s23 = smov 64   ;;  %s12823_s24 = smov 4  }
 0x760   : > { %12353 = dma.vmem_to_hbm [thread:$0]  (%p13009_p5), %s7926_s18, 128, %s7928_s10, %s7913_s19, %s12822_s23, %s12822_s23, %s12823_s24   ;;  %v7908_v4 = vpop.f32.mrf.mxu3 }
 0x761 PF: > { %s7942_s26 = sand.u32 1, %s12796_s29   ;;  %p17281_p10 = scmp.ge.s32.totalorder %s12808_s16, 2 }
 0x762   : > { %s7943_s9 = scalar_lea.sflag [#allocation4], %s7942_s26 }
 0x763   : > { %p12385_p13 = pnand %p17281_p10, %p13013_p6 }
 0x765   : > { %p12386_p11 = pneg %p12385_p13 }
 0x767   : > { %12791 = dma.done.wait (%p12386_p11), %s7943_s9, 128  }
 0x768   : > { %12793 = vsyncadd (%p12386_p11), %s7943_s9, 4294967168  ;;  %p31_p0 = scmp.ge.s32.totalorder %s12983_s28, 4   ;;  %s17282_s29 = smov %s12800_s30 }
 0x769   : > { %s17283_s30 = smov %s12804_s15  ;;  %s17284_s15 = smov %s12994_s6 }
 0x76a   : > { %s17285_s16 = smov %s12983_s28  ;;  %33 = sbr.rel (!%p31_p0) target bundleno = 19 (0x13), region = 153 }
 0x76f   :  { %7949 = vsyncpa [#allocation3], 1 }
 0x770   :  { %7951 = vsyncpa [#allocation3 + $0x1], 1 }
 0x771   :  { %7952 = vsyncpa [#allocation6], 1 }
 0x772   :  { %7953 = vsyncpa [#allocation9], 1 }
 0x773   :  { %7954 = vsyncpa [#allocation12], 1 }
 0x774   :  { %7955 = vsyncpa [#allocation15], 1 }
 0x775   :  { %7956 = vsyncpa [#allocation4], 1 }
 0x776   :  { %7958 = vsyncpa [#allocation4 + $0x1], 1 }

</bundles_post_ra>
